<compile_context>
chip_gen: v6e
topology: v6e:2x2x1
jax: 0.10.0
libtpu: 0.0.40
codegen_flags: <defaults>
</compile_context>

<pallas_src>
import functools

import numpy as np
import jax
import jax.numpy as jnp
from jax.experimental import pallas as pl
from jax.experimental.pallas import tpu as pltpu

_TB_CAP = 8                                            # selection matrices grow ~TB^2
_STAGES = ((16, 1, 32), (8, 32, 64), (4, 64, 128), (2, 128, 256))  # (H=W, Cin, Cout)


def _vmem_limit_bytes():
    """Generation-aware scoped-VMEM limit (~75% of physical, safe fallback)."""
    try:
        cap = int(pltpu.get_tpu_info().vmem_capacity_bytes)
    except Exception:
        cap = 64 * 1024 * 1024
    return max(32 * 1024 * 1024, min(cap * 3 // 4, 96 * 1024 * 1024))


# --------------------------- weight preprocessing --------------------------- #

def _toeplitz(w, hw):
    """(3,3,Cin,Cout) conv weight -> (3, (hw+2)*Cin, hw*Cout) bf16 block-Toeplitz
    matrices (one per row shift kh); kw shifts are folded into the lane dim:
    rows are (x, ci)-interleaved padded input rows, cols are (j, co)-interleaved
    output rows."""
    cin, cout = w.shape[2], w.shape[3]
    t = jnp.zeros((3, (hw + 2) * cin, hw * cout), jnp.float32)
    for j in range(hw):
        for kw in range(3):
            t = t.at[:, (j + kw) * cin:(j + kw + 1) * cin,
                     j * cout:(j + 1) * cout].set(w[:, kw])
    return t.astype(jnp.bfloat16)


def _row_select(tb, hw, last):
    """0/1 matrices (2, rows_out, tb*(hw+2)-2): via matmul they do the 2x2-pool
    row selection (even/odd conv rows), drop the inter-image garbage rows and
    insert the next stage's zero row-padding (all-zero output rows)."""
    hp = hw + 2
    r_in = tb * hp - 2
    ho = hw // 2
    rows_out = tb * ho if last else tb * (ho + 2)
    p = np.zeros((2, rows_out, r_in), np.float32)
    for b in range(tb):
        for i2 in range(ho):
            r = b * ho + i2 if last else b * (ho + 2) + 1 + i2
            p[0, r, b * hp + 2 * i2] = 1.0
            p[1, r, b * hp + 2 * i2 + 1] = 1.0
    return jnp.asarray(p, jnp.bfloat16)


def _col_select(hw, cout, last):
    """0/1 matrices (2, hw*cout, cols_out): via matmul they do the 2x2-pool
    column selection (even/odd x) and insert the next stage's zero
    column-padding in the interleaved (x, channel) lane layout."""
    wo = hw // 2
    cols_out = wo * cout if last else (wo + 2) * cout
    off = 0 if last else cout
    eye = np.eye(cout, dtype=np.float32)
    s = np.zeros((2, hw * cout, cols_out), np.float32)
    for j2 in range(wo):
        dst = off + j2 * cout
        s[0, (2 * j2) * cout:(2 * j2 + 1) * cout, dst:dst + cout] = eye
        s[1, (2 * j2 + 1) * cout:(2 * j2 + 2) * cout, dst:dst + cout] = eye
    return jnp.asarray(s, jnp.bfloat16)


# ---------------------------------- kernel ---------------------------------- #

def _deepcnn_kernel(x_ref, *refs):
    # refs: 4 stages x (T, bias_row, P, S) | 10 tail refs | o_ref | 3 scratch
    stage_refs = [refs[4 * s: 4 * s + 4] for s in range(4)]
    (w5_ref, b5_ref, w6_ref, b6_ref, wf1_ref, c1_ref,
     wf2_ref, c2_ref, wf3_ref, c3_ref) = refs[16:26]
    o_ref = refs[26]
    next_in = list(refs[27:30]) + [None]          # scratch refs feeding stages 2..4

    def conv_relu_pool(in_ref, t_ref, b_ref, p_ref, s_ref):
        r = in_ref.shape[0] - 2                    # valid conv rows across the tile
        # 3x3 conv = three row-shifted matmuls vs. block-Toeplitz weights (the
        # nine taps are these static in-kernel slices of one resident block).
        acc = jnp.dot(in_ref[pl.ds(0, r), :], t_ref[0],
                      preferred_element_type=jnp.float32)
        for kh in (1, 2):
            acc = acc + jnp.dot(in_ref[pl.ds(kh, r), :], t_ref[kh],
                                preferred_element_type=jnp.float32)
        y = jnp.maximum(acc + b_ref[...], 0.0).astype(jnp.bfloat16)
        # fused 2x2 max-pool (ReLU commutes with max):
        # row pool + zero-row padding via exact 0/1 row-selection matmuls ...
        rows = jnp.maximum(
            jnp.dot(p_ref[0], y, preferred_element_type=jnp.float32),
            jnp.dot(p_ref[1], y, preferred_element_type=jnp.float32),
        ).astype(jnp.bfloat16)
        # ... column pool + zero-column padding via 0/1 lane-selection matmuls.
        return jnp.maximum(
            jnp.dot(rows, s_ref[0], preferred_element_type=jnp.float32),
            jnp.dot(rows, s_ref[1], preferred_element_type=jnp.float32),
        ).astype(jnp.bfloat16)

    cur = x_ref
    feat = None
    for s in range(4):
        t_ref, b_ref, p_ref, s_ref = stage_refs[s]
        out = conv_relu_pool(cur, t_ref, b_ref, p_ref, s_ref)
        if next_in[s] is not None:
            next_in[s][...] = out                  # becomes stage s+1's padded input
            cur = next_in[s]
        else:
            feat = out                             # (TB, 256) bf16

    def dense(h, w_ref, b_ref, relu):
        w = w_ref[...]
        if w.dtype != h.dtype:
            w = w.astype(h.dtype)
        y = jnp.dot(h, w, preferred_element_type=jnp.float32) + b_ref[...]
        return jnp.maximum(y, 0.0) if relu else y

    # conv5/conv6 act on a 1x1 spatial input: only the centre tap contributes.
    h = dense(feat, w5_ref, b5_ref, True).astype(jnp.bfloat16)   # (TB, 512)
    h = dense(h, w6_ref, b6_ref, True).astype(jnp.bfloat16)      # (TB, 1024)
    h = dense(h, wf1_ref, c1_ref, True)                          # (TB, 32)  f32
    h = dense(h, wf2_ref, c2_ref, True)                          # (TB, 16)  f32
    o_ref[...] = dense(h, wf3_ref, c3_ref, False)                # (TB, 1)   f32


# --------------------------------- wrapper ---------------------------------- #

def _const_index(ndim, i):
    return (0,) * ndim


@jax.jit
def deep_cnn_forward(params, x):
    """x: (B, 16, 16) float32 (torch's unsqueeze(1) channel) -> (B, 1) float32."""
    B = x.shape[0]
    TB = max(1, min(_TB_CAP, -(-B // 2)))          # >= 2 grid steps whenever B >= 2
    Bp = -(-B // TB) * TB
    G = Bp // TB

    args, in_specs = [], []

    def add_resident(a):
        args.append(a)
        in_specs.append(
            pl.BlockSpec(a.shape, functools.partial(_const_index, a.ndim)))

    for idx, (hw, cin, cout) in enumerate(_STAGES):
        last = idx == len(_STAGES) - 1
        w, b = params[f"conv{idx + 1}"]
        add_resident(_toeplitz(w, hw))                        # (3, (hw+2)*cin, hw*cout)
        add_resident(jnp.tile(b, hw).reshape(1, hw * cout))   # bias in (x, c) lane layout
        add_resident(_row_select(TB, hw, last))
        add_resident(_col_select(hw, cout, last))

    w5, b5 = params["conv5"]
    w6, b6 = params["conv6"]
    wf1, c1 = params["fc1"]
    wf2, c2 = params["fc2"]
    wf3, c3 = params["fc3"]
    for a in (w5[1, 1].astype(jnp.bfloat16), b5.reshape(1, -1),
              w6[1, 1].astype(jnp.bfloat16), b6.reshape(1, -1),
              wf1.astype(jnp.bfloat16), c1.reshape(1, -1),
              wf2, c2.reshape(1, -1),                          # tiny fcs stay f32
              wf3, c3.reshape(1, -1)):
        add_resident(a)

    # input: cast, zero-pad spatially, row-flatten per batch tile
    xb = x.astype(jnp.bfloat16)
    if Bp != B:
        xb = jnp.pad(xb, ((0, Bp - B), (0, 0), (0, 0)))
    xp = jnp.pad(xb, ((0, 0), (1, 1), (1, 1))).reshape(G, TB * 18, 18)

    out = pl.pallas_call(
        _deepcnn_kernel,
        out_shape=jax.ShapeDtypeStruct((G, TB, 1), jnp.float32),
        grid=(G,),
        in_specs=[pl.BlockSpec((None, TB * 18, 18), lambda i: (i, 0, 0))] + in_specs,
        out_specs=pl.BlockSpec((None, TB, 1), lambda i: (i, 0, 0)),
        scratch_shapes=[
            pltpu.VMEM((TB * 10, 10 * 32), jnp.bfloat16),     # stage-2 padded input
            pltpu.VMEM((TB * 6, 6 * 64), jnp.bfloat16),       # stage-3 padded input
            pltpu.VMEM((TB * 4, 4 * 128), jnp.bfloat16),      # stage-4 padded input
        ],
        compiler_params=pltpu.CompilerParams(
            dimension_semantics=("parallel",),
            vmem_limit_bytes=_vmem_limit_bytes(),
        ),
    )(xp, *args)
    return out.reshape(Bp, 1)[:B]


# -------------------------------- parameters -------------------------------- #

def init_params(key):
    """Self-generated parameters.  NOTE: conv weights are stored HWIO
    (3, 3, Cin, Cout); a real PyTorch checkpoint (Cout, Cin, 3, 3) would need
    w.transpose(2, 3, 1, 0) before use.  Linear weights are (fin, fout)."""
    def conv_p(k, cin, cout):
        k1, k2 = jax.random.split(k)
        w = jax.random.normal(k1, (3, 3, cin, cout), jnp.float32) / np.sqrt(9.0 * cin)
        b = 0.01 * jax.random.normal(k2, (cout,), jnp.float32)
        return w, b

    def lin_p(k, fin, fout):
        k1, k2 = jax.random.split(k)
        w = jax.random.normal(k1, (fin, fout), jnp.float32) / np.sqrt(float(fin))
        b = 0.01 * jax.random.normal(k2, (fout,), jnp.float32)
        return w, b

    ks = jax.random.split(key, 9)
    return {
        "conv1": conv_p(ks[0], 1, 32),
        "conv2": conv_p(ks[1], 32, 64),
        "conv3": conv_p(ks[2], 64, 128),
        "conv4": conv_p(ks[3], 128, 256),
        "conv5": conv_p(ks[4], 256, 512),
        "conv6": conv_p(ks[5], 512, 1024),
        "fc1": lin_p(ks[6], 1024, 32),
        "fc2": lin_p(ks[7], 32, 16),
        "fc3": lin_p(ks[8], 16, 1),
    }


# ------------------------------ plain-JAX reference ------------------------- #

def _reference_forward(params, x):
    """Direct jnp port of DeepCNN.forward, with the same bf16 cast points as
    the kernel (validation only)."""
    h = x.astype(jnp.bfloat16)[..., None]                      # (B, 16, 16, 1)
    for name in ("conv1", "conv2", "conv3", "conv4", "conv5", "conv6"):
        w, b = params[name]
        y = jax.lax.conv_general_dilated(
            h, w.astype(jnp.bfloat16), window_strides=(1, 1),
            padding=((1, 1), (1, 1)),
            dimension_numbers=("NHWC", "HWIO", "NHWC"),
            preferred_element_type=jnp.float32) + b
        y = jnp.maximum(y, 0.0)
        if name in ("conv1", "conv2", "conv3", "conv4"):       # MaxPool2d(2)
            s = y.shape
            y = y.reshape(s[0], s[1] // 2, 2, s[2] // 2, 2, s[3]).max(axis=(2, 4))
        h = y.astype(jnp.bfloat16)
    t = h.reshape(h.shape[0], -1)                              # Flatten -> (B, 1024)
    wf1, c1 = params["fc1"]
    t = jnp.maximum(jnp.dot(t, wf1.astype(jnp.bfloat16),
                            preferred_element_type=jnp.float32) + c1, 0.0)
    wf2, c2 = params["fc2"]
    t = jnp.maximum(jnp.dot(t, wf2, preferred_element_type=jnp.float32) + c2, 0.0)
    wf3, c3 = params["fc3"]
    return jnp.dot(t, wf3, preferred_element_type=jnp.float32) + c3


# ----------------------------------- main ----------------------------------- #

if __name__ == "__main__":
    key = jax.random.PRNGKey(0)
    pkey, xkey = jax.random.split(key)
    params = init_params(pkey)
    x = jax.random.normal(xkey, (2, 16, 16), jnp.float32)      # B=2, 16x16, 1 channel

    out = jax.block_until_ready(deep_cnn_forward(params, x))
    assert out.shape == (2, 1) and out.dtype == jnp.float32

    ref = jax.block_until_ready(_reference_forward(params, x))
    np.testing.assert_allclose(np.asarray(out), np.asarray(ref), rtol=5e-2, atol=5e-2)
    print("KERNEL_OK")
</pallas_src>

<mosaic_0001>
module attributes {stable_mosaic.version = 11 : i64} {
  func.func @_deepcnn_kernel(%arg0: i32, %arg1: memref<1x18x18xbf16, #tpu.memory_space<vmem>>, %arg2: memref<3x18x512xbf16, #tpu.memory_space<vmem>>, %arg3: memref<1x512xf32, #tpu.memory_space<vmem>>, %arg4: memref<2x10x16xbf16, #tpu.memory_space<vmem>>, %arg5: memref<2x512x320xbf16, #tpu.memory_space<vmem>>, %arg6: memref<3x320x512xbf16, #tpu.memory_space<vmem>>, %arg7: memref<1x512xf32, #tpu.memory_space<vmem>>, %arg8: memref<2x6x8xbf16, #tpu.memory_space<vmem>>, %arg9: memref<2x512x384xbf16, #tpu.memory_space<vmem>>, %arg10: memref<3x384x512xbf16, #tpu.memory_space<vmem>>, %arg11: memref<1x512xf32, #tpu.memory_space<vmem>>, %arg12: memref<2x4x4xbf16, #tpu.memory_space<vmem>>, %arg13: memref<2x512x512xbf16, #tpu.memory_space<vmem>>, %arg14: memref<3x512x512xbf16, #tpu.memory_space<vmem>>, %arg15: memref<1x512xf32, #tpu.memory_space<vmem>>, %arg16: memref<2x1x2xbf16, #tpu.memory_space<vmem>>, %arg17: memref<2x512x256xbf16, #tpu.memory_space<vmem>>, %arg18: memref<256x512xbf16, #tpu.memory_space<vmem>>, %arg19: memref<1x512xf32, #tpu.memory_space<vmem>>, %arg20: memref<512x1024xbf16, #tpu.memory_space<vmem>>, %arg21: memref<1x1024xf32, #tpu.memory_space<vmem>>, %arg22: memref<1024x32xbf16, #tpu.memory_space<vmem>>, %arg23: memref<1x32xf32, #tpu.memory_space<vmem>>, %arg24: memref<32x16xf32, #tpu.memory_space<vmem>>, %arg25: memref<1x16xf32, #tpu.memory_space<vmem>>, %arg26: memref<16x1xf32, #tpu.memory_space<vmem>>, %arg27: memref<1x1xf32, #tpu.memory_space<vmem>>, %arg28: memref<1x1x1xf32, #tpu.memory_space<vmem>>, %arg29: memref<10x320xbf16, #tpu.memory_space<vmem>>, %arg30: memref<6x384xbf16, #tpu.memory_space<vmem>>, %arg31: memref<4x512xbf16, #tpu.memory_space<vmem>>) attributes {dimension_semantics = [#tpu.dimension_semantics<parallel>], iteration_bounds = array<i64: 2>, scalar_prefetch = 0 : i64, scratch_operands = 3 : i64, tpu.core_type = #tpu.core_type<tc>, window_params = [{transform_indices = @transform_0, window_bounds = array<i64: 1, 18, 18>}, {pipeline_mode = #tpu.pipeline_mode<synchronous>, transform_indices = @transform_1, window_bounds = array<i64: 3, 18, 512>}, {pipeline_mode = #tpu.pipeline_mode<synchronous>, transform_indices = @transform_2, window_bounds = array<i64: 1, 512>}, {pipeline_mode = #tpu.pipeline_mode<synchronous>, transform_indices = @transform_3, window_bounds = array<i64: 2, 10, 16>}, {pipeline_mode = #tpu.pipeline_mode<synchronous>, transform_indices = @transform_4, window_bounds = array<i64: 2, 512, 320>}, {pipeline_mode = #tpu.pipeline_mode<synchronous>, transform_indices = @transform_5, window_bounds = array<i64: 3, 320, 512>}, {pipeline_mode = #tpu.pipeline_mode<synchronous>, transform_indices = @transform_6, window_bounds = array<i64: 1, 512>}, {pipeline_mode = #tpu.pipeline_mode<synchronous>, transform_indices = @transform_7, window_bounds = array<i64: 2, 6, 8>}, {pipeline_mode = #tpu.pipeline_mode<synchronous>, transform_indices = @transform_8, window_bounds = array<i64: 2, 512, 384>}, {pipeline_mode = #tpu.pipeline_mode<synchronous>, transform_indices = @transform_9, window_bounds = array<i64: 3, 384, 512>}, {pipeline_mode = #tpu.pipeline_mode<synchronous>, transform_indices = @transform_10, window_bounds = array<i64: 1, 512>}, {pipeline_mode = #tpu.pipeline_mode<synchronous>, transform_indices = @transform_11, window_bounds = array<i64: 2, 4, 4>}, {pipeline_mode = #tpu.pipeline_mode<synchronous>, transform_indices = @transform_12, window_bounds = array<i64: 2, 512, 512>}, {pipeline_mode = #tpu.pipeline_mode<synchronous>, transform_indices = @transform_13, window_bounds = array<i64: 3, 512, 512>}, {pipeline_mode = #tpu.pipeline_mode<synchronous>, transform_indices = @transform_14, window_bounds = array<i64: 1, 512>}, {pipeline_mode = #tpu.pipeline_mode<synchronous>, transform_indices = @transform_15, window_bounds = array<i64: 2, 1, 2>}, {pipeline_mode = #tpu.pipeline_mode<synchronous>, transform_indices = @transform_16, window_bounds = array<i64: 2, 512, 256>}, {pipeline_mode = #tpu.pipeline_mode<synchronous>, transform_indices = @transform_17, window_bounds = array<i64: 256, 512>}, {pipeline_mode = #tpu.pipeline_mode<synchronous>, transform_indices = @transform_18, window_bounds = array<i64: 1, 512>}, {pipeline_mode = #tpu.pipeline_mode<synchronous>, transform_indices = @transform_19, window_bounds = array<i64: 512, 1024>}, {pipeline_mode = #tpu.pipeline_mode<synchronous>, transform_indices = @transform_20, window_bounds = array<i64: 1, 1024>}, {pipeline_mode = #tpu.pipeline_mode<synchronous>, transform_indices = @transform_21, window_bounds = array<i64: 1024, 32>}, {pipeline_mode = #tpu.pipeline_mode<synchronous>, transform_indices = @transform_22, window_bounds = array<i64: 1, 32>}, {pipeline_mode = #tpu.pipeline_mode<synchronous>, transform_indices = @transform_23, window_bounds = array<i64: 32, 16>}, {pipeline_mode = #tpu.pipeline_mode<synchronous>, transform_indices = @transform_24, window_bounds = array<i64: 1, 16>}, {pipeline_mode = #tpu.pipeline_mode<synchronous>, transform_indices = @transform_25, window_bounds = array<i64: 16, 1>}, {pipeline_mode = #tpu.pipeline_mode<synchronous>, transform_indices = @transform_26, window_bounds = array<i64: 1, 1>}, {transform_indices = @transform_27, window_bounds = array<i64: 1, 1, 1>}]} {
    %c0 = arith.constant 0 : index
    %c0_0 = arith.constant 0 : index
    %c0_1 = arith.constant 0 : index
    %0 = vector.load %arg1[%c0, %c0_0, %c0_1] : memref<1x18x18xbf16, #tpu.memory_space<vmem>>, vector<1x16x18xbf16>
    %1 = vector.shape_cast %0 : vector<1x16x18xbf16> to vector<16x18xbf16>
    %c0_2 = arith.constant 0 : index
    %c0_3 = arith.constant 0 : index
    %c0_4 = arith.constant 0 : index
    %2 = vector.load %arg2[%c0_2, %c0_3, %c0_4] : memref<3x18x512xbf16, #tpu.memory_space<vmem>>, vector<1x18x512xbf16>
    %3 = vector.shape_cast %2 : vector<1x18x512xbf16> to vector<18x512xbf16>
    %cst = arith.constant dense<0.000000e+00> : vector<16x512xf32>
    %4 = tpu.matmul %1, %3, %cst {dimension_numbers = #tpu.dot_dimension_numbers<[1], [0], [0], [1], [0, 0, 1, 1], [], []>} : vector<16x18xbf16>, vector<18x512xbf16>, vector<16x512xf32> -> vector<16x512xf32>
    %c0_5 = arith.constant 0 : index
    %c1 = arith.constant 1 : index
    %c0_6 = arith.constant 0 : index
    %5 = vector.load %arg1[%c0_5, %c1, %c0_6] : memref<1x18x18xbf16, #tpu.memory_space<vmem>>, vector<1x16x18xbf16>
    %6 = vector.shape_cast %5 : vector<1x16x18xbf16> to vector<16x18xbf16>
    %c1_7 = arith.constant 1 : index
    %c0_8 = arith.constant 0 : index
    %c0_9 = arith.constant 0 : index
    %7 = vector.load %arg2[%c1_7, %c0_8, %c0_9] : memref<3x18x512xbf16, #tpu.memory_space<vmem>>, vector<1x18x512xbf16>
    %8 = vector.shape_cast %7 : vector<1x18x512xbf16> to vector<18x512xbf16>
    %cst_10 = arith.constant dense<0.000000e+00> : vector<16x512xf32>
    %9 = tpu.matmul %6, %8, %cst_10 {dimension_numbers = #tpu.dot_dimension_numbers<[1], [0], [0], [1], [0, 0, 1, 1], [], []>} : vector<16x18xbf16>, vector<18x512xbf16>, vector<16x512xf32> -> vector<16x512xf32>
    %10 = arith.addf %4, %9 : vector<16x512xf32>
    %c0_11 = arith.constant 0 : index
    %c2 = arith.constant 2 : index
    %c0_12 = arith.constant 0 : index
    %11 = vector.load %arg1[%c0_11, %c2, %c0_12] : memref<1x18x18xbf16, #tpu.memory_space<vmem>>, vector<1x16x18xbf16>
    %12 = vector.shape_cast %11 : vector<1x16x18xbf16> to vector<16x18xbf16>
    %c2_13 = arith.constant 2 : index
    %c0_14 = arith.constant 0 : index
    %c0_15 = arith.constant 0 : index
    %13 = vector.load %arg2[%c2_13, %c0_14, %c0_15] : memref<3x18x512xbf16, #tpu.memory_space<vmem>>, vector<1x18x512xbf16>
    %14 = vector.shape_cast %13 : vector<1x18x512xbf16> to vector<18x512xbf16>
    %cst_16 = arith.constant dense<0.000000e+00> : vector<16x512xf32>
    %15 = tpu.matmul %12, %14, %cst_16 {dimension_numbers = #tpu.dot_dimension_numbers<[1], [0], [0], [1], [0, 0, 1, 1], [], []>} : vector<16x18xbf16>, vector<18x512xbf16>, vector<16x512xf32> -> vector<16x512xf32>
    %16 = arith.addf %10, %15 : vector<16x512xf32>
    %c0_17 = arith.constant 0 : index
    %c0_18 = arith.constant 0 : index
    %17 = vector.load %arg3[%c0_17, %c0_18] : memref<1x512xf32, #tpu.memory_space<vmem>>, vector<1x512xf32>
    %18 = vector.broadcast %17 : vector<1x512xf32> to vector<16x512xf32>
    %19 = arith.addf %16, %18 : vector<16x512xf32>
    %cst_19 = arith.constant 0.000000e+00 : f32
    %20 = vector.broadcast %cst_19 : f32 to vector<16x512xf32>
    %21 = arith.maximumf %19, %20 : vector<16x512xf32>
    %22 = arith.truncf %21 : vector<16x512xf32> to vector<16x512xbf16>
    %c0_20 = arith.constant 0 : index
    %c0_21 = arith.constant 0 : index
    %c0_22 = arith.constant 0 : index
    %23 = vector.load %arg4[%c0_20, %c0_21, %c0_22] : memref<2x10x16xbf16, #tpu.memory_space<vmem>>, vector<1x10x16xbf16>
    %24 = vector.shape_cast %23 : vector<1x10x16xbf16> to vector<10x16xbf16>
    %cst_23 = arith.constant dense<0.000000e+00> : vector<10x512xf32>
    %25 = tpu.matmul %24, %22, %cst_23 {dimension_numbers = #tpu.dot_dimension_numbers<[1], [0], [0], [1], [0, 0, 1, 1], [], []>} : vector<10x16xbf16>, vector<16x512xbf16>, vector<10x512xf32> -> vector<10x512xf32>
    %c1_24 = arith.constant 1 : index
    %c0_25 = arith.constant 0 : index
    %c0_26 = arith.constant 0 : index
    %26 = vector.load %arg4[%c1_24, %c0_25, %c0_26] : memref<2x10x16xbf16, #tpu.memory_space<vmem>>, vector<1x10x16xbf16>
    %27 = vector.shape_cast %26 : vector<1x10x16xbf16> to vector<10x16xbf16>
    %cst_27 = arith.constant dense<0.000000e+00> : vector<10x512xf32>
    %28 = tpu.matmul %27, %22, %cst_27 {dimension_numbers = #tpu.dot_dimension_numbers<[1], [0], [0], [1], [0, 0, 1, 1], [], []>} : vector<10x16xbf16>, vector<16x512xbf16>, vector<10x512xf32> -> vector<10x512xf32>
    %29 = arith.maximumf %25, %28 : vector<10x512xf32>
    %30 = arith.truncf %29 : vector<10x512xf32> to vector<10x512xbf16>
    %c0_28 = arith.constant 0 : index
    %c0_29 = arith.constant 0 : index
    %c0_30 = arith.constant 0 : index
    %31 = vector.load %arg5[%c0_28, %c0_29, %c0_30] : memref<2x512x320xbf16, #tpu.memory_space<vmem>>, vector<1x512x320xbf16>
    %32 = vector.shape_cast %31 : vector<1x512x320xbf16> to vector<512x320xbf16>
    %cst_31 = arith.constant dense<0.000000e+00> : vector<10x320xf32>
    %33 = tpu.matmul %30, %32, %cst_31 {dimension_numbers = #tpu.dot_dimension_numbers<[1], [0], [0], [1], [0, 0, 1, 1], [], []>} : vector<10x512xbf16>, vector<512x320xbf16>, vector<10x320xf32> -> vector<10x320xf32>
    %c1_32 = arith.constant 1 : index
    %c0_33 = arith.constant 0 : index
    %c0_34 = arith.constant 0 : index
    %34 = vector.load %arg5[%c1_32, %c0_33, %c0_34] : memref<2x512x320xbf16, #tpu.memory_space<vmem>>, vector<1x512x320xbf16>
    %35 = vector.shape_cast %34 : vector<1x512x320xbf16> to vector<512x320xbf16>
    %cst_35 = arith.constant dense<0.000000e+00> : vector<10x320xf32>
    %36 = tpu.matmul %30, %35, %cst_35 {dimension_numbers = #tpu.dot_dimension_numbers<[1], [0], [0], [1], [0, 0, 1, 1], [], []>} : vector<10x512xbf16>, vector<512x320xbf16>, vector<10x320xf32> -> vector<10x320xf32>
    %37 = arith.maximumf %33, %36 : vector<10x320xf32>
    %38 = arith.truncf %37 : vector<10x320xf32> to vector<10x320xbf16>
    %c0_36 = arith.constant 0 : index
    %c0_37 = arith.constant 0 : index
    %39 = vector.load %arg29[%c0_36, %c0_37] : memref<10x320xbf16, #tpu.memory_space<vmem>>, vector<10x320xbf16>
    tpu.vector_store %arg29[%c0_36, %c0_37], %38 {strides = array<i32>} : memref<10x320xbf16, #tpu.memory_space<vmem>>, vector<10x320xbf16>,
    %c0_38 = arith.constant 0 : index
    %c0_39 = arith.constant 0 : index
    %40 = vector.load %arg29[%c0_38, %c0_39] : memref<10x320xbf16, #tpu.memory_space<vmem>>, vector<8x320xbf16>
    %c0_40 = arith.constant 0 : index
    %c0_41 = arith.constant 0 : index
    %c0_42 = arith.constant 0 : index
    %41 = vector.load %arg6[%c0_40, %c0_41, %c0_42] : memref<3x320x512xbf16, #tpu.memory_space<vmem>>, vector<1x320x512xbf16>
    %42 = vector.shape_cast %41 : vector<1x320x512xbf16> to vector<320x512xbf16>
    %cst_43 = arith.constant dense<0.000000e+00> : vector<8x512xf32>
    %43 = tpu.matmul %40, %42, %cst_43 {dimension_numbers = #tpu.dot_dimension_numbers<[1], [0], [0], [1], [0, 0, 1, 1], [], []>} : vector<8x320xbf16>, vector<320x512xbf16>, vector<8x512xf32> -> vector<8x512xf32>
    %c1_44 = arith.constant 1 : index
    %c0_45 = arith.constant 0 : index
    %44 = vector.load %arg29[%c1_44, %c0_45] : memref<10x320xbf16, #tpu.memory_space<vmem>>, vector<8x320xbf16>
    %c1_46 = arith.constant 1 : index
    %c0_47 = arith.constant 0 : index
    %c0_48 = arith.constant 0 : index
    %45 = vector.load %arg6[%c1_46, %c0_47, %c0_48] : memref<3x320x512xbf16, #tpu.memory_space<vmem>>, vector<1x320x512xbf16>
    %46 = vector.shape_cast %45 : vector<1x320x512xbf16> to vector<320x512xbf16>
    %cst_49 = arith.constant dense<0.000000e+00> : vector<8x512xf32>
    %47 = tpu.matmul %44, %46, %cst_49 {dimension_numbers = #tpu.dot_dimension_numbers<[1], [0], [0], [1], [0, 0, 1, 1], [], []>} : vector<8x320xbf16>, vector<320x512xbf16>, vector<8x512xf32> -> vector<8x512xf32>
    %48 = arith.addf %43, %47 : vector<8x512xf32>
    %c2_50 = arith.constant 2 : index
    %c0_51 = arith.constant 0 : index
    %49 = vector.load %arg29[%c2_50, %c0_51] : memref<10x320xbf16, #tpu.memory_space<vmem>>, vector<8x320xbf16>
    %c2_52 = arith.constant 2 : index
    %c0_53 = arith.constant 0 : index
    %c0_54 = arith.constant 0 : index
    %50 = vector.load %arg6[%c2_52, %c0_53, %c0_54] : memref<3x320x512xbf16, #tpu.memory_space<vmem>>, vector<1x320x512xbf16>
    %51 = vector.shape_cast %50 : vector<1x320x512xbf16> to vector<320x512xbf16>
    %cst_55 = arith.constant dense<0.000000e+00> : vector<8x512xf32>
    %52 = tpu.matmul %49, %51, %cst_55 {dimension_numbers = #tpu.dot_dimension_numbers<[1], [0], [0], [1], [0, 0, 1, 1], [], []>} : vector<8x320xbf16>, vector<320x512xbf16>, vector<8x512xf32> -> vector<8x512xf32>
    %53 = arith.addf %48, %52 : vector<8x512xf32>
    %c0_56 = arith.constant 0 : index
    %c0_57 = arith.constant 0 : index
    %54 = vector.load %arg7[%c0_56, %c0_57] : memref<1x512xf32, #tpu.memory_space<vmem>>, vector<1x512xf32>
    %55 = vector.broadcast %54 : vector<1x512xf32> to vector<8x512xf32>
    %56 = arith.addf %53, %55 : vector<8x512xf32>
    %cst_58 = arith.constant 0.000000e+00 : f32
    %57 = vector.broadcast %cst_58 : f32 to vector<8x512xf32>
    %58 = arith.maximumf %56, %57 : vector<8x512xf32>
    %59 = arith.truncf %58 : vector<8x512xf32> to vector<8x512xbf16>
    %c0_59 = arith.constant 0 : index
    %c0_60 = arith.constant 0 : index
    %c0_61 = arith.constant 0 : index
    %60 = vector.load %arg8[%c0_59, %c0_60, %c0_61] : memref<2x6x8xbf16, #tpu.memory_space<vmem>>, vector<1x6x8xbf16>
    %61 = vector.shape_cast %60 : vector<1x6x8xbf16> to vector<6x8xbf16>
    %cst_62 = arith.constant dense<0.000000e+00> : vector<6x512xf32>
    %62 = tpu.matmul %61, %59, %cst_62 {dimension_numbers = #tpu.dot_dimension_numbers<[1], [0], [0], [1], [0, 0, 1, 1], [], []>} : vector<6x8xbf16>, vector<8x512xbf16>, vector<6x512xf32> -> vector<6x512xf32>
    %c1_63 = arith.constant 1 : index
    %c0_64 = arith.constant 0 : index
    %c0_65 = arith.constant 0 : index
    %63 = vector.load %arg8[%c1_63, %c0_64, %c0_65] : memref<2x6x8xbf16, #tpu.memory_space<vmem>>, vector<1x6x8xbf16>
    %64 = vector.shape_cast %63 : vector<1x6x8xbf16> to vector<6x8xbf16>
    %cst_66 = arith.constant dense<0.000000e+00> : vector<6x512xf32>
    %65 = tpu.matmul %64, %59, %cst_66 {dimension_numbers = #tpu.dot_dimension_numbers<[1], [0], [0], [1], [0, 0, 1, 1], [], []>} : vector<6x8xbf16>, vector<8x512xbf16>, vector<6x512xf32> -> vector<6x512xf32>
    %66 = arith.maximumf %62, %65 : vector<6x512xf32>
    %67 = arith.truncf %66 : vector<6x512xf32> to vector<6x512xbf16>
    %c0_67 = arith.constant 0 : index
    %c0_68 = arith.constant 0 : index
    %c0_69 = arith.constant 0 : index
    %68 = vector.load %arg9[%c0_67, %c0_68, %c0_69] : memref<2x512x384xbf16, #tpu.memory_space<vmem>>, vector<1x512x384xbf16>
    %69 = vector.shape_cast %68 : vector<1x512x384xbf16> to vector<512x384xbf16>
    %cst_70 = arith.constant dense<0.000000e+00> : vector<6x384xf32>
    %70 = tpu.matmul %67, %69, %cst_70 {dimension_numbers = #tpu.dot_dimension_numbers<[1], [0], [0], [1], [0, 0, 1, 1], [], []>} : vector<6x512xbf16>, vector<512x384xbf16>, vector<6x384xf32> -> vector<6x384xf32>
    %c1_71 = arith.constant 1 : index
    %c0_72 = arith.constant 0 : index
    %c0_73 = arith.constant 0 : index
    %71 = vector.load %arg9[%c1_71, %c0_72, %c0_73] : memref<2x512x384xbf16, #tpu.memory_space<vmem>>, vector<1x512x384xbf16>
    %72 = vector.shape_cast %71 : vector<1x512x384xbf16> to vector<512x384xbf16>
    %cst_74 = arith.constant dense<0.000000e+00> : vector<6x384xf32>
    %73 = tpu.matmul %67, %72, %cst_74 {dimension_numbers = #tpu.dot_dimension_numbers<[1], [0], [0], [1], [0, 0, 1, 1], [], []>} : vector<6x512xbf16>, vector<512x384xbf16>, vector<6x384xf32> -> vector<6x384xf32>
    %74 = arith.maximumf %70, %73 : vector<6x384xf32>
    %75 = arith.truncf %74 : vector<6x384xf32> to vector<6x384xbf16>
    %c0_75 = arith.constant 0 : index
    %c0_76 = arith.constant 0 : index
    %76 = vector.load %arg30[%c0_75, %c0_76] : memref<6x384xbf16, #tpu.memory_space<vmem>>, vector<6x384xbf16>
    tpu.vector_store %arg30[%c0_75, %c0_76], %75 {strides = array<i32>} : memref<6x384xbf16, #tpu.memory_space<vmem>>, vector<6x384xbf16>,
    %c0_77 = arith.constant 0 : index
    %c0_78 = arith.constant 0 : index
    %77 = vector.load %arg30[%c0_77, %c0_78] : memref<6x384xbf16, #tpu.memory_space<vmem>>, vector<4x384xbf16>
    %c0_79 = arith.constant 0 : index
    %c0_80 = arith.constant 0 : index
    %c0_81 = arith.constant 0 : index
    %78 = vector.load %arg10[%c0_79, %c0_80, %c0_81] : memref<3x384x512xbf16, #tpu.memory_space<vmem>>, vector<1x384x512xbf16>
    %79 = vector.shape_cast %78 : vector<1x384x512xbf16> to vector<384x512xbf16>
    %cst_82 = arith.constant dense<0.000000e+00> : vector<4x512xf32>
    %80 = tpu.matmul %77, %79, %cst_82 {dimension_numbers = #tpu.dot_dimension_numbers<[1], [0], [0], [1], [0, 0, 1, 1], [], []>} : vector<4x384xbf16>, vector<384x512xbf16>, vector<4x512xf32> -> vector<4x512xf32>
    %c1_83 = arith.constant 1 : index
    %c0_84 = arith.constant 0 : index
    %81 = vector.load %arg30[%c1_83, %c0_84] : memref<6x384xbf16, #tpu.memory_space<vmem>>, vector<4x384xbf16>
    %c1_85 = arith.constant 1 : index
    %c0_86 = arith.constant 0 : index
    %c0_87 = arith.constant 0 : index
    %82 = vector.load %arg10[%c1_85, %c0_86, %c0_87] : memref<3x384x512xbf16, #tpu.memory_space<vmem>>, vector<1x384x512xbf16>
    %83 = vector.shape_cast %82 : vector<1x384x512xbf16> to vector<384x512xbf16>
    %cst_88 = arith.constant dense<0.000000e+00> : vector<4x512xf32>
    %84 = tpu.matmul %81, %83, %cst_88 {dimension_numbers = #tpu.dot_dimension_numbers<[1], [0], [0], [1], [0, 0, 1, 1], [], []>} : vector<4x384xbf16>, vector<384x512xbf16>, vector<4x512xf32> -> vector<4x512xf32>
    %85 = arith.addf %80, %84 : vector<4x512xf32>
    %c2_89 = arith.constant 2 : index
    %c0_90 = arith.constant 0 : index
    %86 = vector.load %arg30[%c2_89, %c0_90] : memref<6x384xbf16, #tpu.memory_space<vmem>>, vector<4x384xbf16>
    %c2_91 = arith.constant 2 : index
    %c0_92 = arith.constant 0 : index
    %c0_93 = arith.constant 0 : index
    %87 = vector.load %arg10[%c2_91, %c0_92, %c0_93] : memref<3x384x512xbf16, #tpu.memory_space<vmem>>, vector<1x384x512xbf16>
    %88 = vector.shape_cast %87 : vector<1x384x512xbf16> to vector<384x512xbf16>
    %cst_94 = arith.constant dense<0.000000e+00> : vector<4x512xf32>
    %89 = tpu.matmul %86, %88, %cst_94 {dimension_numbers = #tpu.dot_dimension_numbers<[1], [0], [0], [1], [0, 0, 1, 1], [], []>} : vector<4x384xbf16>, vector<384x512xbf16>, vector<4x512xf32> -> vector<4x512xf32>
    %90 = arith.addf %85, %89 : vector<4x512xf32>
    %c0_95 = arith.constant 0 : index
    %c0_96 = arith.constant 0 : index
    %91 = vector.load %arg11[%c0_95, %c0_96] : memref<1x512xf32, #tpu.memory_space<vmem>>, vector<1x512xf32>
    %92 = vector.broadcast %91 : vector<1x512xf32> to vector<4x512xf32>
    %93 = arith.addf %90, %92 : vector<4x512xf32>
    %cst_97 = arith.constant 0.000000e+00 : f32
    %94 = vector.broadcast %cst_97 : f32 to vector<4x512xf32>
    %95 = arith.maximumf %93, %94 : vector<4x512xf32>
    %96 = arith.truncf %95 : vector<4x512xf32> to vector<4x512xbf16>
    %c0_98 = arith.constant 0 : index
    %c0_99 = arith.constant 0 : index
    %c0_100 = arith.constant 0 : index
    %97 = vector.load %arg12[%c0_98, %c0_99, %c0_100] : memref<2x4x4xbf16, #tpu.memory_space<vmem>>, vector<1x4x4xbf16>
    %98 = vector.shape_cast %97 : vector<1x4x4xbf16> to vector<4x4xbf16>
    %cst_101 = arith.constant dense<0.000000e+00> : vector<4x512xf32>
    %99 = tpu.matmul %98, %96, %cst_101 {dimension_numbers = #tpu.dot_dimension_numbers<[1], [0], [0], [1], [0, 0, 1, 1], [], []>} : vector<4x4xbf16>, vector<4x512xbf16>, vector<4x512xf32> -> vector<4x512xf32>
    %c1_102 = arith.constant 1 : index
    %c0_103 = arith.constant 0 : index
    %c0_104 = arith.constant 0 : index
    %100 = vector.load %arg12[%c1_102, %c0_103, %c0_104] : memref<2x4x4xbf16, #tpu.memory_space<vmem>>, vector<1x4x4xbf16>
    %101 = vector.shape_cast %100 : vector<1x4x4xbf16> to vector<4x4xbf16>
    %cst_105 = arith.constant dense<0.000000e+00> : vector<4x512xf32>
    %102 = tpu.matmul %101, %96, %cst_105 {dimension_numbers = #tpu.dot_dimension_numbers<[1], [0], [0], [1], [0, 0, 1, 1], [], []>} : vector<4x4xbf16>, vector<4x512xbf16>, vector<4x512xf32> -> vector<4x512xf32>
    %103 = arith.maximumf %99, %102 : vector<4x512xf32>
    %104 = arith.truncf %103 : vector<4x512xf32> to vector<4x512xbf16>
    %c0_106 = arith.constant 0 : index
    %c0_107 = arith.constant 0 : index
    %c0_108 = arith.constant 0 : index
    %105 = vector.load %arg13[%c0_106, %c0_107, %c0_108] : memref<2x512x512xbf16, #tpu.memory_space<vmem>>, vector<1x512x512xbf16>
    %106 = vector.shape_cast %105 : vector<1x512x512xbf16> to vector<512x512xbf16>
    %cst_109 = arith.constant dense<0.000000e+00> : vector<4x512xf32>
    %107 = tpu.matmul %104, %106, %cst_109 {dimension_numbers = #tpu.dot_dimension_numbers<[1], [0], [0], [1], [0, 0, 1, 1], [], []>} : vector<4x512xbf16>, vector<512x512xbf16>, vector<4x512xf32> -> vector<4x512xf32>
    %c1_110 = arith.constant 1 : index
    %c0_111 = arith.constant 0 : index
    %c0_112 = arith.constant 0 : index
    %108 = vector.load %arg13[%c1_110, %c0_111, %c0_112] : memref<2x512x512xbf16, #tpu.memory_space<vmem>>, vector<1x512x512xbf16>
    %109 = vector.shape_cast %108 : vector<1x512x512xbf16> to vector<512x512xbf16>
    %cst_113 = arith.constant dense<0.000000e+00> : vector<4x512xf32>
    %110 = tpu.matmul %104, %109, %cst_113 {dimension_numbers = #tpu.dot_dimension_numbers<[1], [0], [0], [1], [0, 0, 1, 1], [], []>} : vector<4x512xbf16>, vector<512x512xbf16>, vector<4x512xf32> -> vector<4x512xf32>
    %111 = arith.maximumf %107, %110 : vector<4x512xf32>
    %112 = arith.truncf %111 : vector<4x512xf32> to vector<4x512xbf16>
    %c0_114 = arith.constant 0 : index
    %c0_115 = arith.constant 0 : index
    %113 = vector.load %arg31[%c0_114, %c0_115] : memref<4x512xbf16, #tpu.memory_space<vmem>>, vector<4x512xbf16>
    tpu.vector_store %arg31[%c0_114, %c0_115], %112 {strides = array<i32>} : memref<4x512xbf16, #tpu.memory_space<vmem>>, vector<4x512xbf16>,
    %c0_116 = arith.constant 0 : index
    %c0_117 = arith.constant 0 : index
    %114 = vector.load %arg31[%c0_116, %c0_117] : memref<4x512xbf16, #tpu.memory_space<vmem>>, vector<2x512xbf16>
    %c0_118 = arith.constant 0 : index
    %c0_119 = arith.constant 0 : index
    %c0_120 = arith.constant 0 : index
    %115 = vector.load %arg14[%c0_118, %c0_119, %c0_120] : memref<3x512x512xbf16, #tpu.memory_space<vmem>>, vector<1x512x512xbf16>
    %116 = vector.shape_cast %115 : vector<1x512x512xbf16> to vector<512x512xbf16>
    %cst_121 = arith.constant dense<0.000000e+00> : vector<2x512xf32>
    %117 = tpu.matmul %114, %116, %cst_121 {dimension_numbers = #tpu.dot_dimension_numbers<[1], [0], [0], [1], [0, 0, 1, 1], [], []>} : vector<2x512xbf16>, vector<512x512xbf16>, vector<2x512xf32> -> vector<2x512xf32>
    %c1_122 = arith.constant 1 : index
    %c0_123 = arith.constant 0 : index
    %118 = vector.load %arg31[%c1_122, %c0_123] : memref<4x512xbf16, #tpu.memory_space<vmem>>, vector<2x512xbf16>
    %c1_124 = arith.constant 1 : index
    %c0_125 = arith.constant 0 : index
    %c0_126 = arith.constant 0 : index
    %119 = vector.load %arg14[%c1_124, %c0_125, %c0_126] : memref<3x512x512xbf16, #tpu.memory_space<vmem>>, vector<1x512x512xbf16>
    %120 = vector.shape_cast %119 : vector<1x512x512xbf16> to vector<512x512xbf16>
    %cst_127 = arith.constant dense<0.000000e+00> : vector<2x512xf32>
    %121 = tpu.matmul %118, %120, %cst_127 {dimension_numbers = #tpu.dot_dimension_numbers<[1], [0], [0], [1], [0, 0, 1, 1], [], []>} : vector<2x512xbf16>, vector<512x512xbf16>, vector<2x512xf32> -> vector<2x512xf32>
    %122 = arith.addf %117, %121 : vector<2x512xf32>
    %c2_128 = arith.constant 2 : index
    %c0_129 = arith.constant 0 : index
    %123 = vector.load %arg31[%c2_128, %c0_129] : memref<4x512xbf16, #tpu.memory_space<vmem>>, vector<2x512xbf16>
    %c2_130 = arith.constant 2 : index
    %c0_131 = arith.constant 0 : index
    %c0_132 = arith.constant 0 : index
    %124 = vector.load %arg14[%c2_130, %c0_131, %c0_132] : memref<3x512x512xbf16, #tpu.memory_space<vmem>>, vector<1x512x512xbf16>
    %125 = vector.shape_cast %124 : vector<1x512x512xbf16> to vector<512x512xbf16>
    %cst_133 = arith.constant dense<0.000000e+00> : vector<2x512xf32>
    %126 = tpu.matmul %123, %125, %cst_133 {dimension_numbers = #tpu.dot_dimension_numbers<[1], [0], [0], [1], [0, 0, 1, 1], [], []>} : vector<2x512xbf16>, vector<512x512xbf16>, vector<2x512xf32> -> vector<2x512xf32>
    %127 = arith.addf %122, %126 : vector<2x512xf32>
    %c0_134 = arith.constant 0 : index
    %c0_135 = arith.constant 0 : index
    %128 = vector.load %arg15[%c0_134, %c0_135] : memref<1x512xf32, #tpu.memory_space<vmem>>, vector<1x512xf32>
    %129 = vector.broadcast %128 : vector<1x512xf32> to vector<2x512xf32>
    %130 = arith.addf %127, %129 : vector<2x512xf32>
    %cst_136 = arith.constant 0.000000e+00 : f32
    %131 = vector.broadcast %cst_136 : f32 to vector<2x512xf32>
    %132 = arith.maximumf %130, %131 : vector<2x512xf32>
    %133 = arith.truncf %132 : vector<2x512xf32> to vector<2x512xbf16>
    %c0_137 = arith.constant 0 : index
    %c0_138 = arith.constant 0 : index
    %c0_139 = arith.constant 0 : index
    %134 = vector.load %arg16[%c0_137, %c0_138, %c0_139] : memref<2x1x2xbf16, #tpu.memory_space<vmem>>, vector<1x1x2xbf16>
    %135 = vector.shape_cast %134 : vector<1x1x2xbf16> to vector<1x2xbf16>
    %cst_140 = arith.constant dense<0.000000e+00> : vector<1x512xf32>
    %136 = tpu.matmul %135, %133, %cst_140 {dimension_numbers = #tpu.dot_dimension_numbers<[1], [0], [0], [1], [0, 0, 1, 1], [], []>} : vector<1x2xbf16>, vector<2x512xbf16>, vector<1x512xf32> -> vector<1x512xf32>
    %c1_141 = arith.constant 1 : index
    %c0_142 = arith.constant 0 : index
    %c0_143 = arith.constant 0 : index
    %137 = vector.load %arg16[%c1_141, %c0_142, %c0_143] : memref<2x1x2xbf16, #tpu.memory_space<vmem>>, vector<1x1x2xbf16>
    %138 = vector.shape_cast %137 : vector<1x1x2xbf16> to vector<1x2xbf16>
    %cst_144 = arith.constant dense<0.000000e+00> : vector<1x512xf32>
    %139 = tpu.matmul %138, %133, %cst_144 {dimension_numbers = #tpu.dot_dimension_numbers<[1], [0], [0], [1], [0, 0, 1, 1], [], []>} : vector<1x2xbf16>, vector<2x512xbf16>, vector<1x512xf32> -> vector<1x512xf32>
    %140 = arith.maximumf %136, %139 : vector<1x512xf32>
    %141 = arith.truncf %140 : vector<1x512xf32> to vector<1x512xbf16>
    %c0_145 = arith.constant 0 : index
    %c0_146 = arith.constant 0 : index
    %c0_147 = arith.constant 0 : index
    %142 = vector.load %arg17[%c0_145, %c0_146, %c0_147] : memref<2x512x256xbf16, #tpu.memory_space<vmem>>, vector<1x512x256xbf16>
    %143 = vector.shape_cast %142 : vector<1x512x256xbf16> to vector<512x256xbf16>
    %cst_148 = arith.constant dense<0.000000e+00> : vector<1x256xf32>
    %144 = tpu.matmul %141, %143, %cst_148 {dimension_numbers = #tpu.dot_dimension_numbers<[1], [0], [0], [1], [0, 0, 1, 1], [], []>} : vector<1x512xbf16>, vector<512x256xbf16>, vector<1x256xf32> -> vector<1x256xf32>
    %c1_149 = arith.constant 1 : index
    %c0_150 = arith.constant 0 : index
    %c0_151 = arith.constant 0 : index
    %145 = vector.load %arg17[%c1_149, %c0_150, %c0_151] : memref<2x512x256xbf16, #tpu.memory_space<vmem>>, vector<1x512x256xbf16>
    %146 = vector.shape_cast %145 : vector<1x512x256xbf16> to vector<512x256xbf16>
    %cst_152 = arith.constant dense<0.000000e+00> : vector<1x256xf32>
    %147 = tpu.matmul %141, %146, %cst_152 {dimension_numbers = #tpu.dot_dimension_numbers<[1], [0], [0], [1], [0, 0, 1, 1], [], []>} : vector<1x512xbf16>, vector<512x256xbf16>, vector<1x256xf32> -> vector<1x256xf32>
    %148 = arith.maximumf %144, %147 : vector<1x256xf32>
    %149 = arith.truncf %148 : vector<1x256xf32> to vector<1x256xbf16>
    %c0_153 = arith.constant 0 : index
    %c0_154 = arith.constant 0 : index
    %150 = vector.load %arg18[%c0_153, %c0_154] : memref<256x512xbf16, #tpu.memory_space<vmem>>, vector<256x512xbf16>
    %cst_155 = arith.constant dense<0.000000e+00> : vector<1x512xf32>
    %151 = tpu.matmul %149, %150, %cst_155 {dimension_numbers = #tpu.dot_dimension_numbers<[1], [0], [0], [1], [0, 0, 1, 1], [], []>} : vector<1x256xbf16>, vector<256x512xbf16>, vector<1x512xf32> -> vector<1x512xf32>
    %c0_156 = arith.constant 0 : index
    %c0_157 = arith.constant 0 : index
    %152 = vector.load %arg19[%c0_156, %c0_157] : memref<1x512xf32, #tpu.memory_space<vmem>>, vector<1x512xf32>
    %153 = arith.addf %151, %152 : vector<1x512xf32>
    %cst_158 = arith.constant 0.000000e+00 : f32
    %154 = vector.broadcast %cst_158 : f32 to vector<1x512xf32>
    %155 = arith.maximumf %153, %154 : vector<1x512xf32>
    %156 = arith.truncf %155 : vector<1x512xf32> to vector<1x512xbf16>
    %c0_159 = arith.constant 0 : index
    %c0_160 = arith.constant 0 : index
    %157 = vector.load %arg20[%c0_159, %c0_160] : memref<512x1024xbf16, #tpu.memory_space<vmem>>, vector<512x1024xbf16>
    %cst_161 = arith.constant dense<0.000000e+00> : vector<1x1024xf32>
    %158 = tpu.matmul %156, %157, %cst_161 {dimension_numbers = #tpu.dot_dimension_numbers<[1], [0], [0], [1], [0, 0, 1, 1], [], []>} : vector<1x512xbf16>, vector<512x1024xbf16>, vector<1x1024xf32> -> vector<1x1024xf32>
    %c0_162 = arith.constant 0 : index
    %c0_163 = arith.constant 0 : index
    %159 = vector.load %arg21[%c0_162, %c0_163] : memref<1x1024xf32, #tpu.memory_space<vmem>>, vector<1x1024xf32>
    %160 = arith.addf %158, %159 : vector<1x1024xf32>
    %cst_164 = arith.constant 0.000000e+00 : f32
    %161 = vector.broadcast %cst_164 : f32 to vector<1x1024xf32>
    %162 = arith.maximumf %160, %161 : vector<1x1024xf32>
    %163 = arith.truncf %162 : vector<1x1024xf32> to vector<1x1024xbf16>
    %c0_165 = arith.constant 0 : index
    %c0_166 = arith.constant 0 : index
    %164 = vector.load %arg22[%c0_165, %c0_166] : memref<1024x32xbf16, #tpu.memory_space<vmem>>, vector<1024x32xbf16>
    %cst_167 = arith.constant dense<0.000000e+00> : vector<1x32xf32>
    %165 = tpu.matmul %163, %164, %cst_167 {dimension_numbers = #tpu.dot_dimension_numbers<[1], [0], [0], [1], [0, 0, 1, 1], [], []>} : vector<1x1024xbf16>, vector<1024x32xbf16>, vector<1x32xf32> -> vector<1x32xf32>
    %c0_168 = arith.constant 0 : index
    %c0_169 = arith.constant 0 : index
    %166 = vector.load %arg23[%c0_168, %c0_169] : memref<1x32xf32, #tpu.memory_space<vmem>>, vector<1x32xf32>
    %167 = arith.addf %165, %166 : vector<1x32xf32>
    %cst_170 = arith.constant 0.000000e+00 : f32
    %168 = vector.broadcast %cst_170 : f32 to vector<1x32xf32>
    %169 = arith.maximumf %167, %168 : vector<1x32xf32>
    %c0_171 = arith.constant 0 : index
    %c0_172 = arith.constant 0 : index
    %170 = vector.load %arg24[%c0_171, %c0_172] : memref<32x16xf32, #tpu.memory_space<vmem>>, vector<32x16xf32>
    %cst_173 = arith.constant dense<0.000000e+00> : vector<1x16xf32>
    %171 = tpu.matmul %169, %170, %cst_173 {dimension_numbers = #tpu.dot_dimension_numbers<[1], [0], [0], [1], [0, 0, 1, 1], [], []>} : vector<1x32xf32>, vector<32x16xf32>, vector<1x16xf32> -> vector<1x16xf32>
    %c0_174 = arith.constant 0 : index
    %c0_175 = arith.constant 0 : index
    %172 = vector.load %arg25[%c0_174, %c0_175] : memref<1x16xf32, #tpu.memory_space<vmem>>, vector<1x16xf32>
    %173 = arith.addf %171, %172 : vector<1x16xf32>
    %cst_176 = arith.constant 0.000000e+00 : f32
    %174 = vector.broadcast %cst_176 : f32 to vector<1x16xf32>
    %175 = arith.maximumf %173, %174 : vector<1x16xf32>
    %c0_177 = arith.constant 0 : index
    %c0_178 = arith.constant 0 : index
    %176 = vector.load %arg26[%c0_177, %c0_178] : memref<16x1xf32, #tpu.memory_space<vmem>>, vector<16x1xf32>
    %cst_179 = arith.constant dense<0.000000e+00> : vector<1x1xf32>
    %177 = tpu.matmul %175, %176, %cst_179 {dimension_numbers = #tpu.dot_dimension_numbers<[1], [0], [0], [1], [0, 0, 1, 1], [], []>} : vector<1x16xf32>, vector<16x1xf32>, vector<1x1xf32> -> vector<1x1xf32>
    %c0_180 = arith.constant 0 : index
    %c0_181 = arith.constant 0 : index
    %178 = vector.load %arg27[%c0_180, %c0_181] : memref<1x1xf32, #tpu.memory_space<vmem>>, vector<1x1xf32>
    %179 = arith.addf %177, %178 : vector<1x1xf32>
    %c0_182 = arith.constant 0 : index
    %c0_183 = arith.constant 0 : index
    %c0_184 = arith.constant 0 : index
    %180 = vector.load %arg28[%c0_182, %c0_183, %c0_184] : memref<1x1x1xf32, #tpu.memory_space<vmem>>, vector<1x1x1xf32>
    %181 = vector.shape_cast %180 : vector<1x1x1xf32> to vector<1x1xf32>
    %182 = vector.shape_cast %179 : vector<1x1xf32> to vector<1x1x1xf32>
    tpu.vector_store %arg28[%c0_182, %c0_183, %c0_184], %182 {strides = array<i32>} : memref<1x1x1xf32, #tpu.memory_space<vmem>>, vector<1x1x1xf32>,
    return
  }
  func.func @transform_0(%arg0: i32) -> (i32, i32, i32) {
    %c0_i32 = arith.constant 0 : i32
    %c0_i32_0 = arith.constant 0 : i32
    %c0_i32_1 = arith.constant 0 : i32
    return %arg0, %c0_i32, %c0_i32_0 : i32, i32, i32
  }
  func.func @transform_1(%arg0: i32) -> (i32, i32, i32) {
    %c0_i32 = arith.constant 0 : i32
    %c0_i32_0 = arith.constant 0 : i32
    %c0_i32_1 = arith.constant 0 : i32
    %c0_i32_2 = arith.constant 0 : i32
    return %c0_i32, %c0_i32_0, %c0_i32_1 : i32, i32, i32
  }
  func.func @transform_2(%arg0: i32) -> (i32, i32) {
    %c0_i32 = arith.constant 0 : i32
    %c0_i32_0 = arith.constant 0 : i32
    %c0_i32_1 = arith.constant 0 : i32
    return %c0_i32, %c0_i32_0 : i32, i32
  }
  func.func @transform_3(%arg0: i32) -> (i32, i32, i32) {
    %c0_i32 = arith.constant 0 : i32
    %c0_i32_0 = arith.constant 0 : i32
    %c0_i32_1 = arith.constant 0 : i32
    %c0_i32_2 = arith.constant 0 : i32
    return %c0_i32, %c0_i32_0, %c0_i32_1 : i32, i32, i32
  }
  func.func @transform_4(%arg0: i32) -> (i32, i32, i32) {
    %c0_i32 = arith.constant 0 : i32
    %c0_i32_0 = arith.constant 0 : i32
    %c0_i32_1 = arith.constant 0 : i32
    %c0_i32_2 = arith.constant 0 : i32
    return %c0_i32, %c0_i32_0, %c0_i32_1 : i32, i32, i32
  }
  func.func @transform_5(%arg0: i32) -> (i32, i32, i32) {
    %c0_i32 = arith.constant 0 : i32
    %c0_i32_0 = arith.constant 0 : i32
    %c0_i32_1 = arith.constant 0 : i32
    %c0_i32_2 = arith.constant 0 : i32
    return %c0_i32, %c0_i32_0, %c0_i32_1 : i32, i32, i32
  }
  func.func @transform_6(%arg0: i32) -> (i32, i32) {
    %c0_i32 = arith.constant 0 : i32
    %c0_i32_0 = arith.constant 0 : i32
    %c0_i32_1 = arith.constant 0 : i32
    return %c0_i32, %c0_i32_0 : i32, i32
  }
  func.func @transform_7(%arg0: i32) -> (i32, i32, i32) {
    %c0_i32 = arith.constant 0 : i32
    %c0_i32_0 = arith.constant 0 : i32
    %c0_i32_1 = arith.constant 0 : i32
    %c0_i32_2 = arith.constant 0 : i32
    return %c0_i32, %c0_i32_0, %c0_i32_1 : i32, i32, i32
  }
  func.func @transform_8(%arg0: i32) -> (i32, i32, i32) {
    %c0_i32 = arith.constant 0 : i32
    %c0_i32_0 = arith.constant 0 : i32
    %c0_i32_1 = arith.constant 0 : i32
    %c0_i32_2 = arith.constant 0 : i32
    return %c0_i32, %c0_i32_0, %c0_i32_1 : i32, i32, i32
  }
  func.func @transform_9(%arg0: i32) -> (i32, i32, i32) {
    %c0_i32 = arith.constant 0 : i32
    %c0_i32_0 = arith.constant 0 : i32
    %c0_i32_1 = arith.constant 0 : i32
    %c0_i32_2 = arith.constant 0 : i32
    return %c0_i32, %c0_i32_0, %c0_i32_1 : i32, i32, i32
  }
  func.func @transform_10(%arg0: i32) -> (i32, i32) {
    %c0_i32 = arith.constant 0 : i32
    %c0_i32_0 = arith.constant 0 : i32
    %c0_i32_1 = arith.constant 0 : i32
    return %c0_i32, %c0_i32_0 : i32, i32
  }
  func.func @transform_11(%arg0: i32) -> (i32, i32, i32) {
    %c0_i32 = arith.constant 0 : i32
    %c0_i32_0 = arith.constant 0 : i32
    %c0_i32_1 = arith.constant 0 : i32
    %c0_i32_2 = arith.constant 0 : i32
    return %c0_i32, %c0_i32_0, %c0_i32_1 : i32, i32, i32
  }
  func.func @transform_12(%arg0: i32) -> (i32, i32, i32) {
    %c0_i32 = arith.constant 0 : i32
    %c0_i32_0 = arith.constant 0 : i32
    %c0_i32_1 = arith.constant 0 : i32
    %c0_i32_2 = arith.constant 0 : i32
    return %c0_i32, %c0_i32_0, %c0_i32_1 : i32, i32, i32
  }
  func.func @transform_13(%arg0: i32) -> (i32, i32, i32) {
    %c0_i32 = arith.constant 0 : i32
    %c0_i32_0 = arith.constant 0 : i32
    %c0_i32_1 = arith.constant 0 : i32
    %c0_i32_2 = arith.constant 0 : i32
    return %c0_i32, %c0_i32_0, %c0_i32_1 : i32, i32, i32
  }
  func.func @transform_14(%arg0: i32) -> (i32, i32) {
    %c0_i32 = arith.constant 0 : i32
    %c0_i32_0 = arith.constant 0 : i32
    %c0_i32_1 = arith.constant 0 : i32
    return %c0_i32, %c0_i32_0 : i32, i32
  }
  func.func @transform_15(%arg0: i32) -> (i32, i32, i32) {
    %c0_i32 = arith.constant 0 : i32
    %c0_i32_0 = arith.constant 0 : i32
    %c0_i32_1 = arith.constant 0 : i32
    %c0_i32_2 = arith.constant 0 : i32
    return %c0_i32, %c0_i32_0, %c0_i32_1 : i32, i32, i32
  }
  func.func @transform_16(%arg0: i32) -> (i32, i32, i32) {
    %c0_i32 = arith.constant 0 : i32
    %c0_i32_0 = arith.constant 0 : i32
    %c0_i32_1 = arith.constant 0 : i32
    %c0_i32_2 = arith.constant 0 : i32
    return %c0_i32, %c0_i32_0, %c0_i32_1 : i32, i32, i32
  }
  func.func @transform_17(%arg0: i32) -> (i32, i32) {
    %c0_i32 = arith.constant 0 : i32
    %c0_i32_0 = arith.constant 0 : i32
    %c0_i32_1 = arith.constant 0 : i32
    return %c0_i32, %c0_i32_0 : i32, i32
  }
  func.func @transform_18(%arg0: i32) -> (i32, i32) {
    %c0_i32 = arith.constant 0 : i32
    %c0_i32_0 = arith.constant 0 : i32
    %c0_i32_1 = arith.constant 0 : i32
    return %c0_i32, %c0_i32_0 : i32, i32
  }
  func.func @transform_19(%arg0: i32) -> (i32, i32) {
    %c0_i32 = arith.constant 0 : i32
    %c0_i32_0 = arith.constant 0 : i32
    %c0_i32_1 = arith.constant 0 : i32
    return %c0_i32, %c0_i32_0 : i32, i32
  }
  func.func @transform_20(%arg0: i32) -> (i32, i32) {
    %c0_i32 = arith.constant 0 : i32
    %c0_i32_0 = arith.constant 0 : i32
    %c0_i32_1 = arith.constant 0 : i32
    return %c0_i32, %c0_i32_0 : i32, i32
  }
  func.func @transform_21(%arg0: i32) -> (i32, i32) {
    %c0_i32 = arith.constant 0 : i32
    %c0_i32_0 = arith.constant 0 : i32
    %c0_i32_1 = arith.constant 0 : i32
    return %c0_i32, %c0_i32_0 : i32, i32
  }
  func.func @transform_22(%arg0: i32) -> (i32, i32) {
    %c0_i32 = arith.constant 0 : i32
    %c0_i32_0 = arith.constant 0 : i32
    %c0_i32_1 = arith.constant 0 : i32
    return %c0_i32, %c0_i32_0 : i32, i32
  }
  func.func @transform_23(%arg0: i32) -> (i32, i32) {
    %c0_i32 = arith.constant 0 : i32
    %c0_i32_0 = arith.constant 0 : i32
    %c0_i32_1 = arith.constant 0 : i32
    return %c0_i32, %c0_i32_0 : i32, i32
  }
  func.func @transform_24(%arg0: i32) -> (i32, i32) {
    %c0_i32 = arith.constant 0 : i32
    %c0_i32_0 = arith.constant 0 : i32
    %c0_i32_1 = arith.constant 0 : i32
    return %c0_i32, %c0_i32_0 : i32, i32
  }
  func.func @transform_25(%arg0: i32) -> (i32, i32) {
    %c0_i32 = arith.constant 0 : i32
    %c0_i32_0 = arith.constant 0 : i32
    %c0_i32_1 = arith.constant 0 : i32
    return %c0_i32, %c0_i32_0 : i32, i32
  }
  func.func @transform_26(%arg0: i32) -> (i32, i32) {
    %c0_i32 = arith.constant 0 : i32
    %c0_i32_0 = arith.constant 0 : i32
    %c0_i32_1 = arith.constant 0 : i32
    return %c0_i32, %c0_i32_0 : i32, i32
  }
  func.func @transform_27(%arg0: i32) -> (i32, i32, i32) {
    %c0_i32 = arith.constant 0 : i32
    %c0_i32_0 = arith.constant 0 : i32
    %c0_i32_1 = arith.constant 0 : i32
    return %arg0, %c0_i32, %c0_i32_0 : i32, i32, i32
  }
}

</mosaic_0001>

<bundles_post_ra>
// kernel: tile.23
= control target key start
LH: loop header
LB: loop body
LE: loop exit
PB: predicated region body
PF: predicated region fallthrough
CT: control target
= control target key end

     0   :  { %s28_s0 = inlined_call_operand.vmem [shape: f32[32], index: 0, kind: input, shape index: {}]   ;;  %s29_s1 = inlined_call_operand.vmem [shape: f32[16,32], index: 1, kind: output, shape index: {}]  }
   0x1   :  { %v4_v0 = vld [vmem:[%s28_s0] ss:$0 sm:$0xff] }
   0x2   :  { %5 = vst [vmem:[%s29_s1] sm:$0xff] %v4_v0  ;;  %8 = vst [vmem:[%s29_s1 + $0x8] sm:$0xff] %v4_v0 }

// kernel: tile.24
= control target key start
LH: loop header
LB: loop body
LE: loop exit
PB: predicated region body
PF: predicated region fallthrough
CT: control target
= control target key end

     0   :  { %s62_s8 = smov 96   ;;  %vm3_vm0 = vcmask 261120   ;;  %s64_s15 = smov 64   ;;  %vm9_vm1 = vcmask 1048320   ;;  %vm15_vm2 = vcmask 785920   ;;  %vm21_vm3 = vcmask 523520   ;;  %s99_s0 = inlined_call_operand.vmem [shape: f32[16,32], index: 0, kind: input, shape index: {}]   ;;  %s100_s1 = inlined_call_operand.vmem [shape: f32[1,512], index: 1, kind: output, shape index: {}]  }
   0x1   :  { %v53_v0 = vld [vmem:[%s99_s0 + $0x3] ss:$4 sm:$0xf]   ;;  %v54_v1 = vld [vmem:[%s99_s0 + $0x2] ss:$4 sm:$0xf]  }
   0x2   :  { %7 = vrot.lane.b32.xlu0 %v53_v0, %s62_s8  ;;  %v55_v2 = vld [vmem:[%s99_s0 + $0x1] ss:$4 sm:$0xf]   ;;  %v2_v3 = vld [vmem:[%s99_s0] ss:$4 sm:$0xf]  }
   0x3   :  { %s63_s0 = smov 32   ;;  %4 = vst.msk [vmem:[#allocation0] ss:$8 sm:$0xf] %vm3_vm0, %v2_v3  }
   0x4   :  { %19 = vrot.lane.b32.xlu1 %v55_v2, %s63_s0 }
   0x6   :  { %13 = vrot.lane.b32.xlu0 %v54_v1, %s64_s15 }
  0x74   :  { %v8_v4 = vpop.permute.xlu0 %7  }
  0x75   :  { %10 = vst.msk [vmem:[#allocation0] ss:$8 sm:$0xf] %vm9_vm1, %v8_v4  }
  0x76   :  { %v20_v5 = vpop.permute.xlu1 %19  }
  0x78   :  { %v14_v6 = vpop.permute.xlu0 %13  }
  0x79   :  { %16 = vst.msk [vmem:[#allocation0] ss:$8 sm:$0xf] %vm15_vm2, %v14_v6  }
  0x7a   :  { %22 = vst.msk [vmem:[#allocation0] ss:$8 sm:$0xf] %vm21_vm3, %v20_v5  }
  0x81   :  { %v27_v7 = vld [vmem:[#allocation0] sm:$0x1]  ;;  %v32_v8 = vld [vmem:[#allocation0 + $0x8] sm:$0x1]  ;;  %v38_v9 = vld [vmem:[#allocation0 + $0x10] sm:$0x1] }
  0x82   :  { %30 = vst [vmem:[%s100_s1] sm:$0x1] %v27_v7  ;;  %56 = vst [vmem:[%s100_s1 + $0x1] sm:$0x1] %v32_v8  ;;  %v45_v10 = vld [vmem:[#allocation0 + $0x18] sm:$0x1] }
  0x83   :  { %57 = vst [vmem:[%s100_s1 + $0x2] sm:$0x1] %v38_v9  ;;  %58 = vst [vmem:[%s100_s1 + $0x3] sm:$0x1] %v45_v10 }

// kernel: tile.28
= control target key start
LH: loop header
LB: loop body
LE: loop exit
PB: predicated region body
PF: predicated region fallthrough
CT: control target
= control target key end

     0   :  { %s22_s0 = inlined_call_operand.vmem [shape: f32[64], index: 0, kind: input, shape index: {}]   ;;  %s23_s1 = inlined_call_operand.vmem [shape: f32[8,64], index: 1, kind: output, shape index: {}]  }
   0x1   :  { %v4_v0 = vld [vmem:[%s22_s0] ss:$0 sm:$0xff] }
   0x2   :  { %5 = vst [vmem:[%s23_s1] sm:$0xff] %v4_v0 }

// kernel: tile.29
= control target key start
LH: loop header
LB: loop body
LE: loop exit
PB: predicated region body
PF: predicated region fallthrough
CT: control target
= control target key end

     0   :  { %vm3_vm0 = vcmask 523264   ;;  %s46_s8 = smov 64   ;;  %vm9_vm1 = vcmask 1048064   ;;  %s75_s0 = inlined_call_operand.vmem [shape: f32[8,64], index: 0, kind: input, shape index: {}]   ;;  %s76_s1 = inlined_call_operand.vmem [shape: f32[1,512], index: 1, kind: output, shape index: {}]  }
   0x1   :  { %v41_v0 = vld [vmem:[%s75_s0 + $0x1] ss:$2 sm:$0xf]   ;;  %v2_v1 = vld [vmem:[%s75_s0] ss:$2 sm:$0xf]  }
   0x2   :  { %7 = vrot.lane.b32.xlu0 %v41_v0, %s46_s8  ;;  %4 = vst.msk [vmem:[#allocation0] ss:$8 sm:$0xf] %vm3_vm0, %v2_v1  }
  0x74   :  { %v8_v2 = vpop.permute.xlu0 %7  }
  0x75   :  { %10 = vst.msk [vmem:[#allocation0] ss:$8 sm:$0xf] %vm9_vm1, %v8_v2  }
  0x7c   :  { %v15_v3 = vld [vmem:[#allocation0] sm:$0x1]  ;;  %v20_v4 = vld [vmem:[#allocation0 + $0x8] sm:$0x1]  ;;  %v26_v5 = vld [vmem:[#allocation0 + $0x10] sm:$0x1] }
  0x7d   :  { %18 = vst [vmem:[%s76_s1] sm:$0x1] %v15_v3  ;;  %42 = vst [vmem:[%s76_s1 + $0x1] sm:$0x1] %v20_v4  ;;  %v33_v6 = vld [vmem:[#allocation0 + $0x18] sm:$0x1] }
  0x7e   :  { %43 = vst [vmem:[%s76_s1 + $0x2] sm:$0x1] %v26_v5  ;;  %44 = vst [vmem:[%s76_s1 + $0x3] sm:$0x1] %v33_v6 }

// kernel: tile.33
= control target key start
LH: loop header
LB: loop body
LE: loop exit
PB: predicated region body
PF: predicated region fallthrough
CT: control target
= control target key end

     0   :  { %s22_s0 = inlined_call_operand.vmem [shape: f32[128], index: 0, kind: input, shape index: {}]   ;;  %s23_s1 = inlined_call_operand.vmem [shape: f32[4,128], index: 1, kind: output, shape index: {}]  }
   0x1   :  { %v4_v0 = vld [vmem:[%s22_s0] ss:$0 sm:$0xff] }
   0x2   :  { %5 = vst [vmem:[%s23_s1] sm:$0xf] %v4_v0 }

// kernel: deep_cnn_forward.1
= control target key start
LH: loop header
LB: loop body
LE: loop exit
PB: predicated region body
PF: predicated region fallthrough
CT: control target
= control target key end

     0   :  { %s32084_s0 = inlined_call_operand.vmem [shape: bf16[2,18,18], index: 0, kind: input, shape index: {}]   ;;  %s32085_s1 = inlined_call_operand.vmem [shape: bf16[3,18,512], index: 1, kind: input, shape index: {}]   ;;  %s32086_s2 = inlined_call_operand.vmem [shape: f32[1,512], index: 2, kind: input, shape index: {}]   ;;  %s32087_s3 = inlined_call_operand.vmem [shape: bf16[2,10,16], index: 3, kind: input, shape index: {}]   ;;  %s32088_s4 = inlined_call_operand.vmem [shape: bf16[2,512,320], index: 4, kind: input, shape index: {}]   ;;  %s32089_s5 = inlined_call_operand.vmem [shape: bf16[3,320,512], index: 5, kind: input, shape index: {}]   ;;  %s32090_s6 = inlined_call_operand.vmem [shape: f32[1,512], index: 6, kind: input, shape index: {}]   ;;  %s32091_s7 = inlined_call_operand.vmem [shape: bf16[2,6,8], index: 7, kind: input, shape index: {}]   ;;  %s32092_s8 = inlined_call_operand.vmem [shape: bf16[2,512,384], index: 8, kind: input, shape index: {}]   ;;  %s32093_s9 = inlined_call_operand.vmem [shape: bf16[3,384,512], index: 9, kind: input, shape index: {}]   ;;  %s32094_s10 = inlined_call_operand.vmem [shape: f32[1,512], index: 10, kind: input, shape index: {}]   ;;  %s32095_s11 = inlined_call_operand.vmem [shape: bf16[2,4,4], index: 11, kind: input, shape index: {}]   ;;  %s32096_s12 = inlined_call_operand.vmem [shape: bf16[2,512,512], index: 12, kind: input, shape index: {}]   ;;  %s32097_s13 = inlined_call_operand.vmem [shape: bf16[3,512,512], index: 13, kind: input, shape index: {}]   ;;  %s32098_s14 = inlined_call_operand.vmem [shape: f32[1,512], index: 14, kind: input, shape index: {}]   ;;  %s32099_s15 = inlined_call_operand.vmem [shape: bf16[2,1,2], index: 15, kind: input, shape index: {}]   ;;  %s32100_s16 = inlined_call_operand.vmem [shape: bf16[2,512,256], index: 16, kind: input, shape index: {}]   ;;  %s32101_s17 = inlined_call_operand.vmem [shape: bf16[256,512], index: 17, kind: input, shape index: {}]   ;;  %s32102_s18 = inlined_call_operand.vmem [shape: f32[1,512], index: 18, kind: input, shape index: {}]   ;;  %s32103_s19 = inlined_call_operand.vmem [shape: bf16[512,1024], index: 19, kind: input, shape index: {}]   ;;  %s32104_s20 = inlined_call_operand.vmem [shape: f32[1,1024], index: 20, kind: input, shape index: {}]   ;;  %s32105_s21 = inlined_call_operand.vmem [shape: bf16[1024,32], index: 21, kind: input, shape index: {}]   ;;  %s32106_s22 = inlined_call_operand.vmem [shape: f32[1,32], index: 22, kind: input, shape index: {}]   ;;  %s32107_s23 = inlined_call_operand.vmem [shape: f32[32,16], index: 23, kind: input, shape index: {}]   ;;  %s32108_s24 = inlined_call_operand.vmem [shape: f32[1,16], index: 24, kind: input, shape index: {}]   ;;  %s32109_s25 = inlined_call_operand.vmem [shape: f32[16,1], index: 25, kind: input, shape index: {}]   ;;  %s32110_s26 = inlined_call_operand.<no memory space> [shape: f32[1,1], index: 26, kind: input, shape index: {}]   ;;  %s32111_s27 = inlined_call_operand.vmem [shape: f32[2,1,1], index: 27, kind: output, shape index: {}]  }
   0x1   :  { %32125 = sst [smem:[#allocation6_spill]] %s32084_s0  ;;  %v32_v0 = vstv %s32110_s26 }
   0x2   :  { %32126 = sst [smem:[#allocation7_spill]] %s32085_s1  ;;  %33 = vst [vmem:[#allocation5] sm:$0x1] %v32_v0 }
   0x3   :  { %32127 = sst [smem:[#allocation8_spill]] %s32086_s2 }
   0x4   :  { %32128 = sst [smem:[#allocation9_spill]] %s32087_s3 }
   0x5   :  { %32129 = sst [smem:[#allocation10_spill]] %s32088_s4 }
   0x6   :  { %32130 = sst [smem:[#allocation11_spill]] %s32089_s5 }
   0x7   :  { %32131 = sst [smem:[#allocation12_spill]] %s32090_s6 }
   0x8   :  { %32132 = sst [smem:[#allocation13_spill]] %s32091_s7 }
   0x9   :  { %32133 = sst [smem:[#allocation14_spill]] %s32092_s8  ;;  %s25188_s8 = smov 0  }
   0xa   :  { %32134 = sst [smem:[#allocation15_spill]] %s32093_s9 }
   0xb   :  { %32135 = sst [smem:[#allocation16_spill]] %s32094_s10 }
   0xc   :  { %32136 = sst [smem:[#allocation17_spill]] %s32095_s11 }
   0xd LB: > { %s18808_s30 = sadd.s32 4294967295, %s25039_s8   ;;  %p18812_p0 = scmp.ge.s32.totalorder %s25039_s8, 1  ;;  %s25039_s8 = sphi %s25188_s8, %s39_s8  }
   0xe   : > { %p739_p1 = scmp.lt.s32.totalorder %s25039_s8, 3 }
  0x10   : > { %p740_p2 = pnand %p18812_p0, %p739_p1 }
  0x11   : > { %s32137_s28 = sld [smem:[#allocation7_spill]] (!%p740_p2)  ;;  %p809_p3 = scmp.lt.s32.totalorder (!%p740_p2), %s18808_s30, 1 }
  0x12   : > { %743 = sbr.rel (%p740_p2) target bundleno = 5093 (0x13e5), region = 128  ;;  %s32138_s1 = sld [smem:[#allocation6_spill]] (!%p740_p2) }
  0x13   : > { %s32139_s10 = sld [smem:[#allocation8_spill]] (!%p740_p2) }
  0x14   : > { %s32140_s11 = sld [smem:[#allocation9_spill]] (!%p740_p2) }
  0x15   : > { %s32141_s7 = sld [smem:[#allocation10_spill]] (!%p740_p2) }
  0x16   : > { %s32142_s4 = sld [smem:[#allocation11_spill]] (!%p740_p2) }
  0x17   : > { %v18818_v1 = vld [vmem:[%s32137_s28 + $0x50] sm:$0x11]  ;;  %vm889_vm0 = vcmask 1040384   ;;  %v18819_v2 = vld [vmem:[%s32137_s28 + $0x58] sm:$0x11]  ;;  %s32150_s30 = smov (!%p809_p3, %s18808_s30), 1  ;;  %v1274_v62 = vlaneseq }
  0x18   : > { %v18827_v3 = vcombine.high %v18818_v1, %v18818_v1  ;;  %v18829_v4 = vcombine.high %v18819_v2, %v18819_v2  ;;  %v18826_v5 = vcombine.low %v18818_v1, %v18818_v1  ;;  %v18828_v6 = vcombine.low %v18819_v2, %v18819_v2  ;;  %v22369_v7 = vld [vmem:[%s32137_s28 + $0x34] ss:$16 sps:$4 sm:$0xff]   ;;  %v22371_v8 = vld [vmem:[%s32137_s28 + $0x3c] ss:$16 sps:$4 sm:$0xff]   ;;  %v22373_v11 = vld [vmem:[%s32137_s28 + $0x30] ss:$16 sps:$4 sm:$0xff]  }
  0x19   : > { %v22374_v12 = vld [vmem:[%s32137_s28 + $0x38] ss:$16 sps:$4 sm:$0xff]   ;;  %v824_v13 = vld [vmem:[%s32137_s28 + $0x20] sm:$0x11]  ;;  %s22352_s0 = smul.u32 12, %s32150_s30  ;;  %v25041_v17 = vmov 0  }
  0x1a   : > { %18830 = vmatprep.subr.msk.bf16.mxu0 %vm889_vm0, %v18827_v3  ;;  %18832 = vmatprep.subr.msk.bf16.mxu1 %vm889_vm0, %v18829_v4  ;;  %v891_v9 = vsel %vm889_vm0, %v18826_v5, 0  ;;  %v897_v10 = vsel %vm889_vm0, %v18828_v6, 0  ;;  %v825_v14 = vld [vmem:[%s32137_s28 + $0x28] sm:$0x11]  ;;  %v18839_v15 = vcombine.high %v824_v13, %v824_v13  ;;  %v18838_v25 = vcombine.low %v824_v13, %v824_v13  ;;  %v22383_v29 = vld [vmem:[%s32137_s28 + $0x4] ss:$16 sps:$4 sm:$0xff]  }
  0x1b   : > { %915 = vmatpush1.bf16.msra.mxu0 %v891_v9  ;;  %958 = vmatpush1.bf16.msra.mxu1 %v897_v10  ;;  %v18841_v16 = vcombine.high %v825_v14, %v825_v14  ;;  %s813_s6 = scalar_lea.vmem %s32138_s1, %s22352_s0  ;;  %v18840_v26 = vcombine.low %v825_v14, %v825_v14  ;;  %vm842_vm1 = vsmask.f32 7424  ;;  %v22386_v30 = vld [vmem:[%s32137_s28 + $0xc] ss:$16 sps:$4 sm:$0xff]   ;;  %v18850_v31 = vld [vmem:[%s32137_s28 + $0x80] sm:$0x11] }
  0x1c   : > { %916 = vmatprep.subr.bf16.mxu0 %v22369_v7  ;;  %959 = vmatprep.subr.bf16.mxu1 %v22371_v8  ;;  %v818_v18 = vld [vmem:[%s813_s6] sm:$0xf]  ;;  %v819_v19 = vld [vmem:[%s813_s6 + $0x4] sm:$0xf]  ;;  %vm885_vm2 = vcmask 146432   ;;  %v1021_v34 = vsel %vm889_vm0, %v18838_v25, 0  ;;  %v18858_v40 = vcombine.high %v18850_v31, %v18850_v31  ;;  %v18857_v42 = vcombine.low %v18850_v31, %v18850_v31 }
  0x1d   : > { %934 = vmatprep.mubr.bf16.mxu0 %v25041_v17  ;;  %977 = vmatprep.mubr.bf16.mxu1 %v25041_v17  ;;  %v18820_v20 = vcombine.low %v818_v18, %v819_v19  ;;  %v22376_v21 = vld [vmem:[%s813_s6 + $0x8] ss:$0 sps:$4 sm:$0x11]   ;;  %v1027_v35 = vsel %vm889_vm0, %v18840_v26, 0  ;;  %v22381_v37 = vld [vmem:[%s32137_s28] ss:$16 sps:$4 sm:$0xff]  }
  0x1e   : > { %v851_v24 = vshll.u32 %v22376_v21, 16  ;;  %v18851_v33 = vld [vmem:[%s32137_s28 + $0x88] sm:$0x11]  ;;  %v1118_v39 = vld [vmem:[%s813_s6] sm:$0xe]  ;;  %v1167_v47 = vsel %vm889_vm0, %v18857_v42, 0 }
  0x1f   : > { %917 = vmatpush1.bf16.msra.mxu0 %v22373_v11  ;;  %960 = vmatpush1.bf16.msra.mxu1 %v22374_v12  ;;  %v844_v22 = vshrl.u32 %v18820_v20, 16  ;;  %v846_v23 = vshll.u32 %v18820_v20, 16  ;;  %v22384_v38 = vld [vmem:[%s32137_s28 + $0x8] ss:$16 sps:$4 sm:$0xff]   ;;  %v18860_v41 = vcombine.high %v18851_v33, %v18851_v33  ;;  %v18859_v43 = vcombine.low %v18851_v33, %v18851_v33  ;;  %v22393_v44 = vld [vmem:[%s32137_s28 + $0x64] ss:$16 sps:$4 sm:$0xff]  }
  0x20   : > { %18842 = vmatprep.subr.msk.bf16.mxu0 %vm889_vm0, %v18839_v15  ;;  %18844 = vmatprep.subr.msk.bf16.mxu1 %vm889_vm0, %v18841_v16  ;;  %v853_v28 = vrot.slane %v851_v24, 1  ;;  %v22396_v45 = vld [vmem:[%s32137_s28 + $0x6c] ss:$16 sps:$4 sm:$0xff]   ;;  %v18852_v46 = vcombine.low %v1118_v39, %v819_v19  ;;  %v22391_v49 = vld [vmem:[%s32137_s28 + $0x60] ss:$16 sps:$4 sm:$0xff]   ;;  %v1131_v52 = vrot.slane %v22376_v21, 1 }
  0x21   : > { %v848_v27 = vrot.slane %v846_v23, 1  ;;  %v1173_v48 = vsel %vm889_vm0, %v18859_v43, 0  ;;  %v22394_v50 = vld [vmem:[%s32137_s28 + $0x68] ss:$16 sps:$4 sm:$0xff]   ;;  %vm1129_vm3 = vcmask 1046528   ;;  %v25282_v3 = vshrl.u32 %v1274_v62, 7 }
  0x22   : > { %v1130_v51 = vrot.slane %v18852_v46, 1  ;;  %v1272_v7 = vld [vmem:[%s32139_s10] sm:$0xf]  ;;  %vm1321_vm4 = vcmask 130048   ;;  %vm3164_vm5 = vcmask 519168   ;;  %vm3167_vm6 = vcmask 516096   ;;  %s816_s10 = scalar_lea.vmem %s32111_s27, %s32150_s30 }
  0x23   : > { %v849_v32 = vor.u32 %v848_v27, %v844_v22  ;;  %v25285_v6 = vsub.s32 1, %v25282_v3  ;;  %v25291_v8 = vsub.s32 3, %v25282_v3  ;;  %v25294_v11 = vsub.s32 0, %v25282_v3  ;;  %s32143_s9 = sld [smem:[#allocation12_spill]] }
  0x24   : > { %v1132_v53 = vsel %vm1129_vm3, %v1130_v51, %v1131_v52  ;;  %v25297_v14 = vsub.s32 2, %v25282_v3  ;;  %vm3770_vm7 = vcmask 523264   ;;  %vm5216_vm8 = vcmask 1043456   ;;  %s32144_s0 = sld [smem:[#allocation13_spill]] }
  0x25   : > { %v854_v36 = vsel %vm842_vm1, %v849_v32, %v853_v28  ;;  %v1281_v15 = vrot.slane %v1272_v7, %v25285_v6  ;;  %v1277_v25 = vrot.slane %v1272_v7, %v25294_v11  ;;  %vm5212_vm9 = vcmask 64512   ;;  %s32145_s1 = sld [smem:[#allocation14_spill]] }
  0x26   : > { %18831 = vmatmul.mubr.msk.bf16.vlgmr.msra.gmra.mxu0 %vm885_vm2, %v854_v36  ;;  %18833 = vmatmul.mubr.msk.bf16.vlgmr.msra.gmra.mxu1 %vm885_vm2, %v854_v36  ;;  %v1285_v31 = vrot.slane %v1272_v7, %v25297_v14  ;;  %s32147_s5 = sld [smem:[#allocation16_spill]]  ;;  %vm9357_vm10 = vcmask 1041408   ;;  %vm9353_vm11 = vcmask 31744   ;;  %vm14381_vm12 = vcmask 15360  }
  0x27   : > { %1045 = vmatpush1.bf16.msra.mxu0 %v1021_v34  ;;  %1088 = vmatpush1.bf16.msra.mxu1 %v1027_v35  ;;  %vm25044_vm13 = vmmov 0   ;;  %vm18608_vm14 = vcmask 261120   ;;  %vm18759_vm15 = vcmask 0  }
  0x28   : > { %1046 = vmatprep.subr.bf16.mxu0 %v22383_v29  ;;  %1089 = vmatprep.subr.bf16.mxu1 %v22386_v30 }
  0x29   : > { %1064 = vmatprep.mubr.bf16.mxu0 %v25041_v17  ;;  %1107 = vmatprep.mubr.bf16.mxu1 %v25041_v17 }
  0x2b   : > { %1047 = vmatpush1.bf16.msra.mxu0 %v22381_v37  ;;  %1090 = vmatpush1.bf16.msra.mxu1 %v22384_v38 }
  0x2c   : > { %18861 = vmatprep.subr.msk.bf16.mxu0 %vm889_vm0, %v18858_v40  ;;  %18863 = vmatprep.subr.msk.bf16.mxu1 %vm889_vm0, %v18860_v41 }
  0x2e   : > { %18843 = vmatmul.mubr.msk.bf16.vlgmr.msra.gmra.mxu0 %vm885_vm2, %v18820_v20  ;;  %18845 = vmatmul.mubr.msk.bf16.vlgmr.msra.gmra.mxu1 %vm885_vm2, %v18820_v20  ;;  %v1289_v20 = vrot.slane %v1272_v7, %v25291_v8  ;;  %v22411_v7 = vld [vmem:[%s32141_s7 + $0x214] ss:$12 sps:$4 sm:$0xff]  }
  0x2f   : > { %1191 = vmatpush1.bf16.msra.mxu0 %v1167_v47  ;;  %1234 = vmatpush1.bf16.msra.mxu1 %v1173_v48 }
  0x30   : > { %1192 = vmatprep.subr.bf16.mxu0 %v22393_v44  ;;  %1235 = vmatprep.subr.bf16.mxu1 %v22396_v45 }
  0x31   : > { %1210 = vmatprep.mubr.bf16.mxu0 %v25041_v17  ;;  %1253 = vmatprep.mubr.bf16.mxu1 %v25041_v17 }
  0x33   : > { %1193 = vmatpush1.bf16.msra.mxu0 %v22391_v49  ;;  %1236 = vmatpush1.bf16.msra.mxu1 %v22394_v50 }
  0x36   : > { %18862 = vmatmul.mubr.msk.bf16.vlgmr.msra.gmra.mxu0 %vm885_vm2, %v1132_v53  ;;  %18864 = vmatmul.mubr.msk.bf16.vlgmr.msra.gmra.mxu1 %vm885_vm2, %v1132_v53 }
  0x37   : > { %1357 = vmatprep.mubr.bf16.mxu0 %v25041_v17  ;;  %1400 = vmatprep.mubr.bf16.mxu1 %v25041_v17 }
  0xe6   : > { %v936_v54 = vpop.f32.mrf.mxu0  ;;  %v979_v55 = vpop.f32.mrf.mxu1 }
  0xe8   : > { %v938_v56 = vpop.f32.mrf.mxu0  ;;  %v981_v57 = vpop.f32.mrf.mxu1 }
  0xea   : > { %v940_v58 = vpop.f32.mrf.mxu0  ;;  %v983_v59 = vpop.f32.mrf.mxu1 }
  0xec   : > { %v942_v60 = vpop.f32.mrf.mxu0  ;;  %v985_v61 = vpop.f32.mrf.mxu1 }
  0xee   : > { %v1066_v63 = vpop.f32.mrf.mxu0  ;;  %v1109_v0 = vpop.f32.mrf.mxu1 }
  0xef   : > { %v1067_v16 = vadd.f32 %v1066_v63, %v936_v54  ;;  %v1110_v21 = vadd.f32 %v1109_v0, %v979_v55  ;;  %v22402_v63 = vld [vmem:[%s32141_s7 + $0xac] ss:$12 sps:$4 sm:$0xff]  }
  0xf0   : > { %v1068_v1 = vpop.f32.mrf.mxu0  ;;  %v1111_v2 = vpop.f32.mrf.mxu1  ;;  %v22405_v0 = vld [vmem:[%s32141_s7 + $0x22c] ss:$12 sps:$4 sm:$0xff]  }
  0xf1   : > { %v1069_v18 = vadd.f32 %v1068_v1, %v938_v56  ;;  %v1112_v19 = vadd.f32 %v1111_v2, %v981_v57  ;;  %v22399_v1 = vld [vmem:[%s32140_s11 + $0x8] sm:$0x1f]  }
  0xf2   : > { %v1070_v4 = vpop.f32.mrf.mxu0  ;;  %v1113_v5 = vpop.f32.mrf.mxu1  ;;  %v22400_v2 = vld [vmem:[%s32141_s7 + $0xa8] ss:$12 sps:$4 sm:$0xff]  }
  0xf3   : > { %v1071_v28 = vadd.f32 %v1070_v4, %v940_v58  ;;  %v1114_v29 = vadd.f32 %v1113_v5, %v983_v59  ;;  %v22403_v4 = vld [vmem:[%s32141_s7 + $0x228] ss:$12 sps:$4 sm:$0xff]  }
  0xf4   : > { %v1072_v9 = vpop.f32.mrf.mxu0  ;;  %v1115_v10 = vpop.f32.mrf.mxu1  ;;  %v22408_v5 = vld [vmem:[%s32141_s7 + $0x94] ss:$12 sps:$4 sm:$0xff]  }
  0xf5   : > { %v1073_v34 = vadd.f32 %v1072_v9, %v942_v60  ;;  %v1116_v35 = vadd.f32 %v1115_v10, %v985_v61  ;;  %v22398_v60 = vld [vmem:[%s32140_s11] sm:$0x1f]   ;;  %v22406_v9 = vld [vmem:[%s32141_s7 + $0x90] ss:$12 sps:$4 sm:$0xff]  }
  0xf6   : > { %v1212_v12 = vpop.f32.mrf.mxu0  ;;  %v1255_v13 = vpop.f32.mrf.mxu1  ;;  %v22409_v10 = vld [vmem:[%s32141_s7 + $0x210] ss:$12 sps:$4 sm:$0xff]  }
  0xf7   : > { %v1264_v24 = vadd.f32 %v1212_v12, %v1067_v16  ;;  %v1266_v30 = vadd.f32 %v1255_v13, %v1110_v21  ;;  %v22414_v12 = vld [vmem:[%s32141_s7 + $0x7c] ss:$12 sps:$4 sm:$0xff]   ;;  %v22415_v16 = vld [vmem:[%s32141_s7 + $0x1f8] ss:$12 sps:$4 sm:$0xff]   ;;  %v22421_v21 = vld [vmem:[%s32141_s7 + $0x1e0] ss:$12 sps:$4 sm:$0xff]  }
  0xf8   : > { %v1214_v22 = vpop.f32.mrf.mxu0  ;;  %v1257_v23 = vpop.f32.mrf.mxu1  ;;  %v22417_v13 = vld [vmem:[%s32141_s7 + $0x1fc] ss:$12 sps:$4 sm:$0xff]  }
  0xf9   : > { %v1265_v26 = vadd.f32 %v1214_v22, %v1069_v18  ;;  %v1267_v27 = vadd.f32 %v1257_v23, %v1112_v19  ;;  %v1294_v42 = vadd.f32 %v1277_v25, %v1264_v24  ;;  %v1296_v45 = vadd.f32 %v1285_v31, %v1266_v30  ;;  %v22420_v18 = vld [vmem:[%s32141_s7 + $0x64] ss:$12 sps:$4 sm:$0xff]   ;;  %v22426_v22 = vld [vmem:[%s32141_s7 + $0x4c] ss:$12 sps:$4 sm:$0xff]   ;;  %v22424_v24 = vld [vmem:[%s32141_s7 + $0x48] ss:$12 sps:$4 sm:$0xff]  }
  0xfa   : > { %v1216_v32 = vpop.f32.mrf.mxu0  ;;  %v1259_v33 = vpop.f32.mrf.mxu1  ;;  %v22423_v19 = vld [vmem:[%s32141_s7 + $0x1e4] ss:$12 sps:$4 sm:$0xff]   ;;  %v22429_v23 = vld [vmem:[%s32141_s7 + $0x1cc] ss:$12 sps:$4 sm:$0xff]   ;;  %v22438_v30 = vld [vmem:[%s32141_s7 + $0x1c] ss:$12 sps:$4 sm:$0xff]  }
  0xfb   : > { %v1295_v36 = vadd.f32 %v1281_v15, %v1265_v26  ;;  %v1297_v37 = vadd.f32 %v1289_v20, %v1267_v27  ;;  %v1268_v38 = vadd.f32 %v1216_v32, %v1071_v28  ;;  %v1270_v39 = vadd.f32 %v1259_v33, %v1114_v29  ;;  %v22432_v26 = vld [vmem:[%s32141_s7 + $0x34] ss:$12 sps:$4 sm:$0xff]   ;;  %v22430_v28 = vld [vmem:[%s32141_s7 + $0x30] ss:$12 sps:$4 sm:$0xff]   ;;  %v22436_v32 = vld [vmem:[%s32141_s7 + $0x18] ss:$12 sps:$4 sm:$0xff]  }
  0xfc   : > { %v1218_v40 = vpop.f32.mrf.mxu0  ;;  %v1261_v41 = vpop.f32.mrf.mxu1  ;;  %v1302_v56 = vmax.f32 %v1294_v42, 0.0  ;;  %v1304_v57 = vmax.f32 %v1296_v45, 0.0  ;;  %v22435_v27 = vld [vmem:[%s32141_s7 + $0x1b4] ss:$12 sps:$4 sm:$0xff]   ;;  %v22433_v29 = vld [vmem:[%s32141_s7 + $0x1b0] ss:$12 sps:$4 sm:$0xff]  }
  0xfd   : > { %v1269_v43 = vadd.f32 %v1218_v40, %v1073_v34  ;;  %v1271_v44 = vadd.f32 %v1261_v41, %v1116_v35  ;;  %v1303_v46 = vmax.f32 %v1295_v36, 0.0  ;;  %v1298_v47 = vadd.f32 %v1277_v25, %v1268_v38  ;;  %v22427_v25 = vld [vmem:[%s32141_s7 + $0x1c8] ss:$12 sps:$4 sm:$0xff]   ;;  %v22439_v33 = vld [vmem:[%s32141_s7 + $0x198] ss:$12 sps:$4 sm:$0xff]  }
  0xfe   : > { %v1300_v48 = vadd.f32 %v1285_v31, %v1270_v39  ;;  %v1305_v49 = vmax.f32 %v1297_v37, 0.0  ;;  %v22441_v31 = vld [vmem:[%s32141_s7 + $0x19c] ss:$12 sps:$4 sm:$0xff]   ;;  %v22444_v34 = vld [vmem:[%s32141_s7 + $0x4] ss:$12 sps:$4 sm:$0xff]  }
  0xff   : > { %v1299_v50 = vadd.f32 %v1281_v15, %v1269_v43  ;;  %v1301_v51 = vadd.f32 %v1289_v20, %v1271_v44  ;;  %v1306_v52 = vmax.f32 %v1298_v47, 0.0  ;;  %v22412_v15 = vld [vmem:[%s32141_s7 + $0x78] ss:$12 sps:$4 sm:$0xff]   ;;  %v22418_v20 = vld [vmem:[%s32141_s7 + $0x60] ss:$12 sps:$4 sm:$0xff]  }
 0x100   : > { %v1308_v53 = vmax.f32 %v1300_v48, 0.0  ;;  %v22447_v35 = vld [vmem:[%s32141_s7 + $0x184] ss:$12 sps:$4 sm:$0xff]   ;;  %v22442_v36 = vld [vmem:[%s32141_s7] ss:$12 sps:$4 sm:$0xff]  }
 0x101   : > { %v1307_v54 = vmax.f32 %v1299_v50, 0.0  ;;  %v1309_v55 = vmax.f32 %v1301_v51, 0.0  ;;  %v1310_v61 = vpack.c.bf16 %v1306_v52, %v1302_v56  ;;  %v22445_v37 = vld [vmem:[%s32141_s7 + $0x180] ss:$12 sps:$4 sm:$0xff]   ;;  %v22448_v40 = vld [vmem:[%s32141_s7 + $0x168] ss:$12 sps:$4 sm:$0xff]  }
 0x102   : > { %v1312_v62 = vpack.c.bf16 %v1308_v53, %v1304_v57  ;;  %v22450_v38 = vld [vmem:[%s32141_s7 + $0x16c] ss:$12 sps:$4 sm:$0xff]   ;;  %v22451_v41 = vld [vmem:[%s32141_s7 + $0x2e8] ss:$12 sps:$4 sm:$0xff]   ;;  %v22454_v44 = vld [vmem:[%s32141_s7 + $0x150] ss:$12 sps:$4 sm:$0xff]  }
 0x103   : > { %v1311_v58 = vpack.c.bf16 %v1307_v54, %v1303_v46  ;;  %v1313_v59 = vpack.c.bf16 %v1309_v55, %v1305_v49  ;;  %v22453_v39 = vld [vmem:[%s32141_s7 + $0x2ec] ss:$12 sps:$4 sm:$0xff]   ;;  %v22456_v42 = vld [vmem:[%s32141_s7 + $0x154] ss:$12 sps:$4 sm:$0xff]   ;;  %v22457_v45 = vld [vmem:[%s32141_s7 + $0x2d0] ss:$12 sps:$4 sm:$0xff]  }
 0x104   : > { %v22459_v43 = vld [vmem:[%s32141_s7 + $0x2d4] ss:$12 sps:$4 sm:$0xff]   ;;  %v22462_v46 = vld [vmem:[%s32141_s7 + $0x13c] ss:$12 sps:$4 sm:$0xff]   ;;  %v22460_v48 = vld [vmem:[%s32141_s7 + $0x138] ss:$12 sps:$4 sm:$0xff]  }
 0x105   : > { %1339 = vmatprep.subr.bf16.mxu0 %v1311_v58  ;;  %1382 = vmatprep.subr.bf16.mxu1 %v1313_v59  ;;  %v22465_v47 = vld [vmem:[%s32141_s7 + $0x2bc] ss:$12 sps:$4 sm:$0xff]   ;;  %v22463_v49 = vld [vmem:[%s32141_s7 + $0x2b8] ss:$12 sps:$4 sm:$0xff]   ;;  %v22466_v52 = vld [vmem:[%s32141_s7 + $0x120] ss:$12 sps:$4 sm:$0xff]  }
 0x106   : > { %1340 = vmatpush1.bf16.msra.mxu0 %v1310_v61  ;;  %1383 = vmatpush1.bf16.msra.mxu1 %v1312_v62  ;;  %v22468_v50 = vld [vmem:[%s32141_s7 + $0x124] ss:$12 sps:$4 sm:$0xff]   ;;  %v22469_v53 = vld [vmem:[%s32141_s7 + $0x2a0] ss:$12 sps:$4 sm:$0xff]   ;;  %v22472_v54 = vld [vmem:[%s32141_s7 + $0x108] ss:$12 sps:$4 sm:$0xff]  }
 0x107   : > { %1436 = vmatprep.subr.bf16.mxu0 %v1311_v58  ;;  %1479 = vmatprep.subr.bf16.mxu1 %v1313_v59  ;;  %v22471_v51 = vld [vmem:[%s32141_s7 + $0x2a4] ss:$12 sps:$4 sm:$0xff]   ;;  %v22474_v55 = vld [vmem:[%s32141_s7 + $0x10c] ss:$12 sps:$4 sm:$0xff]   ;;  %v22475_v56 = vld [vmem:[%s32141_s7 + $0x288] ss:$12 sps:$4 sm:$0xff]  }
 0x108   : > { %v22477_v57 = vld [vmem:[%s32141_s7 + $0x28c] ss:$12 sps:$4 sm:$0xff]   ;;  %v22478_v58 = vld [vmem:[%s32141_s7 + $0xf0] ss:$12 sps:$4 sm:$0xff]   ;;  %v22480_v59 = vld [vmem:[%s32141_s7 + $0xf4] ss:$12 sps:$4 sm:$0xff]  }
 0x109   : > { %18866 = vmatmul.mubr.msk.bf16.vlgmr.msra.gmra.mxu0 %vm1321_vm4, %v22398_v60  ;;  %18867 = vmatmul.mubr.msk.bf16.vlgmr.msra.gmra.mxu1 %vm1321_vm4, %v22398_v60  ;;  %v22481_v60 = vld [vmem:[%s32141_s7 + $0x270] ss:$12 sps:$4 sm:$0xff]  }
 0x10a   : > { %1437 = vmatpush1.bf16.msra.mxu0 %v1310_v61  ;;  %1480 = vmatpush1.bf16.msra.mxu1 %v1312_v62  ;;  %v22483_v61 = vld [vmem:[%s32141_s7 + $0x274] ss:$12 sps:$4 sm:$0xff]   ;;  %v22486_v62 = vld [vmem:[%s32141_s7 + $0xdc] ss:$12 sps:$4 sm:$0xff]  }
 0x10b   : > { %1454 = vmatprep.mubr.bf16.mxu0 %v25041_v17  ;;  %1497 = vmatprep.mubr.bf16.mxu1 %v25041_v17 }
 0x10c   : > { %2160 = vmatprep.subr.bf16.mxu0 %v22402_v63  ;;  %2203 = vmatprep.subr.bf16.mxu1 %v22405_v0  ;;  %v22489_v63 = vld [vmem:[%s32141_s7 + $0x25c] ss:$12 sps:$4 sm:$0xff]   ;;  %v22484_v0 = vld [vmem:[%s32141_s7 + $0xd8] ss:$12 sps:$4 sm:$0xff]  }
 0x111   : > { %18871 = vmatmul.mubr.msk.bf16.vlgmr.msra.gmra.mxu0 %vm1321_vm4, %v22399_v1  ;;  %18872 = vmatmul.mubr.msk.bf16.vlgmr.msra.gmra.mxu1 %vm1321_vm4, %v22399_v1  ;;  %v22487_v1 = vld [vmem:[%s32141_s7 + $0x258] ss:$12 sps:$4 sm:$0xff]  }
 0x112   : > { %2161 = vmatpush1.bf16.msra.mxu0 %v22400_v2  ;;  %2204 = vmatpush1.bf16.msra.mxu1 %v22403_v4  ;;  %v22492_v2 = vld [vmem:[%s32141_s7 + $0xc4] ss:$12 sps:$4 sm:$0xff]  }
 0x113   : > { %2162 = vmatprep.subr.bf16.mxu0 %v22408_v5  ;;  %2205 = vmatprep.subr.bf16.mxu1 %v22411_v7  ;;  %v22495_v4 = vld [vmem:[%s32141_s7 + $0x244] ss:$12 sps:$4 sm:$0xff]   ;;  %v22490_v5 = vld [vmem:[%s32141_s7 + $0xc0] ss:$12 sps:$4 sm:$0xff]  }
 0x114   : > { %v22493_v7 = vld [vmem:[%s32141_s7 + $0x240] ss:$12 sps:$4 sm:$0xff]  }
 0x116   : > { %2163 = vmatpush1.bf16.msra.mxu0 %v22406_v9  ;;  %2206 = vmatpush1.bf16.msra.mxu1 %v22409_v10  ;;  %v22496_v9 = vld [vmem:[%s32141_s7 + $0x170] ss:$12 sps:$4 sm:$0xff]  }
 0x117   : > { %2164 = vmatprep.subr.bf16.mxu0 %v22414_v12  ;;  %2207 = vmatprep.subr.bf16.mxu1 %v22417_v13  ;;  %v22497_v10 = vld [vmem:[%s32141_s7 + $0x2f0] ss:$12 sps:$4 sm:$0xff]  }
 0x11a   : > { %2165 = vmatpush1.bf16.msra.mxu0 %v22412_v15  ;;  %2208 = vmatpush1.bf16.msra.mxu1 %v22415_v16 }
 0x11b   : > { %2166 = vmatprep.subr.bf16.mxu0 %v22420_v18  ;;  %2209 = vmatprep.subr.bf16.mxu1 %v22423_v19 }
 0x11e   : > { %2167 = vmatpush1.bf16.msra.mxu0 %v22418_v20  ;;  %2210 = vmatpush1.bf16.msra.mxu1 %v22421_v21 }
 0x11f   : > { %2168 = vmatprep.subr.bf16.mxu0 %v22426_v22  ;;  %2211 = vmatprep.subr.bf16.mxu1 %v22429_v23 }
 0x122   : > { %2169 = vmatpush1.bf16.msra.mxu0 %v22424_v24  ;;  %2212 = vmatpush1.bf16.msra.mxu1 %v22427_v25 }
 0x123   : > { %2170 = vmatprep.subr.bf16.mxu0 %v22432_v26  ;;  %2213 = vmatprep.subr.bf16.mxu1 %v22435_v27 }
 0x126   : > { %2171 = vmatpush1.bf16.msra.mxu0 %v22430_v28  ;;  %2214 = vmatpush1.bf16.msra.mxu1 %v22433_v29 }
 0x127   : > { %2172 = vmatprep.subr.bf16.mxu0 %v22438_v30  ;;  %2215 = vmatprep.subr.bf16.mxu1 %v22441_v31 }
 0x12a   : > { %2173 = vmatpush1.bf16.msra.mxu0 %v22436_v32  ;;  %2216 = vmatpush1.bf16.msra.mxu1 %v22439_v33 }
 0x12b   : > { %2174 = vmatprep.subr.bf16.mxu0 %v22444_v34  ;;  %2217 = vmatprep.subr.bf16.mxu1 %v22447_v35 }
 0x12e   : > { %2175 = vmatpush1.bf16.msra.mxu0 %v22442_v36  ;;  %2218 = vmatpush1.bf16.msra.mxu1 %v22445_v37  ;;  %v22498_v36 = vld [vmem:[%s32141_s7 + $0xb0] ss:$12 sps:$4 sm:$0xff]  }
 0x12f   : > { %2176 = vmatprep.subr.bf16.mxu0 %v22450_v38  ;;  %2219 = vmatprep.subr.bf16.mxu1 %v22453_v39  ;;  %v22499_v37 = vld [vmem:[%s32141_s7 + $0x230] ss:$12 sps:$4 sm:$0xff]  }
 0x132   : > { %2177 = vmatpush2.bf16.msra.mxu0 %v22448_v40  ;;  %2220 = vmatpush2.bf16.msra.mxu1 %v22451_v41 }
 0x133   : > { %2178 = vmatprep.subr.bf16.mxu0 %v22456_v42  ;;  %2221 = vmatprep.subr.bf16.mxu1 %v22459_v43  ;;  %v22500_v42 = vld [vmem:[%s32141_s7 + $0x158] ss:$12 sps:$4 sm:$0xff]  }
 0x134   : > { %v22501_v43 = vld [vmem:[%s32141_s7 + $0x2d8] ss:$12 sps:$4 sm:$0xff]  }
 0x136   : > { %2179 = vmatpush2.bf16.msra.mxu0 %v22454_v44  ;;  %2222 = vmatpush2.bf16.msra.mxu1 %v22457_v45 }
 0x137   : > { %2180 = vmatprep.subr.bf16.mxu0 %v22462_v46  ;;  %2223 = vmatprep.subr.bf16.mxu1 %v22465_v47  ;;  %v22502_v46 = vld [vmem:[%s32141_s7 + $0x98] ss:$12 sps:$4 sm:$0xff]  }
 0x138   : > { %v22503_v47 = vld [vmem:[%s32141_s7 + $0x218] ss:$12 sps:$4 sm:$0xff]  }
 0x13a   : > { %2181 = vmatpush2.bf16.msra.mxu0 %v22460_v48  ;;  %2224 = vmatpush2.bf16.msra.mxu1 %v22463_v49  ;;  %v22504_v48 = vld [vmem:[%s32141_s7 + $0x140] ss:$12 sps:$4 sm:$0xff]  }
 0x13b   : > { %2182 = vmatprep.subr.bf16.mxu0 %v22468_v50  ;;  %2225 = vmatprep.subr.bf16.mxu1 %v22471_v51  ;;  %v22505_v49 = vld [vmem:[%s32141_s7 + $0x2c0] ss:$12 sps:$4 sm:$0xff]  }
 0x13c   : > { %v22506_v50 = vld [vmem:[%s32141_s7 + $0x80] ss:$12 sps:$4 sm:$0xff]  }
 0x13d   : > { %v22507_v51 = vld [vmem:[%s32141_s7 + $0x200] ss:$12 sps:$4 sm:$0xff]  }
 0x13e   : > { %2183 = vmatpush2.bf16.msra.mxu0 %v22466_v52  ;;  %2226 = vmatpush2.bf16.msra.mxu1 %v22469_v53  ;;  %v22508_v52 = vld [vmem:[%s32141_s7 + $0x128] ss:$12 sps:$4 sm:$0xff]  }
 0x13f   : > { %2184 = vmatprep.subr.bf16.mxu0 %v22474_v55  ;;  %2227 = vmatprep.subr.bf16.mxu1 %v22477_v57  ;;  %v22509_v53 = vld [vmem:[%s32141_s7 + $0x2a8] ss:$12 sps:$4 sm:$0xff]   ;;  %v22513_v57 = vld [vmem:[%s32141_s7 + $0x290] ss:$12 sps:$4 sm:$0xff]  }
 0x140   : > { %v22511_v55 = vld [vmem:[%s32141_s7 + $0x1e8] ss:$12 sps:$4 sm:$0xff]  }
 0x142   : > { %2185 = vmatpush2.bf16.msra.mxu0 %v22472_v54  ;;  %2228 = vmatpush2.bf16.msra.mxu1 %v22475_v56  ;;  %v22510_v54 = vld [vmem:[%s32141_s7 + $0x68] ss:$12 sps:$4 sm:$0xff]   ;;  %v22512_v56 = vld [vmem:[%s32141_s7 + $0x110] ss:$12 sps:$4 sm:$0xff]  }
 0x143   : > { %2186 = vmatprep.subr.bf16.mxu0 %v22480_v59  ;;  %2229 = vmatprep.subr.bf16.mxu1 %v22483_v61  ;;  %v22515_v59 = vld [vmem:[%s32141_s7 + $0x1d0] ss:$12 sps:$4 sm:$0xff]   ;;  %v22517_v61 = vld [vmem:[%s32141_s7 + $0x278] ss:$12 sps:$4 sm:$0xff]  }
 0x146   : > { %2187 = vmatpush2.bf16.msra.mxu0 %v22478_v58  ;;  %2230 = vmatpush2.bf16.msra.mxu1 %v22481_v60  ;;  %v22514_v58 = vld [vmem:[%s32141_s7 + $0x50] ss:$12 sps:$4 sm:$0xff]   ;;  %v22516_v60 = vld [vmem:[%s32141_s7 + $0xf8] ss:$12 sps:$4 sm:$0xff]  }
 0x147   : > { %2188 = vmatprep.subr.bf16.mxu0 %v22486_v62  ;;  %2231 = vmatprep.subr.bf16.mxu1 %v22489_v63  ;;  %v22518_v62 = vld [vmem:[%s32141_s7 + $0x38] ss:$12 sps:$4 sm:$0xff]  }
 0x148   : > { %v22519_v63 = vld [vmem:[%s32141_s7 + $0x1b8] ss:$12 sps:$4 sm:$0xff]  }
 0x14a   : > { %2189 = vmatpush2.bf16.msra.mxu0 %v22484_v0  ;;  %2232 = vmatpush2.bf16.msra.mxu1 %v22487_v1  ;;  %v22520_v0 = vld [vmem:[%s32141_s7 + $0xe0] ss:$12 sps:$4 sm:$0xff]  }
 0x14b   : > { %2190 = vmatprep.subr.bf16.mxu0 %v22492_v2  ;;  %2233 = vmatprep.subr.bf16.mxu1 %v22495_v4  ;;  %v22521_v1 = vld [vmem:[%s32141_s7 + $0x260] ss:$12 sps:$4 sm:$0xff]  }
 0x14c   : > { %v22522_v2 = vld [vmem:[%s32141_s7 + $0x20] ss:$12 sps:$4 sm:$0xff]  }
 0x14d   : > { %v22523_v4 = vld [vmem:[%s32141_s7 + $0x1a0] ss:$12 sps:$4 sm:$0xff]  }
 0x14e   : > { %2191 = vmatpush2.bf16.msra.mxu0 %v22490_v5  ;;  %2234 = vmatpush2.bf16.msra.mxu1 %v22493_v7  ;;  %v22524_v5 = vld [vmem:[%s32141_s7 + $0xc8] ss:$12 sps:$4 sm:$0xff]  }
 0x14f   : > { %22062 = vmatprep.subr.bf16.mxu0 %v22496_v9  ;;  %22084 = vmatprep.subr.bf16.mxu1 %v22497_v10  ;;  %v22525_v7 = vld [vmem:[%s32141_s7 + $0x248] ss:$12 sps:$4 sm:$0xff]  }
 0x150   : > { %v22526_v9 = vld [vmem:[%s32141_s7 + $0x8] ss:$12 sps:$4 sm:$0xff]  }
 0x151   : > { %v22527_v10 = vld [vmem:[%s32141_s7 + $0x188] ss:$12 sps:$4 sm:$0xff]  }
 0x1c9   : > { %v1359_v12 = vpop.f32.mrf.mxu0  ;;  %v1402_v13 = vpop.f32.mrf.mxu1 }
 0x1cb   : > { %v1361_v15 = vpop.f32.mrf.mxu0  ;;  %v1404_v16 = vpop.f32.mrf.mxu1 }
 0x1cd   : > { %v1363_v18 = vpop.f32.mrf.mxu0  ;;  %v1406_v19 = vpop.f32.mrf.mxu1 }
 0x1cf   : > { %v1365_v20 = vpop.f32.mrf.mxu0  ;;  %v1408_v21 = vpop.f32.mrf.mxu1 }
 0x1d1   : > { %v1456_v22 = vpop.f32.mrf.mxu0  ;;  %v1499_v23 = vpop.f32.mrf.mxu1 }
 0x1d2   : > { %v1508_v38 = vmax.f32 %v1359_v12, %v1456_v22  ;;  %v1510_v39 = vmax.f32 %v1402_v13, %v1499_v23  ;;  %v22530_v12 = vld [vmem:[%s32141_s7 + $0x3ac] ss:$12 sps:$4 sm:$0xff]   ;;  %v22542_v22 = vld [vmem:[%s32141_s7 + $0x37c] ss:$12 sps:$4 sm:$0xff]  }
 0x1d3   : > { %v1458_v24 = vpop.f32.mrf.mxu0  ;;  %v1501_v25 = vpop.f32.mrf.mxu1  ;;  %v22533_v13 = vld [vmem:[%s32141_s7 + $0x52c] ss:$12 sps:$4 sm:$0xff]   ;;  %v22545_v23 = vld [vmem:[%s32141_s7 + $0x4fc] ss:$12 sps:$4 sm:$0xff]  }
 0x1d4   : > { %v1509_v32 = vmax.f32 %v1361_v15, %v1458_v24  ;;  %v1511_v33 = vmax.f32 %v1404_v16, %v1501_v25  ;;  %v22528_v15 = vld [vmem:[%s32141_s7 + $0x3a8] ss:$12 sps:$4 sm:$0xff]   ;;  %v22540_v24 = vld [vmem:[%s32141_s7 + $0x378] ss:$12 sps:$4 sm:$0xff]  }
 0x1d5   : > { %v1460_v26 = vpop.f32.mrf.mxu0  ;;  %v1503_v27 = vpop.f32.mrf.mxu1  ;;  %v22531_v16 = vld [vmem:[%s32141_s7 + $0x528] ss:$12 sps:$4 sm:$0xff]   ;;  %v22543_v25 = vld [vmem:[%s32141_s7 + $0x4f8] ss:$12 sps:$4 sm:$0xff]  }
 0x1d6   : > { %v1512_v28 = vmax.f32 %v1363_v18, %v1460_v26  ;;  %v1514_v29 = vmax.f32 %v1406_v19, %v1503_v27  ;;  %v22536_v18 = vld [vmem:[%s32141_s7 + $0x394] ss:$12 sps:$4 sm:$0xff]   ;;  %v22548_v26 = vld [vmem:[%s32141_s7 + $0x364] ss:$12 sps:$4 sm:$0xff]  }
 0x1d7   : > { %v1462_v30 = vpop.f32.mrf.mxu0  ;;  %v1505_v31 = vpop.f32.mrf.mxu1  ;;  %v22539_v19 = vld [vmem:[%s32141_s7 + $0x514] ss:$12 sps:$4 sm:$0xff]   ;;  %v22551_v27 = vld [vmem:[%s32141_s7 + $0x4e4] ss:$12 sps:$4 sm:$0xff]  }
 0x1d8   : > { %v1513_v34 = vmax.f32 %v1365_v20, %v1462_v30  ;;  %v1515_v35 = vmax.f32 %v1408_v21, %v1505_v31  ;;  %v25529_v44 = vpack.c.bf16 %v1512_v28, %v1508_v38  ;;  %v25531_v45 = vpack.c.bf16 %v1514_v29, %v1510_v39  ;;  %v22534_v20 = vld [vmem:[%s32141_s7 + $0x390] ss:$12 sps:$4 sm:$0xff]   ;;  %v22546_v28 = vld [vmem:[%s32141_s7 + $0x360] ss:$12 sps:$4 sm:$0xff]  }
 0x1d9   : > { %v22537_v21 = vld [vmem:[%s32141_s7 + $0x510] ss:$12 sps:$4 sm:$0xff]   ;;  %v22549_v29 = vld [vmem:[%s32141_s7 + $0x4e0] ss:$12 sps:$4 sm:$0xff]  }
 0x1da   : > { %v25519_v40 = vpack.c.bf16 %v1513_v34, %v1509_v32  ;;  %v25521_v41 = vpack.c.bf16 %v1515_v35, %v1511_v33  ;;  %v22554_v30 = vld [vmem:[%s32141_s7 + $0x34c] ss:$12 sps:$4 sm:$0xff]   ;;  %v22552_v32 = vld [vmem:[%s32141_s7 + $0x348] ss:$12 sps:$4 sm:$0xff]  }
 0x1db   : > { %v22557_v31 = vld [vmem:[%s32141_s7 + $0x4cc] ss:$12 sps:$4 sm:$0xff]   ;;  %v22555_v33 = vld [vmem:[%s32141_s7 + $0x4c8] ss:$12 sps:$4 sm:$0xff]  }
 0x1dc   : > { %2192 = vmatprep.mubr.bf16.mxu0 %v25519_v40  ;;  %2235 = vmatprep.mubr.bf16.mxu1 %v25521_v41  ;;  %v22560_v34 = vld [vmem:[%s32141_s7 + $0x334] ss:$12 sps:$4 sm:$0xff]   ;;  %v22566_v38 = vld [vmem:[%s32141_s7 + $0x31c] ss:$12 sps:$4 sm:$0xff]  }
 0x1dd   : > { %2193 = vmatmul.mubr.bf16.vlgmr.msra.gmra.mxu0 %v25529_v44  ;;  %2236 = vmatmul.mubr.bf16.vlgmr.msra.gmra.mxu1 %v25531_v45  ;;  %v22563_v35 = vld [vmem:[%s32141_s7 + $0x4b4] ss:$12 sps:$4 sm:$0xff]   ;;  %v22569_v39 = vld [vmem:[%s32141_s7 + $0x49c] ss:$12 sps:$4 sm:$0xff]  }
 0x1de   : > { %22063 = vmatpush3.bf16.msra.mxu0 %v22498_v36  ;;  %22085 = vmatpush3.bf16.msra.mxu1 %v22499_v37  ;;  %v22558_v36 = vld [vmem:[%s32141_s7 + $0x330] ss:$12 sps:$4 sm:$0xff]  }
 0x1df   : > { %2278 = vmatprep.mubr.bf16.mxu0 %v25519_v40  ;;  %2319 = vmatprep.mubr.bf16.mxu1 %v25521_v41  ;;  %v22561_v37 = vld [vmem:[%s32141_s7 + $0x4b0] ss:$12 sps:$4 sm:$0xff]  }
 0x1e0   : > { %22064 = vmatprep.subr.bf16.mxu0 %v22500_v42  ;;  %22086 = vmatprep.subr.bf16.mxu1 %v22501_v43  ;;  %v22564_v42 = vld [vmem:[%s32141_s7 + $0x318] ss:$12 sps:$4 sm:$0xff]  }
 0x1e1   : > { %v22567_v43 = vld [vmem:[%s32141_s7 + $0x498] ss:$12 sps:$4 sm:$0xff]  }
 0x1e2   : > { %22065 = vmatpush3.bf16.msra.mxu0 %v22502_v46  ;;  %22087 = vmatpush3.bf16.msra.mxu1 %v22503_v47  ;;  %v22572_v46 = vld [vmem:[%s32141_s7 + $0x304] ss:$12 sps:$4 sm:$0xff]  }
 0x1e3   : > { %22066 = vmatprep.subr.bf16.mxu0 %v22504_v48  ;;  %22088 = vmatprep.subr.bf16.mxu1 %v22505_v49  ;;  %v22575_v47 = vld [vmem:[%s32141_s7 + $0x484] ss:$12 sps:$4 sm:$0xff]   ;;  %v22570_v48 = vld [vmem:[%s32141_s7 + $0x300] ss:$12 sps:$4 sm:$0xff]  }
 0x1e4   : > { %v22573_v49 = vld [vmem:[%s32141_s7 + $0x480] ss:$12 sps:$4 sm:$0xff]  }
 0x1e6   : > { %22067 = vmatpush3.bf16.msra.mxu0 %v22506_v50  ;;  %22089 = vmatpush3.bf16.msra.mxu1 %v22507_v51  ;;  %v22578_v50 = vld [vmem:[%s32141_s7 + $0x46c] ss:$12 sps:$4 sm:$0xff]  }
 0x1e7   : > { %22068 = vmatprep.subr.bf16.mxu0 %v22508_v52  ;;  %22090 = vmatprep.subr.bf16.mxu1 %v22509_v53  ;;  %v22581_v51 = vld [vmem:[%s32141_s7 + $0x5ec] ss:$12 sps:$4 sm:$0xff]   ;;  %v22576_v52 = vld [vmem:[%s32141_s7 + $0x468] ss:$12 sps:$4 sm:$0xff]  }
 0x1e8   : > { %v22579_v53 = vld [vmem:[%s32141_s7 + $0x5e8] ss:$12 sps:$4 sm:$0xff]  }
 0x1ea   : > { %22069 = vmatpush3.bf16.msra.mxu0 %v22510_v54  ;;  %22091 = vmatpush3.bf16.msra.mxu1 %v22511_v55  ;;  %v22584_v54 = vld [vmem:[%s32141_s7 + $0x454] ss:$12 sps:$4 sm:$0xff]  }
 0x1eb   : > { %22070 = vmatprep.subr.bf16.mxu0 %v22512_v56  ;;  %22092 = vmatprep.subr.bf16.mxu1 %v22513_v57  ;;  %v22587_v55 = vld [vmem:[%s32141_s7 + $0x5d4] ss:$12 sps:$4 sm:$0xff]   ;;  %v22582_v56 = vld [vmem:[%s32141_s7 + $0x450] ss:$12 sps:$4 sm:$0xff]  }
 0x1ec   : > { %v22585_v57 = vld [vmem:[%s32141_s7 + $0x5d0] ss:$12 sps:$4 sm:$0xff]  }
 0x1ee   : > { %22071 = vmatpush3.bf16.msra.mxu0 %v22514_v58  ;;  %22093 = vmatpush3.bf16.msra.mxu1 %v22515_v59  ;;  %v22590_v58 = vld [vmem:[%s32141_s7 + $0x43c] ss:$12 sps:$4 sm:$0xff]  }
 0x1ef   : > { %22072 = vmatprep.subr.bf16.mxu0 %v22516_v60  ;;  %22094 = vmatprep.subr.bf16.mxu1 %v22517_v61  ;;  %v22593_v59 = vld [vmem:[%s32141_s7 + $0x5bc] ss:$12 sps:$4 sm:$0xff]   ;;  %v22588_v60 = vld [vmem:[%s32141_s7 + $0x438] ss:$12 sps:$4 sm:$0xff]  }
 0x1f0   : > { %v22591_v61 = vld [vmem:[%s32141_s7 + $0x5b8] ss:$12 sps:$4 sm:$0xff]  }
 0x1f2   : > { %22073 = vmatpush3.bf16.msra.mxu0 %v22518_v62  ;;  %22095 = vmatpush3.bf16.msra.mxu1 %v22519_v63  ;;  %v22596_v62 = vld [vmem:[%s32141_s7 + $0x424] ss:$12 sps:$4 sm:$0xff]  }
 0x1f3   : > { %22074 = vmatprep.subr.bf16.mxu0 %v22520_v0  ;;  %22096 = vmatprep.subr.bf16.mxu1 %v22521_v1  ;;  %v22599_v63 = vld [vmem:[%s32141_s7 + $0x5a4] ss:$12 sps:$4 sm:$0xff]   ;;  %v22594_v0 = vld [vmem:[%s32141_s7 + $0x420] ss:$12 sps:$4 sm:$0xff]  }
 0x1f4   : > { %v22597_v1 = vld [vmem:[%s32141_s7 + $0x5a0] ss:$12 sps:$4 sm:$0xff]  }
 0x1f6   : > { %22075 = vmatpush3.bf16.msra.mxu0 %v22522_v2  ;;  %22097 = vmatpush3.bf16.msra.mxu1 %v22523_v4  ;;  %v22602_v2 = vld [vmem:[%s32141_s7 + $0x40c] ss:$12 sps:$4 sm:$0xff]  }
 0x1f7   : > { %22076 = vmatprep.subr.bf16.mxu0 %v22524_v5  ;;  %22098 = vmatprep.subr.bf16.mxu1 %v22525_v7  ;;  %v22605_v4 = vld [vmem:[%s32141_s7 + $0x58c] ss:$12 sps:$4 sm:$0xff]   ;;  %v22600_v5 = vld [vmem:[%s32141_s7 + $0x408] ss:$12 sps:$4 sm:$0xff]  }
 0x1f8   : > { %v22603_v7 = vld [vmem:[%s32141_s7 + $0x588] ss:$12 sps:$4 sm:$0xff]  }
 0x1fa   : > { %22077 = vmatpush3.bf16.msra.mxu0 %v22526_v9  ;;  %22099 = vmatpush3.bf16.msra.mxu1 %v22527_v10  ;;  %v22608_v9 = vld [vmem:[%s32141_s7 + $0x3f4] ss:$12 sps:$4 sm:$0xff]  }
 0x1fb   : > { %2969 = vmatprep.subr.bf16.mxu0 %v22530_v12  ;;  %3012 = vmatprep.subr.bf16.mxu1 %v22533_v13  ;;  %v22611_v10 = vld [vmem:[%s32141_s7 + $0x574] ss:$12 sps:$4 sm:$0xff]   ;;  %v22606_v12 = vld [vmem:[%s32141_s7 + $0x3f0] ss:$12 sps:$4 sm:$0xff]  }
 0x1fc   : > { %v22609_v13 = vld [vmem:[%s32141_s7 + $0x570] ss:$12 sps:$4 sm:$0xff]  }
 0x1fd   : > { %2279 = vmatmul.mubr.bf16.vlgmr.msra.gmra.mxu0 %v25529_v44  ;;  %2320 = vmatmul.mubr.bf16.vlgmr.msra.gmra.mxu1 %v25531_v45 }
 0x1fe   : > { %2970 = vmatpush1.bf16.msra.mxu0 %v22528_v15  ;;  %3001 = vmatprep.mubr.bf16.mxu0 %v25519_v40  ;;  %v22614_v15 = vld [vmem:[%s32141_s7 + $0x3dc] ss:$12 sps:$4 sm:$0xff]  }
 0x1ff   : > { %3013 = vmatpush1.bf16.msra.mxu1 %v22531_v16  ;;  %3044 = vmatprep.mubr.bf16.mxu1 %v25521_v41  ;;  %v22617_v16 = vld [vmem:[%s32141_s7 + $0x55c] ss:$12 sps:$4 sm:$0xff]  }
 0x200   : > { %2971 = vmatprep.subr.bf16.mxu0 %v22536_v18  ;;  %3014 = vmatprep.subr.bf16.mxu1 %v22539_v19  ;;  %v22612_v18 = vld [vmem:[%s32141_s7 + $0x3d8] ss:$12 sps:$4 sm:$0xff]  }
 0x201   : > { %v22615_v19 = vld [vmem:[%s32141_s7 + $0x558] ss:$12 sps:$4 sm:$0xff]  }
 0x202   : > { %2972 = vmatpush1.bf16.msra.mxu0 %v22534_v20  ;;  %v22620_v20 = vld [vmem:[%s32141_s7 + $0x3c4] ss:$12 sps:$4 sm:$0xff]  }
 0x203   : > { %3015 = vmatpush1.bf16.msra.mxu1 %v22537_v21  ;;  %2973 = vmatprep.subr.bf16.mxu0 %v22542_v22  ;;  %v22623_v21 = vld [vmem:[%s32141_s7 + $0x544] ss:$12 sps:$4 sm:$0xff]   ;;  %v22618_v22 = vld [vmem:[%s32141_s7 + $0x3c0] ss:$12 sps:$4 sm:$0xff]  }
 0x204   : > { %3016 = vmatprep.subr.bf16.mxu1 %v22545_v23  ;;  %v22621_v23 = vld [vmem:[%s32141_s7 + $0x540] ss:$12 sps:$4 sm:$0xff]  }
 0x206   : > { %2974 = vmatpush1.bf16.msra.mxu0 %v22540_v24  ;;  %v22624_v24 = vld [vmem:[%s32141_s7 + $0x470] ss:$12 sps:$4 sm:$0xff]  }
 0x207   : > { %3017 = vmatpush1.bf16.msra.mxu1 %v22543_v25  ;;  %2975 = vmatprep.subr.bf16.mxu0 %v22548_v26  ;;  %v22625_v25 = vld [vmem:[%s32141_s7 + $0x5f0] ss:$12 sps:$4 sm:$0xff]  }
 0x208   : > { %3018 = vmatprep.subr.bf16.mxu1 %v22551_v27  ;;  %v22626_v26 = vld [vmem:[%s32141_s7 + $0x3b0] ss:$12 sps:$4 sm:$0xff]  }
 0x209   : > { %v22627_v27 = vld [vmem:[%s32141_s7 + $0x530] ss:$12 sps:$4 sm:$0xff]  }
 0x20a   : > { %2976 = vmatpush1.bf16.msra.mxu0 %v22546_v28  ;;  %v22628_v28 = vld [vmem:[%s32141_s7 + $0x458] ss:$12 sps:$4 sm:$0xff]  }
 0x20b   : > { %3019 = vmatpush1.bf16.msra.mxu1 %v22549_v29  ;;  %2977 = vmatprep.subr.bf16.mxu0 %v22554_v30  ;;  %v22629_v29 = vld [vmem:[%s32141_s7 + $0x5d8] ss:$12 sps:$4 sm:$0xff]  }
 0x20c   : > { %3020 = vmatprep.subr.bf16.mxu1 %v22557_v31  ;;  %v22630_v30 = vld [vmem:[%s32141_s7 + $0x398] ss:$12 sps:$4 sm:$0xff]  }
 0x20d   : > { %v22631_v31 = vld [vmem:[%s32141_s7 + $0x518] ss:$12 sps:$4 sm:$0xff]  }
 0x20e   : > { %2978 = vmatpush1.bf16.msra.mxu0 %v22552_v32  ;;  %v22632_v32 = vld [vmem:[%s32141_s7 + $0x440] ss:$12 sps:$4 sm:$0xff]  }
 0x20f   : > { %3021 = vmatpush1.bf16.msra.mxu1 %v22555_v33  ;;  %2979 = vmatprep.subr.bf16.mxu0 %v22560_v34  ;;  %v22633_v33 = vld [vmem:[%s32141_s7 + $0x5c0] ss:$12 sps:$4 sm:$0xff]  }
 0x210   : > { %3022 = vmatprep.subr.bf16.mxu1 %v22563_v35  ;;  %v22634_v34 = vld [vmem:[%s32141_s7 + $0x380] ss:$12 sps:$4 sm:$0xff]  }
 0x211   : > { %v22635_v35 = vld [vmem:[%s32141_s7 + $0x500] ss:$12 sps:$4 sm:$0xff]  }
 0x212   : > { %2980 = vmatpush1.bf16.msra.mxu0 %v22558_v36  ;;  %v22636_v36 = vld [vmem:[%s32141_s7 + $0x428] ss:$12 sps:$4 sm:$0xff]  }
 0x213   : > { %3023 = vmatpush1.bf16.msra.mxu1 %v22561_v37  ;;  %2981 = vmatprep.subr.bf16.mxu0 %v22566_v38  ;;  %v22639_v37 = vld [vmem:[%s32141_s7 + $0x4e8] ss:$12 sps:$4 sm:$0xff]   ;;  %v22640_v38 = vld [vmem:[%s32141_s7 + $0x410] ss:$12 sps:$4 sm:$0xff]  }
 0x214   : > { %3024 = vmatprep.subr.bf16.mxu1 %v22569_v39  ;;  %v22641_v39 = vld [vmem:[%s32141_s7 + $0x590] ss:$12 sps:$4 sm:$0xff]  }
 0x216   : > { %2982 = vmatpush1.bf16.msra.mxu0 %v22564_v42  ;;  %v22642_v42 = vld [vmem:[%s32141_s7 + $0x350] ss:$12 sps:$4 sm:$0xff]  }
 0x217   : > { %3025 = vmatpush1.bf16.msra.mxu1 %v22567_v43  ;;  %2983 = vmatprep.subr.bf16.mxu0 %v22572_v46  ;;  %v22643_v43 = vld [vmem:[%s32141_s7 + $0x4d0] ss:$12 sps:$4 sm:$0xff]   ;;  %v22644_v46 = vld [vmem:[%s32141_s7 + $0x3f8] ss:$12 sps:$4 sm:$0xff]  }
 0x218   : > { %3026 = vmatprep.subr.bf16.mxu1 %v22575_v47  ;;  %v22645_v47 = vld [vmem:[%s32141_s7 + $0x578] ss:$12 sps:$4 sm:$0xff]  }
 0x21a   : > { %2984 = vmatpush1.bf16.msra.mxu0 %v22570_v48  ;;  %v22646_v48 = vld [vmem:[%s32141_s7 + $0x338] ss:$12 sps:$4 sm:$0xff]  }
 0x21b   : > { %3027 = vmatpush1.bf16.msra.mxu1 %v22573_v49  ;;  %2985 = vmatprep.subr.bf16.mxu0 %v22578_v50  ;;  %v22647_v49 = vld [vmem:[%s32141_s7 + $0x4b8] ss:$12 sps:$4 sm:$0xff]   ;;  %v22648_v50 = vld [vmem:[%s32141_s7 + $0x3e0] ss:$12 sps:$4 sm:$0xff]  }
 0x21c   : > { %3028 = vmatprep.subr.bf16.mxu1 %v22581_v51  ;;  %v22649_v51 = vld [vmem:[%s32141_s7 + $0x560] ss:$12 sps:$4 sm:$0xff]  }
 0x21e   : > { %2986 = vmatpush2.bf16.msra.mxu0 %v22576_v52  ;;  %v22650_v52 = vld [vmem:[%s32141_s7 + $0x320] ss:$12 sps:$4 sm:$0xff]  }
 0x21f   : > { %3029 = vmatpush2.bf16.msra.mxu1 %v22579_v53  ;;  %2987 = vmatprep.subr.bf16.mxu0 %v22584_v54  ;;  %v22651_v53 = vld [vmem:[%s32141_s7 + $0x4a0] ss:$12 sps:$4 sm:$0xff]   ;;  %v22652_v54 = vld [vmem:[%s32141_s7 + $0x3c8] ss:$12 sps:$4 sm:$0xff]  }
 0x220   : > { %3030 = vmatprep.subr.bf16.mxu1 %v22587_v55  ;;  %v22653_v55 = vld [vmem:[%s32141_s7 + $0x548] ss:$12 sps:$4 sm:$0xff]  }
 0x222   : > { %2988 = vmatpush2.bf16.msra.mxu0 %v22582_v56  ;;  %v22654_v56 = vld [vmem:[%s32141_s7 + $0x308] ss:$12 sps:$4 sm:$0xff]  }
 0x223   : > { %3031 = vmatpush2.bf16.msra.mxu1 %v22585_v57  ;;  %2989 = vmatprep.subr.bf16.mxu0 %v22590_v58  ;;  %v22655_v57 = vld [vmem:[%s32141_s7 + $0x488] ss:$12 sps:$4 sm:$0xff]  }
 0x224   : > { %3032 = vmatprep.subr.bf16.mxu1 %v22593_v59  ;;  %v22658_v58 = vld [vmem:[%s32142_s4 + $0x364] ss:$16 sps:$4 sm:$0xff]   ;;  %v22656_v59 = vld [vmem:[%s32142_s4 + $0x360] ss:$16 sps:$4 sm:$0xff]  }
 0x226   : > { %2990 = vmatpush2.bf16.msra.mxu0 %v22588_v60  ;;  %v22661_v60 = vld [vmem:[%s32142_s4 + $0x344] ss:$16 sps:$4 sm:$0xff]  }
 0x227   : > { %3033 = vmatpush2.bf16.msra.mxu1 %v22591_v61  ;;  %2991 = vmatprep.subr.bf16.mxu0 %v22596_v62  ;;  %v22659_v61 = vld [vmem:[%s32142_s4 + $0x340] ss:$16 sps:$4 sm:$0xff]   ;;  %v22664_v62 = vld [vmem:[%s32142_s4 + $0x324] ss:$16 sps:$4 sm:$0xff]  }
 0x228   : > { %3034 = vmatprep.subr.bf16.mxu1 %v22599_v63  ;;  %v22662_v63 = vld [vmem:[%s32142_s4 + $0x320] ss:$16 sps:$4 sm:$0xff]  }
 0x22a   : > { %2992 = vmatpush2.bf16.msra.mxu0 %v22594_v0  ;;  %v22667_v0 = vld [vmem:[%s32142_s4 + $0x304] ss:$16 sps:$4 sm:$0xff]  }
 0x22b   : > { %3035 = vmatpush2.bf16.msra.mxu1 %v22597_v1  ;;  %2993 = vmatprep.subr.bf16.mxu0 %v22602_v2  ;;  %v22668_v1 = vld [vmem:[%s32142_s4 + $0x2e0] ss:$16 sps:$4 sm:$0xff]   ;;  %v22673_v2 = vld [vmem:[%s32142_s4 + $0x2c4] ss:$16 sps:$4 sm:$0xff]  }
 0x22c   : > { %3036 = vmatprep.subr.bf16.mxu1 %v22605_v4  ;;  %v22671_v4 = vld [vmem:[%s32142_s4 + $0x2c0] ss:$16 sps:$4 sm:$0xff]  }
 0x22e   : > { %2994 = vmatpush2.bf16.msra.mxu0 %v22600_v5  ;;  %v22676_v5 = vld [vmem:[%s32142_s4 + $0x2a4] ss:$16 sps:$4 sm:$0xff]  }
 0x22f   : > { %3037 = vmatpush2.bf16.msra.mxu1 %v22603_v7  ;;  %2995 = vmatprep.subr.bf16.mxu0 %v22608_v9  ;;  %v22674_v7 = vld [vmem:[%s32142_s4 + $0x2a0] ss:$16 sps:$4 sm:$0xff]   ;;  %v22679_v9 = vld [vmem:[%s32142_s4 + $0x284] ss:$16 sps:$4 sm:$0xff]  }
 0x230   : > { %3038 = vmatprep.subr.bf16.mxu1 %v22611_v10  ;;  %v22677_v10 = vld [vmem:[%s32142_s4 + $0x280] ss:$16 sps:$4 sm:$0xff]  }
 0x232   : > { %2996 = vmatpush2.bf16.msra.mxu0 %v22606_v12  ;;  %v22682_v12 = vld [vmem:[%s32142_s4 + $0x464] ss:$16 sps:$4 sm:$0xff]  }
 0x233   : > { %3039 = vmatpush2.bf16.msra.mxu1 %v22609_v13  ;;  %2997 = vmatprep.subr.bf16.mxu0 %v22614_v15  ;;  %v22680_v13 = vld [vmem:[%s32142_s4 + $0x460] ss:$16 sps:$4 sm:$0xff]   ;;  %v22685_v15 = vld [vmem:[%s32142_s4 + $0x444] ss:$16 sps:$4 sm:$0xff]  }
 0x234   : > { %3040 = vmatprep.subr.bf16.mxu1 %v22617_v16  ;;  %v22683_v16 = vld [vmem:[%s32142_s4 + $0x440] ss:$16 sps:$4 sm:$0xff]  }
 0x236   : > { %2998 = vmatpush2.bf16.msra.mxu0 %v22612_v18  ;;  %v22688_v18 = vld [vmem:[%s32142_s4 + $0x424] ss:$16 sps:$4 sm:$0xff]  }
 0x237   : > { %3041 = vmatpush2.bf16.msra.mxu1 %v22615_v19  ;;  %2999 = vmatprep.subr.bf16.mxu0 %v22620_v20  ;;  %v22686_v19 = vld [vmem:[%s32142_s4 + $0x420] ss:$16 sps:$4 sm:$0xff]   ;;  %v22691_v20 = vld [vmem:[%s32142_s4 + $0x404] ss:$16 sps:$4 sm:$0xff]  }
 0x238   : > { %3042 = vmatprep.subr.bf16.mxu1 %v22623_v21  ;;  %v22689_v21 = vld [vmem:[%s32142_s4 + $0x400] ss:$16 sps:$4 sm:$0xff]  }
 0x23a   : > { %3000 = vmatpush2.bf16.msra.mxu0 %v22618_v22  ;;  %v22692_v22 = vld [vmem:[%s32142_s4 + $0x3e0] ss:$16 sps:$4 sm:$0xff]  }
 0x23b   : > { %3043 = vmatpush2.bf16.msra.mxu1 %v22621_v23  ;;  %22106 = vmatprep.subr.bf16.mxu0 %v22624_v24  ;;  %v22694_v23 = vld [vmem:[%s32142_s4 + $0x3e4] ss:$16 sps:$4 sm:$0xff]  }
 0x23c   : > { %22128 = vmatprep.subr.bf16.mxu1 %v22625_v25  ;;  %v22697_v24 = vld [vmem:[%s32142_s4 + $0x3c4] ss:$16 sps:$4 sm:$0xff]   ;;  %v22695_v25 = vld [vmem:[%s32142_s4 + $0x3c0] ss:$16 sps:$4 sm:$0xff]  }
 0x23d   : > { %3002 = vmatmul.mubr.bf16.vlgmr.msra.gmra.mxu0 %v25529_v44 }
 0x23e   : > { %3045 = vmatmul.mubr.bf16.vlgmr.msra.gmra.mxu1 %v25531_v45  ;;  %22107 = vmatpush3.bf16.msra.mxu0 %v22626_v26  ;;  %v22700_v26 = vld [vmem:[%s32142_s4 + $0x3a4] ss:$16 sps:$4 sm:$0xff]  }
 0x23f   : > { %3087 = vmatprep.mubr.bf16.mxu0 %v25519_v40  ;;  %22129 = vmatpush3.bf16.msra.mxu1 %v22627_v27  ;;  %v22637_v40 = vld [vmem:[%s32141_s7 + $0x5a8] ss:$12 sps:$4 sm:$0xff]   ;;  %v22698_v27 = vld [vmem:[%s32142_s4 + $0x3a0] ss:$16 sps:$4 sm:$0xff]  }
 0x240   : > { %3128 = vmatprep.mubr.bf16.mxu1 %v25521_v41  ;;  %22108 = vmatprep.subr.bf16.mxu0 %v22628_v28  ;;  %v22638_v41 = vld [vmem:[%s32141_s7 + $0x368] ss:$12 sps:$4 sm:$0xff]   ;;  %s32146_s7 = sld [smem:[#allocation15_spill]] }
 0x241   : > { %22130 = vmatprep.subr.bf16.mxu1 %v22629_v29  ;;  %v22703_v28 = vld [vmem:[%s32142_s4 + $0x384] ss:$16 sps:$4 sm:$0xff]   ;;  %v22701_v29 = vld [vmem:[%s32142_s4 + $0x380] ss:$16 sps:$4 sm:$0xff]  }
 0x242   : > { %22109 = vmatpush3.bf16.msra.mxu0 %v22630_v30  ;;  %v22706_v30 = vld [vmem:[%s32142_s4 + $0x4e4] ss:$16 sps:$4 sm:$0xff]  }
 0x243   : > { %22131 = vmatpush3.bf16.msra.mxu1 %v22631_v31  ;;  %22110 = vmatprep.subr.bf16.mxu0 %v22632_v32  ;;  %v22709_v31 = vld [vmem:[%s32142_s4 + $0x4ec] ss:$16 sps:$4 sm:$0xff]   ;;  %v22704_v32 = vld [vmem:[%s32142_s4 + $0x4e0] ss:$16 sps:$4 sm:$0xff]  }
 0x244   : > { %22132 = vmatprep.subr.bf16.mxu1 %v22633_v33  ;;  %v22712_v33 = vld [vmem:[%s32142_s4 + $0x4c4] ss:$16 sps:$4 sm:$0xff]  }
 0x246   : > { %22111 = vmatpush3.bf16.msra.mxu0 %v22634_v34  ;;  %v22710_v34 = vld [vmem:[%s32142_s4 + $0x4c0] ss:$16 sps:$4 sm:$0xff]  }
 0x247   : > { %22133 = vmatpush3.bf16.msra.mxu1 %v22635_v35  ;;  %22112 = vmatprep.subr.bf16.mxu0 %v22636_v36  ;;  %v22718_v35 = vld [vmem:[%s32142_s4 + $0x4a4] ss:$16 sps:$4 sm:$0xff]   ;;  %v22716_v36 = vld [vmem:[%s32142_s4 + $0x4a0] ss:$16 sps:$4 sm:$0xff]  }
 0x248   : > { %22134 = vmatprep.subr.bf16.mxu1 %v22637_v40  ;;  %v22724_v40 = vld [vmem:[%s32142_s4 + $0x484] ss:$16 sps:$4 sm:$0xff]  }
 0x24a   : > { %22113 = vmatpush3.bf16.msra.mxu0 %v22638_v41  ;;  %v22722_v41 = vld [vmem:[%s32142_s4 + $0x480] ss:$16 sps:$4 sm:$0xff]  }
 0x24b   : > { %22135 = vmatpush3.bf16.msra.mxu1 %v22639_v37  ;;  %22114 = vmatprep.subr.bf16.mxu0 %v22640_v38  ;;  %v22730_v37 = vld [vmem:[%s32142_s4 + $0x36c] ss:$16 sps:$4 sm:$0xff]  }
 0x24c   : > { %22136 = vmatprep.subr.bf16.mxu1 %v22641_v39 }
 0x24e   : > { %22115 = vmatpush3.bf16.msra.mxu0 %v22642_v42 }
 0x24f   : > { %22137 = vmatpush3.bf16.msra.mxu1 %v22643_v43  ;;  %22116 = vmatprep.subr.bf16.mxu0 %v22644_v46 }
 0x250   : > { %22138 = vmatprep.subr.bf16.mxu1 %v22645_v47 }
 0x252   : > { %22117 = vmatpush3.bf16.msra.mxu0 %v22646_v48 }
 0x253   : > { %22139 = vmatpush3.bf16.msra.mxu1 %v22647_v49  ;;  %22118 = vmatprep.subr.bf16.mxu0 %v22648_v50 }
 0x254   : > { %22140 = vmatprep.subr.bf16.mxu1 %v22649_v51 }
 0x256   : > { %22119 = vmatpush3.bf16.msra.mxu0 %v22650_v52 }
 0x257   : > { %22141 = vmatpush3.bf16.msra.mxu1 %v22651_v53  ;;  %22120 = vmatprep.subr.bf16.mxu0 %v22652_v54 }
 0x258   : > { %22142 = vmatprep.subr.bf16.mxu1 %v22653_v55 }
 0x25a   : > { %22121 = vmatpush3.bf16.msra.mxu0 %v22654_v56 }
 0x25b   : > { %22143 = vmatpush3.bf16.msra.mxu1 %v22655_v57  ;;  %3774 = vmatprep.subr.bf16.mxu0 %v22658_v58 }
 0x25c   : > { %3823 = vmatprep.subr.bf16.mxu1 %v22706_v30  ;;  %v22715_v30 = vld [vmem:[%s32142_s4 + $0x4cc] ss:$16 sps:$4 sm:$0xff]  }
 0x25d   : > { %3088 = vmatmul.mubr.bf16.vlgmr.msra.gmra.mxu0 %v25529_v44  ;;  %v22665_v44 = vld [vmem:[%s32142_s4 + $0x300] ss:$16 sps:$4 sm:$0xff]  }
 0x25e   : > { %3129 = vmatmul.mubr.bf16.vlgmr.msra.gmra.mxu1 %v25531_v45  ;;  %3775 = vmatpush1.bf16.msra.mxu0 %v22656_v59  ;;  %v22670_v45 = vld [vmem:[%s32142_s4 + $0x2e4] ss:$16 sps:$4 sm:$0xff]  }
 0x25f   : > { %3776 = vmatprep.subr.bf16.mxu0 %v22661_v60  ;;  %3847 = vmatprep.mubr.bf16.mxu1 %v25041_v17 }
 0x260   : > { %3824 = vmatpush1.bf16.msra.mxu1 %v22704_v32 }
 0x261   : > { %3825 = vmatprep.subr.bf16.mxu1 %v22712_v33  ;;  %v22713_v33 = vld [vmem:[%s32142_s4 + $0x4c8] ss:$16 sps:$4 sm:$0xff]  }
 0x262   : > { %3777 = vmatpush1.bf16.msra.mxu0 %v22659_v61 }
 0x263   : > { %3778 = vmatprep.subr.bf16.mxu0 %v22664_v62 }
 0x264   : > { %3826 = vmatpush1.bf16.msra.mxu1 %v22710_v34  ;;  %v22721_v34 = vld [vmem:[%s32142_s4 + $0x4ac] ss:$16 sps:$4 sm:$0xff]  }
 0x265   : > { %3827 = vmatprep.subr.bf16.mxu1 %v22718_v35 }
 0x266   : > { %3779 = vmatpush1.bf16.msra.mxu0 %v22662_v63 }
 0x267   : > { %3780 = vmatprep.subr.bf16.mxu0 %v22667_v0 }
 0x268   : > { %3828 = vmatpush1.bf16.msra.mxu1 %v22716_v36 }
 0x269   : > { %3829 = vmatprep.subr.bf16.mxu1 %v22724_v40 }
 0x26a   : > { %3781 = vmatpush1.bf16.msra.mxu0 %v22665_v44 }
 0x26b   : > { %3782 = vmatprep.subr.bf16.mxu0 %v22670_v45 }
 0x26c   : > { %3830 = vmatpush1.bf16.msra.mxu1 %v22722_v41 }
 0x26d   : > { %3856 = vmatprep.subr.bf16.mxu1 %v22730_v37 }
 0x26e   : > { %3783 = vmatpush1.bf16.msra.mxu0 %v22668_v1 }
 0x26f   : > { %3784 = vmatprep.subr.bf16.mxu0 %v22673_v2 }
 0x272   : > { %3785 = vmatpush1.bf16.msra.mxu0 %v22671_v4 }
 0x273   : > { %3786 = vmatprep.subr.bf16.mxu0 %v22676_v5 }
 0x276   : > { %3787 = vmatpush1.bf16.msra.mxu0 %v22674_v7 }
 0x277   : > { %3788 = vmatprep.subr.bf16.mxu0 %v22679_v9 }
 0x27a   : > { %3789 = vmatpush1.bf16.msra.mxu0 %v22677_v10 }
 0x27b   : > { %3790 = vmatprep.subr.bf16.mxu0 %v22682_v12 }
 0x27e   : > { %3791 = vmatpush2.bf16.msra.mxu0 %v22680_v13 }
 0x27f   : > { %3792 = vmatprep.subr.bf16.mxu0 %v22685_v15 }
 0x282   : > { %3793 = vmatpush2.bf16.msra.mxu0 %v22683_v16 }
 0x283   : > { %3794 = vmatprep.subr.bf16.mxu0 %v22688_v18 }
 0x286   : > { %3795 = vmatpush2.bf16.msra.mxu0 %v22686_v19 }
 0x287   : > { %3796 = vmatprep.subr.bf16.mxu0 %v22691_v20 }
 0x28a   : > { %3797 = vmatpush2.bf16.msra.mxu0 %v22689_v21 }
 0x28b   : > { %3798 = vmatprep.subr.bf16.mxu0 %v22694_v23 }
 0x28e   : > { %3799 = vmatpush2.bf16.msra.mxu0 %v22692_v22 }
 0x28f   : > { %3800 = vmatprep.subr.bf16.mxu0 %v22697_v24 }
 0x292   : > { %3801 = vmatpush2.bf16.msra.mxu0 %v22695_v25 }
 0x293   : > { %3802 = vmatprep.subr.bf16.mxu0 %v22700_v26 }
 0x296   : > { %3803 = vmatpush2.bf16.msra.mxu0 %v22698_v27 }
 0x297   : > { %3804 = vmatprep.subr.bf16.mxu0 %v22703_v28 }
 0x29a   : > { %3805 = vmatpush2.bf16.msra.mxu0 %v22701_v29  ;;  %v22707_v29 = vld [vmem:[%s32142_s4 + $0x4e8] ss:$16 sps:$4 sm:$0xff]  }
 0x29b   : > { %3905 = vmatprep.subr.bf16.mxu0 %v22709_v31 }
 0x29d   : > { %v2194_v38 = vpop.f32.mrf.mxu0  ;;  %v2237_v39 = vpop.f32.mrf.mxu1 }
 0x29e   : > { %v2238_v63 = vadd.f32 %v2237_v39, %v2194_v38  ;;  %v22719_v38 = vld [vmem:[%s32142_s4 + $0x4a8] ss:$16 sps:$4 sm:$0xff]  }
 0x29f   : > { %v2196_v42 = vpop.f32.mrf.mxu0  ;;  %v2239_v43 = vpop.f32.mrf.mxu1 }
 0x2a0   : > { %v2240_v0 = vadd.f32 %v2239_v43, %v2196_v42  ;;  %v22727_v43 = vld [vmem:[%s32142_s4 + $0x48c] ss:$16 sps:$4 sm:$0xff]  }
 0x2a1   : > { %v2198_v46 = vpop.f32.mrf.mxu0  ;;  %v2241_v47 = vpop.f32.mrf.mxu1 }
 0x2a2   : > { %v2242_v10 = vadd.f32 %v2241_v47, %v2198_v46 }
 0x2a3   : > { %v2200_v48 = vpop.f32.mrf.mxu0  ;;  %v2243_v49 = vpop.f32.mrf.mxu1 }
 0x2a4   : > { %v2244_v12 = vadd.f32 %v2243_v49, %v2200_v48 }
 0x2bd   : > { %v22078_v50 = vpop.f32.mrf.mxu0  ;;  %v22100_v51 = vpop.f32.mrf.mxu1 }
 0x2bf   : > { %v22079_v52 = vpop.f32.mrf.mxu0  ;;  %v22101_v53 = vpop.f32.mrf.mxu1 }
 0x2c0   : > { %v22080_v40 = vadd.f32 %v22079_v52, %v22078_v50  ;;  %v22102_v41 = vadd.f32 %v22101_v53, %v22100_v51 }
 0x2c1   : > { %v26042_v54 = vpop.f32.mrf.mxu0  ;;  %v26044_v55 = vpop.f32.mrf.mxu1 }
 0x2c2   : > { %v2322_v49 = vadd.f32 %v22102_v41, %v22080_v40  ;;  %v22762_v40 = vld [vmem:[%s32142_s4 + $0x40] ss:$16 sps:$4 sm:$0xff]   ;;  %v22767_v41 = vld [vmem:[%s32142_s4 + $0x2ac] ss:$16 sps:$4 sm:$0xff]  }
 0x2c3   : > { %v22082_v56 = vpop.f32.mrf.mxu0  ;;  %v22104_v57 = vpop.f32.mrf.mxu1 }
 0x2c4   : > { %v22083_v50 = vadd.f32 %v22082_v56, %v26042_v54  ;;  %v22105_v51 = vadd.f32 %v22104_v57, %v26044_v55 }
 0x2fd   : > { %v3003_v58 = vpop.f32.mrf.mxu0 }
 0x2fe   : > { %v3046_v59 = vpop.f32.mrf.mxu1 }
 0x2ff   : > { %v3047_v60 = vadd.f32 %v3046_v59, %v3003_v58  ;;  %v3005_v61 = vpop.f32.mrf.mxu0  ;;  %v22725_v58 = vld [vmem:[%s32142_s4 + $0x488] ss:$16 sps:$4 sm:$0xff]  }
 0x300   : > { %v3048_v62 = vpop.f32.mrf.mxu1 }
 0x301   : > { %v3049_v44 = vadd.f32 %v3048_v62, %v3005_v61  ;;  %v3007_v45 = vpop.f32.mrf.mxu0  ;;  %v26046_v2 = vmax.f32 %v2238_v63, %v3047_v60  ;;  %v22733_v61 = vld [vmem:[%s32142_s4 + $0xe4] ss:$16 sps:$4 sm:$0xff]  }
 0x302   : > { %v3050_v1 = vpop.f32.mrf.mxu1 }
 0x303   : > { %v26048_v4 = vmax.f32 %v2240_v0, %v3049_v44  ;;  %v3051_v5 = vadd.f32 %v3050_v1, %v3007_v45  ;;  %v3009_v7 = vpop.f32.mrf.mxu0  ;;  %v2325_v0 = vadd.f32 %v22105_v51, %v22083_v50  ;;  %v22777_v50 = vld [vmem:[%s32142_s4 + $0x468] ss:$16 sps:$4 sm:$0xff]   ;;  %v22780_v51 = vld [vmem:[%s32142_s4 + $0x1e0] ss:$16 sps:$4 sm:$0xff]  }
 0x304   : > { %v3052_v9 = vpop.f32.mrf.mxu1 }
 0x305   : > { %v22056_v13 = vpack.c.bf16 %v26048_v4, %v26046_v2  ;;  %v3053_v15 = vadd.f32 %v3052_v9, %v3009_v7  ;;  %v3140_v16 = vmax.f32 %v2242_v10, %v3051_v5  ;;  %v22728_v7 = vld [vmem:[%s32142_s4 + $0x368] ss:$16 sps:$4 sm:$0xff]   ;;  %v22731_v9 = vld [vmem:[%s32142_s4 + $0xe0] ss:$16 sps:$4 sm:$0xff]  }
 0x307   : > { %3163 = vst [vmem:[#allocation2] sm:$0xff] %v22056_v13  ;;  %v3141_v18 = vmax.f32 %v2244_v12, %v3053_v15  ;;  %v22737_v15 = vld [vmem:[%s32142_s4 + $0x34c] ss:$16 sps:$4 sm:$0xff]  }
 0x309   : > { %v22058_v19 = vpack.c.bf16 %v3141_v18, %v3140_v16  ;;  %v22740_v16 = vld [vmem:[%s32142_s4 + $0xc4] ss:$16 sps:$4 sm:$0xff]   ;;  %v22735_v18 = vld [vmem:[%s32142_s4 + $0x348] ss:$16 sps:$4 sm:$0xff]  }
 0x30b   : > { %3166 = vst [vmem:[#allocation2 + $0xc] sm:$0x11] %v22058_v19  ;;  %v22738_v19 = vld [vmem:[%s32142_s4 + $0xc0] ss:$16 sps:$4 sm:$0xff]  }
 0x312   : > { %v26052_v20 = vld [vmem:[#allocation2 + $0xc] sm:$0x11] }
 0x313   : > { %v19278_v21 = vcombine.high %v22056_v13, %v26052_v20  ;;  %v19277_v22 = vcombine.low %v22056_v13, %v26052_v20 }
 0x315   : > { %v3357_v23 = vshll.u32 %v19278_v21, 16  ;;  %v3350_v24 = vshll.u32 %v19277_v22, 16  ;;  %v3355_v25 = vshrl.u32 %v19278_v21, 16  ;;  %v3348_v27 = vshrl.u32 %v19277_v22, 16  ;;  %v22743_v22 = vld [vmem:[%s32142_s4 + $0x32c] ss:$16 sps:$4 sm:$0xff]  }
 0x316   : > { %v26118_v21 = vpack.c.bf16 %v26048_v4, %v26048_v4  ;;  %v22741_v4 = vld [vmem:[%s32142_s4 + $0x328] ss:$16 sps:$4 sm:$0xff]  }
 0x317   : > { %v3359_v26 = vrot.slane %v3357_v23, 1  ;;  %v3352_v28 = vrot.slane %v3350_v24, 1  ;;  %v22746_v23 = vld [vmem:[%s32142_s4 + $0xa4] ss:$16 sps:$4 sm:$0xff]   ;;  %v22744_v24 = vld [vmem:[%s32142_s4 + $0xa0] ss:$16 sps:$4 sm:$0xff]  }
 0x319   : > { %v26062_v31 = vor.u32 %v3359_v26, %v3355_v25  ;;  %v26064_v32 = vor.u32 %v3352_v28, %v3348_v27  ;;  %v22749_v25 = vld [vmem:[%s32142_s4 + $0x30c] ss:$16 sps:$4 sm:$0xff]   ;;  %v22752_v26 = vld [vmem:[%s32142_s4 + $0x84] ss:$16 sps:$4 sm:$0xff]   ;;  %v22747_v27 = vld [vmem:[%s32142_s4 + $0x308] ss:$16 sps:$4 sm:$0xff]  }
 0x31a   : > { %v22750_v28 = vld [vmem:[%s32142_s4 + $0x80] ss:$16 sps:$4 sm:$0xff]  }
 0x31b   : > { %3806 = vmatprep.mubr.bf16.mxu0 %v26062_v31 }
 0x31c   : > { %3807 = vmatmul.mubr.bf16.vlgmr.msra.gmra.mxu0 %v26064_v32 }
 0x31d   : > { %v22122_v35 = vpop.f32.mrf.mxu0  ;;  %3906 = vmatpush1.bf16.msra.mxu0 %v22707_v29  ;;  %3929 = vmatprep.mubr.bf16.mxu0 %v25041_v17  ;;  %v22755_v29 = vld [vmem:[%s32142_s4 + $0x2ec] ss:$16 sps:$4 sm:$0xff]  }
 0x31e   : > { %v22144_v36 = vpop.f32.mrf.mxu1  ;;  %3907 = vmatprep.subr.bf16.mxu0 %v22715_v30  ;;  %v22758_v30 = vld [vmem:[%s32142_s4 + $0x64] ss:$16 sps:$4 sm:$0xff]  }
 0x31f   : > { %v22123_v37 = vpop.f32.mrf.mxu0 }
 0x320   : > { %v22124_v39 = vadd.f32 %v22123_v37, %v22122_v35  ;;  %v22145_v42 = vpop.f32.mrf.mxu1  ;;  %v22764_v35 = vld [vmem:[%s32142_s4 + $0x44] ss:$16 sps:$4 sm:$0xff]  }
 0x321   : > { %v22146_v46 = vadd.f32 %v22145_v42, %v22144_v36  ;;  %v22125_v47 = vpop.f32.mrf.mxu0  ;;  %3908 = vmatpush1.bf16.msra.mxu0 %v22713_v33  ;;  %v22756_v33 = vld [vmem:[%s32142_s4 + $0x60] ss:$16 sps:$4 sm:$0xff]   ;;  %v22759_v36 = vld [vmem:[%s32142_s4 + $0x2c8] ss:$16 sps:$4 sm:$0xff]   ;;  %v22770_v37 = vld [vmem:[%s32142_s4 + $0x24] ss:$16 sps:$4 sm:$0xff]  }
 0x322   : > { %v22147_v48 = vpop.f32.mrf.mxu1  ;;  %3909 = vmatprep.subr.bf16.mxu0 %v22721_v34  ;;  %v22761_v34 = vld [vmem:[%s32142_s4 + $0x2cc] ss:$16 sps:$4 sm:$0xff]  }
 0x323   : > { %v3131_v52 = vadd.f32 %v22146_v46, %v22124_v39  ;;  %v22126_v53 = vpop.f32.mrf.mxu0  ;;  %v22768_v39 = vld [vmem:[%s32142_s4 + $0x20] ss:$16 sps:$4 sm:$0xff]   ;;  %v22773_v42 = vld [vmem:[%s32142_s4 + $0x28c] ss:$16 sps:$4 sm:$0xff]   ;;  %v22771_v46 = vld [vmem:[%s32142_s4 + $0x288] ss:$16 sps:$4 sm:$0xff]  }
 0x324   : > { %v22127_v59 = vadd.f32 %v22126_v53, %v22125_v47  ;;  %v22148_v60 = vpop.f32.mrf.mxu1  ;;  %v22774_v47 = vld [vmem:[%s32142_s4] ss:$16 sps:$4 sm:$0xff]   ;;  %v22788_v53 = vld [vmem:[%s32142_s4 + $0x1c4] ss:$16 sps:$4 sm:$0xff]  }
 0x325   : > { %v3139_v62 = vmax.f32 %v2322_v49, %v3131_v52  ;;  %v22149_v63 = vadd.f32 %v22148_v60, %v22147_v48  ;;  %3910 = vmatpush1.bf16.msra.mxu0 %v22719_v38  ;;  %v22765_v38 = vld [vmem:[%s32142_s4 + $0x2a8] ss:$16 sps:$4 sm:$0xff]   ;;  %v22779_v48 = vld [vmem:[%s32142_s4 + $0x46c] ss:$16 sps:$4 sm:$0xff]   ;;  %v22782_v49 = vld [vmem:[%s32142_s4 + $0x1e4] ss:$16 sps:$4 sm:$0xff]  }
 0x326   : > { %3911 = vmatprep.subr.bf16.mxu0 %v22727_v43  ;;  %v22776_v43 = vld [vmem:[%s32142_s4 + $0x4] ss:$16 sps:$4 sm:$0xff]   ;;  %v22785_v52 = vld [vmem:[%s32142_s4 + $0x44c] ss:$16 sps:$4 sm:$0xff]  }
 0x327   : > { %v22057_v54 = vpack.c.bf16 %v3139_v62, %v3139_v62  ;;  %v3134_v56 = vadd.f32 %v22149_v63, %v22127_v59  ;;  %v22786_v59 = vld [vmem:[%s32142_s4 + $0x1c0] ss:$16 sps:$4 sm:$0xff]   ;;  %v22791_v60 = vld [vmem:[%s32142_s4 + $0x42c] ss:$16 sps:$4 sm:$0xff]   ;;  %v22789_v62 = vld [vmem:[%s32142_s4 + $0x428] ss:$16 sps:$4 sm:$0xff]  }
 0x328   : > { %v22792_v63 = vld [vmem:[%s32142_s4 + $0x1a0] ss:$16 sps:$4 sm:$0xff]  }
 0x329   : > { %3165 = vst.msk [vmem:[#allocation2 + $0x8] sm:$0xf] %vm3164_vm5, %v22057_v54  ;;  %v3142_v55 = vmax.f32 %v2325_v0, %v3134_v56  ;;  %3912 = vmatpush1.bf16.msra.mxu0 %v22725_v58  ;;  %v22783_v58 = vld [vmem:[%s32142_s4 + $0x448] ss:$16 sps:$4 sm:$0xff]   ;;  %v22797_v0 = vld [vmem:[%s32142_s4 + $0x40c] ss:$16 sps:$4 sm:$0xff]  }
 0x32a   : > { %4346 = vmatprep.subr.bf16.mxu0 %v22733_v61  ;;  %v22794_v61 = vld [vmem:[%s32142_s4 + $0x1a4] ss:$16 sps:$4 sm:$0xff]   ;;  %v22795_v56 = vld [vmem:[%s32142_s4 + $0x408] ss:$16 sps:$4 sm:$0xff]  }
 0x32b   : > { %v22059_v57 = vpack.c.bf16 %v3142_v55, %v3142_v55  ;;  %v22800_v54 = vld [vmem:[%s32142_s4 + $0x184] ss:$16 sps:$4 sm:$0xff]   ;;  %v22798_v55 = vld [vmem:[%s32142_s4 + $0x180] ss:$16 sps:$4 sm:$0xff]  }
 0x32d   : > { %3168 = vst.msk [vmem:[#allocation2 + $0x14] sm:$0x1] %vm3167_vm6, %v22059_v57  ;;  %v22803_v57 = vld [vmem:[%s32142_s4 + $0x3ec] ss:$16 sps:$4 sm:$0xff]  }
 0x330   : > { %v26090_v44 = vld [vmem:[#allocation2 + $0x8] sm:$0xf] }
 0x334   : > { %v26092_v45 = vld [vmem:[#allocation2 + $0x14] sm:$0x1] }
 0x335   : > { %v19279_v1 = vcombine.low %v26090_v44, %v26092_v45 }
 0x337   : > { %v3364_v5 = vshll.u32 %v19279_v1, 16  ;;  %v3362_v10 = vshrl.u32 %v19279_v1, 16  ;;  %v22806_v1 = vld [vmem:[%s32142_s4 + $0x164] ss:$16 sps:$4 sm:$0xff]  }
 0x339   : > { %v3366_v12 = vrot.slane %v3364_v5, 1  ;;  %v22801_v5 = vld [vmem:[%s32142_s4 + $0x3e8] ss:$16 sps:$4 sm:$0xff]  }
 0x33b   : > { %v3367_v13 = vor.u32 %v3366_v12, %v3362_v10  ;;  %v22812_v10 = vld [vmem:[%s32142_s4 + $0x144] ss:$16 sps:$4 sm:$0xff]   ;;  %v22807_v12 = vld [vmem:[%s32142_s4 + $0x3c8] ss:$16 sps:$4 sm:$0xff]  }
 0x33d   : > { %19360 = vmatmul.mubr.msk.bf16.vlgmr.msra.gmra.mxu1 %vm3770_vm7, %v3367_v13  ;;  %19361 = vmatmul.mubr.msk.bf16.vlgmr.msra.gmra.mxu0 %vm3770_vm7, %v3367_v13  ;;  %v22810_v13 = vld [vmem:[%s32142_s4 + $0x140] ss:$16 sps:$4 sm:$0xff]  }
 0x33e   : > { %3857 = vmatpush1.bf16.msra.mxu1 %v22728_v7  ;;  %4347 = vmatpush1.bf16.msra.mxu0 %v22731_v9  ;;  %v22804_v7 = vld [vmem:[%s32142_s4 + $0x160] ss:$16 sps:$4 sm:$0xff]   ;;  %v22809_v9 = vld [vmem:[%s32142_s4 + $0x3cc] ss:$16 sps:$4 sm:$0xff]  }
 0x33f   : > { %3888 = vmatprep.mubr.bf16.mxu1 %v26062_v31  ;;  %4378 = vmatprep.mubr.bf16.mxu0 %v26118_v21  ;;  %v22753_v31 = vld [vmem:[%s32142_s4 + $0x2e8] ss:$16 sps:$4 sm:$0xff]  }
 0x340   : > { %3858 = vmatprep.subr.bf16.mxu1 %v22737_v15  ;;  %4348 = vmatprep.subr.bf16.mxu0 %v22740_v16  ;;  %v22815_v15 = vld [vmem:[%s32142_s4 + $0x3ac] ss:$16 sps:$4 sm:$0xff]   ;;  %v22818_v16 = vld [vmem:[%s32142_s4 + $0x124] ss:$16 sps:$4 sm:$0xff]  }
 0x342   : > { %3859 = vmatpush1.bf16.msra.mxu1 %v22735_v18  ;;  %4349 = vmatpush1.bf16.msra.mxu0 %v22738_v19  ;;  %v22813_v18 = vld [vmem:[%s32142_s4 + $0x3a8] ss:$16 sps:$4 sm:$0xff]   ;;  %v22816_v19 = vld [vmem:[%s32142_s4 + $0x120] ss:$16 sps:$4 sm:$0xff]  }
 0x343   : > { %3860 = vmatprep.subr.bf16.mxu1 %v22743_v22  ;;  %4350 = vmatprep.subr.bf16.mxu0 %v22746_v23  ;;  %v22821_v22 = vld [vmem:[%s32142_s4 + $0x38c] ss:$16 sps:$4 sm:$0xff]   ;;  %v22824_v23 = vld [vmem:[%s32142_s4 + $0x104] ss:$16 sps:$4 sm:$0xff]  }
 0x346   : > { %3861 = vmatpush1.bf16.msra.mxu1 %v22741_v4  ;;  %4351 = vmatpush1.bf16.msra.mxu0 %v22744_v24  ;;  %v22819_v4 = vld [vmem:[%s32142_s4 + $0x388] ss:$16 sps:$4 sm:$0xff]   ;;  %v22822_v24 = vld [vmem:[%s32142_s4 + $0x100] ss:$16 sps:$4 sm:$0xff]  }
 0x347   : > { %3862 = vmatprep.subr.bf16.mxu1 %v22749_v25  ;;  %4352 = vmatprep.subr.bf16.mxu0 %v22752_v26  ;;  %v22827_v25 = vld [vmem:[%s32142_s4 + $0x264] ss:$16 sps:$4 sm:$0xff]   ;;  %v22830_v26 = vld [vmem:[%s32142_s4 + $0x26c] ss:$16 sps:$4 sm:$0xff]  }
 0x34a   : > { %3863 = vmatpush1.bf16.msra.mxu1 %v22747_v27  ;;  %4353 = vmatpush1.bf16.msra.mxu0 %v22750_v28  ;;  %v22825_v27 = vld [vmem:[%s32142_s4 + $0x260] ss:$16 sps:$4 sm:$0xff]   ;;  %v22828_v28 = vld [vmem:[%s32142_s4 + $0x268] ss:$16 sps:$4 sm:$0xff]  }
 0x34b   : > { %3864 = vmatprep.subr.bf16.mxu1 %v22755_v29  ;;  %4354 = vmatprep.subr.bf16.mxu0 %v22758_v30  ;;  %v26304_v29 = vpack.c.bf16 %v26046_v2, %v26046_v2  ;;  %v22833_v30 = vld [vmem:[%s32142_s4 + $0x244] ss:$16 sps:$4 sm:$0xff]   ;;  %v22831_v2 = vld [vmem:[%s32142_s4 + $0x240] ss:$16 sps:$4 sm:$0xff]  }
 0x34e   : > { %3865 = vmatpush1.bf16.msra.mxu1 %v22753_v31  ;;  %4355 = vmatpush1.bf16.msra.mxu0 %v22756_v33  ;;  %v22836_v31 = vld [vmem:[%s32142_s4 + $0x24c] ss:$16 sps:$4 sm:$0xff]   ;;  %v22834_v33 = vld [vmem:[%s32142_s4 + $0x248] ss:$16 sps:$4 sm:$0xff]  }
 0x34f   : > { %3866 = vmatprep.subr.bf16.mxu1 %v22761_v34  ;;  %4356 = vmatprep.subr.bf16.mxu0 %v22764_v35  ;;  %v22839_v34 = vld [vmem:[%s32142_s4 + $0x224] ss:$16 sps:$4 sm:$0xff]   ;;  %v22837_v35 = vld [vmem:[%s32142_s4 + $0x220] ss:$16 sps:$4 sm:$0xff]  }
 0x352   : > { %3867 = vmatpush1.bf16.msra.mxu1 %v22759_v36  ;;  %4357 = vmatpush1.bf16.msra.mxu0 %v22762_v40  ;;  %v22840_v36 = vld [vmem:[%s32142_s4 + $0x228] ss:$16 sps:$4 sm:$0xff]   ;;  %v22845_v40 = vld [vmem:[%s32142_s4 + $0x204] ss:$16 sps:$4 sm:$0xff]  }
 0x353   : > { %3868 = vmatprep.subr.bf16.mxu1 %v22767_v41  ;;  %4358 = vmatprep.subr.bf16.mxu0 %v22770_v37  ;;  %v22848_v41 = vld [vmem:[%s32142_s4 + $0x20c] ss:$16 sps:$4 sm:$0xff]   ;;  %v22843_v37 = vld [vmem:[%s32142_s4 + $0x200] ss:$16 sps:$4 sm:$0xff]  }
 0x356   : > { %3869 = vmatpush1.bf16.msra.mxu1 %v22765_v38  ;;  %4359 = vmatpush1.bf16.msra.mxu0 %v22768_v39  ;;  %v22846_v38 = vld [vmem:[%s32142_s4 + $0x208] ss:$16 sps:$4 sm:$0xff]   ;;  %v22852_v39 = vld [vmem:[%s32142_s4 + $0xec] ss:$16 sps:$4 sm:$0xff]  }
 0x357   : > { %3870 = vmatprep.subr.bf16.mxu1 %v22773_v42  ;;  %4360 = vmatprep.subr.bf16.mxu0 %v22776_v43  ;;  %v22855_v42 = vld [vmem:[%s32142_s4 + $0x5e4] ss:$16 sps:$4 sm:$0xff]  }
 0x358   : > { %v26352_v43 = vld [vmem:[#allocation2] sm:$0xee] }
 0x35a   : > { %3871 = vmatpush1.bf16.msra.mxu1 %v22771_v46  ;;  %4361 = vmatpush1.bf16.msra.mxu0 %v22774_v47  ;;  %v19528_v46 = vcombine.high %v26352_v43, %v26052_v20  ;;  %v22850_v47 = vld [vmem:[%s32142_s4 + $0xe8] ss:$16 sps:$4 sm:$0xff]  }
 0x35b   : > { %3872 = vmatprep.subr.bf16.mxu1 %v22779_v48  ;;  %4362 = vmatprep.subr.bf16.mxu0 %v22782_v49  ;;  %v19364_v48 = vcombine.low %v26090_v44, %v26090_v44  ;;  %v22853_v49 = vld [vmem:[%s32142_s4 + $0x5e0] ss:$16 sps:$4 sm:$0xff]   ;;  %v22856_v44 = vld [vmem:[%s32142_s4 + $0xc8] ss:$16 sps:$4 sm:$0xff]  }
 0x35e   : > { %3873 = vmatpush2.bf16.msra.mxu1 %v22777_v50  ;;  %4363 = vmatpush2.bf16.msra.mxu0 %v22780_v51  ;;  %v22858_v50 = vld [vmem:[%s32142_s4 + $0xcc] ss:$16 sps:$4 sm:$0xff]   ;;  %v22861_v51 = vld [vmem:[%s32142_s4 + $0x5c4] ss:$16 sps:$4 sm:$0xff]  }
 0x35f   : > { %3874 = vmatprep.subr.bf16.mxu1 %v22785_v52  ;;  %4364 = vmatprep.subr.bf16.mxu0 %v22788_v53  ;;  %v26372_v52 = vrot.slane %v19528_v46, 1  ;;  %v22859_v53 = vld [vmem:[%s32142_s4 + $0x5c0] ss:$16 sps:$4 sm:$0xff]   ;;  %v22933_v46 = vld [vmem:[%s32142_s4 + $0x644] ss:$16 sps:$4 sm:$0xff]  }
 0x362   : > { %3875 = vmatpush2.bf16.msra.mxu1 %v22783_v58  ;;  %4365 = vmatpush2.bf16.msra.mxu0 %v22786_v59  ;;  %v22864_v58 = vld [vmem:[%s32142_s4 + $0xac] ss:$16 sps:$4 sm:$0xff]   ;;  %v22862_v59 = vld [vmem:[%s32142_s4 + $0xa8] ss:$16 sps:$4 sm:$0xff]  }
 0x363   : > { %3876 = vmatprep.subr.bf16.mxu1 %v22791_v60  ;;  %4366 = vmatprep.subr.bf16.mxu0 %v22794_v61  ;;  %v22865_v60 = vld [vmem:[%s32142_s4 + $0x5a0] ss:$16 sps:$4 sm:$0xff]   ;;  %v22870_v61 = vld [vmem:[%s32142_s4 + $0x8c] ss:$16 sps:$4 sm:$0xff]  }
 0x366   : > { %3877 = vmatpush2.bf16.msra.mxu1 %v22789_v62  ;;  %4367 = vmatpush2.bf16.msra.mxu0 %v22792_v63  ;;  %v22873_v62 = vld [vmem:[%s32142_s4 + $0x584] ss:$16 sps:$4 sm:$0xff]   ;;  %v22868_v63 = vld [vmem:[%s32142_s4 + $0x88] ss:$16 sps:$4 sm:$0xff]  }
 0x367   : > { %3878 = vmatprep.subr.bf16.mxu1 %v22797_v0  ;;  %4368 = vmatprep.subr.bf16.mxu0 %v22800_v54  ;;  %v22871_v0 = vld [vmem:[%s32142_s4 + $0x580] ss:$16 sps:$4 sm:$0xff]   ;;  %v22876_v54 = vld [vmem:[%s32142_s4 + $0x6c] ss:$16 sps:$4 sm:$0xff]  }
 0x36a   : > { %3879 = vmatpush2.bf16.msra.mxu1 %v22795_v56  ;;  %4369 = vmatpush2.bf16.msra.mxu0 %v22798_v55  ;;  %v22879_v56 = vld [vmem:[%s32142_s4 + $0x564] ss:$16 sps:$4 sm:$0xff]   ;;  %v22874_v55 = vld [vmem:[%s32142_s4 + $0x68] ss:$16 sps:$4 sm:$0xff]  }
 0x36b   : > { %3880 = vmatprep.subr.bf16.mxu1 %v22803_v57  ;;  %4370 = vmatprep.subr.bf16.mxu0 %v22806_v1  ;;  %v22877_v57 = vld [vmem:[%s32142_s4 + $0x560] ss:$16 sps:$4 sm:$0xff]   ;;  %v22882_v1 = vld [vmem:[%s32142_s4 + $0x4c] ss:$16 sps:$4 sm:$0xff]  }
 0x36e   : > { %3881 = vmatpush2.bf16.msra.mxu1 %v22801_v5  ;;  %4371 = vmatpush2.bf16.msra.mxu0 %v22804_v7  ;;  %v22885_v5 = vld [vmem:[%s32142_s4 + $0x544] ss:$16 sps:$4 sm:$0xff]   ;;  %v22880_v7 = vld [vmem:[%s32142_s4 + $0x48] ss:$16 sps:$4 sm:$0xff]  }
 0x36f   : > { %3882 = vmatprep.subr.bf16.mxu1 %v22809_v9  ;;  %4372 = vmatprep.subr.bf16.mxu0 %v22812_v10  ;;  %v22883_v9 = vld [vmem:[%s32142_s4 + $0x540] ss:$16 sps:$4 sm:$0xff]   ;;  %v22888_v10 = vld [vmem:[%s32142_s4 + $0x2c] ss:$16 sps:$4 sm:$0xff]  }
 0x372   : > { %3883 = vmatpush2.bf16.msra.mxu1 %v22807_v12  ;;  %4373 = vmatpush2.bf16.msra.mxu0 %v22810_v13  ;;  %v22891_v12 = vld [vmem:[%s32142_s4 + $0x524] ss:$16 sps:$4 sm:$0xff]   ;;  %v22886_v13 = vld [vmem:[%s32142_s4 + $0x28] ss:$16 sps:$4 sm:$0xff]  }
 0x373   : > { %3884 = vmatprep.subr.bf16.mxu1 %v22815_v15  ;;  %4374 = vmatprep.subr.bf16.mxu0 %v22818_v16  ;;  %v22889_v15 = vld [vmem:[%s32142_s4 + $0x520] ss:$16 sps:$4 sm:$0xff]   ;;  %v22894_v16 = vld [vmem:[%s32142_s4 + $0xc] ss:$16 sps:$4 sm:$0xff]  }
 0x376   : > { %3885 = vmatpush2.bf16.msra.mxu1 %v22813_v18  ;;  %4375 = vmatpush2.bf16.msra.mxu0 %v22816_v19  ;;  %v22897_v18 = vld [vmem:[%s32142_s4 + $0x504] ss:$16 sps:$4 sm:$0xff]   ;;  %v22892_v19 = vld [vmem:[%s32142_s4 + $0x8] ss:$16 sps:$4 sm:$0xff]  }
 0x377   : > { %3886 = vmatprep.subr.bf16.mxu1 %v22821_v22  ;;  %4376 = vmatprep.subr.bf16.mxu0 %v22824_v23  ;;  %v22895_v22 = vld [vmem:[%s32142_s4 + $0x500] ss:$16 sps:$4 sm:$0xff]   ;;  %v22900_v23 = vld [vmem:[%s32142_s4 + $0x1ec] ss:$16 sps:$4 sm:$0xff]  }
 0x37a   : > { %3887 = vmatpush2.bf16.msra.mxu1 %v22819_v4  ;;  %4377 = vmatpush2.bf16.msra.mxu0 %v22822_v24  ;;  %v22903_v4 = vld [vmem:[%s32142_s4 + $0x6e4] ss:$16 sps:$4 sm:$0xff]   ;;  %v22898_v24 = vld [vmem:[%s32142_s4 + $0x1e8] ss:$16 sps:$4 sm:$0xff]  }
 0x37b   : > { %4395 = vmatprep.subr.bf16.mxu1 %v22827_v25  ;;  %4477 = vmatprep.subr.bf16.mxu0 %v22830_v26  ;;  %v22901_v25 = vld [vmem:[%s32142_s4 + $0x6e0] ss:$16 sps:$4 sm:$0xff]   ;;  %v22906_v26 = vld [vmem:[%s32142_s4 + $0x1cc] ss:$16 sps:$4 sm:$0xff]  }
 0x37d   : > { %3889 = vmatmul.mubr.bf16.vlgmr.msra.gmra.mxu1 %v26064_v32  ;;  %4379 = vmatmul.mubr.bf16.vlgmr.msra.gmra.mxu0 %v26304_v29  ;;  %v22842_v32 = vld [vmem:[%s32142_s4 + $0x22c] ss:$16 sps:$4 sm:$0xff]  }
 0x37e   : > { %4396 = vmatpush1.bf16.msra.mxu1 %v22825_v27  ;;  %4478 = vmatpush1.bf16.msra.mxu0 %v22828_v28  ;;  %v22909_v27 = vld [vmem:[%s32142_s4 + $0x6c4] ss:$16 sps:$4 sm:$0xff]   ;;  %v22904_v28 = vld [vmem:[%s32142_s4 + $0x1c8] ss:$16 sps:$4 sm:$0xff]  }
 0x37f   : > { %4397 = vmatprep.subr.bf16.mxu1 %v22833_v30  ;;  %4479 = vmatprep.subr.bf16.mxu0 %v22836_v31  ;;  %v22907_v30 = vld [vmem:[%s32142_s4 + $0x6c0] ss:$16 sps:$4 sm:$0xff]   ;;  %v22912_v31 = vld [vmem:[%s32142_s4 + $0x1ac] ss:$16 sps:$4 sm:$0xff]  }
 0x380   : > { %4419 = vmatprep.mubr.bf16.mxu1 %v25041_v17  ;;  %4501 = vmatprep.mubr.bf16.mxu0 %v25041_v17 }
 0x382   : > { %4398 = vmatpush1.bf16.msra.mxu1 %v22831_v2  ;;  %4480 = vmatpush1.bf16.msra.mxu0 %v22834_v33  ;;  %v22915_v2 = vld [vmem:[%s32142_s4 + $0x6a4] ss:$16 sps:$4 sm:$0xff]   ;;  %v22910_v33 = vld [vmem:[%s32142_s4 + $0x1a8] ss:$16 sps:$4 sm:$0xff]  }
 0x383   : > { %4399 = vmatprep.subr.bf16.mxu1 %v22839_v34  ;;  %4481 = vmatprep.subr.bf16.mxu0 %v22842_v32  ;;  %v22913_v34 = vld [vmem:[%s32142_s4 + $0x6a0] ss:$16 sps:$4 sm:$0xff]   ;;  %v22918_v32 = vld [vmem:[%s32142_s4 + $0x18c] ss:$16 sps:$4 sm:$0xff]  }
 0x386   : > { %4400 = vmatpush1.bf16.msra.mxu1 %v22837_v35  ;;  %4482 = vmatpush1.bf16.msra.mxu0 %v22840_v36  ;;  %v22921_v35 = vld [vmem:[%s32142_s4 + $0x684] ss:$16 sps:$4 sm:$0xff]   ;;  %v22916_v36 = vld [vmem:[%s32142_s4 + $0x188] ss:$16 sps:$4 sm:$0xff]  }
 0x387   : > { %4401 = vmatprep.subr.bf16.mxu1 %v22845_v40  ;;  %4483 = vmatprep.subr.bf16.mxu0 %v22848_v41  ;;  %v22919_v40 = vld [vmem:[%s32142_s4 + $0x680] ss:$16 sps:$4 sm:$0xff]   ;;  %v22924_v41 = vld [vmem:[%s32142_s4 + $0x16c] ss:$16 sps:$4 sm:$0xff]  }
 0x38a   : > { %4402 = vmatpush1.bf16.msra.mxu1 %v22843_v37  ;;  %4484 = vmatpush1.bf16.msra.mxu0 %v22846_v38  ;;  %v22927_v37 = vld [vmem:[%s32142_s4 + $0x664] ss:$16 sps:$4 sm:$0xff]   ;;  %v22922_v38 = vld [vmem:[%s32142_s4 + $0x168] ss:$16 sps:$4 sm:$0xff]  }
 0x38b   : > { %4428 = vmatprep.subr.bf16.mxu1 %v22852_v39  ;;  %5009 = vmatprep.subr.bf16.mxu0 %v22855_v42  ;;  %v22925_v39 = vld [vmem:[%s32142_s4 + $0x660] ss:$16 sps:$4 sm:$0xff]   ;;  %v22930_v42 = vld [vmem:[%s32142_s4 + $0x14c] ss:$16 sps:$4 sm:$0xff]  }
 0x38d   : > { %19445 = vmatmul.mubr.msk.bf16.vlgmr.msra.gmra.mxu1 %vm3770_vm7, %v19364_v48  ;;  %19446 = vmatmul.mubr.msk.bf16.vlgmr.msra.gmra.mxu0 %vm3770_vm7, %v19364_v48  ;;  %v22931_v48 = vld [vmem:[%s32142_s4 + $0x640] ss:$16 sps:$4 sm:$0xff]  }
 0x38e   : > { %4429 = vmatpush1.bf16.msra.mxu1 %v22850_v47  ;;  %4460 = vmatprep.mubr.bf16.mxu1 %v26118_v21  ;;  %v22867_v21 = vld [vmem:[%s32142_s4 + $0x5a4] ss:$16 sps:$4 sm:$0xff]   ;;  %v22928_v47 = vld [vmem:[%s32142_s4 + $0x148] ss:$16 sps:$4 sm:$0xff]  }
 0x38f   : > { %5010 = vmatpush1.bf16.msra.mxu0 %v22853_v49  ;;  %5041 = vmatprep.mubr.bf16.mxu0 %v26372_v52  ;;  %v22936_v49 = vld [vmem:[%s32142_s4 + $0x12c] ss:$16 sps:$4 sm:$0xff]  }
 0x390   : > { %4430 = vmatprep.subr.bf16.mxu1 %v22858_v50  ;;  %5011 = vmatprep.subr.bf16.mxu0 %v22861_v51  ;;  %v22939_v50 = vld [vmem:[%s32142_s4 + $0x624] ss:$16 sps:$4 sm:$0xff]   ;;  %v22934_v51 = vld [vmem:[%s32142_s4 + $0x128] ss:$16 sps:$4 sm:$0xff]  }
 0x392   : > { %4431 = vmatpush1.bf16.msra.mxu1 %v22856_v44  ;;  %v22937_v44 = vld [vmem:[%s32142_s4 + $0x620] ss:$16 sps:$4 sm:$0xff]  }
 0x393   : > { %5012 = vmatpush1.bf16.msra.mxu0 %v22859_v53  ;;  %4432 = vmatprep.subr.bf16.mxu1 %v22864_v58  ;;  %v22942_v53 = vld [vmem:[%s32142_s4 + $0x10c] ss:$16 sps:$4 sm:$0xff]   ;;  %v22945_v58 = vld [vmem:[%s32142_s4 + $0x604] ss:$16 sps:$4 sm:$0xff]  }
 0x394   : > { %5013 = vmatprep.subr.bf16.mxu0 %v22867_v21  ;;  %v22940_v21 = vld [vmem:[%s32142_s4 + $0x108] ss:$16 sps:$4 sm:$0xff]  }
 0x396   : > { %4433 = vmatpush1.bf16.msra.mxu1 %v22862_v59  ;;  %v22943_v59 = vld [vmem:[%s32142_s4 + $0x600] ss:$16 sps:$4 sm:$0xff]  }
 0x397   : > { %5014 = vmatpush1.bf16.msra.mxu0 %v22865_v60  ;;  %4434 = vmatprep.subr.bf16.mxu1 %v22870_v61  ;;  %v22948_v60 = vld [vmem:[%s32142_s4 + $0x764] ss:$16 sps:$4 sm:$0xff]   ;;  %v19527_v61 = vcombine.low %v26352_v43, %v26052_v20 }
 0x398   : > { %5015 = vmatprep.subr.bf16.mxu0 %v22873_v62  ;;  %v22951_v62 = vld [vmem:[%s32142_s4 + $0x76c] ss:$16 sps:$4 sm:$0xff]   ;;  %v22954_v20 = vld [vmem:[%s32142_s4 + $0x744] ss:$16 sps:$4 sm:$0xff]  }
 0x399   : > { %v26567_v43 = vrot.slane %v19527_v61, 1  ;;  %v23009_v61 = vld [vmem:[%s32142_s4 + $0x66c] ss:$16 sps:$4 sm:$0xff]  }
 0x39a   : > { %4435 = vmatpush1.bf16.msra.mxu1 %v22868_v63  ;;  %v22946_v63 = vld [vmem:[%s32142_s4 + $0x760] ss:$16 sps:$4 sm:$0xff]  }
 0x39b   : > { %5016 = vmatpush1.bf16.msra.mxu0 %v22871_v0  ;;  %4436 = vmatprep.subr.bf16.mxu1 %v22876_v54  ;;  %v22949_v0 = vld [vmem:[%s32142_s4 + $0x768] ss:$16 sps:$4 sm:$0xff]   ;;  %v22957_v54 = vld [vmem:[%s32142_s4 + $0x74c] ss:$16 sps:$4 sm:$0xff]  }
 0x39c   : > { %5017 = vmatprep.subr.bf16.mxu0 %v22879_v56  ;;  %v22952_v56 = vld [vmem:[%s32142_s4 + $0x740] ss:$16 sps:$4 sm:$0xff]  }
 0x39e   : > { %4437 = vmatpush1.bf16.msra.mxu1 %v22874_v55  ;;  %v22955_v55 = vld [vmem:[%s32142_s4 + $0x748] ss:$16 sps:$4 sm:$0xff]  }
 0x39f   : > { %5018 = vmatpush1.bf16.msra.mxu0 %v22877_v57  ;;  %4438 = vmatprep.subr.bf16.mxu1 %v22882_v1  ;;  %v22960_v57 = vld [vmem:[%s32142_s4 + $0x724] ss:$16 sps:$4 sm:$0xff]   ;;  %v22958_v1 = vld [vmem:[%s32142_s4 + $0x720] ss:$16 sps:$4 sm:$0xff]  }
 0x3a0   : > { %5019 = vmatprep.subr.bf16.mxu0 %v22885_v5  ;;  %v22961_v5 = vld [vmem:[%s32142_s4 + $0x728] ss:$16 sps:$4 sm:$0xff]  }
 0x3a2   : > { %4439 = vmatpush1.bf16.msra.mxu1 %v22880_v7  ;;  %v22966_v7 = vld [vmem:[%s32142_s4 + $0x704] ss:$16 sps:$4 sm:$0xff]  }
 0x3a3   : > { %5020 = vmatpush1.bf16.msra.mxu0 %v22883_v9  ;;  %4440 = vmatprep.subr.bf16.mxu1 %v22888_v10  ;;  %v22969_v9 = vld [vmem:[%s32142_s4 + $0x70c] ss:$16 sps:$4 sm:$0xff]   ;;  %v22964_v10 = vld [vmem:[%s32142_s4 + $0x700] ss:$16 sps:$4 sm:$0xff]  }
 0x3a4   : > { %5021 = vmatprep.subr.bf16.mxu0 %v22891_v12  ;;  %v4511_v12 = vld [vmem:[#allocation2 + $0x8] sm:$0xe] }
 0x3a6   : > { %4441 = vmatpush1.bf16.msra.mxu1 %v22886_v13  ;;  %v22967_v13 = vld [vmem:[%s32142_s4 + $0x708] ss:$16 sps:$4 sm:$0xff]  }
 0x3a7   : > { %5022 = vmatpush1.bf16.msra.mxu0 %v22889_v15  ;;  %4442 = vmatprep.subr.bf16.mxu1 %v22894_v16  ;;  %v19529_v15 = vcombine.low %v4511_v12, %v26092_v45  ;;  %v22973_v16 = vld [vmem:[%s32142_s4 + $0x5ec] ss:$16 sps:$4 sm:$0xff]  }
 0x3a8   : > { %5023 = vmatprep.subr.bf16.mxu0 %v22897_v18  ;;  %v22971_v18 = vld [vmem:[%s32142_s4 + $0x5e8] ss:$16 sps:$4 sm:$0xff]  }
 0x3aa   : > { %4443 = vmatpush1.bf16.msra.mxu1 %v22892_v19  ;;  %v4603_v19 = vrot.slane %v19529_v15, 1 }
 0x3ab   : > { %5024 = vmatpush1.bf16.msra.mxu0 %v22895_v22  ;;  %4444 = vmatprep.subr.bf16.mxu1 %v22900_v23  ;;  %v22976_v22 = vld [vmem:[%s32142_s4 + $0x5cc] ss:$16 sps:$4 sm:$0xff]  }
 0x3ac   : > { %5025 = vmatprep.subr.bf16.mxu0 %v22903_v4  ;;  %v22974_v4 = vld [vmem:[%s32142_s4 + $0x5c8] ss:$16 sps:$4 sm:$0xff]  }
 0x3ae   : > { %4445 = vmatpush2.bf16.msra.mxu1 %v22898_v24  ;;  %v22979_v24 = vld [vmem:[%s32142_s4 + $0x5ac] ss:$16 sps:$4 sm:$0xff]  }
 0x3af   : > { %5026 = vmatpush2.bf16.msra.mxu0 %v22901_v25  ;;  %4446 = vmatprep.subr.bf16.mxu1 %v22906_v26 }
 0x3b0   : > { %5027 = vmatprep.subr.bf16.mxu0 %v22909_v27  ;;  %v22977_v27 = vld [vmem:[%s32142_s4 + $0x5a8] ss:$16 sps:$4 sm:$0xff]  }
 0x3b2   : > { %4447 = vmatpush2.bf16.msra.mxu1 %v22904_v28  ;;  %v22982_v28 = vld [vmem:[%s32142_s4 + $0x58c] ss:$16 sps:$4 sm:$0xff]  }
 0x3b3   : > { %5028 = vmatpush2.bf16.msra.mxu0 %v22907_v30  ;;  %4448 = vmatprep.subr.bf16.mxu1 %v22912_v31  ;;  %v22985_v30 = vld [vmem:[%s32142_s4 + $0x56c] ss:$16 sps:$4 sm:$0xff]   ;;  %v22983_v31 = vld [vmem:[%s32142_s4 + $0x568] ss:$16 sps:$4 sm:$0xff]  }
 0x3b4   : > { %5029 = vmatprep.subr.bf16.mxu0 %v22915_v2  ;;  %v22988_v2 = vld [vmem:[%s32142_s4 + $0x54c] ss:$16 sps:$4 sm:$0xff]  }
 0x3b6   : > { %4449 = vmatpush2.bf16.msra.mxu1 %v22910_v33  ;;  %v22986_v33 = vld [vmem:[%s32142_s4 + $0x548] ss:$16 sps:$4 sm:$0xff]  }
 0x3b7   : > { %5030 = vmatpush2.bf16.msra.mxu0 %v22913_v34  ;;  %4450 = vmatprep.subr.bf16.mxu1 %v22918_v32  ;;  %v22991_v34 = vld [vmem:[%s32142_s4 + $0x52c] ss:$16 sps:$4 sm:$0xff]   ;;  %v22989_v32 = vld [vmem:[%s32142_s4 + $0x528] ss:$16 sps:$4 sm:$0xff]  }
 0x3b8   : > { %5031 = vmatprep.subr.bf16.mxu0 %v22921_v35  ;;  %v22994_v35 = vld [vmem:[%s32142_s4 + $0x50c] ss:$16 sps:$4 sm:$0xff]  }
 0x3ba   : > { %4451 = vmatpush2.bf16.msra.mxu1 %v22916_v36  ;;  %v22992_v36 = vld [vmem:[%s32142_s4 + $0x508] ss:$16 sps:$4 sm:$0xff]  }
 0x3bb   : > { %5032 = vmatpush2.bf16.msra.mxu0 %v22919_v40  ;;  %4452 = vmatprep.subr.bf16.mxu1 %v22924_v41  ;;  %v22997_v40 = vld [vmem:[%s32142_s4 + $0x6ec] ss:$16 sps:$4 sm:$0xff]   ;;  %v22995_v41 = vld [vmem:[%s32142_s4 + $0x6e8] ss:$16 sps:$4 sm:$0xff]  }
 0x3bc   : > { %5033 = vmatprep.subr.bf16.mxu0 %v22927_v37  ;;  %v23000_v37 = vld [vmem:[%s32142_s4 + $0x6cc] ss:$16 sps:$4 sm:$0xff]  }
 0x3be   : > { %4453 = vmatpush2.bf16.msra.mxu1 %v22922_v38 }
 0x3bf   : > { %5034 = vmatpush2.bf16.msra.mxu0 %v22925_v39  ;;  %4454 = vmatprep.subr.bf16.mxu1 %v22930_v42 }
 0x3c0   : > { %5035 = vmatprep.subr.bf16.mxu0 %v22933_v46  ;;  %v22998_v46 = vld [vmem:[%s32142_s4 + $0x6c8] ss:$16 sps:$4 sm:$0xff]  }
 0x3c2   : > { %4455 = vmatpush2.bf16.msra.mxu1 %v22928_v47 }
 0x3c3   : > { %5036 = vmatpush2.bf16.msra.mxu0 %v22931_v48  ;;  %4456 = vmatprep.subr.bf16.mxu1 %v22936_v49  ;;  %v23003_v49 = vld [vmem:[%s32142_s4 + $0x6ac] ss:$16 sps:$4 sm:$0xff]  }
 0x3c4   : > { %5037 = vmatprep.subr.bf16.mxu0 %v22939_v50 }
 0x3c6   : > { %4457 = vmatpush2.bf16.msra.mxu1 %v22934_v51 }
 0x3c7   : > { %5038 = vmatpush2.bf16.msra.mxu0 %v22937_v44  ;;  %4458 = vmatprep.subr.bf16.mxu1 %v22942_v53  ;;  %v23001_v53 = vld [vmem:[%s32142_s4 + $0x6a8] ss:$16 sps:$4 sm:$0xff]  }
 0x3c8   : > { %5039 = vmatprep.subr.bf16.mxu0 %v22945_v58 }
 0x3ca   : > { %4459 = vmatpush2.bf16.msra.mxu1 %v22940_v21 }
 0x3cb   : > { %5040 = vmatpush2.bf16.msra.mxu0 %v22943_v59  ;;  %5058 = vmatprep.subr.bf16.mxu1 %v22948_v60  ;;  %v23006_v59 = vld [vmem:[%s32142_s4 + $0x68c] ss:$16 sps:$4 sm:$0xff]   ;;  %v23004_v60 = vld [vmem:[%s32142_s4 + $0x688] ss:$16 sps:$4 sm:$0xff]  }
 0x3cc   : > { %5140 = vmatprep.subr.bf16.mxu0 %v22951_v62  ;;  %v23007_v62 = vld [vmem:[%s32142_s4 + $0x668] ss:$16 sps:$4 sm:$0xff]  }
 0x3cd   : > { %4461 = vmatmul.mubr.bf16.vlgmr.msra.gmra.mxu1 %v26304_v29  ;;  %v22963_v29 = vld [vmem:[%s32142_s4 + $0x72c] ss:$16 sps:$4 sm:$0xff]  }
 0x3ce   : > { %5042 = vmatmul.mubr.bf16.vlgmr.msra.gmra.mxu0 %v26567_v43  ;;  %5059 = vmatpush1.bf16.msra.mxu1 %v22946_v63  ;;  %v23012_v63 = vld [vmem:[%s32142_s4 + $0x64c] ss:$16 sps:$4 sm:$0xff]  }
 0x3cf   : > { %5141 = vmatpush1.bf16.msra.mxu0 %v22949_v0  ;;  %5060 = vmatprep.subr.bf16.mxu1 %v22954_v20  ;;  %v23010_v0 = vld [vmem:[%s32142_s4 + $0x648] ss:$16 sps:$4 sm:$0xff]   ;;  %v23015_v20 = vld [vmem:[%s32142_s4 + $0x62c] ss:$16 sps:$4 sm:$0xff]  }
 0x3d0   : > { %5142 = vmatprep.subr.bf16.mxu0 %v22957_v54  ;;  %5082 = vmatprep.mubr.bf16.mxu1 %v25041_v17  ;;  %v23013_v54 = vld [vmem:[%s32142_s4 + $0x628] ss:$16 sps:$4 sm:$0xff]  }
 0x3d1   : > { %5164 = vmatprep.mubr.bf16.mxu0 %v25041_v17 }
 0x3d2   : > { %5061 = vmatpush1.bf16.msra.mxu1 %v22952_v56  ;;  %v23018_v56 = vld [vmem:[%s32142_s4 + $0x60c] ss:$16 sps:$4 sm:$0xff]  }
 0x3d3   : > { %5143 = vmatpush1.bf16.msra.mxu0 %v22955_v55  ;;  %5062 = vmatprep.subr.bf16.mxu1 %v22960_v57  ;;  %v23016_v55 = vld [vmem:[%s32142_s4 + $0x608] ss:$16 sps:$4 sm:$0xff]  }
 0x3d4   : > { %5144 = vmatprep.subr.bf16.mxu0 %v22963_v29 }
 0x3d6   : > { %5063 = vmatpush1.bf16.msra.mxu1 %v22958_v1 }
 0x3d7   : > { %5145 = vmatpush1.bf16.msra.mxu0 %v22961_v5  ;;  %5064 = vmatprep.subr.bf16.mxu1 %v22966_v7 }
 0x3d8   : > { %5146 = vmatprep.subr.bf16.mxu0 %v22969_v9 }
 0x3da   : > { %5065 = vmatpush1.bf16.msra.mxu1 %v22964_v10 }
 0x3db   : > { %5147 = vmatpush1.bf16.msra.mxu0 %v22967_v13  ;;  %5091 = vmatprep.subr.bf16.mxu1 %v22973_v16 }
 0x3dc   : > { %v3808_v23 = vpop.f32.mrf.mxu0 }
 0x3dd   : > { %19610 = vmatmul.mubr.msk.bf16.vlgmr.msra.gmra.mxu1 %vm3770_vm7, %v4603_v19 }
 0x3de   : > { %19611 = vmatmul.mubr.msk.bf16.vlgmr.msra.gmra.mxu0 %vm3770_vm7, %v4603_v19  ;;  %5092 = vmatpush1.bf16.msra.mxu1 %v22971_v18  ;;  %v3810_v45 = vpop.f32.mrf.mxu0 }
 0x3df   : > { %5123 = vmatprep.mubr.bf16.mxu1 %v26372_v52  ;;  %5093 = vmatprep.subr.bf16.mxu1 %v22976_v22  ;;  %v22980_v52 = vld [vmem:[%s32142_s4 + $0x588] ss:$16 sps:$4 sm:$0xff]  }
 0x3e0   : > { %v3812_v25 = vpop.f32.mrf.mxu0  ;;  %5261 = vmatprep.mubr.bf16.mxu0 %v25041_v17 }
 0x3e2   : > { %5094 = vmatpush1.bf16.msra.mxu1 %v22974_v4  ;;  %v3813_v26 = vpop.f32.mrf.mxu0 }
 0x3e3   : > { %5095 = vmatprep.subr.bf16.mxu1 %v22979_v24 }
 0x3e6   : > { %5096 = vmatpush1.bf16.msra.mxu1 %v22977_v27 }
 0x3e7   : > { %5097 = vmatprep.subr.bf16.mxu1 %v22982_v28 }
 0x3ea   : > { %5098 = vmatpush1.bf16.msra.mxu1 %v22980_v52 }
 0x3eb   : > { %5099 = vmatprep.subr.bf16.mxu1 %v22985_v30 }
 0x3ee   : > { %5100 = vmatpush1.bf16.msra.mxu1 %v22983_v31 }
 0x3ef   : > { %5101 = vmatprep.subr.bf16.mxu1 %v22988_v2 }
 0x3f2   : > { %5102 = vmatpush1.bf16.msra.mxu1 %v22986_v33 }
 0x3f3   : > { %5103 = vmatprep.subr.bf16.mxu1 %v22991_v34 }
 0x3f6   : > { %5104 = vmatpush1.bf16.msra.mxu1 %v22989_v32 }
 0x3f7   : > { %5105 = vmatprep.subr.bf16.mxu1 %v22994_v35 }
 0x3fa   : > { %5106 = vmatpush1.bf16.msra.mxu1 %v22992_v36 }
 0x3fb   : > { %5107 = vmatprep.subr.bf16.mxu1 %v22997_v40  ;;  %v26720_v40 = vld [vmem:[%s32143_s9] sm:$0xf] }
 0x3fd   : > { %v3849_v38 = vpop.f32.mrf.mxu1  ;;  %v3931_v39 = vpop.f32.mrf.mxu0 }
 0x3fe   : > { %v3850_v42 = vadd.f32 %v3849_v38, %v3808_v23  ;;  %5108 = vmatpush2.bf16.msra.mxu1 %v22995_v41  ;;  %v5182_v38 = vrot.slane %v26720_v40, %v25294_v11 }
 0x3ff   : > { %v3851_v47 = vpop.f32.mrf.mxu1  ;;  %v3933_v48 = vpop.f32.mrf.mxu0  ;;  %5109 = vmatprep.subr.bf16.mxu1 %v23000_v37 }
 0x400   : > { %v3852_v50 = vadd.f32 %v3851_v47, %v3810_v45 }
 0x401   : > { %v3853_v51 = vpop.f32.mrf.mxu1  ;;  %v3935_v44 = vpop.f32.mrf.mxu0 }
 0x402   : > { %5110 = vmatpush2.bf16.msra.mxu1 %v22998_v46 }
 0x403   : > { %v3854_v58 = vpop.f32.mrf.mxu1  ;;  %v3936_v21 = vpop.f32.mrf.mxu0  ;;  %5111 = vmatprep.subr.bf16.mxu1 %v23003_v49 }
 0x406   : > { %5112 = vmatpush2.bf16.msra.mxu1 %v23001_v53 }
 0x407   : > { %5113 = vmatprep.subr.bf16.mxu1 %v23006_v59 }
 0x40a   : > { %5114 = vmatpush2.bf16.msra.mxu1 %v23004_v60 }
 0x40b   : > { %5115 = vmatprep.subr.bf16.mxu1 %v23009_v61 }
 0x40e   : > { %5116 = vmatpush2.bf16.msra.mxu1 %v23007_v62 }
 0x40f   : > { %5117 = vmatprep.subr.bf16.mxu1 %v23012_v63 }
 0x412   : > { %5118 = vmatpush2.bf16.msra.mxu1 %v23010_v0 }
 0x413   : > { %5119 = vmatprep.subr.bf16.mxu1 %v23015_v20  ;;  %v26735_v20 = vld [vmem:[%s32144_s0] sm:$0x7] }
 0x416   : > { %5120 = vmatpush2.bf16.msra.mxu1 %v23013_v54  ;;  %v23021_v54 = vld [vmem:[%s32145_s1 + $0xac] ss:$12 sps:$4 sm:$0xff]  }
 0x417   : > { %5121 = vmatprep.subr.bf16.mxu1 %v23018_v56  ;;  %v26747_v56 = vld [vmem:[%s32144_s0 + $0x4] sm:$0x7]  ;;  %s32148_s0 = sld [smem:[#allocation17_spill]] }
 0x41a   : > { %5122 = vmatpush2.bf16.msra.mxu1 %v23016_v55  ;;  %v23019_v55 = vld [vmem:[%s32145_s1 + $0xa8] ss:$12 sps:$4 sm:$0xff]  }
 0x41d   : > { %5124 = vmatmul.mubr.bf16.vlgmr.msra.gmra.mxu1 %v26567_v43 }
 0x41e   : > { %5302 = vmatprep.mubr.bf16.mxu1 %v25041_v17 }
 0x43d   : > { %v3890_v57 = vpop.f32.mrf.mxu1  ;;  %v4380_v29 = vpop.f32.mrf.mxu0 }
 0x43e   : > { %v3932_v1 = vadd.f32 %v3931_v39, %v3890_v57  ;;  %v4381_v5 = vadd.f32 %v4380_v29, %v3850_v42  ;;  %v23024_v57 = vld [vmem:[%s32145_s1 + $0x94] ss:$12 sps:$4 sm:$0xff]   ;;  %v23022_v29 = vld [vmem:[%s32145_s1 + $0x90] ss:$12 sps:$4 sm:$0xff]  }
 0x43f   : > { %v3892_v7 = vpop.f32.mrf.mxu1  ;;  %v4382_v9 = vpop.f32.mrf.mxu0 }
 0x440   : > { %v3934_v10 = vadd.f32 %v3933_v48, %v3892_v7  ;;  %v4383_v12 = vadd.f32 %v4382_v9, %v3852_v50  ;;  %v5186_v48 = vrot.slane %v26720_v40, %v25285_v6  ;;  %v23030_v7 = vld [vmem:[%s32145_s1 + $0x64] ss:$12 sps:$4 sm:$0xff]   ;;  %v23028_v9 = vld [vmem:[%s32145_s1 + $0x60] ss:$12 sps:$4 sm:$0xff]  }
 0x441   : > { %v3894_v13 = vpop.f32.mrf.mxu1  ;;  %v4384_v15 = vpop.f32.mrf.mxu0 }
 0x442   : > { %v23036_v13 = vld [vmem:[%s32145_s1 + $0x34] ss:$12 sps:$4 sm:$0xff]   ;;  %v23034_v15 = vld [vmem:[%s32145_s1 + $0x30] ss:$12 sps:$4 sm:$0xff]  }
 0x443   : > { %v3895_v16 = vpop.f32.mrf.mxu1  ;;  %v4385_v18 = vpop.f32.mrf.mxu0 }
 0x444   : > { %v23039_v16 = vld [vmem:[%s32145_s1 + $0x1c] ss:$12 sps:$4 sm:$0xff]   ;;  %v23037_v18 = vld [vmem:[%s32145_s1 + $0x18] ss:$12 sps:$4 sm:$0xff]  }
 0x44d   : > { %v4421_v19 = vpop.f32.mrf.mxu1  ;;  %v26709_v22 = vpop.f32.mrf.mxu0 }
 0x44e   : > { %v4422_v23 = vadd.f32 %v4421_v19, %v4381_v5  ;;  %v23025_v5 = vld [vmem:[%s32145_s1 + $0x78] ss:$12 sps:$4 sm:$0xff]  }
 0x44f   : > { %v4423_v45 = vpop.f32.mrf.mxu1  ;;  %v26711_v43 = vpop.f32.mrf.mxu0  ;;  %v23042_v19 = vld [vmem:[%s32145_s1 + $0x4] ss:$12 sps:$4 sm:$0xff]  }
 0x450   : > { %v4424_v4 = vadd.f32 %v4423_v45, %v4383_v12  ;;  %v23031_v12 = vld [vmem:[%s32145_s1 + $0x48] ss:$12 sps:$4 sm:$0xff]   ;;  %v23045_v45 = vld [vmem:[%s32145_s1 + $0x16c] ss:$12 sps:$4 sm:$0xff]  }
 0x451   : > { %v4425_v24 = vpop.f32.mrf.mxu1  ;;  %v4507_v25 = vpop.f32.mrf.mxu0 }
 0x452   : > { %v23048_v24 = vld [vmem:[%s32145_s1 + $0x154] ss:$12 sps:$4 sm:$0xff]   ;;  %v23046_v25 = vld [vmem:[%s32145_s1 + $0x150] ss:$12 sps:$4 sm:$0xff]  }
 0x453   : > { %v4426_v26 = vpop.f32.mrf.mxu1  ;;  %v4508_v27 = vpop.f32.mrf.mxu0 }
 0x454   : > { %v23051_v26 = vld [vmem:[%s32145_s1 + $0x13c] ss:$12 sps:$4 sm:$0xff]   ;;  %v23049_v27 = vld [vmem:[%s32145_s1 + $0x138] ss:$12 sps:$4 sm:$0xff]  }
 0x48d   : > { %v4462_v28 = vpop.f32.mrf.mxu1 }
 0x48e   : > { %v26713_v52 = vadd.f32 %v4462_v28, %v3932_v1  ;;  %v5043_v30 = vpop.f32.mrf.mxu0  ;;  %v23027_v1 = vld [vmem:[%s32145_s1 + $0x7c] ss:$12 sps:$4 sm:$0xff]   ;;  %v23054_v28 = vld [vmem:[%s32145_s1 + $0x124] ss:$12 sps:$4 sm:$0xff]  }
 0x48f   : > { %v4464_v31 = vpop.f32.mrf.mxu1 }
 0x490   : > { %v26715_v2 = vadd.f32 %v4464_v31, %v3934_v10  ;;  %v5045_v33 = vpop.f32.mrf.mxu0  ;;  %v23033_v10 = vld [vmem:[%s32145_s1 + $0x4c] ss:$12 sps:$4 sm:$0xff]   ;;  %v4504_v31 = vadd.f32 %v26709_v22, %v26713_v52  ;;  %v5194_v22 = vrot.slane %v26720_v40, %v25291_v8 }
 0x491   : > { %v4466_v34 = vpop.f32.mrf.mxu1  ;;  %v23057_v52 = vld [vmem:[%s32145_s1 + $0x10c] ss:$12 sps:$4 sm:$0xff]  }
 0x492   : > { %v5047_v32 = vpop.f32.mrf.mxu0  ;;  %v5190_v34 = vrot.slane %v26720_v40, %v25297_v14 }
 0x493   : > { %v4467_v35 = vpop.f32.mrf.mxu1 }
 0x494   : > { %v5048_v36 = vpop.f32.mrf.mxu0  ;;  %v23052_v35 = vld [vmem:[%s32145_s1 + $0x120] ss:$12 sps:$4 sm:$0xff]  }
 0x495   : > { %v4506_v36 = vadd.f32 %v26711_v43, %v26715_v2  ;;  %v23055_v43 = vld [vmem:[%s32145_s1 + $0x108] ss:$12 sps:$4 sm:$0xff]  }
 0x49d   : > { %v5084_v41 = vpop.f32.mrf.mxu1 }
 0x49e   : > { %v5085_v37 = vadd.f32 %v5084_v41, %v5043_v30  ;;  %v26724_v39 = vpop.f32.mrf.mxu0 }
 0x49f   : > { %v5086_v42 = vpop.f32.mrf.mxu1 }
 0x4a0   : > { %v5173_v46 = vadd.f32 %v5085_v37, %v4422_v23  ;;  %v5087_v47 = vadd.f32 %v5086_v42, %v5045_v33  ;;  %v26728_v49 = vpop.f32.mrf.mxu0  ;;  %v23040_v23 = vld [vmem:[%s32145_s1] ss:$12 sps:$4 sm:$0xff]  }
 0x4a1   : > { %v5088_v50 = vpop.f32.mrf.mxu1 }
 0x4a2   : > { %v5199_v51 = vadd.f32 %v5182_v38, %v5173_v46  ;;  %v5174_v44 = vadd.f32 %v5087_v47, %v4424_v4  ;;  %v5170_v53 = vpop.f32.mrf.mxu0  ;;  %v23043_v4 = vld [vmem:[%s32145_s1 + $0x168] ss:$12 sps:$4 sm:$0xff]  }
 0x4a3   : > { %v5089_v58 = vpop.f32.mrf.mxu1  ;;  %v23061_v53 = vld [vmem:[%s32145_s1 + $0xd8] ss:$12 sps:$4 sm:$0xff]  }
 0x4a4   : > { %v5203_v21 = vmax.f32 %v5199_v51, 0.0  ;;  %v5200_v59 = vadd.f32 %v5186_v48, %v5174_v44  ;;  %v5171_v60 = vpop.f32.mrf.mxu0  ;;  %v23058_v51 = vld [vmem:[%s32145_s1 + $0xf0] ss:$12 sps:$4 sm:$0xff]   ;;  %v23060_v44 = vld [vmem:[%s32145_s1 + $0xf4] ss:$12 sps:$4 sm:$0xff]  }
 0x4a5   : > { %v23063_v58 = vld [vmem:[%s32145_s1 + $0xdc] ss:$12 sps:$4 sm:$0xff]   ;;  %v23069_v60 = vld [vmem:[%s32145_s1 + $0x22c] ss:$12 sps:$4 sm:$0xff]  }
 0x4a6   : > { %v5204_v61 = vmax.f32 %v5200_v59, 0.0  ;;  %v5207_v62 = vpack.c.bf16 %v5203_v21, %v5203_v21  ;;  %v23066_v21 = vld [vmem:[%s32145_s1 + $0xc4] ss:$12 sps:$4 sm:$0xff]   ;;  %v23064_v59 = vld [vmem:[%s32145_s1 + $0xc0] ss:$12 sps:$4 sm:$0xff]  }
 0x4a8   : > { %v5208_v63 = vpack.c.bf16 %v5204_v61, %v5204_v61  ;;  %v5218_v0 = vsel %vm5216_vm8, %v5207_v62, 0  ;;  %v23070_v61 = vld [vmem:[%s32145_s1 + $0x170] ss:$12 sps:$4 sm:$0xff]   ;;  %v23067_v62 = vld [vmem:[%s32145_s1 + $0x228] ss:$12 sps:$4 sm:$0xff]  }
 0x4aa   : > { %19612 = vmatprep.subr.msk.bf16.mxu0 %vm5216_vm8, %v5208_v63 }
 0x4ab   : > { %5244 = vmatpush1.bf16.msra.mxu0 %v5218_v0 }
 0x4ac   : > { %19617 = vmatprep.subr.msk.bf16.mxu0 %vm5216_vm8, %v5208_v63  ;;  %v23072_v63 = vld [vmem:[%s32145_s1 + $0x210] ss:$12 sps:$4 sm:$0xff]  }
 0x4ae   : > { %19613 = vmatmul.mubr.msk.bf16.vlgmr.msra.gmra.mxu0 %vm5212_vm9, %v26735_v20 }
 0x4af   : > { %5331 = vmatpush1.bf16.msra.mxu0 %v5218_v0  ;;  %5348 = vmatprep.mubr.bf16.mxu0 %v25041_v17  ;;  %v23074_v0 = vld [vmem:[%s32145_s1 + $0x214] ss:$12 sps:$4 sm:$0xff]  }
 0x4b0   : > { %6046 = vmatprep.subr.bf16.mxu0 %v23021_v54  ;;  %v23079_v54 = vld [vmem:[%s32145_s1 + $0x1fc] ss:$12 sps:$4 sm:$0xff]  }
 0x4b6   : > { %19618 = vmatmul.mubr.msk.bf16.vlgmr.msra.gmra.mxu0 %vm5212_vm9, %v26747_v56 }
 0x4b7   : > { %6047 = vmatpush1.bf16.msra.mxu0 %v23019_v55  ;;  %v23084_v55 = vld [vmem:[%s32145_s1 + $0x1e4] ss:$12 sps:$4 sm:$0xff]  }
 0x4b8   : > { %6048 = vmatprep.subr.bf16.mxu0 %v23024_v57  ;;  %v23087_v57 = vld [vmem:[%s32145_s1 + $0x1c8] ss:$12 sps:$4 sm:$0xff]  }
 0x4bb   : > { %6049 = vmatpush1.bf16.msra.mxu0 %v23022_v29  ;;  %v23089_v29 = vld [vmem:[%s32145_s1 + $0x1cc] ss:$12 sps:$4 sm:$0xff]  }
 0x4bc   : > { %6050 = vmatprep.subr.bf16.mxu0 %v23027_v1  ;;  %v23092_v1 = vld [vmem:[%s32145_s1 + $0x1b0] ss:$12 sps:$4 sm:$0xff]  }
 0x4bf   : > { %6051 = vmatpush1.bf16.msra.mxu0 %v23025_v5  ;;  %v23094_v5 = vld [vmem:[%s32145_s1 + $0x1b4] ss:$12 sps:$4 sm:$0xff]  }
 0x4c0   : > { %6052 = vmatprep.subr.bf16.mxu0 %v23030_v7  ;;  %v23097_v7 = vld [vmem:[%s32145_s1 + $0x198] ss:$12 sps:$4 sm:$0xff]  }
 0x4c3   : > { %6053 = vmatpush1.bf16.msra.mxu0 %v23028_v9  ;;  %v23099_v9 = vld [vmem:[%s32145_s1 + $0x19c] ss:$12 sps:$4 sm:$0xff]  }
 0x4c4   : > { %6054 = vmatprep.subr.bf16.mxu0 %v23033_v10  ;;  %v23102_v10 = vld [vmem:[%s32145_s1 + $0x180] ss:$12 sps:$4 sm:$0xff]  }
 0x4c7   : > { %6055 = vmatpush1.bf16.msra.mxu0 %v23031_v12  ;;  %v23104_v12 = vld [vmem:[%s32145_s1 + $0x184] ss:$12 sps:$4 sm:$0xff]  }
 0x4c8   : > { %6056 = vmatprep.subr.bf16.mxu0 %v23036_v13  ;;  %v23107_v13 = vld [vmem:[%s32145_s1 + $0x2e8] ss:$12 sps:$4 sm:$0xff]  }
 0x4cb   : > { %6057 = vmatpush1.bf16.msra.mxu0 %v23034_v15  ;;  %v23109_v15 = vld [vmem:[%s32145_s1 + $0x2ec] ss:$12 sps:$4 sm:$0xff]  }
 0x4cc   : > { %6058 = vmatprep.subr.bf16.mxu0 %v23039_v16  ;;  %v23113_v16 = vld [vmem:[%s32145_s1 + $0x2d0] ss:$12 sps:$4 sm:$0xff]  }
 0x4cf   : > { %6059 = vmatpush1.bf16.msra.mxu0 %v23037_v18  ;;  %v23115_v18 = vld [vmem:[%s32145_s1 + $0x2d4] ss:$12 sps:$4 sm:$0xff]  }
 0x4d0   : > { %6060 = vmatprep.subr.bf16.mxu0 %v23042_v19  ;;  %v23119_v19 = vld [vmem:[%s32145_s1 + $0x2b8] ss:$12 sps:$4 sm:$0xff]  }
 0x4d3   : > { %6061 = vmatpush1.bf16.msra.mxu0 %v23040_v23  ;;  %v23121_v23 = vld [vmem:[%s32145_s1 + $0x2bc] ss:$12 sps:$4 sm:$0xff]  }
 0x4d4   : > { %6062 = vmatprep.subr.bf16.mxu0 %v23045_v45  ;;  %v23125_v45 = vld [vmem:[%s32145_s1 + $0x2a0] ss:$12 sps:$4 sm:$0xff]  }
 0x4d7   : > { %6063 = vmatpush2.bf16.msra.mxu0 %v23043_v4  ;;  %v23127_v4 = vld [vmem:[%s32145_s1 + $0x2a4] ss:$12 sps:$4 sm:$0xff]  }
 0x4d8   : > { %6064 = vmatprep.subr.bf16.mxu0 %v23048_v24  ;;  %v23131_v24 = vld [vmem:[%s32145_s1 + $0x288] ss:$12 sps:$4 sm:$0xff]  }
 0x4db   : > { %6065 = vmatpush2.bf16.msra.mxu0 %v23046_v25  ;;  %v23133_v25 = vld [vmem:[%s32145_s1 + $0x28c] ss:$12 sps:$4 sm:$0xff]  }
 0x4dc   : > { %6066 = vmatprep.subr.bf16.mxu0 %v23051_v26  ;;  %v23137_v26 = vld [vmem:[%s32145_s1 + $0x270] ss:$12 sps:$4 sm:$0xff]  }
 0x4dd   : > { %v5125_v30 = vpop.f32.mrf.mxu1 }
 0x4de   : > { %v5167_v33 = vadd.f32 %v26724_v39, %v5125_v30  ;;  %v23145_v30 = vld [vmem:[%s32145_s1 + $0x25c] ss:$12 sps:$4 sm:$0xff]  }
 0x4df   : > { %v5127_v32 = vpop.f32.mrf.mxu1  ;;  %6067 = vmatpush2.bf16.msra.mxu0 %v23049_v27  ;;  %v23139_v27 = vld [vmem:[%s32145_s1 + $0x274] ss:$12 sps:$4 sm:$0xff]  }
 0x4e0   : > { %v5175_v41 = vadd.f32 %v5167_v33, %v4504_v31  ;;  %v5169_v37 = vadd.f32 %v26728_v49, %v5127_v32  ;;  %6068 = vmatprep.subr.bf16.mxu0 %v23054_v28  ;;  %v23143_v28 = vld [vmem:[%s32145_s1 + $0x258] ss:$12 sps:$4 sm:$0xff]   ;;  %v23149_v33 = vld [vmem:[%s32145_s1 + $0x240] ss:$12 sps:$4 sm:$0xff]  }
 0x4e1   : > { %v5129_v38 = vpop.f32.mrf.mxu1  ;;  %v23151_v31 = vld [vmem:[%s32145_s1 + $0x244] ss:$12 sps:$4 sm:$0xff]  }
 0x4e2   : > { %v5201_v39 = vadd.f32 %v5190_v34, %v5175_v41  ;;  %v5176_v42 = vadd.f32 %v5169_v37, %v4506_v36  ;;  %v23155_v34 = vld [vmem:[%s32145_s1 + $0x2f0] ss:$12 sps:$4 sm:$0xff]  }
 0x4e3   : > { %v5130_v46 = vpop.f32.mrf.mxu1  ;;  %6069 = vmatpush2.bf16.msra.mxu0 %v23052_v35 }
 0x4e4   : > { %v5205_v2 = vmax.f32 %v5201_v39, 0.0  ;;  %v5202_v47 = vadd.f32 %v5194_v22, %v5176_v42  ;;  %6070 = vmatprep.subr.bf16.mxu0 %v23057_v52 }
 0x4e6   : > { %v5206_v48 = vmax.f32 %v5202_v47, 0.0  ;;  %v5209_v49 = vpack.c.bf16 %v5205_v2, %v5205_v2  ;;  %v23075_v2 = vld [vmem:[%s32145_s1 + $0x158] ss:$12 sps:$4 sm:$0xff]  }
 0x4e7   : > { %6071 = vmatpush2.bf16.msra.mxu0 %v23055_v43  ;;  %v23071_v43 = vld [vmem:[%s32145_s1 + $0xb0] ss:$12 sps:$4 sm:$0xff]  }
 0x4e8   : > { %v5210_v40 = vpack.c.bf16 %v5206_v48, %v5206_v48  ;;  %v5224_v50 = vsel %vm5216_vm8, %v5209_v49, 0  ;;  %6072 = vmatprep.subr.bf16.mxu0 %v23060_v44  ;;  %v23076_v48 = vld [vmem:[%s32145_s1 + $0x98] ss:$12 sps:$4 sm:$0xff]   ;;  %v23080_v49 = vld [vmem:[%s32145_s1 + $0x140] ss:$12 sps:$4 sm:$0xff]  }
 0x4e9   : > { %v23090_v44 = vld [vmem:[%s32145_s1 + $0x110] ss:$12 sps:$4 sm:$0xff]  }
 0x4ea   : > { %19614 = vmatprep.subr.msk.bf16.mxu1 %vm5216_vm8, %v5210_v40 }
 0x4eb   : > { %5285 = vmatpush1.bf16.msra.mxu1 %v5224_v50  ;;  %6073 = vmatpush2.bf16.msra.mxu0 %v23058_v51  ;;  %v23086_v51 = vld [vmem:[%s32145_s1 + $0x68] ss:$12 sps:$4 sm:$0xff]  }
 0x4ec   : > { %19619 = vmatprep.subr.msk.bf16.mxu1 %vm5216_vm8, %v5210_v40  ;;  %6074 = vmatprep.subr.bf16.mxu0 %v23063_v58  ;;  %v23081_v40 = vld [vmem:[%s32145_s1 + $0x80] ss:$12 sps:$4 sm:$0xff]   ;;  %v23095_v58 = vld [vmem:[%s32145_s1 + $0xf8] ss:$12 sps:$4 sm:$0xff]  }
 0x4ee   : > { %19615 = vmatmul.mubr.msk.bf16.vlgmr.msra.gmra.mxu1 %vm5212_vm9, %v26735_v20  ;;  %v23077_v20 = vld [vmem:[%s32145_s1 + $0x1f8] ss:$12 sps:$4 sm:$0xff]  }
 0x4ef   : > { %5372 = vmatpush1.bf16.msra.mxu1 %v5224_v50  ;;  %5389 = vmatprep.mubr.bf16.mxu1 %v25041_v17  ;;  %v23085_v50 = vld [vmem:[%s32145_s1 + $0x128] ss:$12 sps:$4 sm:$0xff]  }
 0x4f0   : > { %6075 = vmatpush2.bf16.msra.mxu0 %v23061_v53  ;;  %6087 = vmatprep.subr.bf16.mxu1 %v23069_v60  ;;  %v23091_v53 = vld [vmem:[%s32145_s1 + $0x50] ss:$12 sps:$4 sm:$0xff]   ;;  %v23101_v60 = vld [vmem:[%s32145_s1 + $0x20] ss:$12 sps:$4 sm:$0xff]  }
 0x4f1   : > { %6076 = vmatprep.subr.bf16.mxu0 %v23066_v21  ;;  %v23096_v21 = vld [vmem:[%s32145_s1 + $0x38] ss:$12 sps:$4 sm:$0xff]  }
 0x4f4   : > { %6077 = vmatpush2.bf16.msra.mxu0 %v23064_v59  ;;  %v23100_v59 = vld [vmem:[%s32145_s1 + $0xe0] ss:$12 sps:$4 sm:$0xff]  }
 0x4f5   : > { %22150 = vmatprep.subr.bf16.mxu0 %v23070_v61  ;;  %v23105_v61 = vld [vmem:[%s32145_s1 + $0xc8] ss:$12 sps:$4 sm:$0xff]  }
 0x4f6   : > { %19620 = vmatmul.mubr.msk.bf16.vlgmr.msra.gmra.mxu1 %vm5212_vm9, %v26747_v56  ;;  %v23082_v56 = vld [vmem:[%s32145_s1 + $0x1e0] ss:$12 sps:$4 sm:$0xff]  }
 0x4f7   : > { %6088 = vmatpush1.bf16.msra.mxu1 %v23067_v62  ;;  %v23106_v62 = vld [vmem:[%s32145_s1 + $0x8] ss:$12 sps:$4 sm:$0xff]  }
 0x4f8   : > { %6089 = vmatprep.subr.bf16.mxu1 %v23074_v0  ;;  %v23110_v0 = vld [vmem:[%s32145_s1 + $0x3a8] ss:$12 sps:$4 sm:$0xff]  }
 0x4fb   : > { %6090 = vmatpush1.bf16.msra.mxu1 %v23072_v63  ;;  %v23112_v63 = vld [vmem:[%s32145_s1 + $0x3ac] ss:$12 sps:$4 sm:$0xff]  }
 0x4fc   : > { %6091 = vmatprep.subr.bf16.mxu1 %v23079_v54  ;;  %v23116_v54 = vld [vmem:[%s32145_s1 + $0x390] ss:$12 sps:$4 sm:$0xff]  }
 0x4ff   : > { %6092 = vmatpush1.bf16.msra.mxu1 %v23077_v20  ;;  %v23118_v20 = vld [vmem:[%s32145_s1 + $0x394] ss:$12 sps:$4 sm:$0xff]  }
 0x500   : > { %6093 = vmatprep.subr.bf16.mxu1 %v23084_v55  ;;  %v23122_v55 = vld [vmem:[%s32145_s1 + $0x378] ss:$12 sps:$4 sm:$0xff]  }
 0x503   : > { %6094 = vmatpush1.bf16.msra.mxu1 %v23082_v56  ;;  %v23124_v56 = vld [vmem:[%s32145_s1 + $0x37c] ss:$12 sps:$4 sm:$0xff]  }
 0x504   : > { %6095 = vmatprep.subr.bf16.mxu1 %v23089_v29  ;;  %v23128_v29 = vld [vmem:[%s32145_s1 + $0x360] ss:$12 sps:$4 sm:$0xff]  }
 0x507   : > { %6096 = vmatpush1.bf16.msra.mxu1 %v23087_v57  ;;  %v23130_v57 = vld [vmem:[%s32145_s1 + $0x364] ss:$12 sps:$4 sm:$0xff]  }
 0x508   : > { %6097 = vmatprep.subr.bf16.mxu1 %v23094_v5  ;;  %v23134_v5 = vld [vmem:[%s32145_s1 + $0x348] ss:$12 sps:$4 sm:$0xff]  }
 0x50b   : > { %6098 = vmatpush1.bf16.msra.mxu1 %v23092_v1  ;;  %v23136_v1 = vld [vmem:[%s32145_s1 + $0x34c] ss:$12 sps:$4 sm:$0xff]  }
 0x50c   : > { %6099 = vmatprep.subr.bf16.mxu1 %v23099_v9 }
 0x50f   : > { %6100 = vmatpush1.bf16.msra.mxu1 %v23097_v7  ;;  %v23142_v7 = vld [vmem:[%s32145_s1 + $0x334] ss:$12 sps:$4 sm:$0xff]  }
 0x510   : > { %6101 = vmatprep.subr.bf16.mxu1 %v23104_v12 }
 0x513   : > { %6102 = vmatpush1.bf16.msra.mxu1 %v23102_v10  ;;  %v23140_v10 = vld [vmem:[%s32145_s1 + $0x330] ss:$12 sps:$4 sm:$0xff]  }
 0x514   : > { %6103 = vmatprep.subr.bf16.mxu1 %v23109_v15 }
 0x517   : > { %6104 = vmatpush2.bf16.msra.mxu1 %v23107_v13  ;;  %v23148_v13 = vld [vmem:[%s32145_s1 + $0x31c] ss:$12 sps:$4 sm:$0xff]  }
 0x518   : > { %6105 = vmatprep.subr.bf16.mxu1 %v23115_v18 }
 0x51b   : > { %6106 = vmatpush2.bf16.msra.mxu1 %v23113_v16  ;;  %v23146_v16 = vld [vmem:[%s32145_s1 + $0x318] ss:$12 sps:$4 sm:$0xff]  }
 0x51c   : > { %6107 = vmatprep.subr.bf16.mxu1 %v23121_v23 }
 0x51f   : > { %6108 = vmatpush2.bf16.msra.mxu1 %v23119_v19  ;;  %v23154_v19 = vld [vmem:[%s32145_s1 + $0x304] ss:$12 sps:$4 sm:$0xff]  }
 0x520   : > { %6109 = vmatprep.subr.bf16.mxu1 %v23127_v4 }
 0x523   : > { %6110 = vmatpush2.bf16.msra.mxu1 %v23125_v45  ;;  %v23152_v45 = vld [vmem:[%s32145_s1 + $0x300] ss:$12 sps:$4 sm:$0xff]  }
 0x524   : > { %6111 = vmatprep.subr.bf16.mxu1 %v23133_v25  ;;  %v23158_v25 = vld [vmem:[%s32145_s1 + $0x46c] ss:$12 sps:$4 sm:$0xff]  }
 0x527   : > { %6112 = vmatpush2.bf16.msra.mxu1 %v23131_v24 }
 0x528   : > { %6113 = vmatprep.subr.bf16.mxu1 %v23139_v27 }
 0x52b   : > { %6114 = vmatpush2.bf16.msra.mxu1 %v23137_v26 }
 0x52c   : > { %6115 = vmatprep.subr.bf16.mxu1 %v23145_v30  ;;  %v23156_v30 = vld [vmem:[%s32145_s1 + $0x468] ss:$12 sps:$4 sm:$0xff]  }
 0x52f   : > { %6116 = vmatpush2.bf16.msra.mxu1 %v23143_v28 }
 0x530   : > { %6117 = vmatprep.subr.bf16.mxu1 %v23151_v31  ;;  %v23159_v31 = vld [vmem:[%s32145_s1 + $0x230] ss:$12 sps:$4 sm:$0xff]  }
 0x533   : > { %6118 = vmatpush2.bf16.msra.mxu1 %v23149_v33 }
 0x534   : > { %22172 = vmatprep.subr.bf16.mxu1 %v23155_v34 }
 0x56e   : > { %v5263_v32 = vpop.f32.mrf.mxu0 }
 0x570   : > { %v5265_v35 = vpop.f32.mrf.mxu0 }
 0x572   : > { %v5267_v36 = vpop.f32.mrf.mxu0 }
 0x573   : > { %v23161_v36 = vld [vmem:[%s32145_s1 + $0x450] ss:$12 sps:$4 sm:$0xff]  }
 0x574   : > { %v5268_v41 = vpop.f32.mrf.mxu0 }
 0x575   : > { %v23164_v41 = vld [vmem:[%s32145_s1 + $0x218] ss:$12 sps:$4 sm:$0xff]  }
 0x576   : > { %v5350_v37 = vpop.f32.mrf.mxu0 }
 0x577   : > { %v5398_v22 = vmax.f32 %v5263_v32, %v5350_v37  ;;  %v23160_v32 = vld [vmem:[%s32145_s1 + $0x2d8] ss:$12 sps:$4 sm:$0xff]   ;;  %v23165_v37 = vld [vmem:[%s32145_s1 + $0x2c0] ss:$12 sps:$4 sm:$0xff]  }
 0x578   : > { %v5352_v52 = vpop.f32.mrf.mxu0 }
 0x579   : > { %v5399_v38 = vmax.f32 %v5265_v35, %v5352_v52  ;;  %v26964_v39 = vpack.c.bf16 %v5398_v22, %v5398_v22  ;;  %v23163_v35 = vld [vmem:[%s32145_s1 + $0x454] ss:$12 sps:$4 sm:$0xff]   ;;  %v23168_v22 = vld [vmem:[%s32145_s1 + $0x43c] ss:$12 sps:$4 sm:$0xff]   ;;  %v23166_v52 = vld [vmem:[%s32145_s1 + $0x438] ss:$12 sps:$4 sm:$0xff]  }
 0x57a   : > { %v5354_v42 = vpop.f32.mrf.mxu0 }
 0x57b   : > { %v26966_v46 = vpack.c.bf16 %v5399_v38, %v5399_v38  ;;  %v23169_v38 = vld [vmem:[%s32145_s1 + $0x200] ss:$12 sps:$4 sm:$0xff]   ;;  %v23170_v42 = vld [vmem:[%s32145_s1 + $0x2a8] ss:$12 sps:$4 sm:$0xff]  }
 0x57c   : > { %v5355_v47 = vpop.f32.mrf.mxu0 }
 0x57d   : > { %6078 = vmatprep.mubr.bf16.mxu0 %v26966_v46  ;;  %v23174_v47 = vld [vmem:[%s32145_s1 + $0x1e8] ss:$12 sps:$4 sm:$0xff]  }
 0x57e   : > { %6079 = vmatmul.mubr.bf16.vlgmr.msra.gmra.mxu0 %v26964_v39 }
 0x57f   : > { %22151 = vmatpush3.bf16.msra.mxu0 %v23071_v43  ;;  %6160 = vmatprep.mubr.bf16.mxu0 %v26966_v46  ;;  %v23173_v43 = vld [vmem:[%s32145_s1 + $0x424] ss:$12 sps:$4 sm:$0xff]  }
 0x580   : > { %22152 = vmatprep.subr.bf16.mxu0 %v23075_v2  ;;  %v23171_v2 = vld [vmem:[%s32145_s1 + $0x420] ss:$12 sps:$4 sm:$0xff]  }
 0x583   : > { %22153 = vmatpush3.bf16.msra.mxu0 %v23076_v48  ;;  %v23175_v48 = vld [vmem:[%s32145_s1 + $0x290] ss:$12 sps:$4 sm:$0xff]  }
 0x584   : > { %22154 = vmatprep.subr.bf16.mxu0 %v23080_v49  ;;  %v23178_v49 = vld [vmem:[%s32145_s1 + $0x40c] ss:$12 sps:$4 sm:$0xff]  }
 0x587   : > { %22155 = vmatpush3.bf16.msra.mxu0 %v23081_v40  ;;  %v23176_v40 = vld [vmem:[%s32145_s1 + $0x408] ss:$12 sps:$4 sm:$0xff]  }
 0x588   : > { %22156 = vmatprep.subr.bf16.mxu0 %v23085_v50  ;;  %v23179_v50 = vld [vmem:[%s32145_s1 + $0x1d0] ss:$12 sps:$4 sm:$0xff]  }
 0x58b   : > { %22157 = vmatpush3.bf16.msra.mxu0 %v23086_v51  ;;  %v23180_v51 = vld [vmem:[%s32145_s1 + $0x278] ss:$12 sps:$4 sm:$0xff]  }
 0x58c   : > { %22158 = vmatprep.subr.bf16.mxu0 %v23090_v44  ;;  %v23183_v44 = vld [vmem:[%s32145_s1 + $0x3f4] ss:$12 sps:$4 sm:$0xff]  }
 0x58f   : > { %22159 = vmatpush3.bf16.msra.mxu0 %v23091_v53  ;;  %v23181_v53 = vld [vmem:[%s32145_s1 + $0x3f0] ss:$12 sps:$4 sm:$0xff]  }
 0x590   : > { %22160 = vmatprep.subr.bf16.mxu0 %v23095_v58  ;;  %v23184_v58 = vld [vmem:[%s32145_s1 + $0x1b8] ss:$12 sps:$4 sm:$0xff]  }
 0x593   : > { %22161 = vmatpush3.bf16.msra.mxu0 %v23096_v21  ;;  %v23185_v21 = vld [vmem:[%s32145_s1 + $0x260] ss:$12 sps:$4 sm:$0xff]  }
 0x594   : > { %22162 = vmatprep.subr.bf16.mxu0 %v23100_v59  ;;  %v23188_v59 = vld [vmem:[%s32145_s1 + $0x3dc] ss:$12 sps:$4 sm:$0xff]  }
 0x597   : > { %22163 = vmatpush3.bf16.msra.mxu0 %v23101_v60  ;;  %v23186_v60 = vld [vmem:[%s32145_s1 + $0x3d8] ss:$12 sps:$4 sm:$0xff]  }
 0x598   : > { %22164 = vmatprep.subr.bf16.mxu0 %v23105_v61  ;;  %v23189_v61 = vld [vmem:[%s32145_s1 + $0x1a0] ss:$12 sps:$4 sm:$0xff]  }
 0x59b   : > { %22165 = vmatpush3.bf16.msra.mxu0 %v23106_v62  ;;  %v23190_v62 = vld [vmem:[%s32145_s1 + $0x248] ss:$12 sps:$4 sm:$0xff]  }
 0x59c   : > { %6849 = vmatprep.subr.bf16.mxu0 %v23112_v63  ;;  %v23193_v63 = vld [vmem:[%s32145_s1 + $0x3c4] ss:$12 sps:$4 sm:$0xff]  }
 0x59e   : > { %6161 = vmatmul.mubr.bf16.vlgmr.msra.gmra.mxu0 %v26964_v39 }
 0x59f   : > { %6850 = vmatpush1.bf16.msra.mxu0 %v23110_v0  ;;  %6881 = vmatprep.mubr.bf16.mxu0 %v26966_v46  ;;  %v23191_v0 = vld [vmem:[%s32145_s1 + $0x3c0] ss:$12 sps:$4 sm:$0xff]  }
 0x5a0   : > { %6851 = vmatprep.subr.bf16.mxu0 %v23118_v20  ;;  %v23194_v20 = vld [vmem:[%s32145_s1 + $0x188] ss:$12 sps:$4 sm:$0xff]  }
 0x5a3   : > { %6852 = vmatpush1.bf16.msra.mxu0 %v23116_v54  ;;  %v23197_v54 = vld [vmem:[%s32145_s1 + $0x52c] ss:$12 sps:$4 sm:$0xff]  }
 0x5a4   : > { %6853 = vmatprep.subr.bf16.mxu0 %v23124_v56  ;;  %v23198_v56 = vld [vmem:[%s32145_s1 + $0x470] ss:$12 sps:$4 sm:$0xff]  }
 0x5a7   : > { %6854 = vmatpush1.bf16.msra.mxu0 %v23122_v55  ;;  %v23195_v55 = vld [vmem:[%s32145_s1 + $0x528] ss:$12 sps:$4 sm:$0xff]  }
 0x5a8   : > { %6855 = vmatprep.subr.bf16.mxu0 %v23130_v57  ;;  %v23199_v57 = vld [vmem:[%s32145_s1 + $0x3b0] ss:$12 sps:$4 sm:$0xff]  }
 0x5ab   : > { %6856 = vmatpush1.bf16.msra.mxu0 %v23128_v29  ;;  %v23202_v29 = vld [vmem:[%s32145_s1 + $0x514] ss:$12 sps:$4 sm:$0xff]  }
 0x5ac   : > { %6857 = vmatprep.subr.bf16.mxu0 %v23136_v1  ;;  %v23203_v1 = vld [vmem:[%s32145_s1 + $0x458] ss:$12 sps:$4 sm:$0xff]  }
 0x5ae   : > { %v5304_v9 = vpop.f32.mrf.mxu1 }
 0x5af   : > { %6858 = vmatpush1.bf16.msra.mxu0 %v23134_v5  ;;  %v23200_v5 = vld [vmem:[%s32145_s1 + $0x510] ss:$12 sps:$4 sm:$0xff]  }
 0x5b0   : > { %v5306_v12 = vpop.f32.mrf.mxu1  ;;  %6859 = vmatprep.subr.bf16.mxu0 %v23142_v7  ;;  %v23204_v7 = vld [vmem:[%s32145_s1 + $0x398] ss:$12 sps:$4 sm:$0xff]  }
 0x5b2   : > { %v5308_v15 = vpop.f32.mrf.mxu1 }
 0x5b3   : > { %6860 = vmatpush1.bf16.msra.mxu0 %v23140_v10  ;;  %v23208_v10 = vld [vmem:[%s32145_s1 + $0x440] ss:$12 sps:$4 sm:$0xff]   ;;  %v23213_v15 = vld [vmem:[%s32145_s1 + $0x428] ss:$12 sps:$4 sm:$0xff]  }
 0x5b4   : > { %v5309_v18 = vpop.f32.mrf.mxu1  ;;  %6861 = vmatprep.subr.bf16.mxu0 %v23148_v13  ;;  %v23212_v13 = vld [vmem:[%s32145_s1 + $0x4e4] ss:$12 sps:$4 sm:$0xff]  }
 0x5b5   : > { %v23214_v18 = vld [vmem:[%s32145_s1 + $0x368] ss:$12 sps:$4 sm:$0xff]  }
 0x5b6   : > { %v5391_v23 = vpop.f32.mrf.mxu1 }
 0x5b7   : > { %6862 = vmatpush1.bf16.msra.mxu0 %v23146_v16  ;;  %v5400_v4 = vmax.f32 %v5304_v9, %v5391_v23  ;;  %v23207_v9 = vld [vmem:[%s32145_s1 + $0x4fc] ss:$12 sps:$4 sm:$0xff]   ;;  %v23210_v16 = vld [vmem:[%s32145_s1 + $0x4e0] ss:$12 sps:$4 sm:$0xff]  }
 0x5b8   : > { %v5393_v24 = vpop.f32.mrf.mxu1  ;;  %6863 = vmatprep.subr.bf16.mxu0 %v23154_v19  ;;  %v23217_v19 = vld [vmem:[%s32145_s1 + $0x4cc] ss:$12 sps:$4 sm:$0xff]   ;;  %v23218_v23 = vld [vmem:[%s32145_s1 + $0x410] ss:$12 sps:$4 sm:$0xff]  }
 0x5b9   : > { %v5401_v26 = vmax.f32 %v5306_v12, %v5393_v24  ;;  %v27077_v33 = vpack.c.bf16 %v5400_v4, %v5400_v4  ;;  %v23205_v12 = vld [vmem:[%s32145_s1 + $0x4f8] ss:$12 sps:$4 sm:$0xff]   ;;  %v23219_v4 = vld [vmem:[%s32145_s1 + $0x350] ss:$12 sps:$4 sm:$0xff]   ;;  %v23222_v24 = vld [vmem:[%s32145_s1 + $0x4b4] ss:$12 sps:$4 sm:$0xff]  }
 0x5ba   : > { %v5395_v27 = vpop.f32.mrf.mxu1 }
 0x5bb   : > { %v27069_v28 = vpack.c.bf16 %v5401_v26, %v5401_v26  ;;  %6864 = vmatpush1.bf16.msra.mxu0 %v23152_v45  ;;  %v23215_v45 = vld [vmem:[%s32145_s1 + $0x4c8] ss:$12 sps:$4 sm:$0xff]   ;;  %v23220_v26 = vld [vmem:[%s32145_s1 + $0x4b0] ss:$12 sps:$4 sm:$0xff]   ;;  %v23224_v27 = vld [vmem:[%s32145_s1 + $0x338] ss:$12 sps:$4 sm:$0xff]  }
 0x5bc   : > { %v5396_v34 = vpop.f32.mrf.mxu1  ;;  %6865 = vmatprep.subr.bf16.mxu0 %v23158_v25  ;;  %v23223_v25 = vld [vmem:[%s32145_s1 + $0x3f8] ss:$12 sps:$4 sm:$0xff]  }
 0x5bd   : > { %6119 = vmatprep.mubr.bf16.mxu1 %v27069_v28  ;;  %v23225_v34 = vld [vmem:[%s32145_s1 + $0x498] ss:$12 sps:$4 sm:$0xff]  }
 0x5be   : > { %6120 = vmatmul.mubr.bf16.vlgmr.msra.gmra.mxu1 %v27077_v33 }
 0x5bf   : > { %22173 = vmatpush3.bf16.msra.mxu1 %v23159_v31  ;;  %6866 = vmatpush2.bf16.msra.mxu0 %v23156_v30  ;;  %v23227_v30 = vld [vmem:[%s32145_s1 + $0x49c] ss:$12 sps:$4 sm:$0xff]   ;;  %v23228_v31 = vld [vmem:[%s32145_s1 + $0x3e0] ss:$12 sps:$4 sm:$0xff]  }
 0x5c0   : > { %6200 = vmatprep.mubr.bf16.mxu1 %v27069_v28  ;;  %22174 = vmatprep.subr.bf16.mxu1 %v23160_v32  ;;  %v23229_v32 = vld [vmem:[%s32145_s1 + $0x320] ss:$12 sps:$4 sm:$0xff]  }
 0x5c1   : > { %6867 = vmatprep.subr.bf16.mxu0 %v23163_v35  ;;  %v23232_v35 = vld [vmem:[%s32145_s1 + $0x484] ss:$12 sps:$4 sm:$0xff]  }
 0x5c3   : > { %22175 = vmatpush3.bf16.msra.mxu1 %v23164_v41  ;;  %6868 = vmatpush2.bf16.msra.mxu0 %v23161_v36  ;;  %v23233_v36 = vld [vmem:[%s32145_s1 + $0x3c8] ss:$12 sps:$4 sm:$0xff]   ;;  %v23230_v41 = vld [vmem:[%s32145_s1 + $0x480] ss:$12 sps:$4 sm:$0xff]  }
 0x5c4   : > { %22176 = vmatprep.subr.bf16.mxu1 %v23165_v37  ;;  %6869 = vmatprep.subr.bf16.mxu0 %v23168_v22  ;;  %v23234_v37 = vld [vmem:[%s32145_s1 + $0x308] ss:$12 sps:$4 sm:$0xff]   ;;  %v23237_v22 = vld [vmem:[%s32145_s1 + $0x5ec] ss:$12 sps:$4 sm:$0xff]  }
 0x5c7   : > { %22177 = vmatpush3.bf16.msra.mxu1 %v23169_v38  ;;  %6870 = vmatpush2.bf16.msra.mxu0 %v23166_v52  ;;  %v23235_v52 = vld [vmem:[%s32145_s1 + $0x5e8] ss:$12 sps:$4 sm:$0xff]  }
 0x5c8   : > { %22178 = vmatprep.subr.bf16.mxu1 %v23170_v42  ;;  %6871 = vmatprep.subr.bf16.mxu0 %v23173_v43  ;;  %v23240_v38 = vld [vmem:[%s32145_s1 + $0x5d4] ss:$12 sps:$4 sm:$0xff]   ;;  %v23238_v42 = vld [vmem:[%s32145_s1 + $0x5d0] ss:$12 sps:$4 sm:$0xff]  }
 0x5c9   : > { %v23243_v43 = vld [vmem:[%s32145_s1 + $0x5bc] ss:$12 sps:$4 sm:$0xff]  }
 0x5cb   : > { %22179 = vmatpush3.bf16.msra.mxu1 %v23174_v47  ;;  %6872 = vmatpush2.bf16.msra.mxu0 %v23171_v2  ;;  %v23241_v2 = vld [vmem:[%s32145_s1 + $0x5b8] ss:$12 sps:$4 sm:$0xff]   ;;  %v23244_v47 = vld [vmem:[%s32145_s1 + $0x5a0] ss:$12 sps:$4 sm:$0xff]  }
 0x5cc   : > { %22180 = vmatprep.subr.bf16.mxu1 %v23175_v48  ;;  %6873 = vmatprep.subr.bf16.mxu0 %v23178_v49  ;;  %v23249_v48 = vld [vmem:[%s32145_s1 + $0x58c] ss:$12 sps:$4 sm:$0xff]   ;;  %v23247_v49 = vld [vmem:[%s32145_s1 + $0x588] ss:$12 sps:$4 sm:$0xff]  }
 0x5cf   : > { %22181 = vmatpush3.bf16.msra.mxu1 %v23179_v50  ;;  %6874 = vmatpush2.bf16.msra.mxu0 %v23176_v40  ;;  %v23252_v40 = vld [vmem:[%s32145_s1 + $0x574] ss:$12 sps:$4 sm:$0xff]   ;;  %v23250_v50 = vld [vmem:[%s32145_s1 + $0x570] ss:$12 sps:$4 sm:$0xff]  }
 0x5d0   : > { %22182 = vmatprep.subr.bf16.mxu1 %v23180_v51  ;;  %6875 = vmatprep.subr.bf16.mxu0 %v23183_v44  ;;  %v23255_v51 = vld [vmem:[%s32145_s1 + $0x55c] ss:$12 sps:$4 sm:$0xff]   ;;  %v23253_v44 = vld [vmem:[%s32145_s1 + $0x558] ss:$12 sps:$4 sm:$0xff]  }
 0x5d3   : > { %22183 = vmatpush3.bf16.msra.mxu1 %v23184_v58  ;;  %6876 = vmatpush2.bf16.msra.mxu0 %v23181_v53  ;;  %v23258_v53 = vld [vmem:[%s32145_s1 + $0x544] ss:$12 sps:$4 sm:$0xff]   ;;  %v23256_v58 = vld [vmem:[%s32145_s1 + $0x540] ss:$12 sps:$4 sm:$0xff]  }
 0x5d4   : > { %22184 = vmatprep.subr.bf16.mxu1 %v23185_v21  ;;  %6877 = vmatprep.subr.bf16.mxu0 %v23188_v59  ;;  %v23259_v21 = vld [vmem:[%s32145_s1 + $0x5f0] ss:$12 sps:$4 sm:$0xff]  }
 0x5d5   : > { %v23260_v59 = vld [vmem:[%s32145_s1 + $0x530] ss:$12 sps:$4 sm:$0xff]  }
 0x5d7   : > { %22185 = vmatpush3.bf16.msra.mxu1 %v23189_v61  ;;  %6878 = vmatpush2.bf16.msra.mxu0 %v23186_v60  ;;  %v23261_v60 = vld [vmem:[%s32145_s1 + $0x5d8] ss:$12 sps:$4 sm:$0xff]  }
 0x5d8   : > { %22186 = vmatprep.subr.bf16.mxu1 %v23190_v62  ;;  %6879 = vmatprep.subr.bf16.mxu0 %v23193_v63  ;;  %v23262_v61 = vld [vmem:[%s32145_s1 + $0x518] ss:$12 sps:$4 sm:$0xff]   ;;  %v23263_v62 = vld [vmem:[%s32145_s1 + $0x5c0] ss:$12 sps:$4 sm:$0xff]  }
 0x5d9   : > { %v23264_v63 = vld [vmem:[%s32145_s1 + $0x500] ss:$12 sps:$4 sm:$0xff]  }
 0x5db   : > { %22187 = vmatpush3.bf16.msra.mxu1 %v23194_v20  ;;  %6880 = vmatpush2.bf16.msra.mxu0 %v23191_v0  ;;  %v23265_v0 = vld [vmem:[%s32145_s1 + $0x5a8] ss:$12 sps:$4 sm:$0xff]  }
 0x5dc   : > { %6890 = vmatprep.subr.bf16.mxu1 %v23197_v54  ;;  %22194 = vmatprep.subr.bf16.mxu0 %v23198_v56  ;;  %v23277_v20 = vld [vmem:[%s32146_s7 + $0x3e4] ss:$16 sps:$4 sm:$0xff]  }
 0x5dd   : > { %v23280_v54 = vld [vmem:[%s32146_s7 + $0x3c4] ss:$16 sps:$4 sm:$0xff]  }
 0x5de   : > { %6201 = vmatmul.mubr.bf16.vlgmr.msra.gmra.mxu1 %v27077_v33  ;;  %6882 = vmatmul.mubr.bf16.vlgmr.msra.gmra.mxu0 %v26964_v39  ;;  %v23266_v56 = vld [vmem:[%s32145_s1 + $0x4e8] ss:$12 sps:$4 sm:$0xff]  }
 0x5df   : > { %6891 = vmatpush1.bf16.msra.mxu1 %v23195_v55  ;;  %6922 = vmatprep.mubr.bf16.mxu1 %v27069_v28  ;;  %v23278_v55 = vld [vmem:[%s32146_s7 + $0x3c0] ss:$16 sps:$4 sm:$0xff]  }
 0x5e0   : > { %22195 = vmatpush3.bf16.msra.mxu0 %v23199_v57  ;;  %6963 = vmatprep.mubr.bf16.mxu0 %v26966_v46  ;;  %v23209_v46 = vld [vmem:[%s32145_s1 + $0x380] ss:$12 sps:$4 sm:$0xff]   ;;  %v23267_v57 = vld [vmem:[%s32145_s1 + $0x590] ss:$12 sps:$4 sm:$0xff]  }
 0x5e1   : > { %6892 = vmatprep.subr.bf16.mxu1 %v23202_v29  ;;  %22196 = vmatprep.subr.bf16.mxu0 %v23203_v1  ;;  %v23268_v29 = vld [vmem:[%s32145_s1 + $0x4d0] ss:$12 sps:$4 sm:$0xff]   ;;  %v23269_v1 = vld [vmem:[%s32145_s1 + $0x578] ss:$12 sps:$4 sm:$0xff]  }
 0x5e3   : > { %6893 = vmatpush1.bf16.msra.mxu1 %v23200_v5  ;;  %v23270_v5 = vld [vmem:[%s32145_s1 + $0x4b8] ss:$12 sps:$4 sm:$0xff]  }
 0x5e4   : > { %22197 = vmatpush3.bf16.msra.mxu0 %v23204_v7  ;;  %6894 = vmatprep.subr.bf16.mxu1 %v23207_v9  ;;  %v23271_v7 = vld [vmem:[%s32145_s1 + $0x560] ss:$12 sps:$4 sm:$0xff]  }
 0x5e5   : > { %22198 = vmatprep.subr.bf16.mxu0 %v23208_v10  ;;  %v23272_v9 = vld [vmem:[%s32145_s1 + $0x4a0] ss:$12 sps:$4 sm:$0xff]   ;;  %v23273_v10 = vld [vmem:[%s32145_s1 + $0x548] ss:$12 sps:$4 sm:$0xff]  }
 0x5e7   : > { %6895 = vmatpush1.bf16.msra.mxu1 %v23205_v12  ;;  %v23274_v12 = vld [vmem:[%s32145_s1 + $0x488] ss:$12 sps:$4 sm:$0xff]  }
 0x5e8   : > { %22199 = vmatpush3.bf16.msra.mxu0 %v23209_v46  ;;  %6896 = vmatprep.subr.bf16.mxu1 %v23212_v13  ;;  %v23283_v13 = vld [vmem:[%s32146_s7 + $0x3a4] ss:$16 sps:$4 sm:$0xff]  }
 0x5e9   : > { %22200 = vmatprep.subr.bf16.mxu0 %v23213_v15  ;;  %v23281_v15 = vld [vmem:[%s32146_s7 + $0x3a0] ss:$16 sps:$4 sm:$0xff]  }
 0x5eb   : > { %6897 = vmatpush1.bf16.msra.mxu1 %v23210_v16 }
 0x5ec   : > { %22201 = vmatpush3.bf16.msra.mxu0 %v23214_v18  ;;  %6898 = vmatprep.subr.bf16.mxu1 %v23217_v19  ;;  %v23284_v19 = vld [vmem:[%s32146_s7 + $0x380] ss:$16 sps:$4 sm:$0xff]  }
 0x5ed   : > { %22202 = vmatprep.subr.bf16.mxu0 %v23218_v23 }
 0x5ef   : > { %6899 = vmatpush1.bf16.msra.mxu1 %v23215_v45  ;;  %v23287_v45 = vld [vmem:[%s32146_s7 + $0x360] ss:$16 sps:$4 sm:$0xff]  }
 0x5f0   : > { %22203 = vmatpush3.bf16.msra.mxu0 %v23219_v4  ;;  %6900 = vmatprep.subr.bf16.mxu1 %v23222_v24  ;;  %v23289_v4 = vld [vmem:[%s32146_s7 + $0x364] ss:$16 sps:$4 sm:$0xff]  }
 0x5f1   : > { %22204 = vmatprep.subr.bf16.mxu0 %v23223_v25  ;;  %v23292_v24 = vld [vmem:[%s32146_s7 + $0x344] ss:$16 sps:$4 sm:$0xff]   ;;  %v23290_v25 = vld [vmem:[%s32146_s7 + $0x340] ss:$16 sps:$4 sm:$0xff]  }
 0x5f3   : > { %6901 = vmatpush1.bf16.msra.mxu1 %v23220_v26  ;;  %v23295_v26 = vld [vmem:[%s32146_s7 + $0x324] ss:$16 sps:$4 sm:$0xff]  }
 0x5f4   : > { %22205 = vmatpush3.bf16.msra.mxu0 %v23224_v27  ;;  %6902 = vmatprep.subr.bf16.mxu1 %v23227_v30  ;;  %v23293_v27 = vld [vmem:[%s32146_s7 + $0x320] ss:$16 sps:$4 sm:$0xff]   ;;  %v23298_v30 = vld [vmem:[%s32146_s7 + $0x304] ss:$16 sps:$4 sm:$0xff]  }
 0x5f5   : > { %22206 = vmatprep.subr.bf16.mxu0 %v23228_v31  ;;  %v23296_v31 = vld [vmem:[%s32146_s7 + $0x300] ss:$16 sps:$4 sm:$0xff]  }
 0x5f7   : > { %6903 = vmatpush1.bf16.msra.mxu1 %v23225_v34  ;;  %v23301_v34 = vld [vmem:[%s32146_s7 + $0x4e4] ss:$16 sps:$4 sm:$0xff]  }
 0x5f8   : > { %22207 = vmatpush3.bf16.msra.mxu0 %v23229_v32  ;;  %6904 = vmatprep.subr.bf16.mxu1 %v23232_v35  ;;  %v23299_v32 = vld [vmem:[%s32146_s7 + $0x4e0] ss:$16 sps:$4 sm:$0xff]   ;;  %v23304_v35 = vld [vmem:[%s32146_s7 + $0x4c4] ss:$16 sps:$4 sm:$0xff]  }
 0x5f9   : > { %22208 = vmatprep.subr.bf16.mxu0 %v23233_v36  ;;  %v23302_v36 = vld [vmem:[%s32146_s7 + $0x4c0] ss:$16 sps:$4 sm:$0xff]  }
 0x5fb   : > { %6905 = vmatpush1.bf16.msra.mxu1 %v23230_v41 }
 0x5fc   : > { %22209 = vmatpush3.bf16.msra.mxu0 %v23234_v37  ;;  %6906 = vmatprep.subr.bf16.mxu1 %v23237_v22  ;;  %v23307_v37 = vld [vmem:[%s32146_s7 + $0x4a4] ss:$16 sps:$4 sm:$0xff]   ;;  %v23305_v22 = vld [vmem:[%s32146_s7 + $0x4a0] ss:$16 sps:$4 sm:$0xff]  }
 0x5fd   : > { %7738 = vmatprep.subr.bf16.mxu0 %v23277_v20 }
 0x5ff   : > { %6964 = vmatmul.mubr.bf16.vlgmr.msra.gmra.mxu0 %v26964_v39  ;;  %6907 = vmatpush2.bf16.msra.mxu1 %v23235_v52  ;;  %v23246_v39 = vld [vmem:[%s32145_s1 + $0x5a4] ss:$12 sps:$4 sm:$0xff]  }
 0x600   : > { %6908 = vmatprep.subr.bf16.mxu1 %v23240_v38 }
 0x603   : > { %6909 = vmatpush2.bf16.msra.mxu1 %v23238_v42 }
 0x604   : > { %6910 = vmatprep.subr.bf16.mxu1 %v23243_v43  ;;  %v23310_v43 = vld [vmem:[%s32146_s7 + $0x484] ss:$16 sps:$4 sm:$0xff]  }
 0x607   : > { %6911 = vmatpush2.bf16.msra.mxu1 %v23241_v2  ;;  %v23308_v2 = vld [vmem:[%s32146_s7 + $0x480] ss:$16 sps:$4 sm:$0xff]  }
 0x608   : > { %6912 = vmatprep.subr.bf16.mxu1 %v23246_v39 }
 0x60b   : > { %6913 = vmatpush2.bf16.msra.mxu1 %v23244_v47  ;;  %v23313_v47 = vld [vmem:[%s32146_s7 + $0x464] ss:$16 sps:$4 sm:$0xff]  }
 0x60c   : > { %6914 = vmatprep.subr.bf16.mxu1 %v23249_v48  ;;  %v23311_v48 = vld [vmem:[%s32146_s7 + $0x460] ss:$16 sps:$4 sm:$0xff]  }
 0x60f   : > { %6915 = vmatpush2.bf16.msra.mxu1 %v23247_v49  ;;  %v23316_v49 = vld [vmem:[%s32146_s7 + $0x444] ss:$16 sps:$4 sm:$0xff]  }
 0x610   : > { %6916 = vmatprep.subr.bf16.mxu1 %v23252_v40  ;;  %v23314_v40 = vld [vmem:[%s32146_s7 + $0x440] ss:$16 sps:$4 sm:$0xff]  }
 0x613   : > { %6917 = vmatpush2.bf16.msra.mxu1 %v23250_v50  ;;  %v23319_v50 = vld [vmem:[%s32146_s7 + $0x424] ss:$16 sps:$4 sm:$0xff]  }
 0x614   : > { %6918 = vmatprep.subr.bf16.mxu1 %v23255_v51  ;;  %v23317_v51 = vld [vmem:[%s32146_s7 + $0x420] ss:$16 sps:$4 sm:$0xff]  }
 0x617   : > { %6919 = vmatpush2.bf16.msra.mxu1 %v23253_v44  ;;  %v23322_v44 = vld [vmem:[%s32146_s7 + $0x404] ss:$16 sps:$4 sm:$0xff]  }
 0x618   : > { %6920 = vmatprep.subr.bf16.mxu1 %v23258_v53  ;;  %v23320_v53 = vld [vmem:[%s32146_s7 + $0x400] ss:$16 sps:$4 sm:$0xff]  }
 0x61b   : > { %6921 = vmatpush2.bf16.msra.mxu1 %v23256_v58  ;;  %v23327_v58 = vld [vmem:[%s32146_s7 + $0x5e4] ss:$16 sps:$4 sm:$0xff]  }
 0x61c   : > { %22216 = vmatprep.subr.bf16.mxu1 %v23259_v21  ;;  %v23330_v21 = vld [vmem:[%s32146_s7 + $0x5ec] ss:$16 sps:$4 sm:$0xff]  }
 0x61e   : > { %6923 = vmatmul.mubr.bf16.vlgmr.msra.gmra.mxu1 %v27077_v33 }
 0x61f   : > { %22217 = vmatpush3.bf16.msra.mxu1 %v23260_v59  ;;  %7003 = vmatprep.mubr.bf16.mxu1 %v27069_v28  ;;  %v23275_v28 = vld [vmem:[%s32146_s7 + $0x3e0] ss:$16 sps:$4 sm:$0xff]  }
 0x620   : > { %22218 = vmatprep.subr.bf16.mxu1 %v23261_v60  ;;  %7739 = vmatpush1.bf16.msra.mxu0 %v23275_v28  ;;  %v23325_v59 = vld [vmem:[%s32146_s7 + $0x5e0] ss:$16 sps:$4 sm:$0xff]  }
 0x621   : > { %7740 = vmatprep.subr.bf16.mxu0 %v23280_v54  ;;  %v23331_v60 = vld [vmem:[%s32146_s7 + $0x5c0] ss:$16 sps:$4 sm:$0xff]  }
 0x622   : > { %v23337_v28 = vld [vmem:[%s32146_s7 + $0x5a0] ss:$16 sps:$4 sm:$0xff]  }
 0x623   : > { %22219 = vmatpush3.bf16.msra.mxu1 %v23262_v61  ;;  %v23333_v61 = vld [vmem:[%s32146_s7 + $0x5c4] ss:$16 sps:$4 sm:$0xff]  }
 0x624   : > { %22220 = vmatprep.subr.bf16.mxu1 %v23263_v62  ;;  %7741 = vmatpush1.bf16.msra.mxu0 %v23278_v55  ;;  %v23345_v55 = vld [vmem:[%s32146_s7 + $0x584] ss:$16 sps:$4 sm:$0xff]  }
 0x625   : > { %7742 = vmatprep.subr.bf16.mxu0 %v23283_v13  ;;  %v23369_v13 = vld [vmem:[%s32146_s7 + $0x504] ss:$16 sps:$4 sm:$0xff]  }
 0x627   : > { %22221 = vmatpush3.bf16.msra.mxu1 %v23264_v63  ;;  %v23339_v63 = vld [vmem:[%s32146_s7 + $0x5a4] ss:$16 sps:$4 sm:$0xff]  }
 0x628   : > { %22222 = vmatprep.subr.bf16.mxu1 %v23265_v0  ;;  %7743 = vmatpush1.bf16.msra.mxu0 %v23281_v15  ;;  %v23375_v15 = vld [vmem:[%s32146_s7 + $0x3ec] ss:$16 sps:$4 sm:$0xff]  }
 0x62b   : > { %22223 = vmatpush3.bf16.msra.mxu1 %v23266_v56 }
 0x62c   : > { %22224 = vmatprep.subr.bf16.mxu1 %v23267_v57  ;;  %v23343_v57 = vld [vmem:[%s32146_s7 + $0x580] ss:$16 sps:$4 sm:$0xff]  }
 0x62f   : > { %22225 = vmatpush3.bf16.msra.mxu1 %v23268_v29 }
 0x630   : > { %22226 = vmatprep.subr.bf16.mxu1 %v23269_v1  ;;  %v23351_v1 = vld [vmem:[%s32146_s7 + $0x564] ss:$16 sps:$4 sm:$0xff]  }
 0x633   : > { %22227 = vmatpush3.bf16.msra.mxu1 %v23270_v5  ;;  %v23349_v5 = vld [vmem:[%s32146_s7 + $0x560] ss:$16 sps:$4 sm:$0xff]  }
 0x634   : > { %22228 = vmatprep.subr.bf16.mxu1 %v23271_v7  ;;  %v23355_v7 = vld [vmem:[%s32146_s7 + $0x540] ss:$16 sps:$4 sm:$0xff]  }
 0x637   : > { %22229 = vmatpush3.bf16.msra.mxu1 %v23272_v9  ;;  %v23357_v9 = vld [vmem:[%s32146_s7 + $0x544] ss:$16 sps:$4 sm:$0xff]  }
 0x638   : > { %22230 = vmatprep.subr.bf16.mxu1 %v23273_v10  ;;  %v23361_v10 = vld [vmem:[%s32146_s7 + $0x520] ss:$16 sps:$4 sm:$0xff]  }
 0x63b   : > { %22231 = vmatpush3.bf16.msra.mxu1 %v23274_v12  ;;  %v23363_v12 = vld [vmem:[%s32146_s7 + $0x524] ss:$16 sps:$4 sm:$0xff]  }
 0x63c   : > { %7779 = vmatprep.subr.bf16.mxu1 %v23327_v58  ;;  %v23328_v58 = vld [vmem:[%s32146_s7 + $0x5e8] ss:$16 sps:$4 sm:$0xff]  }
 0x63e   : > { %7004 = vmatmul.mubr.bf16.vlgmr.msra.gmra.mxu1 %v27077_v33  ;;  %v27378_v46 = vpop.f32.mrf.mxu0  ;;  %v23286_v33 = vld [vmem:[%s32146_s7 + $0x384] ss:$16 sps:$4 sm:$0xff]  }
 0x63f   : > { %7811 = vmatprep.mubr.bf16.mxu1 %v25041_v17  ;;  %7744 = vmatprep.subr.bf16.mxu0 %v23286_v33 }
 0x640   : > { %v27387_v16 = vpop.f32.mrf.mxu0  ;;  %7745 = vmatpush1.bf16.msra.mxu0 %v23284_v19  ;;  %7780 = vmatpush1.bf16.msra.mxu1 %v23325_v59  ;;  %v23334_v59 = vld [vmem:[%s32146_s7 + $0x5c8] ss:$16 sps:$4 sm:$0xff]  }
 0x641   : > { %7746 = vmatprep.subr.bf16.mxu0 %v23289_v4  ;;  %7781 = vmatprep.subr.bf16.mxu1 %v23333_v61  ;;  %v23340_v61 = vld [vmem:[%s32146_s7 + $0x5a8] ss:$16 sps:$4 sm:$0xff]  }
 0x642   : > { %v6084_v18 = vpop.f32.mrf.mxu0 }
 0x644   : > { %v6085_v23 = vpop.f32.mrf.mxu0  ;;  %7747 = vmatpush1.bf16.msra.mxu0 %v23287_v45  ;;  %7782 = vmatpush1.bf16.msra.mxu1 %v23331_v60  ;;  %v23342_v60 = vld [vmem:[%s32146_s7 + $0x5ac] ss:$16 sps:$4 sm:$0xff]  }
 0x645   : > { %7748 = vmatprep.subr.bf16.mxu0 %v23292_v24  ;;  %7783 = vmatprep.subr.bf16.mxu1 %v23339_v63  ;;  %v23348_v63 = vld [vmem:[%s32146_s7 + $0x58c] ss:$16 sps:$4 sm:$0xff]  }
 0x648   : > { %7749 = vmatpush1.bf16.msra.mxu0 %v23290_v25  ;;  %7784 = vmatpush1.bf16.msra.mxu1 %v23337_v28 }
 0x649   : > { %7750 = vmatprep.subr.bf16.mxu0 %v23295_v26  ;;  %7785 = vmatprep.subr.bf16.mxu1 %v23345_v55  ;;  %v23354_v55 = vld [vmem:[%s32146_s7 + $0x56c] ss:$16 sps:$4 sm:$0xff]  }
 0x64c   : > { %7751 = vmatpush1.bf16.msra.mxu0 %v23293_v27  ;;  %7786 = vmatpush1.bf16.msra.mxu1 %v23343_v57 }
 0x64d   : > { %7752 = vmatprep.subr.bf16.mxu0 %v23298_v30  ;;  %7787 = vmatprep.subr.bf16.mxu1 %v23351_v1 }
 0x650   : > { %7753 = vmatpush1.bf16.msra.mxu0 %v23296_v31  ;;  %7788 = vmatpush1.bf16.msra.mxu1 %v23349_v5  ;;  %v23352_v5 = vld [vmem:[%s32146_s7 + $0x568] ss:$16 sps:$4 sm:$0xff]  }
 0x651   : > { %7754 = vmatprep.subr.bf16.mxu0 %v23301_v34  ;;  %7789 = vmatprep.subr.bf16.mxu1 %v23357_v9 }
 0x654   : > { %7755 = vmatpush2.bf16.msra.mxu0 %v23299_v32  ;;  %7790 = vmatpush1.bf16.msra.mxu1 %v23355_v7  ;;  %v23360_v7 = vld [vmem:[%s32146_s7 + $0x54c] ss:$16 sps:$4 sm:$0xff]  }
 0x655   : > { %7756 = vmatprep.subr.bf16.mxu0 %v23304_v35  ;;  %7791 = vmatprep.subr.bf16.mxu1 %v23363_v12  ;;  %v23366_v12 = vld [vmem:[%s32146_s7 + $0x52c] ss:$16 sps:$4 sm:$0xff]  }
 0x658   : > { %7757 = vmatpush2.bf16.msra.mxu0 %v23302_v36  ;;  %7792 = vmatpush1.bf16.msra.mxu1 %v23361_v10  ;;  %v23358_v10 = vld [vmem:[%s32146_s7 + $0x548] ss:$16 sps:$4 sm:$0xff]  }
 0x659   : > { %7758 = vmatprep.subr.bf16.mxu0 %v23307_v37  ;;  %7793 = vmatprep.subr.bf16.mxu1 %v23369_v13  ;;  %v23372_v13 = vld [vmem:[%s32146_s7 + $0x50c] ss:$16 sps:$4 sm:$0xff]  }
 0x65c   : > { %7759 = vmatpush2.bf16.msra.mxu0 %v23305_v22 }
 0x65d   : > { %7760 = vmatprep.subr.bf16.mxu0 %v23310_v43 }
 0x65e   : > { %v22166_v41 = vpop.f32.mrf.mxu0 }
 0x660   : > { %v22167_v52 = vpop.f32.mrf.mxu0  ;;  %7761 = vmatpush2.bf16.msra.mxu0 %v23308_v2 }
 0x661   : > { %v27437_v38 = vadd.f32 %v22167_v52, %v22166_v41  ;;  %7762 = vmatprep.subr.bf16.mxu0 %v23313_v47 }
 0x662   : > { %v22169_v42 = vpop.f32.mrf.mxu0 }
 0x664   : > { %v22170_v39 = vpop.f32.mrf.mxu0  ;;  %7763 = vmatpush2.bf16.msra.mxu0 %v23311_v48 }
 0x665   : > { %7764 = vmatprep.subr.bf16.mxu0 %v23316_v49 }
 0x668   : > { %7765 = vmatpush2.bf16.msra.mxu0 %v23314_v40 }
 0x669   : > { %7766 = vmatprep.subr.bf16.mxu0 %v23319_v50 }
 0x66c   : > { %7767 = vmatpush2.bf16.msra.mxu0 %v23317_v51 }
 0x66d   : > { %7768 = vmatprep.subr.bf16.mxu0 %v23322_v44 }
 0x670   : > { %7769 = vmatpush2.bf16.msra.mxu0 %v23320_v53 }
 0x671   : > { %7861 = vmatprep.subr.bf16.mxu0 %v23330_v21  ;;  %v23336_v21 = vld [vmem:[%s32146_s7 + $0x5cc] ss:$16 sps:$4 sm:$0xff]  }
 0x67e   : > { %v6121_v62 = vpop.f32.mrf.mxu1 }
 0x67f   : > { %v6122_v0 = vadd.f32 %v6121_v62, %v27378_v46  ;;  %v23367_v46 = vld [vmem:[%s32146_s7 + $0x500] ss:$16 sps:$4 sm:$0xff]  }
 0x680   : > { %v6123_v20 = vpop.f32.mrf.mxu1  ;;  %7794 = vmatpush1.bf16.msra.mxu1 %v23367_v46  ;;  %v23364_v46 = vld [vmem:[%s32146_s7 + $0x528] ss:$16 sps:$4 sm:$0xff]  }
 0x681   : > { %v6124_v54 = vadd.f32 %v6123_v20, %v27387_v16  ;;  %7820 = vmatprep.subr.bf16.mxu1 %v23375_v15 }
 0x682   : > { %v6125_v56 = vpop.f32.mrf.mxu1 }
 0x684   : > { %v6126_v29 = vpop.f32.mrf.mxu1 }
 0x69e   : > { %v22188_v16 = vpop.f32.mrf.mxu1  ;;  %v6883_v18 = vpop.f32.mrf.mxu0 }
 0x6a0   : > { %v22189_v33 = vpop.f32.mrf.mxu1  ;;  %v6885_v19 = vpop.f32.mrf.mxu0 }
 0x6a1   : > { %v22190_v23 = vadd.f32 %v22189_v33, %v22188_v16  ;;  %v23370_v16 = vld [vmem:[%s32146_s7 + $0x508] ss:$16 sps:$4 sm:$0xff]  }
 0x6a2   : > { %v22191_v45 = vpop.f32.mrf.mxu1  ;;  %v6887_v4 = vpop.f32.mrf.mxu0 }
 0x6a3   : > { %v6203_v24 = vadd.f32 %v22190_v23, %v27437_v38  ;;  %v23373_v45 = vld [vmem:[%s32146_s7 + $0x3e8] ss:$16 sps:$4 sm:$0xff]   ;;  %v23376_v4 = vld [vmem:[%s32146_s7 + $0xe0] ss:$16 sps:$4 sm:$0xff]  }
 0x6a4   : > { %v22192_v25 = vpop.f32.mrf.mxu1  ;;  %v6888_v26 = vpop.f32.mrf.mxu0 }
 0x6a5   : > { %v23384_v26 = vld [vmem:[%s32146_s7 + $0x3cc] ss:$16 sps:$4 sm:$0xff]  }
 0x6bf   : > { %v22210_v27 = vpop.f32.mrf.mxu0 }
 0x6c1   : > { %v22211_v30 = vpop.f32.mrf.mxu0 }
 0x6c2   : > { %v22212_v28 = vadd.f32 %v22211_v30, %v22210_v27  ;;  %v23387_v27 = vld [vmem:[%s32146_s7 + $0xc4] ss:$16 sps:$4 sm:$0xff]  }
 0x6c3   : > { %v22213_v31 = vpop.f32.mrf.mxu0 }
 0x6c4   : > { %v23382_v31 = vld [vmem:[%s32146_s7 + $0x3c8] ss:$16 sps:$4 sm:$0xff]  }
 0x6c5   : > { %v22214_v34 = vpop.f32.mrf.mxu0 }
 0x6c6   : > { %v23385_v34 = vld [vmem:[%s32146_s7 + $0xc0] ss:$16 sps:$4 sm:$0xff]  }
 0x6de   : > { %v6924_v32 = vpop.f32.mrf.mxu1 }
 0x6df   : > { %v6925_v35 = vadd.f32 %v6924_v32, %v6883_v18  ;;  %v23378_v18 = vld [vmem:[%s32146_s7 + $0xe4] ss:$16 sps:$4 sm:$0xff]   ;;  %v23390_v32 = vld [vmem:[%s32146_s7 + $0x3ac] ss:$16 sps:$4 sm:$0xff]  }
 0x6e0   : > { %v6926_v36 = vpop.f32.mrf.mxu1 }
 0x6e1   : > { %v7011_v41 = vmax.f32 %v6122_v0, %v6925_v35  ;;  %v6927_v37 = vadd.f32 %v6926_v36, %v6885_v19  ;;  %v23393_v35 = vld [vmem:[%s32146_s7 + $0xa4] ss:$16 sps:$4 sm:$0xff]   ;;  %v23388_v36 = vld [vmem:[%s32146_s7 + $0x3a8] ss:$16 sps:$4 sm:$0xff]  }
 0x6e2   : > { %v6928_v22 = vpop.f32.mrf.mxu1 }
 0x6e3   : > { %v7012_v52 = vmax.f32 %v6124_v54, %v6927_v37  ;;  %v23346_v54 = vld [vmem:[%s32146_s7 + $0x588] ss:$16 sps:$4 sm:$0xff]   ;;  %v23396_v37 = vld [vmem:[%s32146_s7 + $0x38c] ss:$16 sps:$4 sm:$0xff]   ;;  %v23399_v22 = vld [vmem:[%s32146_s7 + $0x84] ss:$16 sps:$4 sm:$0xff]  }
 0x6e4   : > { %v6929_v42 = vpop.f32.mrf.mxu1 }
 0x6e5   : > { %v22060_v43 = vpack.c.bf16 %v7012_v52, %v7011_v41  ;;  %v23391_v41 = vld [vmem:[%s32146_s7 + $0xa0] ss:$16 sps:$4 sm:$0xff]   ;;  %v23394_v52 = vld [vmem:[%s32146_s7 + $0x388] ss:$16 sps:$4 sm:$0xff]  }
 0x6e6   : > { %v23397_v42 = vld [vmem:[%s32146_s7 + $0x80] ss:$16 sps:$4 sm:$0xff]  }
 0x6e7   : > { %7027 = vst [vmem:[#allocation3] sm:$0x77] %v22060_v43  ;;  %v23402_v43 = vld [vmem:[%s32146_s7 + $0x36c] ss:$16 sps:$4 sm:$0xff]  }
 0x6ee   : > { %v7127_v2 = vld [vmem:[#allocation3] sm:$0x77] }
 0x6ef   : > { %v20039_v39 = vcombine.low %v7127_v2, %v7127_v2  ;;  %v20040_v47 = vcombine.high %v7127_v2, %v7127_v2  ;;  %v23405_v2 = vld [vmem:[%s32146_s7 + $0x64] ss:$16 sps:$4 sm:$0xff]  }
 0x6f1   : > { %v7244_v38 = vshll.u32 %v20040_v47, 16  ;;  %v7237_v48 = vshll.u32 %v20039_v39, 16  ;;  %v7242_v49 = vshrl.u32 %v20040_v47, 16  ;;  %v7235_v50 = vshrl.u32 %v20039_v39, 16  ;;  %v23400_v39 = vld [vmem:[%s32146_s7 + $0x368] ss:$16 sps:$4 sm:$0xff]  }
 0x6f2   : > { %v23403_v47 = vld [vmem:[%s32146_s7 + $0x60] ss:$16 sps:$4 sm:$0xff]  }
 0x6f3   : > { %v7246_v40 = vrot.slane %v7244_v38, 1  ;;  %v7239_v51 = vrot.slane %v7237_v48, 1  ;;  %v23408_v38 = vld [vmem:[%s32146_s7 + $0x34c] ss:$16 sps:$4 sm:$0xff]   ;;  %v23411_v48 = vld [vmem:[%s32146_s7 + $0x44] ss:$16 sps:$4 sm:$0xff]  }
 0x6f5   : > { %v27526_v44 = vor.u32 %v7246_v40, %v7242_v49  ;;  %v27528_v53 = vor.u32 %v7239_v51, %v7235_v50  ;;  %v23406_v49 = vld [vmem:[%s32146_s7 + $0x348] ss:$16 sps:$4 sm:$0xff]   ;;  %v23409_v40 = vld [vmem:[%s32146_s7 + $0x40] ss:$16 sps:$4 sm:$0xff]   ;;  %v23414_v50 = vld [vmem:[%s32146_s7 + $0x32c] ss:$16 sps:$4 sm:$0xff]  }
 0x6f6   : > { %v23417_v51 = vld [vmem:[%s32146_s7 + $0x24] ss:$16 sps:$4 sm:$0xff]  }
 0x6f7   : > { %7770 = vmatprep.mubr.bf16.mxu0 %v27526_v44 }
 0x6f8   : > { %7771 = vmatmul.mubr.bf16.vlgmr.msra.gmra.mxu0 %v27528_v53 }
 0x6f9   : > { %7862 = vmatpush1.bf16.msra.mxu0 %v23328_v58  ;;  %7893 = vmatprep.mubr.bf16.mxu0 %v25041_v17  ;;  %v23415_v58 = vld [vmem:[%s32146_s7 + $0x20] ss:$16 sps:$4 sm:$0xff]  }
 0x6fa   : > { %7863 = vmatprep.subr.bf16.mxu0 %v23336_v21  ;;  %v23420_v21 = vld [vmem:[%s32146_s7 + $0x30c] ss:$16 sps:$4 sm:$0xff]  }
 0x6fd   : > { %7864 = vmatpush1.bf16.msra.mxu0 %v23334_v59  ;;  %v23423_v59 = vld [vmem:[%s32146_s7 + $0x4] ss:$16 sps:$4 sm:$0xff]  }
 0x6fe   : > { %v22232_v62 = vpop.f32.mrf.mxu1  ;;  %7865 = vmatprep.subr.bf16.mxu0 %v23342_v60  ;;  %v23418_v60 = vld [vmem:[%s32146_s7 + $0x308] ss:$16 sps:$4 sm:$0xff]  }
 0x700   : > { %v22233_v0 = vpop.f32.mrf.mxu1 }
 0x701   : > { %v22234_v20 = vadd.f32 %v22233_v0, %v22232_v62  ;;  %7866 = vmatpush1.bf16.msra.mxu0 %v23340_v61  ;;  %v23421_v61 = vld [vmem:[%s32146_s7] ss:$16 sps:$4 sm:$0xff]   ;;  %v23426_v62 = vld [vmem:[%s32146_s7 + $0x4ec] ss:$16 sps:$4 sm:$0xff]   ;;  %v23424_v0 = vld [vmem:[%s32146_s7 + $0x4e8] ss:$16 sps:$4 sm:$0xff]  }
 0x702   : > { %v22235_v56 = vpop.f32.mrf.mxu1  ;;  %7867 = vmatprep.subr.bf16.mxu0 %v23348_v63  ;;  %v23429_v63 = vld [vmem:[%s32146_s7 + $0x1e4] ss:$16 sps:$4 sm:$0xff]  }
 0x703   : > { %v7006_v57 = vadd.f32 %v22234_v20, %v22212_v28  ;;  %v23427_v28 = vld [vmem:[%s32146_s7 + $0x1e0] ss:$16 sps:$4 sm:$0xff]   ;;  %v23432_v20 = vld [vmem:[%s32146_s7 + $0x4cc] ss:$16 sps:$4 sm:$0xff]   ;;  %v23430_v56 = vld [vmem:[%s32146_s7 + $0x4c8] ss:$16 sps:$4 sm:$0xff]  }
 0x704   : > { %v22236_v29 = vpop.f32.mrf.mxu1 }
 0x705   : > { %v7013_v1 = vmax.f32 %v6203_v24, %v7006_v57  ;;  %7868 = vmatpush1.bf16.msra.mxu0 %v23346_v54  ;;  %v27587_v24 = vld [vmem:[#allocation3] sm:$0x33]  ;;  %v23435_v54 = vld [vmem:[%s32146_s7 + $0x1c4] ss:$16 sps:$4 sm:$0xff]  }
 0x706   : > { %7869 = vmatprep.subr.bf16.mxu0 %v23354_v55  ;;  %v27597_v30 = vcombine.high %v27587_v24, %v27587_v24  ;;  %v23433_v55 = vld [vmem:[%s32146_s7 + $0x1c0] ss:$16 sps:$4 sm:$0xff]   ;;  %v23438_v57 = vld [vmem:[%s32146_s7 + $0x4ac] ss:$16 sps:$4 sm:$0xff]   ;;  %v23441_v29 = vld [vmem:[%s32146_s7 + $0x1a4] ss:$16 sps:$4 sm:$0xff]  }
 0x707   : > { %v22061_v9 = vpack.c.bf16 %v7013_v1, %v7013_v1  ;;  %v23436_v1 = vld [vmem:[%s32146_s7 + $0x4a8] ss:$16 sps:$4 sm:$0xff]  }
 0x709   : > { %7028 = vst [vmem:[#allocation3 + $0x8] sm:$0x7] %v22061_v9  ;;  %7870 = vmatpush1.bf16.msra.mxu0 %v23352_v5  ;;  %v23439_v5 = vld [vmem:[%s32146_s7 + $0x1a0] ss:$16 sps:$4 sm:$0xff]   ;;  %v23447_v9 = vld [vmem:[%s32146_s7 + $0x184] ss:$16 sps:$4 sm:$0xff]  }
 0x70a   : > { %7871 = vmatprep.subr.bf16.mxu0 %v23360_v7  ;;  %v23444_v7 = vld [vmem:[%s32146_s7 + $0x48c] ss:$16 sps:$4 sm:$0xff]  }
 0x70d   : > { %7872 = vmatpush1.bf16.msra.mxu0 %v23358_v10  ;;  %v23442_v10 = vld [vmem:[%s32146_s7 + $0x488] ss:$16 sps:$4 sm:$0xff]  }
 0x70e   : > { %7873 = vmatprep.subr.bf16.mxu0 %v23366_v12  ;;  %v23445_v12 = vld [vmem:[%s32146_s7 + $0x180] ss:$16 sps:$4 sm:$0xff]  }
 0x710   : > { %v23379_v15 = vld [vmem:[#allocation3 + $0x8] ss:$0 sps:$4 sm:$0x77]  }
 0x711   : > { %7874 = vmatpush1.bf16.msra.mxu0 %v23364_v46  ;;  %v7251_v33 = vshll.u32 %v23379_v15, 16  ;;  %v7249_v19 = vshrl.u32 %v23379_v15, 16  ;;  %v23450_v46 = vld [vmem:[%s32146_s7 + $0x46c] ss:$16 sps:$4 sm:$0xff]   ;;  %v23448_v15 = vld [vmem:[%s32146_s7 + $0x468] ss:$16 sps:$4 sm:$0xff]  }
 0x712   : > { %7875 = vmatprep.subr.bf16.mxu0 %v23372_v13  ;;  %v23453_v13 = vld [vmem:[%s32146_s7 + $0x164] ss:$16 sps:$4 sm:$0xff]  }
 0x713   : > { %v7253_v23 = vrot.slane %v7251_v33, 1  ;;  %v23459_v33 = vld [vmem:[%s32146_s7 + $0x144] ss:$16 sps:$4 sm:$0xff]  }
 0x715   : > { %7876 = vmatpush1.bf16.msra.mxu0 %v23370_v16  ;;  %v7254_v25 = vor.u32 %v7253_v23, %v7249_v19  ;;  %v23451_v16 = vld [vmem:[%s32146_s7 + $0x160] ss:$16 sps:$4 sm:$0xff]   ;;  %v23454_v19 = vld [vmem:[%s32146_s7 + $0x448] ss:$16 sps:$4 sm:$0xff]  }
 0x716   : > { %8393 = vmatprep.subr.bf16.mxu0 %v23378_v18  ;;  %v23456_v18 = vld [vmem:[%s32146_s7 + $0x44c] ss:$16 sps:$4 sm:$0xff]   ;;  %v23457_v23 = vld [vmem:[%s32146_s7 + $0x140] ss:$16 sps:$4 sm:$0xff]  }
 0x717   : > { %7812 = vmatmul.mubr.bf16.vlgmr.msra.gmra.mxu1 %v7254_v25 }
 0x718   : > { %7894 = vmatmul.mubr.bf16.vlgmr.msra.gmra.mxu0 %v7254_v25  ;;  %7821 = vmatpush1.bf16.msra.mxu1 %v23373_v45  ;;  %v23462_v45 = vld [vmem:[%s32146_s7 + $0x42c] ss:$16 sps:$4 sm:$0xff]   ;;  %v23460_v25 = vld [vmem:[%s32146_s7 + $0x428] ss:$16 sps:$4 sm:$0xff]  }
 0x719   : > { %8394 = vmatpush1.bf16.msra.mxu0 %v23376_v4  ;;  %7852 = vmatprep.mubr.bf16.mxu1 %v27526_v44  ;;  %v23412_v44 = vld [vmem:[%s32146_s7 + $0x328] ss:$16 sps:$4 sm:$0xff]   ;;  %v23465_v4 = vld [vmem:[%s32146_s7 + $0x124] ss:$16 sps:$4 sm:$0xff]  }
 0x71a   : > { %8425 = vmatprep.mubr.bf16.mxu0 %v27597_v30  ;;  %7822 = vmatprep.subr.bf16.mxu1 %v23384_v26  ;;  %v23463_v26 = vld [vmem:[%s32146_s7 + $0x120] ss:$16 sps:$4 sm:$0xff]  }
 0x71b   : > { %8395 = vmatprep.subr.bf16.mxu0 %v23387_v27  ;;  %v23468_v27 = vld [vmem:[%s32146_s7 + $0x40c] ss:$16 sps:$4 sm:$0xff]  }
 0x71c   : > { %7823 = vmatpush1.bf16.msra.mxu1 %v23382_v31  ;;  %v23471_v31 = vld [vmem:[%s32146_s7 + $0x104] ss:$16 sps:$4 sm:$0xff]  }
 0x71d   : > { %8396 = vmatpush1.bf16.msra.mxu0 %v23385_v34  ;;  %7824 = vmatprep.subr.bf16.mxu1 %v23390_v32  ;;  %v23466_v34 = vld [vmem:[%s32146_s7 + $0x408] ss:$16 sps:$4 sm:$0xff]   ;;  %v23469_v32 = vld [vmem:[%s32146_s7 + $0x100] ss:$16 sps:$4 sm:$0xff]  }
 0x71e   : > { %8397 = vmatprep.subr.bf16.mxu0 %v23393_v35  ;;  %v23474_v35 = vld [vmem:[%s32146_s7 + $0x2e4] ss:$16 sps:$4 sm:$0xff]  }
 0x720   : > { %7825 = vmatpush1.bf16.msra.mxu1 %v23388_v36  ;;  %v23477_v36 = vld [vmem:[%s32146_s7 + $0x2ec] ss:$16 sps:$4 sm:$0xff]  }
 0x721   : > { %8398 = vmatpush1.bf16.msra.mxu0 %v23391_v41  ;;  %7826 = vmatprep.subr.bf16.mxu1 %v23396_v37  ;;  %v23472_v41 = vld [vmem:[%s32146_s7 + $0x2e0] ss:$16 sps:$4 sm:$0xff]   ;;  %v23475_v37 = vld [vmem:[%s32146_s7 + $0x2e8] ss:$16 sps:$4 sm:$0xff]  }
 0x722   : > { %8399 = vmatprep.subr.bf16.mxu0 %v23399_v22  ;;  %v27789_v22 = vcombine.low %v27587_v24, %v27587_v24  ;;  %v23478_v24 = vld [vmem:[%s32146_s7 + $0x2c0] ss:$16 sps:$4 sm:$0xff]  }
 0x724   : > { %7827 = vmatpush1.bf16.msra.mxu1 %v23394_v52  ;;  %v23480_v52 = vld [vmem:[%s32146_s7 + $0x2c4] ss:$16 sps:$4 sm:$0xff]  }
 0x725   : > { %8400 = vmatpush1.bf16.msra.mxu0 %v23397_v42  ;;  %7828 = vmatprep.subr.bf16.mxu1 %v23402_v43  ;;  %v23483_v42 = vld [vmem:[%s32146_s7 + $0x2cc] ss:$16 sps:$4 sm:$0xff]   ;;  %v23481_v43 = vld [vmem:[%s32146_s7 + $0x2c8] ss:$16 sps:$4 sm:$0xff]  }
 0x726   : > { %8401 = vmatprep.subr.bf16.mxu0 %v23405_v2  ;;  %v23486_v2 = vld [vmem:[%s32146_s7 + $0x2a4] ss:$16 sps:$4 sm:$0xff]  }
 0x728   : > { %7829 = vmatpush1.bf16.msra.mxu1 %v23400_v39  ;;  %v23484_v39 = vld [vmem:[%s32146_s7 + $0x2a0] ss:$16 sps:$4 sm:$0xff]  }
 0x729   : > { %8402 = vmatpush1.bf16.msra.mxu0 %v23403_v47  ;;  %7830 = vmatprep.subr.bf16.mxu1 %v23408_v38  ;;  %v23487_v47 = vld [vmem:[%s32146_s7 + $0x2a8] ss:$16 sps:$4 sm:$0xff]   ;;  %v23492_v38 = vld [vmem:[%s32146_s7 + $0x284] ss:$16 sps:$4 sm:$0xff]  }
 0x72a   : > { %8403 = vmatprep.subr.bf16.mxu0 %v23411_v48  ;;  %v23495_v48 = vld [vmem:[%s32146_s7 + $0x28c] ss:$16 sps:$4 sm:$0xff]  }
 0x72c   : > { %7831 = vmatpush1.bf16.msra.mxu1 %v23406_v49  ;;  %v23490_v49 = vld [vmem:[%s32146_s7 + $0x280] ss:$16 sps:$4 sm:$0xff]  }
 0x72d   : > { %8404 = vmatpush1.bf16.msra.mxu0 %v23409_v40  ;;  %7832 = vmatprep.subr.bf16.mxu1 %v23414_v50  ;;  %v23493_v40 = vld [vmem:[%s32146_s7 + $0x288] ss:$16 sps:$4 sm:$0xff]   ;;  %v23498_v50 = vld [vmem:[%s32146_s7 + $0x264] ss:$16 sps:$4 sm:$0xff]  }
 0x72e   : > { %8405 = vmatprep.subr.bf16.mxu0 %v23417_v51  ;;  %v23501_v51 = vld [vmem:[%s32146_s7 + $0x26c] ss:$16 sps:$4 sm:$0xff]  }
 0x730   : > { %7833 = vmatpush1.bf16.msra.mxu1 %v23412_v44  ;;  %v23496_v44 = vld [vmem:[%s32146_s7 + $0x260] ss:$16 sps:$4 sm:$0xff]  }
 0x731   : > { %8406 = vmatpush1.bf16.msra.mxu0 %v23415_v58  ;;  %7834 = vmatprep.subr.bf16.mxu1 %v23420_v21  ;;  %v23499_v58 = vld [vmem:[%s32146_s7 + $0x268] ss:$16 sps:$4 sm:$0xff]   ;;  %v23504_v21 = vld [vmem:[%s32146_s7 + $0x244] ss:$16 sps:$4 sm:$0xff]  }
 0x732   : > { %8407 = vmatprep.subr.bf16.mxu0 %v23423_v59  ;;  %v23507_v59 = vld [vmem:[%s32146_s7 + $0x24c] ss:$16 sps:$4 sm:$0xff]  }
 0x734   : > { %7835 = vmatpush1.bf16.msra.mxu1 %v23418_v60  ;;  %v23502_v60 = vld [vmem:[%s32146_s7 + $0x240] ss:$16 sps:$4 sm:$0xff]  }
 0x735   : > { %8408 = vmatpush1.bf16.msra.mxu0 %v23421_v61  ;;  %7836 = vmatprep.subr.bf16.mxu1 %v23426_v62  ;;  %v23505_v61 = vld [vmem:[%s32146_s7 + $0x248] ss:$16 sps:$4 sm:$0xff]   ;;  %v23510_v62 = vld [vmem:[%s32146_s7 + $0x224] ss:$16 sps:$4 sm:$0xff]  }
 0x736   : > { %8409 = vmatprep.subr.bf16.mxu0 %v23429_v63  ;;  %v23513_v63 = vld [vmem:[%s32146_s7 + $0x22c] ss:$16 sps:$4 sm:$0xff]  }
 0x738   : > { %7837 = vmatpush2.bf16.msra.mxu1 %v23424_v0  ;;  %v23508_v0 = vld [vmem:[%s32146_s7 + $0x220] ss:$16 sps:$4 sm:$0xff]  }
 0x739   : > { %8410 = vmatpush2.bf16.msra.mxu0 %v23427_v28  ;;  %7838 = vmatprep.subr.bf16.mxu1 %v23432_v20  ;;  %v23511_v28 = vld [vmem:[%s32146_s7 + $0x228] ss:$16 sps:$4 sm:$0xff]   ;;  %v23516_v20 = vld [vmem:[%s32146_s7 + $0x204] ss:$16 sps:$4 sm:$0xff]  }
 0x73a   : > { %8411 = vmatprep.subr.bf16.mxu0 %v23435_v54  ;;  %v23519_v54 = vld [vmem:[%s32146_s7 + $0x20c] ss:$16 sps:$4 sm:$0xff]  }
 0x73c   : > { %7839 = vmatpush2.bf16.msra.mxu1 %v23430_v56  ;;  %v23514_v56 = vld [vmem:[%s32146_s7 + $0x200] ss:$16 sps:$4 sm:$0xff]  }
 0x73d   : > { %8412 = vmatpush2.bf16.msra.mxu0 %v23433_v55  ;;  %7840 = vmatprep.subr.bf16.mxu1 %v23438_v57  ;;  %v23517_v55 = vld [vmem:[%s32146_s7 + $0x208] ss:$16 sps:$4 sm:$0xff]  }
 0x73e   : > { %8413 = vmatprep.subr.bf16.mxu0 %v23441_v29  ;;  %v27879_v57 = vld [vmem:[#allocation3] sm:$0x66] }
 0x73f   : > { %v23523_v29 = vld [vmem:[%s32146_s7 + $0xec] ss:$16 sps:$4 sm:$0xff]  }
 0x740   : > { %7841 = vmatpush2.bf16.msra.mxu1 %v23436_v1  ;;  %v23526_v1 = vld [vmem:[%s32146_s7 + $0x6e4] ss:$16 sps:$4 sm:$0xff]  }
 0x741   : > { %8414 = vmatpush2.bf16.msra.mxu0 %v23439_v5  ;;  %7842 = vmatprep.subr.bf16.mxu1 %v23444_v7  ;;  %v20334_v5 = vcombine.high %v27879_v57, %v27879_v57  ;;  %v23521_v7 = vld [vmem:[%s32146_s7 + $0xe8] ss:$16 sps:$4 sm:$0xff]  }
 0x742   : > { %8415 = vmatprep.subr.bf16.mxu0 %v23447_v9  ;;  %v23520_v9 = vld [vmem:[#allocation3 + $0x8] ss:$0 sps:$4 sm:$0x33]  }
 0x744   : > { %7843 = vmatpush2.bf16.msra.mxu1 %v23442_v10  ;;  %v23524_v10 = vld [vmem:[%s32146_s7 + $0x6e0] ss:$16 sps:$4 sm:$0xff]  }
 0x745   : > { %8416 = vmatpush2.bf16.msra.mxu0 %v23445_v12  ;;  %7844 = vmatprep.subr.bf16.mxu1 %v23450_v46  ;;  %v23531_v12 = vld [vmem:[%s32146_s7 + $0xcc] ss:$16 sps:$4 sm:$0xff]   ;;  %v23534_v46 = vld [vmem:[%s32146_s7 + $0x6c4] ss:$16 sps:$4 sm:$0xff]  }
 0x746   : > { %8417 = vmatprep.subr.bf16.mxu0 %v23453_v13  ;;  %v27901_v13 = vrot.slane %v20334_v5, 1  ;;  %v23604_v5 = vld [vmem:[%s32146_s7 + $0x740] ss:$16 sps:$4 sm:$0xff]  }
 0x748   : > { %7845 = vmatpush2.bf16.msra.mxu1 %v23448_v15  ;;  %v23529_v15 = vld [vmem:[%s32146_s7 + $0xc8] ss:$16 sps:$4 sm:$0xff]  }
 0x749   : > { %8418 = vmatpush2.bf16.msra.mxu0 %v23451_v16  ;;  %7846 = vmatprep.subr.bf16.mxu1 %v23456_v18  ;;  %v23532_v16 = vld [vmem:[%s32146_s7 + $0x6c0] ss:$16 sps:$4 sm:$0xff]   ;;  %v23537_v18 = vld [vmem:[%s32146_s7 + $0xac] ss:$16 sps:$4 sm:$0xff]  }
 0x74a   : > { %8419 = vmatprep.subr.bf16.mxu0 %v23459_v33  ;;  %v23535_v33 = vld [vmem:[%s32146_s7 + $0xa8] ss:$16 sps:$4 sm:$0xff]  }
 0x74c   : > { %7847 = vmatpush2.bf16.msra.mxu1 %v23454_v19  ;;  %v23538_v19 = vld [vmem:[%s32146_s7 + $0x6a0] ss:$16 sps:$4 sm:$0xff]  }
 0x74d   : > { %8420 = vmatpush2.bf16.msra.mxu0 %v23457_v23  ;;  %7848 = vmatprep.subr.bf16.mxu1 %v23462_v45  ;;  %v23543_v23 = vld [vmem:[%s32146_s7 + $0x8c] ss:$16 sps:$4 sm:$0xff]   ;;  %v23546_v45 = vld [vmem:[%s32146_s7 + $0x684] ss:$16 sps:$4 sm:$0xff]  }
 0x74e   : > { %8421 = vmatprep.subr.bf16.mxu0 %v23465_v4  ;;  %v23541_v4 = vld [vmem:[%s32146_s7 + $0x88] ss:$16 sps:$4 sm:$0xff]  }
 0x750   : > { %7849 = vmatpush2.bf16.msra.mxu1 %v23460_v25  ;;  %v23544_v25 = vld [vmem:[%s32146_s7 + $0x680] ss:$16 sps:$4 sm:$0xff]  }
 0x751   : > { %8422 = vmatpush2.bf16.msra.mxu0 %v23463_v26  ;;  %7850 = vmatprep.subr.bf16.mxu1 %v23468_v27  ;;  %v23549_v26 = vld [vmem:[%s32146_s7 + $0x6c] ss:$16 sps:$4 sm:$0xff]   ;;  %v23552_v27 = vld [vmem:[%s32146_s7 + $0x664] ss:$16 sps:$4 sm:$0xff]  }
 0x752   : > { %8423 = vmatprep.subr.bf16.mxu0 %v23471_v31  ;;  %v23547_v31 = vld [vmem:[%s32146_s7 + $0x68] ss:$16 sps:$4 sm:$0xff]  }
 0x754   : > { %7851 = vmatpush2.bf16.msra.mxu1 %v23466_v34  ;;  %v23550_v34 = vld [vmem:[%s32146_s7 + $0x660] ss:$16 sps:$4 sm:$0xff]  }
 0x755   : > { %8424 = vmatpush2.bf16.msra.mxu0 %v23469_v32  ;;  %8434 = vmatprep.subr.bf16.mxu1 %v23474_v35  ;;  %v23555_v32 = vld [vmem:[%s32146_s7 + $0x4c] ss:$16 sps:$4 sm:$0xff]   ;;  %v23558_v35 = vld [vmem:[%s32146_s7 + $0x644] ss:$16 sps:$4 sm:$0xff]  }
 0x756   : > { %8516 = vmatprep.subr.bf16.mxu0 %v23477_v36  ;;  %v23553_v36 = vld [vmem:[%s32146_s7 + $0x48] ss:$16 sps:$4 sm:$0xff]  }
 0x757   : > { %7853 = vmatmul.mubr.bf16.vlgmr.msra.gmra.mxu1 %v27528_v53  ;;  %v23489_v53 = vld [vmem:[%s32146_s7 + $0x2ac] ss:$16 sps:$4 sm:$0xff]  }
 0x758   : > { %8426 = vmatmul.mubr.bf16.vlgmr.msra.gmra.mxu0 %v27789_v22  ;;  %8435 = vmatpush1.bf16.msra.mxu1 %v23472_v41  ;;  %v23556_v41 = vld [vmem:[%s32146_s7 + $0x640] ss:$16 sps:$4 sm:$0xff]  }
 0x759   : > { %8517 = vmatpush1.bf16.msra.mxu0 %v23475_v37  ;;  %8436 = vmatprep.subr.bf16.mxu1 %v23480_v52  ;;  %v23561_v37 = vld [vmem:[%s32146_s7 + $0x2c] ss:$16 sps:$4 sm:$0xff]   ;;  %v23564_v52 = vld [vmem:[%s32146_s7 + $0x624] ss:$16 sps:$4 sm:$0xff]  }
 0x75a   : > { %8518 = vmatprep.subr.bf16.mxu0 %v23483_v42  ;;  %8466 = vmatprep.mubr.bf16.mxu1 %v25041_v17  ;;  %v23559_v42 = vld [vmem:[%s32146_s7 + $0x28] ss:$16 sps:$4 sm:$0xff]  }
 0x75b   : > { %8548 = vmatprep.mubr.bf16.mxu0 %v25041_v17 }
 0x75c   : > { %8437 = vmatpush1.bf16.msra.mxu1 %v23478_v24  ;;  %v23562_v24 = vld [vmem:[%s32146_s7 + $0x620] ss:$16 sps:$4 sm:$0xff]  }
 0x75d   : > { %8519 = vmatpush1.bf16.msra.mxu0 %v23481_v43  ;;  %8438 = vmatprep.subr.bf16.mxu1 %v23486_v2  ;;  %v23567_v43 = vld [vmem:[%s32146_s7 + $0xc] ss:$16 sps:$4 sm:$0xff]   ;;  %v23570_v2 = vld [vmem:[%s32146_s7 + $0x604] ss:$16 sps:$4 sm:$0xff]  }
 0x75e   : > { %8520 = vmatprep.subr.bf16.mxu0 %v23489_v53  ;;  %v23565_v53 = vld [vmem:[%s32146_s7 + $0x8] ss:$16 sps:$4 sm:$0xff]  }
 0x760   : > { %8439 = vmatpush1.bf16.msra.mxu1 %v23484_v39  ;;  %v23568_v39 = vld [vmem:[%s32146_s7 + $0x600] ss:$16 sps:$4 sm:$0xff]  }
 0x761   : > { %8521 = vmatpush1.bf16.msra.mxu0 %v23487_v47  ;;  %8440 = vmatprep.subr.bf16.mxu1 %v23492_v38  ;;  %v23573_v47 = vld [vmem:[%s32146_s7 + $0x1ec] ss:$16 sps:$4 sm:$0xff]   ;;  %v23576_v38 = vld [vmem:[%s32146_s7 + $0x7e4] ss:$16 sps:$4 sm:$0xff]  }
 0x762   : > { %8522 = vmatprep.subr.bf16.mxu0 %v23495_v48  ;;  %v23571_v48 = vld [vmem:[%s32146_s7 + $0x1e8] ss:$16 sps:$4 sm:$0xff]  }
 0x764   : > { %8441 = vmatpush1.bf16.msra.mxu1 %v23490_v49  ;;  %v23574_v49 = vld [vmem:[%s32146_s7 + $0x7e0] ss:$16 sps:$4 sm:$0xff]  }
 0x765   : > { %8523 = vmatpush1.bf16.msra.mxu0 %v23493_v40  ;;  %8442 = vmatprep.subr.bf16.mxu1 %v23498_v50  ;;  %v23579_v40 = vld [vmem:[%s32146_s7 + $0x1cc] ss:$16 sps:$4 sm:$0xff]   ;;  %v23582_v50 = vld [vmem:[%s32146_s7 + $0x7c4] ss:$16 sps:$4 sm:$0xff]  }
 0x766   : > { %8524 = vmatprep.subr.bf16.mxu0 %v23501_v51  ;;  %v23577_v51 = vld [vmem:[%s32146_s7 + $0x1c8] ss:$16 sps:$4 sm:$0xff]  }
 0x768   : > { %8443 = vmatpush1.bf16.msra.mxu1 %v23496_v44  ;;  %v23580_v44 = vld [vmem:[%s32146_s7 + $0x7c0] ss:$16 sps:$4 sm:$0xff]  }
 0x769   : > { %8525 = vmatpush1.bf16.msra.mxu0 %v23499_v58  ;;  %8444 = vmatprep.subr.bf16.mxu1 %v23504_v21  ;;  %v23585_v58 = vld [vmem:[%s32146_s7 + $0x1ac] ss:$16 sps:$4 sm:$0xff]   ;;  %v23588_v21 = vld [vmem:[%s32146_s7 + $0x7a4] ss:$16 sps:$4 sm:$0xff]  }
 0x76a   : > { %8526 = vmatprep.subr.bf16.mxu0 %v23507_v59  ;;  %v23583_v59 = vld [vmem:[%s32146_s7 + $0x1a8] ss:$16 sps:$4 sm:$0xff]  }
 0x76c   : > { %8445 = vmatpush1.bf16.msra.mxu1 %v23502_v60  ;;  %v23586_v60 = vld [vmem:[%s32146_s7 + $0x7a0] ss:$16 sps:$4 sm:$0xff]  }
 0x76d   : > { %8527 = vmatpush1.bf16.msra.mxu0 %v23505_v61  ;;  %8446 = vmatprep.subr.bf16.mxu1 %v23510_v62  ;;  %v23591_v61 = vld [vmem:[%s32146_s7 + $0x18c] ss:$16 sps:$4 sm:$0xff]   ;;  %v23594_v62 = vld [vmem:[%s32146_s7 + $0x784] ss:$16 sps:$4 sm:$0xff]  }
 0x76e   : > { %8528 = vmatprep.subr.bf16.mxu0 %v23513_v63  ;;  %v23589_v63 = vld [vmem:[%s32146_s7 + $0x188] ss:$16 sps:$4 sm:$0xff]  }
 0x770   : > { %8447 = vmatpush1.bf16.msra.mxu1 %v23508_v0  ;;  %v23592_v0 = vld [vmem:[%s32146_s7 + $0x780] ss:$16 sps:$4 sm:$0xff]  }
 0x771   : > { %8529 = vmatpush1.bf16.msra.mxu0 %v23511_v28  ;;  %8448 = vmatprep.subr.bf16.mxu1 %v23516_v20  ;;  %v23597_v28 = vld [vmem:[%s32146_s7 + $0x16c] ss:$16 sps:$4 sm:$0xff]   ;;  %v23600_v20 = vld [vmem:[%s32146_s7 + $0x764] ss:$16 sps:$4 sm:$0xff]  }
 0x772   : > { %8530 = vmatprep.subr.bf16.mxu0 %v23519_v54  ;;  %v23595_v54 = vld [vmem:[%s32146_s7 + $0x168] ss:$16 sps:$4 sm:$0xff]  }
 0x774   : > { %8449 = vmatpush1.bf16.msra.mxu1 %v23514_v56  ;;  %v23598_v56 = vld [vmem:[%s32146_s7 + $0x760] ss:$16 sps:$4 sm:$0xff]  }
 0x775   : > { %8531 = vmatpush1.bf16.msra.mxu0 %v23517_v55  ;;  %8475 = vmatprep.subr.bf16.mxu1 %v23523_v29  ;;  %v23603_v55 = vld [vmem:[%s32146_s7 + $0x14c] ss:$16 sps:$4 sm:$0xff]   ;;  %v23606_v29 = vld [vmem:[%s32146_s7 + $0x744] ss:$16 sps:$4 sm:$0xff]  }
 0x776   : > { %9150 = vmatprep.subr.bf16.mxu0 %v23526_v1  ;;  %v23601_v1 = vld [vmem:[%s32146_s7 + $0x148] ss:$16 sps:$4 sm:$0xff]  }
 0x777   : > { %8467 = vmatmul.mubr.bf16.vlgmr.msra.gmra.mxu1 %v23520_v9 }
 0x778   : > { %8549 = vmatmul.mubr.bf16.vlgmr.msra.gmra.mxu0 %v23520_v9  ;;  %8476 = vmatpush1.bf16.msra.mxu1 %v23521_v7  ;;  %v23609_v7 = vld [vmem:[%s32146_s7 + $0x12c] ss:$16 sps:$4 sm:$0xff]   ;;  %v23612_v9 = vld [vmem:[%s32146_s7 + $0x724] ss:$16 sps:$4 sm:$0xff]  }
 0x779   : > { %8507 = vmatprep.mubr.bf16.mxu1 %v27597_v30  ;;  %9151 = vmatpush1.bf16.msra.mxu0 %v23524_v10  ;;  %v23540_v30 = vld [vmem:[%s32146_s7 + $0x6a4] ss:$16 sps:$4 sm:$0xff]   ;;  %v23607_v10 = vld [vmem:[%s32146_s7 + $0x128] ss:$16 sps:$4 sm:$0xff]  }
 0x77a   : > { %9182 = vmatprep.mubr.bf16.mxu0 %v27901_v13  ;;  %8477 = vmatprep.subr.bf16.mxu1 %v23531_v12  ;;  %v23610_v12 = vld [vmem:[%s32146_s7 + $0x720] ss:$16 sps:$4 sm:$0xff]  }
 0x77b   : > { %9152 = vmatprep.subr.bf16.mxu0 %v23534_v46  ;;  %v23615_v46 = vld [vmem:[%s32146_s7 + $0x10c] ss:$16 sps:$4 sm:$0xff]  }
 0x77c   : > { %8478 = vmatpush1.bf16.msra.mxu1 %v23529_v15  ;;  %v23618_v15 = vld [vmem:[%s32146_s7 + $0x704] ss:$16 sps:$4 sm:$0xff]  }
 0x77d   : > { %9153 = vmatpush1.bf16.msra.mxu0 %v23532_v16  ;;  %8479 = vmatprep.subr.bf16.mxu1 %v23537_v18  ;;  %v23613_v16 = vld [vmem:[%s32146_s7 + $0x108] ss:$16 sps:$4 sm:$0xff]   ;;  %v23616_v18 = vld [vmem:[%s32146_s7 + $0x700] ss:$16 sps:$4 sm:$0xff]  }
 0x77e   : > { %9154 = vmatprep.subr.bf16.mxu0 %v23540_v30  ;;  %v23621_v30 = vld [vmem:[%s32146_s7 + $0x8e4] ss:$16 sps:$4 sm:$0xff]  }
 0x780   : > { %8480 = vmatpush1.bf16.msra.mxu1 %v23535_v33  ;;  %v20333_v33 = vcombine.low %v27879_v57, %v27879_v57  ;;  %v23627_v57 = vld [vmem:[%s32146_s7 + $0x8c4] ss:$16 sps:$4 sm:$0xff]  }
 0x781   : > { %9155 = vmatpush1.bf16.msra.mxu0 %v23538_v19  ;;  %8481 = vmatprep.subr.bf16.mxu1 %v23543_v23  ;;  %v23624_v19 = vld [vmem:[%s32146_s7 + $0x8ec] ss:$16 sps:$4 sm:$0xff]   ;;  %v23619_v23 = vld [vmem:[%s32146_s7 + $0x8e0] ss:$16 sps:$4 sm:$0xff]  }
 0x782   : > { %9156 = vmatprep.subr.bf16.mxu0 %v23546_v45  ;;  %v23622_v45 = vld [vmem:[%s32146_s7 + $0x8e8] ss:$16 sps:$4 sm:$0xff]  }
 0x784   : > { %8482 = vmatpush1.bf16.msra.mxu1 %v23541_v4  ;;  %v28096_v4 = vrot.slane %v20333_v33, 1  ;;  %v23680_v33 = vld [vmem:[%s32146_s7 + $0x668] ss:$16 sps:$4 sm:$0xff]  }
 0x785   : > { %9157 = vmatpush1.bf16.msra.mxu0 %v23544_v25  ;;  %8483 = vmatprep.subr.bf16.mxu1 %v23549_v26  ;;  %v23630_v25 = vld [vmem:[%s32146_s7 + $0x8cc] ss:$16 sps:$4 sm:$0xff]  }
 0x786   : > { %9158 = vmatprep.subr.bf16.mxu0 %v23552_v27  ;;  %v23625_v27 = vld [vmem:[%s32146_s7 + $0x8c0] ss:$16 sps:$4 sm:$0xff]  }
 0x788   : > { %8484 = vmatpush1.bf16.msra.mxu1 %v23547_v31 }
 0x789   : > { %9159 = vmatpush1.bf16.msra.mxu0 %v23550_v34  ;;  %8485 = vmatprep.subr.bf16.mxu1 %v23555_v32  ;;  %v23628_v34 = vld [vmem:[%s32146_s7 + $0x8c8] ss:$16 sps:$4 sm:$0xff]   ;;  %v23633_v32 = vld [vmem:[%s32146_s7 + $0x8a4] ss:$16 sps:$4 sm:$0xff]  }
 0x78a   : > { %9160 = vmatprep.subr.bf16.mxu0 %v23558_v35 }
 0x78c   : > { %8486 = vmatpush1.bf16.msra.mxu1 %v23553_v36  ;;  %v23631_v36 = vld [vmem:[%s32146_s7 + $0x8a0] ss:$16 sps:$4 sm:$0xff]  }
 0x78d   : > { %9161 = vmatpush1.bf16.msra.mxu0 %v23556_v41  ;;  %8487 = vmatprep.subr.bf16.mxu1 %v23561_v37  ;;  %v23634_v37 = vld [vmem:[%s32146_s7 + $0x8a8] ss:$16 sps:$4 sm:$0xff]  }
 0x78e   : > { %9162 = vmatprep.subr.bf16.mxu0 %v23564_v52  ;;  %v23639_v52 = vld [vmem:[%s32146_s7 + $0x884] ss:$16 sps:$4 sm:$0xff]  }
 0x790   : > { %8488 = vmatpush1.bf16.msra.mxu1 %v23559_v42  ;;  %v23642_v42 = vld [vmem:[%s32146_s7 + $0x88c] ss:$16 sps:$4 sm:$0xff]  }
 0x791   : > { %9163 = vmatpush1.bf16.msra.mxu0 %v23562_v24  ;;  %8489 = vmatprep.subr.bf16.mxu1 %v23567_v43  ;;  %v23637_v24 = vld [vmem:[%s32146_s7 + $0x880] ss:$16 sps:$4 sm:$0xff]   ;;  %v23640_v43 = vld [vmem:[%s32146_s7 + $0x888] ss:$16 sps:$4 sm:$0xff]  }
 0x792   : > { %9164 = vmatprep.subr.bf16.mxu0 %v23570_v2  ;;  %v23645_v2 = vld [vmem:[%s32146_s7 + $0x864] ss:$16 sps:$4 sm:$0xff]  }
 0x794   : > { %8490 = vmatpush1.bf16.msra.mxu1 %v23565_v53  ;;  %v23648_v53 = vld [vmem:[%s32146_s7 + $0x86c] ss:$16 sps:$4 sm:$0xff]  }
 0x795   : > { %9165 = vmatpush1.bf16.msra.mxu0 %v23568_v39  ;;  %8491 = vmatprep.subr.bf16.mxu1 %v23573_v47  ;;  %v23643_v39 = vld [vmem:[%s32146_s7 + $0x860] ss:$16 sps:$4 sm:$0xff]   ;;  %v23646_v47 = vld [vmem:[%s32146_s7 + $0x868] ss:$16 sps:$4 sm:$0xff]  }
 0x796   : > { %9166 = vmatprep.subr.bf16.mxu0 %v23576_v38  ;;  %v23651_v38 = vld [vmem:[%s32146_s7 + $0x844] ss:$16 sps:$4 sm:$0xff]  }
 0x798   : > { %8492 = vmatpush2.bf16.msra.mxu1 %v23571_v48  ;;  %v23654_v48 = vld [vmem:[%s32146_s7 + $0x84c] ss:$16 sps:$4 sm:$0xff]  }
 0x799   : > { %9167 = vmatpush2.bf16.msra.mxu0 %v23574_v49  ;;  %8493 = vmatprep.subr.bf16.mxu1 %v23579_v40  ;;  %v23649_v49 = vld [vmem:[%s32146_s7 + $0x840] ss:$16 sps:$4 sm:$0xff]   ;;  %v23652_v40 = vld [vmem:[%s32146_s7 + $0x848] ss:$16 sps:$4 sm:$0xff]  }
 0x79a   : > { %9168 = vmatprep.subr.bf16.mxu0 %v23582_v50  ;;  %v23657_v50 = vld [vmem:[%s32146_s7 + $0x824] ss:$16 sps:$4 sm:$0xff]  }
 0x79c   : > { %8494 = vmatpush2.bf16.msra.mxu1 %v23577_v51  ;;  %v23660_v51 = vld [vmem:[%s32146_s7 + $0x82c] ss:$16 sps:$4 sm:$0xff]  }
 0x79d   : > { %9169 = vmatpush2.bf16.msra.mxu0 %v23580_v44  ;;  %8495 = vmatprep.subr.bf16.mxu1 %v23585_v58  ;;  %v23655_v44 = vld [vmem:[%s32146_s7 + $0x820] ss:$16 sps:$4 sm:$0xff]   ;;  %v23658_v58 = vld [vmem:[%s32146_s7 + $0x828] ss:$16 sps:$4 sm:$0xff]  }
 0x79e   : > { %9170 = vmatprep.subr.bf16.mxu0 %v23588_v21  ;;  %v23663_v21 = vld [vmem:[%s32146_s7 + $0x804] ss:$16 sps:$4 sm:$0xff]  }
 0x7a0   : > { %8496 = vmatpush2.bf16.msra.mxu1 %v23583_v59  ;;  %v23666_v59 = vld [vmem:[%s32146_s7 + $0x80c] ss:$16 sps:$4 sm:$0xff]  }
 0x7a1   : > { %9171 = vmatpush2.bf16.msra.mxu0 %v23586_v60  ;;  %8497 = vmatprep.subr.bf16.mxu1 %v23591_v61  ;;  %v23661_v60 = vld [vmem:[%s32146_s7 + $0x800] ss:$16 sps:$4 sm:$0xff]  }
 0x7a2   : > { %9172 = vmatprep.subr.bf16.mxu0 %v23594_v62  ;;  %v23667_v61 = vld [vmem:[#allocation3 + $0x8] ss:$0 sps:$4 sm:$0x66]   ;;  %v23664_v62 = vld [vmem:[%s32146_s7 + $0x808] ss:$16 sps:$4 sm:$0xff]  }
 0x7a4   : > { %8498 = vmatpush2.bf16.msra.mxu1 %v23589_v63  ;;  %v23670_v63 = vld [vmem:[%s32146_s7 + $0x6ec] ss:$16 sps:$4 sm:$0xff]  }
 0x7a5   : > { %9173 = vmatpush2.bf16.msra.mxu0 %v23592_v0  ;;  %8499 = vmatprep.subr.bf16.mxu1 %v23597_v28  ;;  %v23668_v0 = vld [vmem:[%s32146_s7 + $0x6e8] ss:$16 sps:$4 sm:$0xff]   ;;  %v8666_v28 = vrot.slane %v23667_v61, 1 }
 0x7a6   : > { %9174 = vmatprep.subr.bf16.mxu0 %v23600_v20  ;;  %v23673_v20 = vld [vmem:[%s32146_s7 + $0x6cc] ss:$16 sps:$4 sm:$0xff]  }
 0x7a8   : > { %8500 = vmatpush2.bf16.msra.mxu1 %v23595_v54 }
 0x7a9   : > { %9175 = vmatpush2.bf16.msra.mxu0 %v23598_v56  ;;  %8501 = vmatprep.subr.bf16.mxu1 %v23603_v55 }
 0x7aa   : > { %9176 = vmatprep.subr.bf16.mxu0 %v23606_v29  ;;  %v23671_v29 = vld [vmem:[%s32146_s7 + $0x6c8] ss:$16 sps:$4 sm:$0xff]  }
 0x7ac   : > { %8502 = vmatpush2.bf16.msra.mxu1 %v23601_v1 }
 0x7ad   : > { %9177 = vmatpush2.bf16.msra.mxu0 %v23604_v5  ;;  %8503 = vmatprep.subr.bf16.mxu1 %v23609_v7  ;;  %v23676_v7 = vld [vmem:[%s32146_s7 + $0x6ac] ss:$16 sps:$4 sm:$0xff]  }
 0x7ae   : > { %9178 = vmatprep.subr.bf16.mxu0 %v23612_v9 }
 0x7b0   : > { %8504 = vmatpush2.bf16.msra.mxu1 %v23607_v10 }
 0x7b1   : > { %9179 = vmatpush2.bf16.msra.mxu0 %v23610_v12  ;;  %8505 = vmatprep.subr.bf16.mxu1 %v23615_v46 }
 0x7b2   : > { %9180 = vmatprep.subr.bf16.mxu0 %v23618_v15 }
 0x7b4   : > { %8506 = vmatpush2.bf16.msra.mxu1 %v23613_v16  ;;  %v23679_v16 = vld [vmem:[%s32146_s7 + $0x68c] ss:$16 sps:$4 sm:$0xff]  }
 0x7b5   : > { %9181 = vmatpush2.bf16.msra.mxu0 %v23616_v18  ;;  %9191 = vmatprep.subr.bf16.mxu1 %v23621_v30  ;;  %v23677_v18 = vld [vmem:[%s32146_s7 + $0x688] ss:$16 sps:$4 sm:$0xff]   ;;  %v23682_v30 = vld [vmem:[%s32146_s7 + $0x66c] ss:$16 sps:$4 sm:$0xff]  }
 0x7b6   : > { %9273 = vmatprep.subr.bf16.mxu0 %v23624_v19  ;;  %v23685_v19 = vld [vmem:[%s32146_s7 + $0x64c] ss:$16 sps:$4 sm:$0xff]  }
 0x7b7   : > { %8508 = vmatmul.mubr.bf16.vlgmr.msra.gmra.mxu1 %v27789_v22  ;;  %v23636_v22 = vld [vmem:[%s32146_s7 + $0x8ac] ss:$16 sps:$4 sm:$0xff]  }
 0x7b8   : > { %v28101_v26 = vpop.f32.mrf.mxu0  ;;  %9183 = vmatmul.mubr.bf16.vlgmr.msra.gmra.mxu0 %v28096_v4  ;;  %9192 = vmatpush1.bf16.msra.mxu1 %v23619_v23  ;;  %v23683_v23 = vld [vmem:[%s32146_s7 + $0x648] ss:$16 sps:$4 sm:$0xff]  }
 0x7b9   : > { %9274 = vmatpush1.bf16.msra.mxu0 %v23622_v45  ;;  %9193 = vmatprep.subr.bf16.mxu1 %v23627_v57  ;;  %v23688_v45 = vld [vmem:[%s32146_s7 + $0x62c] ss:$16 sps:$4 sm:$0xff]   ;;  %v23686_v57 = vld [vmem:[%s32146_s7 + $0x628] ss:$16 sps:$4 sm:$0xff]  }
 0x7ba   : > { %v28108_v31 = vpop.f32.mrf.mxu0  ;;  %9275 = vmatprep.subr.bf16.mxu0 %v23630_v25  ;;  %9223 = vmatprep.mubr.bf16.mxu1 %v25041_v17  ;;  %v23691_v25 = vld [vmem:[%s32146_s7 + $0x60c] ss:$16 sps:$4 sm:$0xff]  }
 0x7bb   : > { %9305 = vmatprep.mubr.bf16.mxu0 %v25041_v17 }
 0x7bc   : > { %v7776_v35 = vpop.f32.mrf.mxu0  ;;  %9194 = vmatpush1.bf16.msra.mxu1 %v23625_v27  ;;  %v23694_v27 = vld [vmem:[%s32146_s7 + $0x7ec] ss:$16 sps:$4 sm:$0xff]  }
 0x7bd   : > { %9276 = vmatpush1.bf16.msra.mxu0 %v23628_v34  ;;  %9195 = vmatprep.subr.bf16.mxu1 %v23633_v32  ;;  %v23697_v34 = vld [vmem:[%s32146_s7 + $0x7cc] ss:$16 sps:$4 sm:$0xff]   ;;  %v23695_v32 = vld [vmem:[%s32146_s7 + $0x7c8] ss:$16 sps:$4 sm:$0xff]  }
 0x7be   : > { %v7777_v41 = vpop.f32.mrf.mxu0  ;;  %9277 = vmatprep.subr.bf16.mxu0 %v23636_v22  ;;  %v23700_v22 = vld [vmem:[%s32146_s7 + $0x7ac] ss:$16 sps:$4 sm:$0xff]   ;;  %v23698_v35 = vld [vmem:[%s32146_s7 + $0x7a8] ss:$16 sps:$4 sm:$0xff]  }
 0x7bf   : > { %v23701_v41 = vld [vmem:[%s32146_s7 + $0x788] ss:$16 sps:$4 sm:$0xff]  }
 0x7c0   : > { %9196 = vmatpush1.bf16.msra.mxu1 %v23631_v36  ;;  %v23703_v36 = vld [vmem:[%s32146_s7 + $0x78c] ss:$16 sps:$4 sm:$0xff]  }
 0x7c1   : > { %9278 = vmatpush1.bf16.msra.mxu0 %v23634_v37  ;;  %9197 = vmatprep.subr.bf16.mxu1 %v23639_v52  ;;  %v23706_v37 = vld [vmem:[%s32146_s7 + $0x76c] ss:$16 sps:$4 sm:$0xff]   ;;  %v23704_v52 = vld [vmem:[%s32146_s7 + $0x768] ss:$16 sps:$4 sm:$0xff]  }
 0x7c2   : > { %9279 = vmatprep.subr.bf16.mxu0 %v23642_v42  ;;  %v23709_v42 = vld [vmem:[%s32146_s7 + $0x74c] ss:$16 sps:$4 sm:$0xff]  }
 0x7c4   : > { %9198 = vmatpush1.bf16.msra.mxu1 %v23637_v24  ;;  %v23707_v24 = vld [vmem:[%s32146_s7 + $0x748] ss:$16 sps:$4 sm:$0xff]  }
 0x7c5   : > { %9280 = vmatpush1.bf16.msra.mxu0 %v23640_v43  ;;  %9199 = vmatprep.subr.bf16.mxu1 %v23645_v2  ;;  %v23712_v43 = vld [vmem:[%s32146_s7 + $0x72c] ss:$16 sps:$4 sm:$0xff]   ;;  %v23710_v2 = vld [vmem:[%s32146_s7 + $0x728] ss:$16 sps:$4 sm:$0xff]  }
 0x7c6   : > { %9281 = vmatprep.subr.bf16.mxu0 %v23648_v53  ;;  %v23715_v53 = vld [vmem:[%s32146_s7 + $0x70c] ss:$16 sps:$4 sm:$0xff]  }
 0x7c8   : > { %9200 = vmatpush1.bf16.msra.mxu1 %v23643_v39  ;;  %v23713_v39 = vld [vmem:[%s32146_s7 + $0x708] ss:$16 sps:$4 sm:$0xff]  }
 0x7c9   : > { %9282 = vmatpush1.bf16.msra.mxu0 %v23646_v47  ;;  %9201 = vmatprep.subr.bf16.mxu1 %v23651_v38 }
 0x7ca   : > { %9283 = vmatprep.subr.bf16.mxu0 %v23654_v48 }
 0x7cc   : > { %9202 = vmatpush1.bf16.msra.mxu1 %v23649_v49 }
 0x7cd   : > { %9284 = vmatpush1.bf16.msra.mxu0 %v23652_v40  ;;  %9203 = vmatprep.subr.bf16.mxu1 %v23657_v50 }
 0x7ce   : > { %9285 = vmatprep.subr.bf16.mxu0 %v23660_v51 }
 0x7d0   : > { %9204 = vmatpush1.bf16.msra.mxu1 %v23655_v44 }
 0x7d1   : > { %9286 = vmatpush1.bf16.msra.mxu0 %v23658_v58  ;;  %9205 = vmatprep.subr.bf16.mxu1 %v23663_v21 }
 0x7d2   : > { %9287 = vmatprep.subr.bf16.mxu0 %v23666_v59 }
 0x7d4   : > { %9206 = vmatpush1.bf16.msra.mxu1 %v23661_v60 }
 0x7d5   : > { %9288 = vmatpush1.bf16.msra.mxu0 %v23664_v62  ;;  %9232 = vmatprep.subr.bf16.mxu1 %v23670_v63 }
 0x7d7   : > { %9224 = vmatmul.mubr.bf16.vlgmr.msra.gmra.mxu1 %v8666_v28  ;;  %v7813_v54 = vpop.f32.mrf.mxu1 }
 0x7d8   : > { %v28196_v56 = vpop.f32.mrf.mxu0  ;;  %9306 = vmatmul.mubr.bf16.vlgmr.msra.gmra.mxu0 %v8666_v28  ;;  %v28199_v55 = vadd.f32 %v7813_v54, %v28101_v26  ;;  %9233 = vmatpush1.bf16.msra.mxu1 %v23668_v0  ;;  %v23689_v26 = vld [vmem:[%s32146_s7 + $0x608] ss:$16 sps:$4 sm:$0xff]  }
 0x7d9   : > { %9264 = vmatprep.mubr.bf16.mxu1 %v27901_v13  ;;  %v7815_v1 = vpop.f32.mrf.mxu1  ;;  %9234 = vmatprep.subr.bf16.mxu1 %v23673_v20  ;;  %v23674_v13 = vld [vmem:[%s32146_s7 + $0x6a8] ss:$16 sps:$4 sm:$0xff]  }
 0x7da   : > { %v28205_v5 = vpop.f32.mrf.mxu0  ;;  %v28211_v9 = vadd.f32 %v7815_v1, %v28108_v31  ;;  %9402 = vmatprep.mubr.bf16.mxu0 %v25041_v17  ;;  %v23692_v31 = vld [vmem:[%s32146_s7 + $0x7e8] ss:$16 sps:$4 sm:$0xff]  }
 0x7db   : > { %v7817_v10 = vpop.f32.mrf.mxu1 }
 0x7dc   : > { %v7899_v12 = vpop.f32.mrf.mxu0  ;;  %9235 = vmatpush1.bf16.msra.mxu1 %v23671_v29 }
 0x7dd   : > { %v7818_v46 = vpop.f32.mrf.mxu1  ;;  %9236 = vmatprep.subr.bf16.mxu1 %v23676_v7 }
 0x7de   : > { %v7900_v15 = vpop.f32.mrf.mxu0 }
 0x7df   : > { %v28313_v15 = vld [vmem:[%s32147_s5] sm:$0xf] }
 0x7e0   : > { %9237 = vmatpush1.bf16.msra.mxu1 %v23674_v13 }
 0x7e1   : > { %9238 = vmatprep.subr.bf16.mxu1 %v23679_v16 }
 0x7e4   : > { %9239 = vmatpush1.bf16.msra.mxu1 %v23677_v18 }
 0x7e5   : > { %9240 = vmatprep.subr.bf16.mxu1 %v23682_v30  ;;  %v9323_v30 = vrot.slane %v28313_v15, %v25294_v11 }
 0x7e8   : > { %9241 = vmatpush1.bf16.msra.mxu1 %v23680_v33 }
 0x7e9   : > { %9242 = vmatprep.subr.bf16.mxu1 %v23685_v19 }
 0x7ec   : > { %9243 = vmatpush1.bf16.msra.mxu1 %v23683_v23 }
 0x7ed   : > { %9244 = vmatprep.subr.bf16.mxu1 %v23688_v45 }
 0x7f0   : > { %9245 = vmatpush1.bf16.msra.mxu1 %v23686_v57  ;;  %v9327_v57 = vrot.slane %v28313_v15, %v25285_v6 }
 0x7f1   : > { %9246 = vmatprep.subr.bf16.mxu1 %v23691_v25 }
 0x7f4   : > { %9247 = vmatpush1.bf16.msra.mxu1 %v23689_v26 }
 0x7f5   : > { %9248 = vmatprep.subr.bf16.mxu1 %v23694_v27 }
 0x7f8   : > { %9249 = vmatpush2.bf16.msra.mxu1 %v23692_v31 }
 0x7f9   : > { %9250 = vmatprep.subr.bf16.mxu1 %v23697_v34 }
 0x7fc   : > { %9251 = vmatpush2.bf16.msra.mxu1 %v23695_v32 }
 0x7fd   : > { %9252 = vmatprep.subr.bf16.mxu1 %v23700_v22 }
 0x800   : > { %9253 = vmatpush2.bf16.msra.mxu1 %v23698_v35 }
 0x801   : > { %9254 = vmatprep.subr.bf16.mxu1 %v23703_v36 }
 0x804   : > { %9255 = vmatpush2.bf16.msra.mxu1 %v23701_v41 }
 0x805   : > { %9256 = vmatprep.subr.bf16.mxu1 %v23706_v37 }
 0x808   : > { %9257 = vmatpush2.bf16.msra.mxu1 %v23704_v52 }
 0x809   : > { %9258 = vmatprep.subr.bf16.mxu1 %v23709_v42 }
 0x80c   : > { %9259 = vmatpush2.bf16.msra.mxu1 %v23707_v24  ;;  %v28328_v24 = vld [vmem:[%s32148_s0] sm:$0x3] }
 0x80d   : > { %9260 = vmatprep.subr.bf16.mxu1 %v23712_v43  ;;  %v23718_v43 = vld [vmem:[%s32096_s12 + $0xe4] ss:$16 sps:$4 sm:$0xff]  }
 0x810   : > { %9261 = vmatpush2.bf16.msra.mxu1 %v23710_v2  ;;  %v28340_v2 = vld [vmem:[%s32148_s0 + $0x2] sm:$0x3] }
 0x811   : > { %9262 = vmatprep.subr.bf16.mxu1 %v23715_v53  ;;  %v23716_v53 = vld [vmem:[%s32096_s12 + $0xe0] ss:$16 sps:$4 sm:$0xff]  }
 0x814   : > { %9263 = vmatpush2.bf16.msra.mxu1 %v23713_v39  ;;  %v23721_v39 = vld [vmem:[%s32096_s12 + $0xc4] ss:$16 sps:$4 sm:$0xff]  }
 0x817   : > { %v7854_v47 = vpop.f32.mrf.mxu1  ;;  %9265 = vmatmul.mubr.bf16.vlgmr.msra.gmra.mxu1 %v28096_v4 }
 0x818   : > { %v8427_v38 = vpop.f32.mrf.mxu0  ;;  %v7896_v48 = vadd.f32 %v28196_v56, %v7854_v47  ;;  %9443 = vmatprep.mubr.bf16.mxu1 %v25041_v17  ;;  %v23719_v47 = vld [vmem:[%s32096_s12 + $0xc0] ss:$16 sps:$4 sm:$0xff]  }
 0x819   : > { %v8428_v49 = vadd.f32 %v8427_v38, %v28199_v55  ;;  %v28299_v40 = vpop.f32.mrf.mxu1  ;;  %v23724_v38 = vld [vmem:[%s32096_s12 + $0xa4] ss:$16 sps:$4 sm:$0xff]  }
 0x81a   : > { %v8429_v50 = vpop.f32.mrf.mxu0 }
 0x81b   : > { %v8430_v51 = vadd.f32 %v8429_v50, %v28211_v9  ;;  %v7858_v44 = vpop.f32.mrf.mxu1  ;;  %v23725_v50 = vld [vmem:[%s32096_s12 + $0x80] ss:$16 sps:$4 sm:$0xff]  }
 0x81c   : > { %v8431_v58 = vpop.f32.mrf.mxu0  ;;  %v23728_v44 = vld [vmem:[%s32096_s12 + $0x60] ss:$16 sps:$4 sm:$0xff]  }
 0x81d   : > { %v7859_v21 = vpop.f32.mrf.mxu1  ;;  %v23733_v58 = vld [vmem:[%s32096_s12 + $0x44] ss:$16 sps:$4 sm:$0xff]  }
 0x81e   : > { %v8432_v59 = vpop.f32.mrf.mxu0  ;;  %v23731_v21 = vld [vmem:[%s32096_s12 + $0x40] ss:$16 sps:$4 sm:$0xff]  }
 0x81f   : > { %v23736_v59 = vld [vmem:[%s32096_s12 + $0x24] ss:$16 sps:$4 sm:$0xff]  }
 0x837   : > { %v8468_v60 = vpop.f32.mrf.mxu1 }
 0x838   : > { %v28302_v61 = vpop.f32.mrf.mxu0  ;;  %v8469_v62 = vadd.f32 %v8468_v60, %v8428_v49  ;;  %v23727_v49 = vld [vmem:[%s32096_s12 + $0x84] ss:$16 sps:$4 sm:$0xff]   ;;  %v23734_v60 = vld [vmem:[%s32096_s12 + $0x20] ss:$16 sps:$4 sm:$0xff]  }
 0x839   : > { %v8470_v4 = vpop.f32.mrf.mxu1 }
 0x83a   : > { %v28304_v63 = vpop.f32.mrf.mxu0  ;;  %v8471_v0 = vadd.f32 %v8470_v4, %v8430_v51  ;;  %v23730_v51 = vld [vmem:[%s32096_s12 + $0x64] ss:$16 sps:$4 sm:$0xff]   ;;  %v23737_v4 = vld [vmem:[%s32096_s12] ss:$16 sps:$4 sm:$0xff]  }
 0x83b   : > { %v8472_v28 = vpop.f32.mrf.mxu1 }
 0x83c   : > { %v8554_v20 = vpop.f32.mrf.mxu0  ;;  %v23740_v28 = vld [vmem:[%s32096_s12 + $0x1e0] ss:$16 sps:$4 sm:$0xff]  }
 0x83d   : > { %v8473_v54 = vpop.f32.mrf.mxu1  ;;  %v23745_v20 = vld [vmem:[%s32096_s12 + $0x1c4] ss:$16 sps:$4 sm:$0xff]  }
 0x83e   : > { %v8555_v56 = vpop.f32.mrf.mxu0  ;;  %v23743_v54 = vld [vmem:[%s32096_s12 + $0x1c0] ss:$16 sps:$4 sm:$0xff]  }
 0x83f   : > { %v23748_v56 = vld [vmem:[%s32096_s12 + $0x1a4] ss:$16 sps:$4 sm:$0xff]  }
 0x877   : > { %v8509_v55 = vpop.f32.mrf.mxu1 }
 0x878   : > { %v28306_v29 = vadd.f32 %v8509_v55, %v7896_v48  ;;  %v9184_v1 = vpop.f32.mrf.mxu0  ;;  %v23722_v48 = vld [vmem:[%s32096_s12 + $0xa0] ss:$16 sps:$4 sm:$0xff]   ;;  %v7898_v55 = vadd.f32 %v28205_v5, %v28299_v40  ;;  %v9331_v5 = vrot.slane %v28313_v15, %v25297_v14 }
 0x879   : > { %v28308_v7 = vpop.f32.mrf.mxu1 }
 0x87a   : > { %v9186_v9 = vpop.f32.mrf.mxu0 }
 0x87b   : > { %v8513_v10 = vpop.f32.mrf.mxu1 }
 0x87c   : > { %v9188_v12 = vpop.f32.mrf.mxu0  ;;  %v23751_v10 = vld [vmem:[%s32096_s12 + $0x184] ss:$16 sps:$4 sm:$0xff]  }
 0x87d   : > { %v8514_v13 = vpop.f32.mrf.mxu1 }
 0x87e   : > { %v9189_v46 = vpop.f32.mrf.mxu0  ;;  %v8551_v13 = vadd.f32 %v28302_v61, %v28306_v29  ;;  %v23754_v61 = vld [vmem:[%s32096_s12 + $0x164] ss:$16 sps:$4 sm:$0xff]  }
 0x897   : > { %v9225_v16 = vpop.f32.mrf.mxu1 }
 0x898   : > { %v9226_v18 = vadd.f32 %v9225_v16, %v9184_v1  ;;  %v28317_v33 = vpop.f32.mrf.mxu0  ;;  %v23746_v1 = vld [vmem:[%s32096_s12 + $0x1a0] ss:$16 sps:$4 sm:$0xff]  }
 0x899   : > { %v9227_v19 = vpop.f32.mrf.mxu1 }
 0x89a   : > { %v9314_v23 = vadd.f32 %v9226_v18, %v8469_v62  ;;  %v9228_v45 = vadd.f32 %v9227_v19, %v9186_v9  ;;  %v28321_v25 = vpop.f32.mrf.mxu0  ;;  %v23739_v62 = vld [vmem:[%s32096_s12 + $0x4] ss:$16 sps:$4 sm:$0xff]   ;;  %v8512_v9 = vadd.f32 %v28308_v7, %v7898_v55  ;;  %v23749_v7 = vld [vmem:[%s32096_s12 + $0x180] ss:$16 sps:$4 sm:$0xff]   ;;  %v9335_v19 = vrot.slane %v28313_v15, %v25291_v8 }
 0x89b   : > { %v9229_v26 = vpop.f32.mrf.mxu1  ;;  %v23836_v55 = vld [vmem:[%s32096_s12 + $0x360] ss:$16 sps:$4 sm:$0xff]  }
 0x89c   : > { %v9340_v27 = vadd.f32 %v9323_v30, %v9314_v23  ;;  %v9315_v31 = vadd.f32 %v9228_v45, %v8471_v0  ;;  %v9311_v34 = vpop.f32.mrf.mxu0  ;;  %v23742_v0 = vld [vmem:[%s32096_s12 + $0x1e4] ss:$16 sps:$4 sm:$0xff]   ;;  %v8553_v16 = vadd.f32 %v28304_v63, %v8512_v9  ;;  %v23752_v63 = vld [vmem:[%s32096_s12 + $0x160] ss:$16 sps:$4 sm:$0xff]  }
 0x89d   : > { %v9230_v32 = vpop.f32.mrf.mxu1  ;;  %v23755_v34 = vld [vmem:[%s32096_s12 + $0x140] ss:$16 sps:$4 sm:$0xff]   ;;  %v23844_v9 = vld [vmem:[%s32096_s12 + $0x344] ss:$16 sps:$4 sm:$0xff]  }
 0x89e   : > { %v9344_v22 = vmax.f32 %v9340_v27, 0.0  ;;  %v9341_v35 = vadd.f32 %v9327_v57, %v9315_v31  ;;  %v9312_v36 = vpop.f32.mrf.mxu0  ;;  %v23757_v32 = vld [vmem:[%s32096_s12 + $0x144] ss:$16 sps:$4 sm:$0xff]  }
 0x89f   : > { %v23761_v36 = vld [vmem:[%s32096_s12 + $0x100] ss:$16 sps:$4 sm:$0xff]  }
 0x8a0   : > { %v9345_v41 = vmax.f32 %v9341_v35, 0.0  ;;  %v9348_v37 = vpack.c.bf16 %v9344_v22, %v9344_v22  ;;  %v23758_v22 = vld [vmem:[%s32096_s12 + $0x120] ss:$16 sps:$4 sm:$0xff]   ;;  %v23760_v35 = vld [vmem:[%s32096_s12 + $0x124] ss:$16 sps:$4 sm:$0xff]  }
 0x8a2   : > { %v9349_v52 = vpack.c.bf16 %v9345_v41, %v9345_v41  ;;  %v9359_v42 = vsel %vm9357_vm10, %v9348_v37, 0  ;;  %v23763_v41 = vld [vmem:[%s32096_s12 + $0x104] ss:$16 sps:$4 sm:$0xff]   ;;  %v23764_v37 = vld [vmem:[%s32096_s12 + $0x2e0] ss:$16 sps:$4 sm:$0xff]  }
 0x8a4   : > { %20432 = vmatprep.subr.msk.bf16.mxu0 %vm9357_vm10, %v9349_v52 }
 0x8a5   : > { %9385 = vmatpush1.bf16.msra.mxu0 %v9359_v42 }
 0x8a6   : > { %20437 = vmatprep.subr.msk.bf16.mxu0 %vm9357_vm10, %v9349_v52  ;;  %v23766_v52 = vld [vmem:[%s32096_s12 + $0x2e4] ss:$16 sps:$4 sm:$0xff]  }
 0x8a8   : > { %20433 = vmatmul.mubr.msk.bf16.vlgmr.msra.gmra.mxu0 %vm9353_vm11, %v28328_v24 }
 0x8a9   : > { %9472 = vmatpush1.bf16.msra.mxu0 %v9359_v42  ;;  %9489 = vmatprep.mubr.bf16.mxu0 %v25041_v17  ;;  %v23769_v42 = vld [vmem:[%s32096_s12 + $0xec] ss:$16 sps:$4 sm:$0xff]  }
 0x8aa   : > { %10315 = vmatprep.subr.bf16.mxu0 %v23718_v43  ;;  %v23770_v43 = vld [vmem:[%s32096_s12 + $0x2c0] ss:$16 sps:$4 sm:$0xff]  }
 0x8b0   : > { %20438 = vmatmul.mubr.msk.bf16.vlgmr.msra.gmra.mxu0 %vm9353_vm11, %v28340_v2 }
 0x8b1   : > { %10316 = vmatpush1.bf16.msra.mxu0 %v23716_v53  ;;  %v23776_v53 = vld [vmem:[%s32096_s12 + $0x2a0] ss:$16 sps:$4 sm:$0xff]  }
 0x8b2   : > { %10317 = vmatprep.subr.bf16.mxu0 %v23721_v39  ;;  %v23784_v39 = vld [vmem:[%s32096_s12 + $0x284] ss:$16 sps:$4 sm:$0xff]  }
 0x8b5   : > { %10318 = vmatpush1.bf16.msra.mxu0 %v23719_v47  ;;  %v23782_v47 = vld [vmem:[%s32096_s12 + $0x280] ss:$16 sps:$4 sm:$0xff]  }
 0x8b6   : > { %10319 = vmatprep.subr.bf16.mxu0 %v23724_v38  ;;  %v23790_v38 = vld [vmem:[%s32096_s12 + $0x264] ss:$16 sps:$4 sm:$0xff]  }
 0x8b9   : > { %10320 = vmatpush1.bf16.msra.mxu0 %v23722_v48  ;;  %v23788_v48 = vld [vmem:[%s32096_s12 + $0x260] ss:$16 sps:$4 sm:$0xff]  }
 0x8ba   : > { %10321 = vmatprep.subr.bf16.mxu0 %v23727_v49  ;;  %v23796_v49 = vld [vmem:[%s32096_s12 + $0x244] ss:$16 sps:$4 sm:$0xff]  }
 0x8bd   : > { %10322 = vmatpush1.bf16.msra.mxu0 %v23725_v50  ;;  %v23794_v50 = vld [vmem:[%s32096_s12 + $0x240] ss:$16 sps:$4 sm:$0xff]  }
 0x8be   : > { %10323 = vmatprep.subr.bf16.mxu0 %v23730_v51  ;;  %v23802_v51 = vld [vmem:[%s32096_s12 + $0x224] ss:$16 sps:$4 sm:$0xff]  }
 0x8c1   : > { %10324 = vmatpush1.bf16.msra.mxu0 %v23728_v44  ;;  %v23800_v44 = vld [vmem:[%s32096_s12 + $0x220] ss:$16 sps:$4 sm:$0xff]  }
 0x8c2   : > { %10325 = vmatprep.subr.bf16.mxu0 %v23733_v58  ;;  %v23808_v58 = vld [vmem:[%s32096_s12 + $0x204] ss:$16 sps:$4 sm:$0xff]  }
 0x8c5   : > { %10326 = vmatpush1.bf16.msra.mxu0 %v23731_v21  ;;  %v23806_v21 = vld [vmem:[%s32096_s12 + $0x200] ss:$16 sps:$4 sm:$0xff]  }
 0x8c6   : > { %10327 = vmatprep.subr.bf16.mxu0 %v23736_v59  ;;  %v23814_v59 = vld [vmem:[%s32096_s12 + $0x3e4] ss:$16 sps:$4 sm:$0xff]  }
 0x8c9   : > { %10328 = vmatpush1.bf16.msra.mxu0 %v23734_v60  ;;  %v23812_v60 = vld [vmem:[%s32096_s12 + $0x3e0] ss:$16 sps:$4 sm:$0xff]  }
 0x8ca   : > { %10329 = vmatprep.subr.bf16.mxu0 %v23739_v62  ;;  %v23820_v62 = vld [vmem:[%s32096_s12 + $0x3c4] ss:$16 sps:$4 sm:$0xff]  }
 0x8cd   : > { %10330 = vmatpush1.bf16.msra.mxu0 %v23737_v4  ;;  %v23818_v4 = vld [vmem:[%s32096_s12 + $0x3c0] ss:$16 sps:$4 sm:$0xff]  }
 0x8ce   : > { %10331 = vmatprep.subr.bf16.mxu0 %v23742_v0  ;;  %v23826_v0 = vld [vmem:[%s32096_s12 + $0x3a4] ss:$16 sps:$4 sm:$0xff]  }
 0x8d1   : > { %10332 = vmatpush2.bf16.msra.mxu0 %v23740_v28  ;;  %v23824_v28 = vld [vmem:[%s32096_s12 + $0x3a0] ss:$16 sps:$4 sm:$0xff]  }
 0x8d2   : > { %10333 = vmatprep.subr.bf16.mxu0 %v23745_v20  ;;  %v23832_v20 = vld [vmem:[%s32096_s12 + $0x384] ss:$16 sps:$4 sm:$0xff]  }
 0x8d5   : > { %10334 = vmatpush2.bf16.msra.mxu0 %v23743_v54  ;;  %v23830_v54 = vld [vmem:[%s32096_s12 + $0x380] ss:$16 sps:$4 sm:$0xff]  }
 0x8d6   : > { %10335 = vmatprep.subr.bf16.mxu0 %v23748_v56  ;;  %v23838_v56 = vld [vmem:[%s32096_s12 + $0x364] ss:$16 sps:$4 sm:$0xff]  }
 0x8d7   : > { %v9266_v12 = vpop.f32.mrf.mxu1 }
 0x8d8   : > { %v9308_v46 = vadd.f32 %v28317_v33, %v9266_v12  ;;  %v23850_v12 = vld [vmem:[%s32096_s12 + $0x324] ss:$16 sps:$4 sm:$0xff]  }
 0x8d9   : > { %v9268_v40 = vpop.f32.mrf.mxu1  ;;  %10336 = vmatpush2.bf16.msra.mxu0 %v23746_v1  ;;  %v23842_v1 = vld [vmem:[%s32096_s12 + $0x340] ss:$16 sps:$4 sm:$0xff]  }
 0x8da   : > { %v9316_v18 = vadd.f32 %v9308_v46, %v8551_v13  ;;  %v9310_v30 = vadd.f32 %v28321_v25, %v9268_v40  ;;  %10337 = vmatprep.subr.bf16.mxu0 %v23751_v10  ;;  %v23848_v10 = vld [vmem:[%s32096_s12 + $0x320] ss:$16 sps:$4 sm:$0xff]   ;;  %v23856_v46 = vld [vmem:[%s32096_s12 + $0x304] ss:$16 sps:$4 sm:$0xff]  }
 0x8db   : > { %v9270_v29 = vpop.f32.mrf.mxu1  ;;  %v23854_v13 = vld [vmem:[%s32096_s12 + $0x300] ss:$16 sps:$4 sm:$0xff]  }
 0x8dc   : > { %v9342_v33 = vadd.f32 %v9331_v5, %v9316_v18  ;;  %v9317_v23 = vadd.f32 %v9310_v30, %v8553_v16  ;;  %v23862_v5 = vld [vmem:[%s32096_s12 + $0x2ec] ss:$16 sps:$4 sm:$0xff]  }
 0x8dd   : > { %v9271_v45 = vpop.f32.mrf.mxu1  ;;  %10338 = vmatpush2.bf16.msra.mxu0 %v23749_v7 }
 0x8de   : > { %v9346_v57 = vmax.f32 %v9342_v33, 0.0  ;;  %v9343_v26 = vadd.f32 %v9335_v19, %v9317_v23  ;;  %10339 = vmatprep.subr.bf16.mxu0 %v23754_v61 }
 0x8e0   : > { %v9347_v25 = vmax.f32 %v9343_v26, 0.0  ;;  %v9350_v27 = vpack.c.bf16 %v9346_v57, %v9346_v57  ;;  %v23775_v57 = vld [vmem:[%s32096_s12 + $0xcc] ss:$16 sps:$4 sm:$0xff]  }
 0x8e1   : > { %10340 = vmatpush2.bf16.msra.mxu0 %v23752_v63  ;;  %v23767_v63 = vld [vmem:[%s32096_s12 + $0xe8] ss:$16 sps:$4 sm:$0xff]  }
 0x8e2   : > { %v9351_v15 = vpack.c.bf16 %v9347_v25, %v9347_v25  ;;  %v9365_v31 = vsel %vm9357_vm10, %v9350_v27, 0  ;;  %10341 = vmatprep.subr.bf16.mxu0 %v23757_v32  ;;  %v23773_v25 = vld [vmem:[%s32096_s12 + $0xc8] ss:$16 sps:$4 sm:$0xff]   ;;  %v23781_v27 = vld [vmem:[%s32096_s12 + $0xac] ss:$16 sps:$4 sm:$0xff]  }
 0x8e3   : > { %v23793_v32 = vld [vmem:[%s32096_s12 + $0x6c] ss:$16 sps:$4 sm:$0xff]  }
 0x8e4   : > { %20434 = vmatprep.subr.msk.bf16.mxu1 %vm9357_vm10, %v9351_v15 }
 0x8e5   : > { %9426 = vmatpush1.bf16.msra.mxu1 %v9365_v31  ;;  %10342 = vmatpush2.bf16.msra.mxu0 %v23755_v34  ;;  %v23785_v34 = vld [vmem:[%s32096_s12 + $0x88] ss:$16 sps:$4 sm:$0xff]  }
 0x8e6   : > { %20439 = vmatprep.subr.msk.bf16.mxu1 %vm9357_vm10, %v9351_v15  ;;  %10343 = vmatprep.subr.bf16.mxu0 %v23760_v35  ;;  %v23779_v15 = vld [vmem:[%s32096_s12 + $0xa8] ss:$16 sps:$4 sm:$0xff]   ;;  %v23799_v35 = vld [vmem:[%s32096_s12 + $0x4c] ss:$16 sps:$4 sm:$0xff]  }
 0x8e8   : > { %20435 = vmatmul.mubr.msk.bf16.vlgmr.msra.gmra.mxu1 %vm9353_vm11, %v28328_v24  ;;  %v23772_v24 = vld [vmem:[%s32096_s12 + $0x2c4] ss:$16 sps:$4 sm:$0xff]  }
 0x8e9   : > { %9513 = vmatpush1.bf16.msra.mxu1 %v9365_v31  ;;  %9530 = vmatprep.mubr.bf16.mxu1 %v25041_v17  ;;  %v23787_v31 = vld [vmem:[%s32096_s12 + $0x8c] ss:$16 sps:$4 sm:$0xff]  }
 0x8ea   : > { %10344 = vmatpush2.bf16.msra.mxu0 %v23758_v22  ;;  %10356 = vmatprep.subr.bf16.mxu1 %v23766_v52  ;;  %v23791_v22 = vld [vmem:[%s32096_s12 + $0x68] ss:$16 sps:$4 sm:$0xff]   ;;  %v23811_v52 = vld [vmem:[%s32096_s12 + $0xc] ss:$16 sps:$4 sm:$0xff]  }
 0x8eb   : > { %10345 = vmatprep.subr.bf16.mxu0 %v23763_v41  ;;  %v23805_v41 = vld [vmem:[%s32096_s12 + $0x2c] ss:$16 sps:$4 sm:$0xff]  }
 0x8ee   : > { %10346 = vmatpush2.bf16.msra.mxu0 %v23761_v36  ;;  %v23797_v36 = vld [vmem:[%s32096_s12 + $0x48] ss:$16 sps:$4 sm:$0xff]  }
 0x8ef   : > { %10397 = vmatprep.subr.bf16.mxu0 %v23769_v42  ;;  %v23809_v42 = vld [vmem:[%s32096_s12 + $0x8] ss:$16 sps:$4 sm:$0xff]  }
 0x8f0   : > { %20440 = vmatmul.mubr.msk.bf16.vlgmr.msra.gmra.mxu1 %vm9353_vm11, %v28340_v2  ;;  %v23778_v2 = vld [vmem:[%s32096_s12 + $0x2a4] ss:$16 sps:$4 sm:$0xff]  }
 0x8f1   : > { %10357 = vmatpush1.bf16.msra.mxu1 %v23764_v37  ;;  %v23803_v37 = vld [vmem:[%s32096_s12 + $0x28] ss:$16 sps:$4 sm:$0xff]  }
 0x8f2   : > { %10358 = vmatprep.subr.bf16.mxu1 %v23772_v24  ;;  %v23817_v24 = vld [vmem:[%s32096_s12 + $0x1ec] ss:$16 sps:$4 sm:$0xff]  }
 0x8f5   : > { %10359 = vmatpush1.bf16.msra.mxu1 %v23770_v43  ;;  %v23815_v43 = vld [vmem:[%s32096_s12 + $0x1e8] ss:$16 sps:$4 sm:$0xff]  }
 0x8f6   : > { %10360 = vmatprep.subr.bf16.mxu1 %v23778_v2  ;;  %v23823_v2 = vld [vmem:[%s32096_s12 + $0x1cc] ss:$16 sps:$4 sm:$0xff]  }
 0x8f9   : > { %10361 = vmatpush1.bf16.msra.mxu1 %v23776_v53  ;;  %v23821_v53 = vld [vmem:[%s32096_s12 + $0x1c8] ss:$16 sps:$4 sm:$0xff]  }
 0x8fa   : > { %10362 = vmatprep.subr.bf16.mxu1 %v23784_v39  ;;  %v23829_v39 = vld [vmem:[%s32096_s12 + $0x1ac] ss:$16 sps:$4 sm:$0xff]  }
 0x8fd   : > { %10363 = vmatpush1.bf16.msra.mxu1 %v23782_v47  ;;  %v23827_v47 = vld [vmem:[%s32096_s12 + $0x1a8] ss:$16 sps:$4 sm:$0xff]  }
 0x8fe   : > { %10364 = vmatprep.subr.bf16.mxu1 %v23790_v38  ;;  %v23835_v38 = vld [vmem:[%s32096_s12 + $0x18c] ss:$16 sps:$4 sm:$0xff]  }
 0x901   : > { %10365 = vmatpush1.bf16.msra.mxu1 %v23788_v48  ;;  %v23833_v48 = vld [vmem:[%s32096_s12 + $0x188] ss:$16 sps:$4 sm:$0xff]  }
 0x902   : > { %10366 = vmatprep.subr.bf16.mxu1 %v23796_v49  ;;  %v23841_v49 = vld [vmem:[%s32096_s12 + $0x16c] ss:$16 sps:$4 sm:$0xff]  }
 0x905   : > { %10367 = vmatpush1.bf16.msra.mxu1 %v23794_v50  ;;  %v23839_v50 = vld [vmem:[%s32096_s12 + $0x168] ss:$16 sps:$4 sm:$0xff]  }
 0x906   : > { %10368 = vmatprep.subr.bf16.mxu1 %v23802_v51  ;;  %v23847_v51 = vld [vmem:[%s32096_s12 + $0x14c] ss:$16 sps:$4 sm:$0xff]  }
 0x909   : > { %10369 = vmatpush1.bf16.msra.mxu1 %v23800_v44 }
 0x90a   : > { %10370 = vmatprep.subr.bf16.mxu1 %v23808_v58  ;;  %v23845_v58 = vld [vmem:[%s32096_s12 + $0x148] ss:$16 sps:$4 sm:$0xff]  }
 0x90d   : > { %10371 = vmatpush1.bf16.msra.mxu1 %v23806_v21 }
 0x90e   : > { %10372 = vmatprep.subr.bf16.mxu1 %v23814_v59  ;;  %v23853_v59 = vld [vmem:[%s32096_s12 + $0x12c] ss:$16 sps:$4 sm:$0xff]  }
 0x911   : > { %10373 = vmatpush2.bf16.msra.mxu1 %v23812_v60 }
 0x912   : > { %10374 = vmatprep.subr.bf16.mxu1 %v23820_v62  ;;  %v23851_v62 = vld [vmem:[%s32096_s12 + $0x128] ss:$16 sps:$4 sm:$0xff]  }
 0x915   : > { %10375 = vmatpush2.bf16.msra.mxu1 %v23818_v4 }
 0x916   : > { %10376 = vmatprep.subr.bf16.mxu1 %v23826_v0  ;;  %v23859_v0 = vld [vmem:[%s32096_s12 + $0x10c] ss:$16 sps:$4 sm:$0xff]  }
 0x919   : > { %10377 = vmatpush2.bf16.msra.mxu1 %v23824_v28 }
 0x91a   : > { %10378 = vmatprep.subr.bf16.mxu1 %v23832_v20  ;;  %v23857_v20 = vld [vmem:[%s32096_s12 + $0x108] ss:$16 sps:$4 sm:$0xff]  }
 0x91d   : > { %10379 = vmatpush2.bf16.msra.mxu1 %v23830_v54 }
 0x91e   : > { %10380 = vmatprep.subr.bf16.mxu1 %v23838_v56 }
 0x921   : > { %10381 = vmatpush2.bf16.msra.mxu1 %v23836_v55  ;;  %v23865_v55 = vld [vmem:[%s32096_s12 + $0x4e4] ss:$16 sps:$4 sm:$0xff]  }
 0x922   : > { %10382 = vmatprep.subr.bf16.mxu1 %v23844_v9 }
 0x925   : > { %10383 = vmatpush2.bf16.msra.mxu1 %v23842_v1 }
 0x926   : > { %10384 = vmatprep.subr.bf16.mxu1 %v23850_v12  ;;  %v23860_v12 = vld [vmem:[%s32096_s12 + $0x2e8] ss:$16 sps:$4 sm:$0xff]  }
 0x929   : > { %10385 = vmatpush2.bf16.msra.mxu1 %v23848_v10 }
 0x92a   : > { %10386 = vmatprep.subr.bf16.mxu1 %v23856_v46 }
 0x92d   : > { %10387 = vmatpush2.bf16.msra.mxu1 %v23854_v13  ;;  %v23863_v13 = vld [vmem:[%s32096_s12 + $0x4e0] ss:$16 sps:$4 sm:$0xff]  }
 0x92e   : > { %10438 = vmatprep.subr.bf16.mxu1 %v23862_v5 }
 0x968   : > { %v9404_v40 = vpop.f32.mrf.mxu0 }
 0x96a   : > { %v9406_v7 = vpop.f32.mrf.mxu0 }
 0x96c   : > { %v9408_v16 = vpop.f32.mrf.mxu0 }
 0x96d   : > { %v23866_v16 = vld [vmem:[%s32096_s12 + $0x2c8] ss:$16 sps:$4 sm:$0xff]  }
 0x96e   : > { %v9409_v18 = vpop.f32.mrf.mxu0 }
 0x96f   : > { %v23869_v18 = vld [vmem:[%s32096_s12 + $0x4c0] ss:$16 sps:$4 sm:$0xff]  }
 0x970   : > { %v9491_v30 = vpop.f32.mrf.mxu0 }
 0x971   : > { %v9539_v19 = vmax.f32 %v9404_v40, %v9491_v30  ;;  %v23868_v40 = vld [vmem:[%s32096_s12 + $0x2cc] ss:$16 sps:$4 sm:$0xff]  }
 0x972   : > { %v9493_v61 = vpop.f32.mrf.mxu0  ;;  %v23874_v30 = vld [vmem:[%s32096_s12 + $0x2ac] ss:$16 sps:$4 sm:$0xff]  }
 0x973   : > { %v9540_v29 = vmax.f32 %v9406_v7, %v9493_v61  ;;  %v28559_v33 = vpack.c.bf16 %v9539_v19, %v9539_v19  ;;  %v23871_v7 = vld [vmem:[%s32096_s12 + $0x4c4] ss:$16 sps:$4 sm:$0xff]   ;;  %v23872_v61 = vld [vmem:[%s32096_s12 + $0x2a8] ss:$16 sps:$4 sm:$0xff]  }
 0x974   : > { %v9495_v23 = vpop.f32.mrf.mxu0  ;;  %v23877_v19 = vld [vmem:[%s32096_s12 + $0x4a4] ss:$16 sps:$4 sm:$0xff]  }
 0x975   : > { %v28561_v45 = vpack.c.bf16 %v9540_v29, %v9540_v29  ;;  %v23875_v29 = vld [vmem:[%s32096_s12 + $0x4a0] ss:$16 sps:$4 sm:$0xff]   ;;  %v23880_v23 = vld [vmem:[%s32096_s12 + $0x28c] ss:$16 sps:$4 sm:$0xff]  }
 0x976   : > { %v9496_v26 = vpop.f32.mrf.mxu0 }
 0x977   : > { %10347 = vmatprep.mubr.bf16.mxu0 %v28561_v45  ;;  %v23881_v26 = vld [vmem:[%s32096_s12 + $0x480] ss:$16 sps:$4 sm:$0xff]  }
 0x978   : > { %10348 = vmatmul.mubr.bf16.vlgmr.msra.gmra.mxu0 %v28559_v33 }
 0x979   : > { %10398 = vmatpush1.bf16.msra.mxu0 %v23767_v63  ;;  %10429 = vmatprep.mubr.bf16.mxu0 %v28561_v45  ;;  %v23883_v63 = vld [vmem:[%s32096_s12 + $0x484] ss:$16 sps:$4 sm:$0xff]  }
 0x97a   : > { %10399 = vmatprep.subr.bf16.mxu0 %v23775_v57  ;;  %v23878_v57 = vld [vmem:[%s32096_s12 + $0x288] ss:$16 sps:$4 sm:$0xff]  }
 0x97d   : > { %10400 = vmatpush1.bf16.msra.mxu0 %v23773_v25  ;;  %v23886_v25 = vld [vmem:[%s32096_s12 + $0x26c] ss:$16 sps:$4 sm:$0xff]  }
 0x97e   : > { %10401 = vmatprep.subr.bf16.mxu0 %v23781_v27  ;;  %v23889_v27 = vld [vmem:[%s32096_s12 + $0x464] ss:$16 sps:$4 sm:$0xff]  }
 0x981   : > { %10402 = vmatpush1.bf16.msra.mxu0 %v23779_v15  ;;  %v23884_v15 = vld [vmem:[%s32096_s12 + $0x268] ss:$16 sps:$4 sm:$0xff]  }
 0x982   : > { %10403 = vmatprep.subr.bf16.mxu0 %v23787_v31  ;;  %v23887_v31 = vld [vmem:[%s32096_s12 + $0x460] ss:$16 sps:$4 sm:$0xff]  }
 0x985   : > { %10404 = vmatpush1.bf16.msra.mxu0 %v23785_v34  ;;  %v23892_v34 = vld [vmem:[%s32096_s12 + $0x24c] ss:$16 sps:$4 sm:$0xff]  }
 0x986   : > { %10405 = vmatprep.subr.bf16.mxu0 %v23793_v32  ;;  %v23895_v32 = vld [vmem:[%s32096_s12 + $0x444] ss:$16 sps:$4 sm:$0xff]  }
 0x989   : > { %10406 = vmatpush1.bf16.msra.mxu0 %v23791_v22  ;;  %v23890_v22 = vld [vmem:[%s32096_s12 + $0x248] ss:$16 sps:$4 sm:$0xff]  }
 0x98a   : > { %10407 = vmatprep.subr.bf16.mxu0 %v23799_v35  ;;  %v23893_v35 = vld [vmem:[%s32096_s12 + $0x440] ss:$16 sps:$4 sm:$0xff]  }
 0x98d   : > { %10408 = vmatpush1.bf16.msra.mxu0 %v23797_v36  ;;  %v23898_v36 = vld [vmem:[%s32096_s12 + $0x22c] ss:$16 sps:$4 sm:$0xff]  }
 0x98e   : > { %10409 = vmatprep.subr.bf16.mxu0 %v23805_v41  ;;  %v23901_v41 = vld [vmem:[%s32096_s12 + $0x424] ss:$16 sps:$4 sm:$0xff]  }
 0x991   : > { %10410 = vmatpush1.bf16.msra.mxu0 %v23803_v37  ;;  %v23896_v37 = vld [vmem:[%s32096_s12 + $0x228] ss:$16 sps:$4 sm:$0xff]  }
 0x992   : > { %10411 = vmatprep.subr.bf16.mxu0 %v23811_v52  ;;  %v23899_v52 = vld [vmem:[%s32096_s12 + $0x420] ss:$16 sps:$4 sm:$0xff]  }
 0x995   : > { %10412 = vmatpush1.bf16.msra.mxu0 %v23809_v42  ;;  %v23904_v42 = vld [vmem:[%s32096_s12 + $0x20c] ss:$16 sps:$4 sm:$0xff]  }
 0x996   : > { %10413 = vmatprep.subr.bf16.mxu0 %v23817_v24  ;;  %v23907_v24 = vld [vmem:[%s32096_s12 + $0x404] ss:$16 sps:$4 sm:$0xff]  }
 0x999   : > { %10414 = vmatpush2.bf16.msra.mxu0 %v23815_v43  ;;  %v23902_v43 = vld [vmem:[%s32096_s12 + $0x208] ss:$16 sps:$4 sm:$0xff]  }
 0x99a   : > { %10415 = vmatprep.subr.bf16.mxu0 %v23823_v2  ;;  %v23905_v2 = vld [vmem:[%s32096_s12 + $0x400] ss:$16 sps:$4 sm:$0xff]  }
 0x99d   : > { %10416 = vmatpush2.bf16.msra.mxu0 %v23821_v53  ;;  %v23910_v53 = vld [vmem:[%s32096_s12 + $0x3ec] ss:$16 sps:$4 sm:$0xff]  }
 0x99e   : > { %10417 = vmatprep.subr.bf16.mxu0 %v23829_v39  ;;  %v23913_v39 = vld [vmem:[%s32096_s12 + $0x5e4] ss:$16 sps:$4 sm:$0xff]  }
 0x9a1   : > { %10418 = vmatpush2.bf16.msra.mxu0 %v23827_v47  ;;  %v23908_v47 = vld [vmem:[%s32096_s12 + $0x3e8] ss:$16 sps:$4 sm:$0xff]  }
 0x9a2   : > { %10419 = vmatprep.subr.bf16.mxu0 %v23835_v38  ;;  %v23911_v38 = vld [vmem:[%s32096_s12 + $0x5e0] ss:$16 sps:$4 sm:$0xff]  }
 0x9a5   : > { %10420 = vmatpush2.bf16.msra.mxu0 %v23833_v48  ;;  %v23916_v48 = vld [vmem:[%s32096_s12 + $0x3cc] ss:$16 sps:$4 sm:$0xff]  }
 0x9a6   : > { %10421 = vmatprep.subr.bf16.mxu0 %v23841_v49  ;;  %v23919_v49 = vld [vmem:[%s32096_s12 + $0x5c4] ss:$16 sps:$4 sm:$0xff]  }
 0x9a8   : > { %v9445_v44 = vpop.f32.mrf.mxu1 }
 0x9a9   : > { %10422 = vmatpush2.bf16.msra.mxu0 %v23839_v50  ;;  %v23914_v50 = vld [vmem:[%s32096_s12 + $0x3c8] ss:$16 sps:$4 sm:$0xff]  }
 0x9aa   : > { %v9447_v21 = vpop.f32.mrf.mxu1  ;;  %10423 = vmatprep.subr.bf16.mxu0 %v23847_v51  ;;  %v23917_v51 = vld [vmem:[%s32096_s12 + $0x5c0] ss:$16 sps:$4 sm:$0xff]  }
 0x9ac   : > { %v9449_v60 = vpop.f32.mrf.mxu1 }
 0x9ad   : > { %10424 = vmatpush2.bf16.msra.mxu0 %v23845_v58  ;;  %v23925_v58 = vld [vmem:[%s32096_s12 + $0x5a4] ss:$16 sps:$4 sm:$0xff]   ;;  %v23928_v60 = vld [vmem:[%s32096_s12 + $0x38c] ss:$16 sps:$4 sm:$0xff]  }
 0x9ae   : > { %v9450_v4 = vpop.f32.mrf.mxu1  ;;  %10425 = vmatprep.subr.bf16.mxu0 %v23853_v59  ;;  %v23923_v59 = vld [vmem:[%s32096_s12 + $0x5a0] ss:$16 sps:$4 sm:$0xff]  }
 0x9af   : > { %v23926_v4 = vld [vmem:[%s32096_s12 + $0x388] ss:$16 sps:$4 sm:$0xff]  }
 0x9b0   : > { %v9532_v28 = vpop.f32.mrf.mxu1 }
 0x9b1   : > { %10426 = vmatpush2.bf16.msra.mxu0 %v23851_v62  ;;  %v9541_v54 = vmax.f32 %v9445_v44, %v9532_v28  ;;  %v23922_v44 = vld [vmem:[%s32096_s12 + $0x3ac] ss:$16 sps:$4 sm:$0xff]   ;;  %v23931_v62 = vld [vmem:[%s32096_s12 + $0x584] ss:$16 sps:$4 sm:$0xff]  }
 0x9b2   : > { %v9534_v56 = vpop.f32.mrf.mxu1  ;;  %10427 = vmatprep.subr.bf16.mxu0 %v23859_v0  ;;  %v23929_v0 = vld [vmem:[%s32096_s12 + $0x580] ss:$16 sps:$4 sm:$0xff]   ;;  %v23934_v28 = vld [vmem:[%s32096_s12 + $0x36c] ss:$16 sps:$4 sm:$0xff]  }
 0x9b3   : > { %v9542_v1 = vmax.f32 %v9447_v21, %v9534_v56  ;;  %v28670_v46 = vpack.c.bf16 %v9541_v54, %v9541_v54  ;;  %v23920_v21 = vld [vmem:[%s32096_s12 + $0x3a8] ss:$16 sps:$4 sm:$0xff]   ;;  %v23935_v56 = vld [vmem:[%s32096_s12 + $0x560] ss:$16 sps:$4 sm:$0xff]  }
 0x9b4   : > { %v9536_v9 = vpop.f32.mrf.mxu1  ;;  %v23932_v54 = vld [vmem:[%s32096_s12 + $0x368] ss:$16 sps:$4 sm:$0xff]  }
 0x9b5   : > { %v28662_v10 = vpack.c.bf16 %v9542_v1, %v9542_v1  ;;  %10428 = vmatpush2.bf16.msra.mxu0 %v23857_v20  ;;  %v23937_v20 = vld [vmem:[%s32096_s12 + $0x564] ss:$16 sps:$4 sm:$0xff]   ;;  %v23938_v9 = vld [vmem:[%s32096_s12 + $0x348] ss:$16 sps:$4 sm:$0xff]  }
 0x9b6   : > { %v9537_v5 = vpop.f32.mrf.mxu1  ;;  %11248 = vmatprep.subr.bf16.mxu0 %v23865_v55  ;;  %v23940_v55 = vld [vmem:[%s32096_s12 + $0x34c] ss:$16 sps:$4 sm:$0xff]   ;;  %v23943_v1 = vld [vmem:[%s32096_s12 + $0x544] ss:$16 sps:$4 sm:$0xff]  }
 0x9b7   : > { %10388 = vmatprep.mubr.bf16.mxu1 %v28662_v10  ;;  %v23949_v5 = vld [vmem:[%s32096_s12 + $0x524] ss:$16 sps:$4 sm:$0xff]  }
 0x9b8   : > { %10430 = vmatmul.mubr.bf16.vlgmr.msra.gmra.mxu0 %v28559_v33  ;;  %10389 = vmatmul.mubr.bf16.vlgmr.msra.gmra.mxu1 %v28670_v46 }
 0x9b9   : > { %10439 = vmatpush1.bf16.msra.mxu1 %v23860_v12  ;;  %11249 = vmatpush1.bf16.msra.mxu0 %v23863_v13  ;;  %v23941_v12 = vld [vmem:[%s32096_s12 + $0x540] ss:$16 sps:$4 sm:$0xff]   ;;  %v23946_v13 = vld [vmem:[%s32096_s12 + $0x32c] ss:$16 sps:$4 sm:$0xff]  }
 0x9ba   : > { %11280 = vmatprep.mubr.bf16.mxu0 %v28561_v45  ;;  %10470 = vmatprep.mubr.bf16.mxu1 %v28662_v10 }
 0x9bb   : > { %10440 = vmatprep.subr.bf16.mxu1 %v23868_v40  ;;  %11250 = vmatprep.subr.bf16.mxu0 %v23871_v7  ;;  %v23944_v40 = vld [vmem:[%s32096_s12 + $0x328] ss:$16 sps:$4 sm:$0xff]   ;;  %v23947_v7 = vld [vmem:[%s32096_s12 + $0x520] ss:$16 sps:$4 sm:$0xff]  }
 0x9bd   : > { %10441 = vmatpush1.bf16.msra.mxu1 %v23866_v16  ;;  %11251 = vmatpush1.bf16.msra.mxu0 %v23869_v18  ;;  %v23952_v16 = vld [vmem:[%s32096_s12 + $0x30c] ss:$16 sps:$4 sm:$0xff]   ;;  %v23955_v18 = vld [vmem:[%s32096_s12 + $0x504] ss:$16 sps:$4 sm:$0xff]  }
 0x9be   : > { %10442 = vmatprep.subr.bf16.mxu1 %v23874_v30  ;;  %11252 = vmatprep.subr.bf16.mxu0 %v23877_v19  ;;  %v23950_v30 = vld [vmem:[%s32096_s12 + $0x308] ss:$16 sps:$4 sm:$0xff]   ;;  %v23953_v19 = vld [vmem:[%s32096_s12 + $0x500] ss:$16 sps:$4 sm:$0xff]  }
 0x9c1   : > { %10443 = vmatpush1.bf16.msra.mxu1 %v23872_v61  ;;  %11253 = vmatpush1.bf16.msra.mxu0 %v23875_v29  ;;  %v23958_v61 = vld [vmem:[%s32096_s12 + $0x6e4] ss:$16 sps:$4 sm:$0xff]   ;;  %v23961_v29 = vld [vmem:[%s32096_s12 + $0x4ec] ss:$16 sps:$4 sm:$0xff]  }
 0x9c2   : > { %10444 = vmatprep.subr.bf16.mxu1 %v23880_v23  ;;  %11254 = vmatprep.subr.bf16.mxu0 %v23883_v63  ;;  %v23956_v23 = vld [vmem:[%s32096_s12 + $0x6e0] ss:$16 sps:$4 sm:$0xff]   ;;  %v23959_v63 = vld [vmem:[%s32096_s12 + $0x4e8] ss:$16 sps:$4 sm:$0xff]  }
 0x9c5   : > { %10445 = vmatpush1.bf16.msra.mxu1 %v23878_v57  ;;  %11255 = vmatpush1.bf16.msra.mxu0 %v23881_v26  ;;  %v23964_v57 = vld [vmem:[%s32096_s12 + $0x6c4] ss:$16 sps:$4 sm:$0xff]   ;;  %v23967_v26 = vld [vmem:[%s32096_s12 + $0x4cc] ss:$16 sps:$4 sm:$0xff]  }
 0x9c6   : > { %10446 = vmatprep.subr.bf16.mxu1 %v23886_v25  ;;  %11256 = vmatprep.subr.bf16.mxu0 %v23889_v27  ;;  %v23962_v25 = vld [vmem:[%s32096_s12 + $0x6c0] ss:$16 sps:$4 sm:$0xff]   ;;  %v23965_v27 = vld [vmem:[%s32096_s12 + $0x4c8] ss:$16 sps:$4 sm:$0xff]  }
 0x9c9   : > { %10447 = vmatpush1.bf16.msra.mxu1 %v23884_v15  ;;  %11257 = vmatpush1.bf16.msra.mxu0 %v23887_v31  ;;  %v23970_v15 = vld [vmem:[%s32096_s12 + $0x6a4] ss:$16 sps:$4 sm:$0xff]   ;;  %v23973_v31 = vld [vmem:[%s32096_s12 + $0x4ac] ss:$16 sps:$4 sm:$0xff]  }
 0x9ca   : > { %10448 = vmatprep.subr.bf16.mxu1 %v23892_v34  ;;  %11258 = vmatprep.subr.bf16.mxu0 %v23895_v32  ;;  %v23968_v34 = vld [vmem:[%s32096_s12 + $0x6a0] ss:$16 sps:$4 sm:$0xff]   ;;  %v23976_v32 = vld [vmem:[%s32096_s12 + $0x684] ss:$16 sps:$4 sm:$0xff]  }
 0x9cd   : > { %10449 = vmatpush1.bf16.msra.mxu1 %v23890_v22  ;;  %11259 = vmatpush1.bf16.msra.mxu0 %v23893_v35  ;;  %v23979_v22 = vld [vmem:[%s32096_s12 + $0x48c] ss:$16 sps:$4 sm:$0xff]   ;;  %v23974_v35 = vld [vmem:[%s32096_s12 + $0x680] ss:$16 sps:$4 sm:$0xff]  }
 0x9ce   : > { %10450 = vmatprep.subr.bf16.mxu1 %v23898_v36  ;;  %11260 = vmatprep.subr.bf16.mxu0 %v23901_v41  ;;  %v23977_v36 = vld [vmem:[%s32096_s12 + $0x488] ss:$16 sps:$4 sm:$0xff]   ;;  %v23982_v41 = vld [vmem:[%s32096_s12 + $0x664] ss:$16 sps:$4 sm:$0xff]  }
 0x9d1   : > { %10451 = vmatpush1.bf16.msra.mxu1 %v23896_v37  ;;  %11261 = vmatpush1.bf16.msra.mxu0 %v23899_v52  ;;  %v23985_v37 = vld [vmem:[%s32096_s12 + $0x46c] ss:$16 sps:$4 sm:$0xff]   ;;  %v23980_v52 = vld [vmem:[%s32096_s12 + $0x660] ss:$16 sps:$4 sm:$0xff]  }
 0x9d2   : > { %10452 = vmatprep.subr.bf16.mxu1 %v23904_v42  ;;  %11262 = vmatprep.subr.bf16.mxu0 %v23907_v24  ;;  %v23983_v42 = vld [vmem:[%s32096_s12 + $0x468] ss:$16 sps:$4 sm:$0xff]   ;;  %v23988_v24 = vld [vmem:[%s32096_s12 + $0x644] ss:$16 sps:$4 sm:$0xff]  }
 0x9d5   : > { %10453 = vmatpush1.bf16.msra.mxu1 %v23902_v43  ;;  %11263 = vmatpush1.bf16.msra.mxu0 %v23905_v2  ;;  %v23991_v43 = vld [vmem:[%s32096_s12 + $0x44c] ss:$16 sps:$4 sm:$0xff]   ;;  %v23986_v2 = vld [vmem:[%s32096_s12 + $0x640] ss:$16 sps:$4 sm:$0xff]  }
 0x9d6   : > { %10454 = vmatprep.subr.bf16.mxu1 %v23910_v53  ;;  %11264 = vmatprep.subr.bf16.mxu0 %v23913_v39  ;;  %v23989_v53 = vld [vmem:[%s32096_s12 + $0x448] ss:$16 sps:$4 sm:$0xff]   ;;  %v23994_v39 = vld [vmem:[%s32096_s12 + $0x624] ss:$16 sps:$4 sm:$0xff]  }
 0x9d9   : > { %10455 = vmatpush2.bf16.msra.mxu1 %v23908_v47  ;;  %11265 = vmatpush2.bf16.msra.mxu0 %v23911_v38  ;;  %v23997_v47 = vld [vmem:[%s32096_s12 + $0x42c] ss:$16 sps:$4 sm:$0xff]   ;;  %v23992_v38 = vld [vmem:[%s32096_s12 + $0x620] ss:$16 sps:$4 sm:$0xff]  }
 0x9da   : > { %10456 = vmatprep.subr.bf16.mxu1 %v23916_v48  ;;  %11266 = vmatprep.subr.bf16.mxu0 %v23919_v49  ;;  %v23995_v48 = vld [vmem:[%s32096_s12 + $0x428] ss:$16 sps:$4 sm:$0xff]   ;;  %v24000_v49 = vld [vmem:[%s32096_s12 + $0x604] ss:$16 sps:$4 sm:$0xff]  }
 0x9dd   : > { %10457 = vmatpush2.bf16.msra.mxu1 %v23914_v50  ;;  %11267 = vmatpush2.bf16.msra.mxu0 %v23917_v51  ;;  %v24003_v50 = vld [vmem:[%s32096_s12 + $0x40c] ss:$16 sps:$4 sm:$0xff]   ;;  %v23998_v51 = vld [vmem:[%s32096_s12 + $0x600] ss:$16 sps:$4 sm:$0xff]  }
 0x9de   : > { %10458 = vmatprep.subr.bf16.mxu1 %v23922_v44  ;;  %11268 = vmatprep.subr.bf16.mxu0 %v23925_v58  ;;  %v24001_v44 = vld [vmem:[%s32096_s12 + $0x408] ss:$16 sps:$4 sm:$0xff]   ;;  %v24006_v58 = vld [vmem:[%s32096_s12 + $0x7e4] ss:$16 sps:$4 sm:$0xff]  }
 0x9e1   : > { %10459 = vmatpush2.bf16.msra.mxu1 %v23920_v21  ;;  %11269 = vmatpush2.bf16.msra.mxu0 %v23923_v59  ;;  %v24009_v21 = vld [vmem:[%s32096_s12 + $0x5ec] ss:$16 sps:$4 sm:$0xff]   ;;  %v24004_v59 = vld [vmem:[%s32096_s12 + $0x7e0] ss:$16 sps:$4 sm:$0xff]  }
 0x9e2   : > { %10460 = vmatprep.subr.bf16.mxu1 %v23928_v60  ;;  %11270 = vmatprep.subr.bf16.mxu0 %v23931_v62  ;;  %v24007_v60 = vld [vmem:[%s32096_s12 + $0x5e8] ss:$16 sps:$4 sm:$0xff]   ;;  %v24012_v62 = vld [vmem:[%s32096_s12 + $0x7c4] ss:$16 sps:$4 sm:$0xff]  }
 0x9e5   : > { %10461 = vmatpush2.bf16.msra.mxu1 %v23926_v4  ;;  %11271 = vmatpush2.bf16.msra.mxu0 %v23929_v0  ;;  %v24015_v4 = vld [vmem:[%s32096_s12 + $0x5cc] ss:$16 sps:$4 sm:$0xff]   ;;  %v24010_v0 = vld [vmem:[%s32096_s12 + $0x7c0] ss:$16 sps:$4 sm:$0xff]  }
 0x9e6   : > { %10462 = vmatprep.subr.bf16.mxu1 %v23934_v28  ;;  %11272 = vmatprep.subr.bf16.mxu0 %v23937_v20  ;;  %v24013_v28 = vld [vmem:[%s32096_s12 + $0x5c8] ss:$16 sps:$4 sm:$0xff]   ;;  %v24018_v20 = vld [vmem:[%s32096_s12 + $0x7a4] ss:$16 sps:$4 sm:$0xff]  }
 0x9e9   : > { %10463 = vmatpush2.bf16.msra.mxu1 %v23932_v54  ;;  %11273 = vmatpush2.bf16.msra.mxu0 %v23935_v56  ;;  %v24021_v54 = vld [vmem:[%s32096_s12 + $0x5ac] ss:$16 sps:$4 sm:$0xff]   ;;  %v24016_v56 = vld [vmem:[%s32096_s12 + $0x7a0] ss:$16 sps:$4 sm:$0xff]  }
 0x9ea   : > { %10464 = vmatprep.subr.bf16.mxu1 %v23940_v55  ;;  %11274 = vmatprep.subr.bf16.mxu0 %v23943_v1  ;;  %v24019_v55 = vld [vmem:[%s32096_s12 + $0x5a8] ss:$16 sps:$4 sm:$0xff]   ;;  %v24024_v1 = vld [vmem:[%s32096_s12 + $0x784] ss:$16 sps:$4 sm:$0xff]  }
 0x9ed   : > { %10465 = vmatpush2.bf16.msra.mxu1 %v23938_v9  ;;  %11275 = vmatpush2.bf16.msra.mxu0 %v23941_v12  ;;  %v24027_v9 = vld [vmem:[%s32096_s12 + $0x58c] ss:$16 sps:$4 sm:$0xff]   ;;  %v24022_v12 = vld [vmem:[%s32096_s12 + $0x780] ss:$16 sps:$4 sm:$0xff]  }
 0x9ee   : > { %10466 = vmatprep.subr.bf16.mxu1 %v23946_v13  ;;  %11276 = vmatprep.subr.bf16.mxu0 %v23949_v5  ;;  %v24025_v13 = vld [vmem:[%s32096_s12 + $0x588] ss:$16 sps:$4 sm:$0xff]   ;;  %v24030_v5 = vld [vmem:[%s32096_s12 + $0x764] ss:$16 sps:$4 sm:$0xff]  }
 0x9f1   : > { %10467 = vmatpush2.bf16.msra.mxu1 %v23944_v40  ;;  %11277 = vmatpush2.bf16.msra.mxu0 %v23947_v7  ;;  %v24033_v40 = vld [vmem:[%s32096_s12 + $0x56c] ss:$16 sps:$4 sm:$0xff]   ;;  %v24028_v7 = vld [vmem:[%s32096_s12 + $0x760] ss:$16 sps:$4 sm:$0xff]  }
 0x9f2   : > { %10468 = vmatprep.subr.bf16.mxu1 %v23952_v16  ;;  %11278 = vmatprep.subr.bf16.mxu0 %v23955_v18  ;;  %v24031_v16 = vld [vmem:[%s32096_s12 + $0x568] ss:$16 sps:$4 sm:$0xff]   ;;  %v24036_v18 = vld [vmem:[%s32096_s12 + $0x744] ss:$16 sps:$4 sm:$0xff]  }
 0x9f5   : > { %10469 = vmatpush2.bf16.msra.mxu1 %v23950_v30  ;;  %11279 = vmatpush2.bf16.msra.mxu0 %v23953_v19  ;;  %v24039_v30 = vld [vmem:[%s32096_s12 + $0x54c] ss:$16 sps:$4 sm:$0xff]   ;;  %v24034_v19 = vld [vmem:[%s32096_s12 + $0x740] ss:$16 sps:$4 sm:$0xff]  }
 0x9f6   : > { %11289 = vmatprep.subr.bf16.mxu1 %v23958_v61  ;;  %11330 = vmatprep.subr.bf16.mxu0 %v23961_v29  ;;  %v24037_v61 = vld [vmem:[%s32096_s12 + $0x548] ss:$16 sps:$4 sm:$0xff]   ;;  %v24042_v29 = vld [vmem:[%s32096_s12 + $0x724] ss:$16 sps:$4 sm:$0xff]  }
 0x9f8   : > { %10471 = vmatmul.mubr.bf16.vlgmr.msra.gmra.mxu1 %v28670_v46  ;;  %11281 = vmatmul.mubr.bf16.vlgmr.msra.gmra.mxu0 %v28559_v33 }
 0x9f9   : > { %11290 = vmatpush1.bf16.msra.mxu1 %v23956_v23  ;;  %11321 = vmatprep.mubr.bf16.mxu1 %v28662_v10  ;;  %v24045_v23 = vld [vmem:[%s32096_s12 + $0x52c] ss:$16 sps:$4 sm:$0xff]  }
 0x9fa   : > { %11331 = vmatpush1.bf16.msra.mxu0 %v23959_v63  ;;  %11362 = vmatprep.mubr.bf16.mxu0 %v28561_v45  ;;  %v23971_v45 = vld [vmem:[%s32096_s12 + $0x4a8] ss:$16 sps:$4 sm:$0xff]   ;;  %v24040_v63 = vld [vmem:[%s32096_s12 + $0x720] ss:$16 sps:$4 sm:$0xff]  }
 0x9fb   : > { %11291 = vmatprep.subr.bf16.mxu1 %v23964_v57  ;;  %11332 = vmatprep.subr.bf16.mxu0 %v23967_v26  ;;  %v24043_v57 = vld [vmem:[%s32096_s12 + $0x528] ss:$16 sps:$4 sm:$0xff]   ;;  %v24048_v26 = vld [vmem:[%s32096_s12 + $0x704] ss:$16 sps:$4 sm:$0xff]  }
 0x9fd   : > { %11292 = vmatpush1.bf16.msra.mxu1 %v23962_v25  ;;  %v24051_v25 = vld [vmem:[%s32096_s12 + $0x50c] ss:$16 sps:$4 sm:$0xff]  }
 0x9fe   : > { %11333 = vmatpush1.bf16.msra.mxu0 %v23965_v27  ;;  %11293 = vmatprep.subr.bf16.mxu1 %v23970_v15  ;;  %v24046_v27 = vld [vmem:[%s32096_s12 + $0x700] ss:$16 sps:$4 sm:$0xff]   ;;  %v24049_v15 = vld [vmem:[%s32096_s12 + $0x508] ss:$16 sps:$4 sm:$0xff]  }
 0x9ff   : > { %11334 = vmatprep.subr.bf16.mxu0 %v23973_v31  ;;  %v24054_v31 = vld [vmem:[%s32096_s12 + $0x6ec] ss:$16 sps:$4 sm:$0xff]  }
 0xa01   : > { %11294 = vmatpush1.bf16.msra.mxu1 %v23968_v34  ;;  %v24052_v34 = vld [vmem:[%s32096_s12 + $0x6e8] ss:$16 sps:$4 sm:$0xff]  }
 0xa02   : > { %11335 = vmatpush1.bf16.msra.mxu0 %v23971_v45  ;;  %11295 = vmatprep.subr.bf16.mxu1 %v23976_v32  ;;  %v24057_v45 = vld [vmem:[%s32096_s12 + $0x6cc] ss:$16 sps:$4 sm:$0xff]  }
 0xa03   : > { %11336 = vmatprep.subr.bf16.mxu0 %v23979_v22  ;;  %v24055_v22 = vld [vmem:[%s32096_s12 + $0x6c8] ss:$16 sps:$4 sm:$0xff]  }
 0xa05   : > { %11296 = vmatpush1.bf16.msra.mxu1 %v23974_v35  ;;  %v24060_v35 = vld [vmem:[%s32096_s12 + $0x6ac] ss:$16 sps:$4 sm:$0xff]  }
 0xa06   : > { %11337 = vmatpush1.bf16.msra.mxu0 %v23977_v36  ;;  %11297 = vmatprep.subr.bf16.mxu1 %v23982_v41 }
 0xa07   : > { %11338 = vmatprep.subr.bf16.mxu0 %v23985_v37  ;;  %v24063_v37 = vld [vmem:[%s32096_s12 + $0x68c] ss:$16 sps:$4 sm:$0xff]  }
 0xa09   : > { %11298 = vmatpush1.bf16.msra.mxu1 %v23980_v52 }
 0xa0a   : > { %11339 = vmatpush1.bf16.msra.mxu0 %v23983_v42  ;;  %11299 = vmatprep.subr.bf16.mxu1 %v23988_v24  ;;  %v24066_v42 = vld [vmem:[%s32096_s12 + $0x66c] ss:$16 sps:$4 sm:$0xff]   ;;  %v24064_v24 = vld [vmem:[%s32096_s12 + $0x668] ss:$16 sps:$4 sm:$0xff]  }
 0xa0b   : > { %11340 = vmatprep.subr.bf16.mxu0 %v23991_v43  ;;  %v24069_v43 = vld [vmem:[%s32096_s12 + $0x64c] ss:$16 sps:$4 sm:$0xff]  }
 0xa0d   : > { %11300 = vmatpush1.bf16.msra.mxu1 %v23986_v2  ;;  %v24067_v2 = vld [vmem:[%s32096_s12 + $0x648] ss:$16 sps:$4 sm:$0xff]  }
 0xa0e   : > { %11341 = vmatpush1.bf16.msra.mxu0 %v23989_v53  ;;  %11301 = vmatprep.subr.bf16.mxu1 %v23994_v39  ;;  %v24072_v53 = vld [vmem:[%s32096_s12 + $0x62c] ss:$16 sps:$4 sm:$0xff]   ;;  %v24070_v39 = vld [vmem:[%s32096_s12 + $0x628] ss:$16 sps:$4 sm:$0xff]  }
 0xa0f   : > { %11342 = vmatprep.subr.bf16.mxu0 %v23997_v47  ;;  %v24075_v47 = vld [vmem:[%s32096_s12 + $0x60c] ss:$16 sps:$4 sm:$0xff]  }
 0xa11   : > { %11302 = vmatpush1.bf16.msra.mxu1 %v23992_v38  ;;  %v24073_v38 = vld [vmem:[%s32096_s12 + $0x608] ss:$16 sps:$4 sm:$0xff]  }
 0xa12   : > { %11343 = vmatpush1.bf16.msra.mxu0 %v23995_v48  ;;  %11303 = vmatprep.subr.bf16.mxu1 %v24000_v49  ;;  %v24078_v48 = vld [vmem:[%s32096_s12 + $0x7ec] ss:$16 sps:$4 sm:$0xff]   ;;  %v24076_v49 = vld [vmem:[%s32096_s12 + $0x7e8] ss:$16 sps:$4 sm:$0xff]  }
 0xa13   : > { %11344 = vmatprep.subr.bf16.mxu0 %v24003_v50  ;;  %v24081_v50 = vld [vmem:[%s32096_s12 + $0x7cc] ss:$16 sps:$4 sm:$0xff]  }
 0xa15   : > { %11304 = vmatpush1.bf16.msra.mxu1 %v23998_v51  ;;  %v24079_v51 = vld [vmem:[%s32096_s12 + $0x7c8] ss:$16 sps:$4 sm:$0xff]  }
 0xa16   : > { %11345 = vmatpush1.bf16.msra.mxu0 %v24001_v44  ;;  %11305 = vmatprep.subr.bf16.mxu1 %v24006_v58  ;;  %v24084_v44 = vld [vmem:[%s32096_s12 + $0x7ac] ss:$16 sps:$4 sm:$0xff]   ;;  %v24082_v58 = vld [vmem:[%s32096_s12 + $0x7a8] ss:$16 sps:$4 sm:$0xff]  }
 0xa17   : > { %11346 = vmatprep.subr.bf16.mxu0 %v24009_v21  ;;  %v24087_v21 = vld [vmem:[%s32096_s12 + $0x78c] ss:$16 sps:$4 sm:$0xff]  }
 0xa19   : > { %11306 = vmatpush2.bf16.msra.mxu1 %v24004_v59  ;;  %v24085_v59 = vld [vmem:[%s32096_s12 + $0x788] ss:$16 sps:$4 sm:$0xff]  }
 0xa1a   : > { %11347 = vmatpush2.bf16.msra.mxu0 %v24007_v60  ;;  %11307 = vmatprep.subr.bf16.mxu1 %v24012_v62  ;;  %v24090_v60 = vld [vmem:[%s32096_s12 + $0x76c] ss:$16 sps:$4 sm:$0xff]   ;;  %v24088_v62 = vld [vmem:[%s32096_s12 + $0x768] ss:$16 sps:$4 sm:$0xff]  }
 0xa1b   : > { %11348 = vmatprep.subr.bf16.mxu0 %v24015_v4  ;;  %v24093_v4 = vld [vmem:[%s32096_s12 + $0x74c] ss:$16 sps:$4 sm:$0xff]  }
 0xa1d   : > { %11308 = vmatpush2.bf16.msra.mxu1 %v24010_v0  ;;  %v24091_v0 = vld [vmem:[%s32096_s12 + $0x748] ss:$16 sps:$4 sm:$0xff]  }
 0xa1e   : > { %11349 = vmatpush2.bf16.msra.mxu0 %v24013_v28  ;;  %11309 = vmatprep.subr.bf16.mxu1 %v24018_v20  ;;  %v24096_v28 = vld [vmem:[%s32096_s12 + $0x72c] ss:$16 sps:$4 sm:$0xff]   ;;  %v24094_v20 = vld [vmem:[%s32096_s12 + $0x728] ss:$16 sps:$4 sm:$0xff]  }
 0xa1f   : > { %11350 = vmatprep.subr.bf16.mxu0 %v24021_v54  ;;  %v24099_v54 = vld [vmem:[%s32096_s12 + $0x70c] ss:$16 sps:$4 sm:$0xff]  }
 0xa21   : > { %11310 = vmatpush2.bf16.msra.mxu1 %v24016_v56  ;;  %v24097_v56 = vld [vmem:[%s32096_s12 + $0x708] ss:$16 sps:$4 sm:$0xff]  }
 0xa22   : > { %11351 = vmatpush2.bf16.msra.mxu0 %v24019_v55  ;;  %11311 = vmatprep.subr.bf16.mxu1 %v24024_v1 }
 0xa23   : > { %11352 = vmatprep.subr.bf16.mxu0 %v24027_v9 }
 0xa25   : > { %11312 = vmatpush2.bf16.msra.mxu1 %v24022_v12 }
 0xa26   : > { %11353 = vmatpush2.bf16.msra.mxu0 %v24025_v13  ;;  %11313 = vmatprep.subr.bf16.mxu1 %v24030_v5 }
 0xa27   : > { %11354 = vmatprep.subr.bf16.mxu0 %v24033_v40 }
 0xa29   : > { %11314 = vmatpush2.bf16.msra.mxu1 %v24028_v7 }
 0xa2a   : > { %11355 = vmatpush2.bf16.msra.mxu0 %v24031_v16  ;;  %11315 = vmatprep.subr.bf16.mxu1 %v24036_v18 }
 0xa2b   : > { %11356 = vmatprep.subr.bf16.mxu0 %v24039_v30  ;;  %v24100_v30 = vld [vmem:[%s32097_s13 + $0x4e0] ss:$16 sps:$4 sm:$0xff]  }
 0xa2d   : > { %11316 = vmatpush2.bf16.msra.mxu1 %v24034_v19  ;;  %v24103_v19 = vld [vmem:[%s32097_s13 + $0x6e0] ss:$16 sps:$4 sm:$0xff]  }
 0xa2e   : > { %11357 = vmatpush2.bf16.msra.mxu0 %v24037_v61  ;;  %11317 = vmatprep.subr.bf16.mxu1 %v24042_v29  ;;  %v24105_v61 = vld [vmem:[%s32097_s13 + $0x6e4] ss:$16 sps:$4 sm:$0xff]  }
 0xa2f   : > { %11358 = vmatprep.subr.bf16.mxu0 %v24045_v23  ;;  %v24108_v29 = vld [vmem:[%s32097_s13 + $0x4c4] ss:$16 sps:$4 sm:$0xff]  }
 0xa30   : > { %v24111_v23 = vld [vmem:[%s32097_s13 + $0x6c4] ss:$16 sps:$4 sm:$0xff]  }
 0xa31   : > { %11318 = vmatpush2.bf16.msra.mxu1 %v24040_v63  ;;  %v24106_v63 = vld [vmem:[%s32097_s13 + $0x4c0] ss:$16 sps:$4 sm:$0xff]  }
 0xa32   : > { %11359 = vmatpush2.bf16.msra.mxu0 %v24043_v57  ;;  %11319 = vmatprep.subr.bf16.mxu1 %v24048_v26  ;;  %v24109_v57 = vld [vmem:[%s32097_s13 + $0x6c0] ss:$16 sps:$4 sm:$0xff]   ;;  %v24114_v26 = vld [vmem:[%s32097_s13 + $0x4a4] ss:$16 sps:$4 sm:$0xff]  }
 0xa33   : > { %11360 = vmatprep.subr.bf16.mxu0 %v24051_v25  ;;  %v24117_v25 = vld [vmem:[%s32097_s13 + $0x6a4] ss:$16 sps:$4 sm:$0xff]  }
 0xa35   : > { %11320 = vmatpush2.bf16.msra.mxu1 %v24046_v27  ;;  %v24112_v27 = vld [vmem:[%s32097_s13 + $0x4a0] ss:$16 sps:$4 sm:$0xff]  }
 0xa36   : > { %11361 = vmatpush2.bf16.msra.mxu0 %v24049_v15  ;;  %11371 = vmatprep.subr.bf16.mxu1 %v24054_v31  ;;  %v24115_v15 = vld [vmem:[%s32097_s13 + $0x6a0] ss:$16 sps:$4 sm:$0xff]   ;;  %v24120_v31 = vld [vmem:[%s32097_s13 + $0x484] ss:$16 sps:$4 sm:$0xff]  }
 0xa38   : > { %11322 = vmatmul.mubr.bf16.vlgmr.msra.gmra.mxu1 %v28670_v46  ;;  %v29063_v32 = vpop.f32.mrf.mxu0 }
 0xa39   : > { %11363 = vmatmul.mubr.bf16.vlgmr.msra.gmra.mxu0 %v28559_v33  ;;  %11372 = vmatpush1.bf16.msra.mxu1 %v24052_v34  ;;  %v24058_v33 = vld [vmem:[%s32096_s12 + $0x6a8] ss:$16 sps:$4 sm:$0xff]   ;;  %v24123_v34 = vld [vmem:[%s32097_s13 + $0x684] ss:$16 sps:$4 sm:$0xff]  }
 0xa3a   : > { %11403 = vmatprep.mubr.bf16.mxu1 %v28662_v10  ;;  %11373 = vmatprep.subr.bf16.mxu1 %v24057_v45  ;;  %v29073_v36 = vpop.f32.mrf.mxu0  ;;  %v24061_v10 = vld [vmem:[%s32096_s12 + $0x688] ss:$16 sps:$4 sm:$0xff]   ;;  %v24118_v45 = vld [vmem:[%s32097_s13 + $0x480] ss:$16 sps:$4 sm:$0xff]  }
 0xa3c   : > { %v10353_v41 = vpop.f32.mrf.mxu0 }
 0xa3d   : > { %11374 = vmatpush1.bf16.msra.mxu1 %v24055_v22  ;;  %v24126_v22 = vld [vmem:[%s32097_s13 + $0x464] ss:$16 sps:$4 sm:$0xff]   ;;  %v24127_v41 = vld [vmem:[%s32097_s13 + $0x660] ss:$16 sps:$4 sm:$0xff]  }
 0xa3e   : > { %11375 = vmatprep.subr.bf16.mxu1 %v24060_v35  ;;  %v10354_v52 = vpop.f32.mrf.mxu0  ;;  %v24129_v35 = vld [vmem:[%s32097_s13 + $0x664] ss:$16 sps:$4 sm:$0xff]  }
 0xa3f   : > { %v24130_v52 = vld [vmem:[%s32097_s13 + $0x440] ss:$16 sps:$4 sm:$0xff]  }
 0xa41   : > { %11376 = vmatpush1.bf16.msra.mxu1 %v24058_v33  ;;  %v24132_v33 = vld [vmem:[%s32097_s13 + $0x444] ss:$16 sps:$4 sm:$0xff]  }
 0xa42   : > { %11377 = vmatprep.subr.bf16.mxu1 %v24063_v37  ;;  %v24135_v37 = vld [vmem:[%s32097_s13 + $0x644] ss:$16 sps:$4 sm:$0xff]  }
 0xa45   : > { %11378 = vmatpush1.bf16.msra.mxu1 %v24061_v10  ;;  %v24133_v10 = vld [vmem:[%s32097_s13 + $0x640] ss:$16 sps:$4 sm:$0xff]  }
 0xa46   : > { %11379 = vmatprep.subr.bf16.mxu1 %v24066_v42  ;;  %v24138_v42 = vld [vmem:[%s32097_s13 + $0x424] ss:$16 sps:$4 sm:$0xff]  }
 0xa49   : > { %11380 = vmatpush1.bf16.msra.mxu1 %v24064_v24  ;;  %v24141_v24 = vld [vmem:[%s32097_s13 + $0x624] ss:$16 sps:$4 sm:$0xff]  }
 0xa4a   : > { %11381 = vmatprep.subr.bf16.mxu1 %v24069_v43  ;;  %v24136_v43 = vld [vmem:[%s32097_s13 + $0x420] ss:$16 sps:$4 sm:$0xff]  }
 0xa4d   : > { %11382 = vmatpush1.bf16.msra.mxu1 %v24067_v2  ;;  %v24139_v2 = vld [vmem:[%s32097_s13 + $0x620] ss:$16 sps:$4 sm:$0xff]  }
 0xa4e   : > { %11383 = vmatprep.subr.bf16.mxu1 %v24072_v53  ;;  %v24144_v53 = vld [vmem:[%s32097_s13 + $0x404] ss:$16 sps:$4 sm:$0xff]  }
 0xa51   : > { %11384 = vmatpush1.bf16.msra.mxu1 %v24070_v39  ;;  %v24147_v39 = vld [vmem:[%s32097_s13 + $0x604] ss:$16 sps:$4 sm:$0xff]  }
 0xa52   : > { %11385 = vmatprep.subr.bf16.mxu1 %v24075_v47  ;;  %v24142_v47 = vld [vmem:[%s32097_s13 + $0x400] ss:$16 sps:$4 sm:$0xff]  }
 0xa55   : > { %11386 = vmatpush1.bf16.msra.mxu1 %v24073_v38  ;;  %v24145_v38 = vld [vmem:[%s32097_s13 + $0x600] ss:$16 sps:$4 sm:$0xff]  }
 0xa56   : > { %11387 = vmatprep.subr.bf16.mxu1 %v24078_v48  ;;  %v24150_v48 = vld [vmem:[%s32097_s13 + $0x5e4] ss:$16 sps:$4 sm:$0xff]  }
 0xa59   : > { %11388 = vmatpush2.bf16.msra.mxu1 %v24076_v49  ;;  %v24148_v49 = vld [vmem:[%s32097_s13 + $0x5e0] ss:$16 sps:$4 sm:$0xff]  }
 0xa5a   : > { %11389 = vmatprep.subr.bf16.mxu1 %v24081_v50  ;;  %v24153_v50 = vld [vmem:[%s32097_s13 + $0x7e4] ss:$16 sps:$4 sm:$0xff]  }
 0xa5d   : > { %11390 = vmatpush2.bf16.msra.mxu1 %v24079_v51  ;;  %v24151_v51 = vld [vmem:[%s32097_s13 + $0x7e0] ss:$16 sps:$4 sm:$0xff]  }
 0xa5e   : > { %11391 = vmatprep.subr.bf16.mxu1 %v24084_v44  ;;  %v24156_v44 = vld [vmem:[%s32097_s13 + $0x5c4] ss:$16 sps:$4 sm:$0xff]  }
 0xa61   : > { %11392 = vmatpush2.bf16.msra.mxu1 %v24082_v58  ;;  %v24154_v58 = vld [vmem:[%s32097_s13 + $0x5c0] ss:$16 sps:$4 sm:$0xff]  }
 0xa62   : > { %11393 = vmatprep.subr.bf16.mxu1 %v24087_v21  ;;  %v24159_v21 = vld [vmem:[%s32097_s13 + $0x7c4] ss:$16 sps:$4 sm:$0xff]  }
 0xa65   : > { %11394 = vmatpush2.bf16.msra.mxu1 %v24085_v59  ;;  %v24157_v59 = vld [vmem:[%s32097_s13 + $0x7c0] ss:$16 sps:$4 sm:$0xff]  }
 0xa66   : > { %11395 = vmatprep.subr.bf16.mxu1 %v24090_v60 }
 0xa69   : > { %11396 = vmatpush2.bf16.msra.mxu1 %v24088_v62 }
 0xa6a   : > { %11397 = vmatprep.subr.bf16.mxu1 %v24093_v4  ;;  %v24162_v4 = vld [vmem:[%s32097_s13 + $0x5a4] ss:$16 sps:$4 sm:$0xff]  }
 0xa6d   : > { %11398 = vmatpush2.bf16.msra.mxu1 %v24091_v0 }
 0xa6e   : > { %11399 = vmatprep.subr.bf16.mxu1 %v24096_v28  ;;  %v24160_v28 = vld [vmem:[%s32097_s13 + $0x5a0] ss:$16 sps:$4 sm:$0xff]  }
 0xa71   : > { %11400 = vmatpush2.bf16.msra.mxu1 %v24094_v20 }
 0xa72   : > { %11401 = vmatprep.subr.bf16.mxu1 %v24099_v54 }
 0xa75   : > { %11402 = vmatpush2.bf16.msra.mxu1 %v24097_v56  ;;  %v24165_v56 = vld [vmem:[%s32097_s13 + $0x7a4] ss:$16 sps:$4 sm:$0xff]  }
 0xa76   : > { %12433 = vmatprep.subr.bf16.mxu1 %v24105_v61  ;;  %v24172_v61 = vld [vmem:[%s32097_s13 + $0x560] ss:$16 sps:$4 sm:$0xff]  }
 0xa78   : > { %v29156_v55 = vpop.f32.mrf.mxu0  ;;  %11404 = vmatmul.mubr.bf16.vlgmr.msra.gmra.mxu1 %v28670_v46  ;;  %v10390_v1 = vpop.f32.mrf.mxu1  ;;  %v24102_v46 = vld [vmem:[%s32097_s13 + $0x4e4] ss:$16 sps:$4 sm:$0xff]  }
 0xa79   : > { %v29160_v9 = vadd.f32 %v10390_v1, %v29063_v32  ;;  %12392 = vmatprep.subr.bf16.mxu0 %v24102_v46  ;;  %12434 = vmatpush1.bf16.msra.mxu1 %v24103_v19  ;;  %v24121_v32 = vld [vmem:[%s32097_s13 + $0x680] ss:$16 sps:$4 sm:$0xff]   ;;  %v24174_v19 = vld [vmem:[%s32097_s13 + $0x564] ss:$16 sps:$4 sm:$0xff]  }
 0xa7a   : > { %v29162_v12 = vpop.f32.mrf.mxu0  ;;  %v10392_v13 = vpop.f32.mrf.mxu1  ;;  %12393 = vmatpush1.bf16.msra.mxu0 %v24100_v30  ;;  %12435 = vmatprep.subr.bf16.mxu1 %v24111_v23  ;;  %v24171_v30 = vld [vmem:[%s32097_s13 + $0x784] ss:$16 sps:$4 sm:$0xff]   ;;  %v24169_v46 = vld [vmem:[%s32097_s13 + $0x780] ss:$16 sps:$4 sm:$0xff]  }
 0xa7b   : > { %v29165_v5 = vadd.f32 %v10392_v13, %v29073_v36  ;;  %12394 = vmatprep.subr.bf16.mxu0 %v24108_v29  ;;  %v24124_v36 = vld [vmem:[%s32097_s13 + $0x460] ss:$16 sps:$4 sm:$0xff]   ;;  %v24177_v29 = vld [vmem:[%s32097_s13 + $0x764] ss:$16 sps:$4 sm:$0xff]  }
 0xa7c   : > { %v10435_v40 = vpop.f32.mrf.mxu0  ;;  %v10394_v7 = vpop.f32.mrf.mxu1  ;;  %v24175_v23 = vld [vmem:[%s32097_s13 + $0x760] ss:$16 sps:$4 sm:$0xff]  }
 0xa7d   : > { %12436 = vmatpush1.bf16.msra.mxu1 %v24109_v57  ;;  %v24168_v7 = vld [vmem:[%s32097_s13 + $0x584] ss:$16 sps:$4 sm:$0xff]   ;;  %v24178_v57 = vld [vmem:[%s32097_s13 + $0x540] ss:$16 sps:$4 sm:$0xff]  }
 0xa7e   : > { %v10436_v16 = vpop.f32.mrf.mxu0  ;;  %v10395_v18 = vpop.f32.mrf.mxu1  ;;  %12395 = vmatpush1.bf16.msra.mxu0 %v24106_v63  ;;  %12437 = vmatprep.subr.bf16.mxu1 %v24117_v25  ;;  %v24180_v63 = vld [vmem:[%s32097_s13 + $0x544] ss:$16 sps:$4 sm:$0xff]  }
 0xa7f   : > { %12396 = vmatprep.subr.bf16.mxu0 %v24114_v26  ;;  %v24166_v16 = vld [vmem:[%s32097_s13 + $0x580] ss:$16 sps:$4 sm:$0xff]   ;;  %v24183_v25 = vld [vmem:[%s32097_s13 + $0x744] ss:$16 sps:$4 sm:$0xff]  }
 0xa80   : > { %v24181_v26 = vld [vmem:[%s32097_s13 + $0x740] ss:$16 sps:$4 sm:$0xff]  }
 0xa81   : > { %12438 = vmatpush1.bf16.msra.mxu1 %v24115_v15  ;;  %v24184_v15 = vld [vmem:[%s32097_s13 + $0x520] ss:$16 sps:$4 sm:$0xff]  }
 0xa82   : > { %12397 = vmatpush1.bf16.msra.mxu0 %v24112_v27  ;;  %12439 = vmatprep.subr.bf16.mxu1 %v24123_v34  ;;  %v24186_v27 = vld [vmem:[%s32097_s13 + $0x524] ss:$16 sps:$4 sm:$0xff]  }
 0xa83   : > { %12398 = vmatprep.subr.bf16.mxu0 %v24120_v31  ;;  %v24189_v31 = vld [vmem:[%s32097_s13 + $0x724] ss:$16 sps:$4 sm:$0xff]  }
 0xa84   : > { %v24192_v34 = vld [vmem:[%s32097_s13 + $0x504] ss:$16 sps:$4 sm:$0xff]  }
 0xa85   : > { %12440 = vmatpush1.bf16.msra.mxu1 %v24121_v32  ;;  %v24195_v32 = vld [vmem:[%s32097_s13 + $0x704] ss:$16 sps:$4 sm:$0xff]  }
 0xa86   : > { %12399 = vmatpush1.bf16.msra.mxu0 %v24118_v45  ;;  %12441 = vmatprep.subr.bf16.mxu1 %v24129_v35  ;;  %v24187_v45 = vld [vmem:[%s32097_s13 + $0x720] ss:$16 sps:$4 sm:$0xff]  }
 0xa87   : > { %12400 = vmatprep.subr.bf16.mxu0 %v24126_v22  ;;  %v24190_v22 = vld [vmem:[%s32097_s13 + $0x500] ss:$16 sps:$4 sm:$0xff]  }
 0xa88   : > { %v24193_v35 = vld [vmem:[%s32097_s13 + $0x700] ss:$16 sps:$4 sm:$0xff]  }
 0xa89   : > { %12442 = vmatpush1.bf16.msra.mxu1 %v24127_v41  ;;  %v24201_v41 = vld [vmem:[%s32097_s13 + $0x6ec] ss:$16 sps:$4 sm:$0xff]  }
 0xa8a   : > { %12401 = vmatpush1.bf16.msra.mxu0 %v24124_v36  ;;  %12443 = vmatprep.subr.bf16.mxu1 %v24135_v37  ;;  %v24198_v36 = vld [vmem:[%s32097_s13 + $0x4ec] ss:$16 sps:$4 sm:$0xff]  }
 0xa8b   : > { %12402 = vmatprep.subr.bf16.mxu0 %v24132_v33 }
 0xa8d   : > { %12444 = vmatpush1.bf16.msra.mxu1 %v24133_v10 }
 0xa8e   : > { %12403 = vmatpush1.bf16.msra.mxu0 %v24130_v52  ;;  %12445 = vmatprep.subr.bf16.mxu1 %v24141_v24 }
 0xa8f   : > { %12404 = vmatprep.subr.bf16.mxu0 %v24138_v42 }
 0xa91   : > { %12446 = vmatpush1.bf16.msra.mxu1 %v24139_v2 }
 0xa92   : > { %12405 = vmatpush1.bf16.msra.mxu0 %v24136_v43  ;;  %12447 = vmatprep.subr.bf16.mxu1 %v24147_v39 }
 0xa93   : > { %12406 = vmatprep.subr.bf16.mxu0 %v24144_v53 }
 0xa95   : > { %12448 = vmatpush1.bf16.msra.mxu1 %v24145_v38 }
 0xa96   : > { %12407 = vmatpush1.bf16.msra.mxu0 %v24142_v47  ;;  %12449 = vmatprep.subr.bf16.mxu1 %v24153_v50 }
 0xa97   : > { %12408 = vmatprep.subr.bf16.mxu0 %v24150_v48 }
 0xa99   : > { %12450 = vmatpush2.bf16.msra.mxu1 %v24151_v51 }
 0xa9a   : > { %12409 = vmatpush2.bf16.msra.mxu0 %v24148_v49  ;;  %12451 = vmatprep.subr.bf16.mxu1 %v24159_v21  ;;  %v25042_v49 = vmov 1983009808  }
 0xa9b   : > { %12410 = vmatprep.subr.bf16.mxu0 %v24156_v44  ;;  %v11427_v50 = vunpack.c.l.s4 %v25042_v49  ;;  %v24234_v49 = vld [vmem:[%s32097_s13 + $0x42c] ss:$16 sps:$4 sm:$0xff]  }
 0xa9d   : > { %12452 = vmatpush2.bf16.msra.mxu1 %v24157_v59  ;;  %v11428_v44 = vunpack.c.0.s8 %v11427_v50  ;;  %v24229_v50 = vld [vmem:[%s32097_s13 + $0x648] ss:$16 sps:$4 sm:$0xff]  }
 0xa9e   : > { %12411 = vmatpush2.bf16.msra.mxu0 %v24154_v58  ;;  %12453 = vmatprep.subr.bf16.mxu1 %v24165_v56 }
 0xa9f   : > { %12412 = vmatprep.subr.bf16.mxu0 %v24162_v4 }
 0xaa2   : > { %12413 = vmatpush2.bf16.msra.mxu0 %v24160_v28 }
 0xaa3   : > { %12414 = vmatprep.subr.bf16.mxu0 %v24168_v7 }
 0xaa6   : > { %12415 = vmatpush2.bf16.msra.mxu0 %v24166_v16 }
 0xaa7   : > { %12416 = vmatprep.subr.bf16.mxu0 %v24174_v19 }
 0xaaa   : > { %12417 = vmatpush2.bf16.msra.mxu0 %v24172_v61 }
 0xaab   : > { %12418 = vmatprep.subr.bf16.mxu0 %v24180_v63  ;;  %v24196_v63 = vld [vmem:[%s32097_s13 + $0x4e8] ss:$16 sps:$4 sm:$0xff]  }
 0xaae   : > { %12419 = vmatpush2.bf16.msra.mxu0 %v24178_v57 }
 0xaaf   : > { %12420 = vmatprep.subr.bf16.mxu0 %v24186_v27 }
 0xab2   : > { %12421 = vmatpush2.bf16.msra.mxu0 %v24184_v15 }
 0xab3   : > { %12422 = vmatprep.subr.bf16.mxu0 %v24192_v34  ;;  %v24204_v34 = vld [vmem:[%s32097_s13 + $0x4cc] ss:$16 sps:$4 sm:$0xff]  }
 0xab6   : > { %12423 = vmatpush2.bf16.msra.mxu0 %v24190_v22  ;;  %v24202_v22 = vld [vmem:[%s32097_s13 + $0x4c8] ss:$16 sps:$4 sm:$0xff]  }
 0xab7   : > { %12474 = vmatprep.subr.bf16.mxu0 %v24198_v36  ;;  %v24205_v36 = vld [vmem:[%s32097_s13 + $0x6c8] ss:$16 sps:$4 sm:$0xff]  }
 0xab8   : > { %v10472_v60 = vpop.f32.mrf.mxu1  ;;  %v29287_v62 = vpop.f32.mrf.mxu0 }
 0xab9   : > { %v29293_v0 = vadd.f32 %v10472_v60, %v29156_v55  ;;  %v24163_v55 = vld [vmem:[%s32097_s13 + $0x7a0] ss:$16 sps:$4 sm:$0xff]  }
 0xaba   : > { %v10474_v20 = vpop.f32.mrf.mxu1  ;;  %v11284_v54 = vpop.f32.mrf.mxu0  ;;  %12454 = vmatpush2.bf16.msra.mxu1 %v24163_v55 }
 0xabb   : > { %v29302_v1 = vadd.f32 %v10474_v20, %v29162_v12  ;;  %12455 = vmatprep.subr.bf16.mxu1 %v24171_v30 }
 0xabc   : > { %v10476_v13 = vpop.f32.mrf.mxu1  ;;  %v11286_v40 = vpop.f32.mrf.mxu0 }
 0xabe   : > { %v10477_v18 = vpop.f32.mrf.mxu1  ;;  %v11287_v12 = vpop.f32.mrf.mxu0  ;;  %12456 = vmatpush2.bf16.msra.mxu1 %v24169_v46 }
 0xabf   : > { %12457 = vmatprep.subr.bf16.mxu1 %v24177_v29 }
 0xac2   : > { %12458 = vmatpush2.bf16.msra.mxu1 %v24175_v23 }
 0xac3   : > { %12459 = vmatprep.subr.bf16.mxu1 %v24183_v25 }
 0xac6   : > { %12460 = vmatpush2.bf16.msra.mxu1 %v24181_v26 }
 0xac7   : > { %12461 = vmatprep.subr.bf16.mxu1 %v24189_v31  ;;  %v24199_v31 = vld [vmem:[%s32097_s13 + $0x6e8] ss:$16 sps:$4 sm:$0xff]  }
 0xaca   : > { %12462 = vmatpush2.bf16.msra.mxu1 %v24187_v45 }
 0xacb   : > { %12463 = vmatprep.subr.bf16.mxu1 %v24195_v32  ;;  %v24207_v32 = vld [vmem:[%s32097_s13 + $0x6cc] ss:$16 sps:$4 sm:$0xff]  }
 0xace   : > { %12464 = vmatpush2.bf16.msra.mxu1 %v24193_v35  ;;  %v24210_v35 = vld [vmem:[%s32097_s13 + $0x4ac] ss:$16 sps:$4 sm:$0xff]  }
 0xacf   : > { %12515 = vmatprep.subr.bf16.mxu1 %v24201_v41  ;;  %v24213_v41 = vld [vmem:[%s32097_s13 + $0x6ac] ss:$16 sps:$4 sm:$0xff]  }
 0xaf8   : > { %v11323_v33 = vpop.f32.mrf.mxu1 }
 0xaf9   : > { %v11324_v37 = vadd.f32 %v11323_v33, %v29287_v62  ;;  %v11364_v52 = vpop.f32.mrf.mxu0  ;;  %v24208_v33 = vld [vmem:[%s32097_s13 + $0x4a8] ss:$16 sps:$4 sm:$0xff]  }
 0xafa   : > { %v11325_v10 = vpop.f32.mrf.mxu1 }
 0xafb   : > { %v11412_v42 = vmax.f32 %v29160_v9, %v11324_v37  ;;  %v11326_v24 = vadd.f32 %v11325_v10, %v11284_v54  ;;  %v11366_v43 = vpop.f32.mrf.mxu0  ;;  %v29378_v9 = vsub.s32 %v11428_v44, %v25282_v3  ;;  %v24216_v37 = vld [vmem:[%s32097_s13 + $0x48c] ss:$16 sps:$4 sm:$0xff]   ;;  %v24232_v44 = vld [vmem:[%s32097_s13 + $0x428] ss:$16 sps:$4 sm:$0xff]  }
 0xafc   : > { %v11327_v2 = vpop.f32.mrf.mxu1  ;;  %v24219_v10 = vld [vmem:[%s32097_s13 + $0x68c] ss:$16 sps:$4 sm:$0xff]  }
 0xafd   : > { %v11413_v53 = vmax.f32 %v29165_v5, %v11326_v24  ;;  %v11368_v39 = vpop.f32.mrf.mxu0  ;;  %v24222_v24 = vld [vmem:[%s32097_s13 + $0x46c] ss:$16 sps:$4 sm:$0xff]  }
 0xafe   : > { %v11328_v47 = vpop.f32.mrf.mxu1  ;;  %v24225_v2 = vld [vmem:[%s32097_s13 + $0x66c] ss:$16 sps:$4 sm:$0xff]  }
 0xaff   : > { %v20825_v38 = vpack.c.bf16 %v11413_v53, %v11412_v42  ;;  %v11369_v48 = vpop.f32.mrf.mxu0  ;;  %v24214_v42 = vld [vmem:[%s32097_s13 + $0x488] ss:$16 sps:$4 sm:$0xff]   ;;  %v24228_v39 = vld [vmem:[%s32097_s13 + $0x44c] ss:$16 sps:$4 sm:$0xff]  }
 0xb00   : > { %v24220_v53 = vld [vmem:[%s32097_s13 + $0x468] ss:$16 sps:$4 sm:$0xff]  }
 0xb01   : > { %v11432_v20 = vrot.slane %v20825_v38, %v29378_v9  ;;  %v24223_v47 = vld [vmem:[%s32097_s13 + $0x668] ss:$16 sps:$4 sm:$0xff]   ;;  %v24231_v38 = vld [vmem:[%s32097_s13 + $0x64c] ss:$16 sps:$4 sm:$0xff]  }
 0xb02   : > { %v24226_v48 = vld [vmem:[%s32097_s13 + $0x448] ss:$16 sps:$4 sm:$0xff]  }
 0xb38   : > { %v11405_v51 = vpop.f32.mrf.mxu1 }
 0xb39   : > { %v11406_v58 = vadd.f32 %v11405_v51, %v11364_v52  ;;  %v24211_v52 = vld [vmem:[%s32097_s13 + $0x6a8] ss:$16 sps:$4 sm:$0xff]   ;;  %v24237_v51 = vld [vmem:[%s32097_s13 + $0x62c] ss:$16 sps:$4 sm:$0xff]  }
 0xb3a   : > { %v11407_v21 = vpop.f32.mrf.mxu1 }
 0xb3b   : > { %v11414_v59 = vmax.f32 %v29293_v0, %v11406_v58  ;;  %v11408_v60 = vadd.f32 %v11407_v21, %v11366_v43  ;;  %v24217_v43 = vld [vmem:[%s32097_s13 + $0x688] ss:$16 sps:$4 sm:$0xff]   ;;  %v24240_v58 = vld [vmem:[%s32097_s13 + $0x40c] ss:$16 sps:$4 sm:$0xff]  }
 0xb3c   : > { %v11409_v62 = vpop.f32.mrf.mxu1  ;;  %v24235_v21 = vld [vmem:[%s32097_s13 + $0x628] ss:$16 sps:$4 sm:$0xff]  }
 0xb3d   : > { %v11415_v4 = vmax.f32 %v29302_v1, %v11408_v60  ;;  %v24238_v60 = vld [vmem:[%s32097_s13 + $0x408] ss:$16 sps:$4 sm:$0xff]   ;;  %v24246_v62 = vld [vmem:[%s32097_s13 + $0x5ec] ss:$16 sps:$4 sm:$0xff]  }
 0xb3e   : > { %v11410_v5 = vpop.f32.mrf.mxu1 }
 0xb3f   : > { %v20826_v28 = vpack.c.bf16 %v11415_v4, %v11414_v59  ;;  %v24243_v59 = vld [vmem:[%s32097_s13 + $0x60c] ss:$16 sps:$4 sm:$0xff]   ;;  %v24241_v4 = vld [vmem:[%s32097_s13 + $0x608] ss:$16 sps:$4 sm:$0xff]  }
 0xb40   : > { %v24249_v5 = vld [vmem:[%s32097_s13 + $0x7ec] ss:$16 sps:$4 sm:$0xff]  }
 0xb41   : > { %v11439_v54 = vrot.slane %v20826_v28, %v29378_v9  ;;  %v24244_v28 = vld [vmem:[%s32097_s13 + $0x5e8] ss:$16 sps:$4 sm:$0xff]  }
 0xb43   : > { %v11440_v56 = vcombine.low %v11432_v20, %v11439_v54  ;;  %v25032_v13 = vcombine.low %v11439_v54, %v11439_v54  ;;  %v24252_v20 = vld [vmem:[%s32097_s13 + $0x5cc] ss:$16 sps:$4 sm:$0xff]   ;;  %v24247_v54 = vld [vmem:[%s32097_s13 + $0x7e8] ss:$16 sps:$4 sm:$0xff]  }
 0xb45   : > { %11442 = vst [vmem:[#allocation4] sm:$0xff] %v11440_v56  ;;  %v11710_v55 = vrot.slane %v11440_v56, %v29378_v9  ;;  %v11717_v7 = vrot.slane %v25032_v13, %v29378_v9  ;;  %v24255_v56 = vld [vmem:[%s32097_s13 + $0x7cc] ss:$16 sps:$4 sm:$0xff]  }
 0xb46   : > { %v24258_v13 = vld [vmem:[%s32097_s13 + $0x5ac] ss:$16 sps:$4 sm:$0xff]  }
 0xb47   : > { %v11718_v40 = vcombine.high %v11710_v55, %v11710_v55  ;;  %v11723_v0 = vshll.u32 %v11710_v55, 16  ;;  %v11719_v18 = vcombine.high %v11717_v7, %v11717_v7  ;;  %v11737_v30 = vshll.u32 %v11717_v7, 16 }
 0xb48   : > { %v11721_v61 = vshrl.u32 %v11710_v55, 16  ;;  %v11735_v27 = vshrl.u32 %v11717_v7, 16  ;;  %v24250_v55 = vld [vmem:[%s32097_s13 + $0x5c8] ss:$16 sps:$4 sm:$0xff]  }
 0xb49   : > { %v11730_v16 = vshll.u32 %v11718_v40, 16  ;;  %v11725_v12 = vrot.slane %v11723_v0, 1  ;;  %v11728_v1 = vshrl.u32 %v11718_v40, 16  ;;  %v11744_v19 = vshll.u32 %v11719_v18, 16  ;;  %v24253_v40 = vld [vmem:[%s32097_s13 + $0x7c8] ss:$16 sps:$4 sm:$0xff]  }
 0xb4a   : > { %v11739_v29 = vrot.slane %v11737_v30, 1  ;;  %v11742_v57 = vshrl.u32 %v11719_v18, 16  ;;  %v24261_v0 = vld [vmem:[%s32097_s13 + $0x7ac] ss:$16 sps:$4 sm:$0xff]   ;;  %v24256_v7 = vld [vmem:[%s32097_s13 + $0x5a8] ss:$16 sps:$4 sm:$0xff]  }
 0xb4b   : > { %v11732_v46 = vrot.slane %v11730_v16, 1  ;;  %v11746_v26 = vrot.slane %v11744_v19, 1  ;;  %v29388_v25 = vor.u32 %v11725_v12, %v11721_v61  ;;  %v24264_v16 = vld [vmem:[%s32097_s13 + $0x58c] ss:$16 sps:$4 sm:$0xff]   ;;  %v24259_v18 = vld [vmem:[%s32097_s13 + $0x7a8] ss:$16 sps:$4 sm:$0xff]  }
 0xb4c   : > { %v29397_v45 = vor.u32 %v11739_v29, %v11735_v27  ;;  %v24267_v12 = vld [vmem:[%s32097_s13 + $0x78c] ss:$16 sps:$4 sm:$0xff]   ;;  %v24262_v30 = vld [vmem:[%s32097_s13 + $0x588] ss:$16 sps:$4 sm:$0xff]  }
 0xb4d   : > { %v11733_v23 = vor.u32 %v11732_v46, %v11728_v1  ;;  %v11747_v15 = vor.u32 %v11746_v26, %v11742_v57  ;;  %v24270_v1 = vld [vmem:[%s32097_s13 + $0x56c] ss:$16 sps:$4 sm:$0xff]   ;;  %v24265_v46 = vld [vmem:[%s32097_s13 + $0x788] ss:$16 sps:$4 sm:$0xff]  }
 0xb4e   : > { %v24273_v19 = vld [vmem:[%s32097_s13 + $0x76c] ss:$16 sps:$4 sm:$0xff]   ;;  %v24268_v61 = vld [vmem:[%s32097_s13 + $0x568] ss:$16 sps:$4 sm:$0xff]  }
 0xb4f   : > { %12424 = vmatprep.mubr.bf16.mxu0 %v11733_v23  ;;  %12465 = vmatprep.mubr.bf16.mxu1 %v11747_v15  ;;  %v24276_v29 = vld [vmem:[%s32097_s13 + $0x54c] ss:$16 sps:$4 sm:$0xff]   ;;  %v24274_v57 = vld [vmem:[%s32097_s13 + $0x548] ss:$16 sps:$4 sm:$0xff]  }
 0xb50   : > { %12425 = vmatmul.mubr.bf16.vlgmr.msra.gmra.mxu0 %v29388_v25  ;;  %12466 = vmatmul.mubr.bf16.vlgmr.msra.gmra.mxu1 %v29397_v45  ;;  %v24282_v26 = vld [vmem:[%s32097_s13 + $0x52c] ss:$16 sps:$4 sm:$0xff]   ;;  %v24277_v27 = vld [vmem:[%s32097_s13 + $0x748] ss:$16 sps:$4 sm:$0xff]  }
 0xb51   : > { %12475 = vmatpush1.bf16.msra.mxu0 %v24196_v63  ;;  %12506 = vmatprep.mubr.bf16.mxu0 %v11733_v23  ;;  %v24271_v23 = vld [vmem:[%s32097_s13 + $0x768] ss:$16 sps:$4 sm:$0xff]   ;;  %v24279_v63 = vld [vmem:[%s32097_s13 + $0x74c] ss:$16 sps:$4 sm:$0xff]  }
 0xb52   : > { %12516 = vmatpush1.bf16.msra.mxu1 %v24199_v31  ;;  %12476 = vmatprep.subr.bf16.mxu0 %v24204_v34  ;;  %v24280_v31 = vld [vmem:[%s32097_s13 + $0x528] ss:$16 sps:$4 sm:$0xff]   ;;  %v24288_v34 = vld [vmem:[%s32097_s13 + $0x50c] ss:$16 sps:$4 sm:$0xff]  }
 0xb53   : > { %12547 = vmatprep.mubr.bf16.mxu1 %v11747_v15  ;;  %12517 = vmatprep.subr.bf16.mxu1 %v24207_v32  ;;  %v24285_v15 = vld [vmem:[%s32097_s13 + $0x72c] ss:$16 sps:$4 sm:$0xff]   ;;  %v11443_v32 = vld [vmem:[#allocation4] sm:$0x55] }
 0xb55   : > { %12477 = vmatpush1.bf16.msra.mxu0 %v24202_v22  ;;  %v24283_v22 = vld [vmem:[%s32097_s13 + $0x728] ss:$16 sps:$4 sm:$0xff]  }
 0xb56   : > { %12478 = vmatprep.subr.bf16.mxu0 %v24210_v35  ;;  %12518 = vmatpush1.bf16.msra.mxu1 %v24205_v36  ;;  %v24291_v35 = vld [vmem:[%s32097_s13 + $0x70c] ss:$16 sps:$4 sm:$0xff]   ;;  %v24286_v36 = vld [vmem:[%s32097_s13 + $0x508] ss:$16 sps:$4 sm:$0xff]  }
 0xb57   : > { %12519 = vmatprep.subr.bf16.mxu1 %v24213_v41  ;;  %v12557_v41 = vcombine.high %v11443_v32, %v11443_v32 }
 0xb59   : > { %12479 = vmatpush1.bf16.msra.mxu0 %v24208_v33  ;;  %v24294_v33 = vld [vmem:[%s32097_s13 + $0xe4] ss:$16 sps:$4 sm:$0xff]  }
 0xb5a   : > { %12480 = vmatprep.subr.bf16.mxu0 %v24216_v37  ;;  %12520 = vmatpush1.bf16.msra.mxu1 %v24211_v52  ;;  %v24289_v37 = vld [vmem:[%s32097_s13 + $0x708] ss:$16 sps:$4 sm:$0xff]   ;;  %v29581_v52 = vrot.slane %v11443_v32, %v29378_v9  ;;  %v24367_v32 = vld [vmem:[%s32097_s13 + $0x164] ss:$16 sps:$4 sm:$0xff]  }
 0xb5b   : > { %12521 = vmatprep.subr.bf16.mxu1 %v24219_v10  ;;  %v24297_v10 = vld [vmem:[%s32097_s13 + $0x2e4] ss:$16 sps:$4 sm:$0xff]  }
 0xb5d   : > { %12481 = vmatpush1.bf16.msra.mxu0 %v24214_v42  ;;  %v24292_v42 = vld [vmem:[%s32097_s13 + $0xe0] ss:$16 sps:$4 sm:$0xff]  }
 0xb5e   : > { %12482 = vmatprep.subr.bf16.mxu0 %v24222_v24  ;;  %12522 = vmatpush1.bf16.msra.mxu1 %v24217_v43  ;;  %v29590_v24 = vrot.slane %v12557_v41, %v29378_v9  ;;  %v24301_v43 = vld [vmem:[%s32097_s13 + $0xc4] ss:$16 sps:$4 sm:$0xff]  }
 0xb5f   : > { %12523 = vmatprep.subr.bf16.mxu1 %v24225_v2  ;;  %v29597_v2 = vcombine.high %v29581_v52, %v29581_v52  ;;  %v24373_v41 = vld [vmem:[%s32097_s13 + $0x144] ss:$16 sps:$4 sm:$0xff]  }
 0xb61   : > { %12483 = vmatpush1.bf16.msra.mxu0 %v24220_v53  ;;  %v24295_v53 = vld [vmem:[%s32097_s13 + $0x2e0] ss:$16 sps:$4 sm:$0xff]  }
 0xb62   : > { %12484 = vmatprep.subr.bf16.mxu0 %v24228_v39  ;;  %12524 = vmatpush1.bf16.msra.mxu1 %v24223_v47  ;;  %v24304_v39 = vld [vmem:[%s32097_s13 + $0x2c4] ss:$16 sps:$4 sm:$0xff]   ;;  %v29609_v47 = vcombine.high %v29590_v24, %v29590_v24 }
 0xb63   : > { %12525 = vmatprep.subr.bf16.mxu1 %v24231_v38  ;;  %v24299_v38 = vld [vmem:[%s32097_s13 + $0xc0] ss:$16 sps:$4 sm:$0xff]  }
 0xb65   : > { %12485 = vmatpush1.bf16.msra.mxu0 %v24226_v48  ;;  %v24302_v48 = vld [vmem:[%s32097_s13 + $0x2c0] ss:$16 sps:$4 sm:$0xff]  }
 0xb66   : > { %12486 = vmatprep.subr.bf16.mxu0 %v24234_v49  ;;  %12526 = vmatpush1.bf16.msra.mxu1 %v24229_v50  ;;  %v24310_v49 = vld [vmem:[%s32097_s13 + $0x2a4] ss:$16 sps:$4 sm:$0xff]  }
 0xb67   : > { %12527 = vmatprep.subr.bf16.mxu1 %v24237_v51  ;;  %v24313_v50 = vld [vmem:[%s32097_s13 + $0x84] ss:$16 sps:$4 sm:$0xff]   ;;  %v24308_v51 = vld [vmem:[%s32097_s13 + $0x2a0] ss:$16 sps:$4 sm:$0xff]  }
 0xb69   : > { %12487 = vmatpush1.bf16.msra.mxu0 %v24232_v44  ;;  %v24316_v44 = vld [vmem:[%s32097_s13 + $0x284] ss:$16 sps:$4 sm:$0xff]  }
 0xb6a   : > { %12488 = vmatprep.subr.bf16.mxu0 %v24240_v58  ;;  %12528 = vmatpush1.bf16.msra.mxu1 %v24235_v21  ;;  %v24311_v58 = vld [vmem:[%s32097_s13 + $0x80] ss:$16 sps:$4 sm:$0xff]   ;;  %v24319_v21 = vld [vmem:[%s32097_s13 + $0x64] ss:$16 sps:$4 sm:$0xff]  }
 0xb6b   : > { %12529 = vmatprep.subr.bf16.mxu1 %v24243_v59  ;;  %v24314_v59 = vld [vmem:[%s32097_s13 + $0x280] ss:$16 sps:$4 sm:$0xff]  }
 0xb6d   : > { %12489 = vmatpush1.bf16.msra.mxu0 %v24238_v60  ;;  %v24322_v60 = vld [vmem:[%s32097_s13 + $0x264] ss:$16 sps:$4 sm:$0xff]  }
 0xb6e   : > { %12490 = vmatprep.subr.bf16.mxu0 %v24246_v62  ;;  %12530 = vmatpush1.bf16.msra.mxu1 %v24241_v4  ;;  %v24317_v62 = vld [vmem:[%s32097_s13 + $0x60] ss:$16 sps:$4 sm:$0xff]   ;;  %v24325_v4 = vld [vmem:[%s32097_s13 + $0x44] ss:$16 sps:$4 sm:$0xff]  }
 0xb6f   : > { %12531 = vmatprep.subr.bf16.mxu1 %v24249_v5  ;;  %v24320_v5 = vld [vmem:[%s32097_s13 + $0x260] ss:$16 sps:$4 sm:$0xff]  }
 0xb71   : > { %12491 = vmatpush2.bf16.msra.mxu0 %v24244_v28  ;;  %v24328_v28 = vld [vmem:[%s32097_s13 + $0x244] ss:$16 sps:$4 sm:$0xff]  }
 0xb72   : > { %12492 = vmatprep.subr.bf16.mxu0 %v24252_v20  ;;  %12532 = vmatpush2.bf16.msra.mxu1 %v24247_v54  ;;  %v24323_v20 = vld [vmem:[%s32097_s13 + $0x40] ss:$16 sps:$4 sm:$0xff]   ;;  %v24331_v54 = vld [vmem:[%s32097_s13 + $0x24] ss:$16 sps:$4 sm:$0xff]  }
 0xb73   : > { %12533 = vmatprep.subr.bf16.mxu1 %v24255_v56  ;;  %v24326_v56 = vld [vmem:[%s32097_s13 + $0x240] ss:$16 sps:$4 sm:$0xff]  }
 0xb75   : > { %12493 = vmatpush2.bf16.msra.mxu0 %v24250_v55  ;;  %v24334_v55 = vld [vmem:[%s32097_s13 + $0x224] ss:$16 sps:$4 sm:$0xff]  }
 0xb76   : > { %12494 = vmatprep.subr.bf16.mxu0 %v24258_v13  ;;  %12534 = vmatpush2.bf16.msra.mxu1 %v24253_v40  ;;  %v24329_v13 = vld [vmem:[%s32097_s13 + $0x20] ss:$16 sps:$4 sm:$0xff]   ;;  %v24337_v40 = vld [vmem:[%s32097_s13 + $0x4] ss:$16 sps:$4 sm:$0xff]  }
 0xb77   : > { %12535 = vmatprep.subr.bf16.mxu1 %v24261_v0  ;;  %v24332_v0 = vld [vmem:[%s32097_s13 + $0x220] ss:$16 sps:$4 sm:$0xff]  }
 0xb79   : > { %12495 = vmatpush2.bf16.msra.mxu0 %v24256_v7  ;;  %v24340_v7 = vld [vmem:[%s32097_s13 + $0x204] ss:$16 sps:$4 sm:$0xff]  }
 0xb7a   : > { %12496 = vmatprep.subr.bf16.mxu0 %v24264_v16  ;;  %12536 = vmatpush2.bf16.msra.mxu1 %v24259_v18  ;;  %v24335_v16 = vld [vmem:[%s32097_s13] ss:$16 sps:$4 sm:$0xff]   ;;  %v24343_v18 = vld [vmem:[%s32097_s13 + $0x1e4] ss:$16 sps:$4 sm:$0xff]  }
 0xb7b   : > { %12537 = vmatprep.subr.bf16.mxu1 %v24267_v12  ;;  %v24338_v12 = vld [vmem:[%s32097_s13 + $0x200] ss:$16 sps:$4 sm:$0xff]  }
 0xb7d   : > { %12497 = vmatpush2.bf16.msra.mxu0 %v24262_v30  ;;  %v24346_v30 = vld [vmem:[%s32097_s13 + $0x3e4] ss:$16 sps:$4 sm:$0xff]  }
 0xb7e   : > { %12498 = vmatprep.subr.bf16.mxu0 %v24270_v1  ;;  %12538 = vmatpush2.bf16.msra.mxu1 %v24265_v46  ;;  %v24341_v1 = vld [vmem:[%s32097_s13 + $0x1e0] ss:$16 sps:$4 sm:$0xff]   ;;  %v24349_v46 = vld [vmem:[%s32097_s13 + $0x1c4] ss:$16 sps:$4 sm:$0xff]  }
 0xb7f   : > { %12539 = vmatprep.subr.bf16.mxu1 %v24273_v19  ;;  %v24344_v19 = vld [vmem:[%s32097_s13 + $0x3e0] ss:$16 sps:$4 sm:$0xff]  }
 0xb81   : > { %12499 = vmatpush2.bf16.msra.mxu0 %v24268_v61  ;;  %v24352_v61 = vld [vmem:[%s32097_s13 + $0x3c4] ss:$16 sps:$4 sm:$0xff]  }
 0xb82   : > { %12500 = vmatprep.subr.bf16.mxu0 %v24276_v29  ;;  %12540 = vmatpush2.bf16.msra.mxu1 %v24271_v23  ;;  %v24347_v29 = vld [vmem:[%s32097_s13 + $0x1c0] ss:$16 sps:$4 sm:$0xff]   ;;  %v24355_v23 = vld [vmem:[%s32097_s13 + $0x1a4] ss:$16 sps:$4 sm:$0xff]  }
 0xb83   : > { %12541 = vmatprep.subr.bf16.mxu1 %v24279_v63  ;;  %v24350_v63 = vld [vmem:[%s32097_s13 + $0x3c0] ss:$16 sps:$4 sm:$0xff]  }
 0xb85   : > { %12501 = vmatpush2.bf16.msra.mxu0 %v24274_v57  ;;  %v24358_v57 = vld [vmem:[%s32097_s13 + $0x3a4] ss:$16 sps:$4 sm:$0xff]  }
 0xb86   : > { %12502 = vmatprep.subr.bf16.mxu0 %v24282_v26  ;;  %12542 = vmatpush2.bf16.msra.mxu1 %v24277_v27  ;;  %v24353_v26 = vld [vmem:[%s32097_s13 + $0x1a0] ss:$16 sps:$4 sm:$0xff]   ;;  %v24361_v27 = vld [vmem:[%s32097_s13 + $0x184] ss:$16 sps:$4 sm:$0xff]  }
 0xb87   : > { %12543 = vmatprep.subr.bf16.mxu1 %v24285_v15  ;;  %v24356_v15 = vld [vmem:[%s32097_s13 + $0x3a0] ss:$16 sps:$4 sm:$0xff]  }
 0xb89   : > { %12503 = vmatpush2.bf16.msra.mxu0 %v24280_v31  ;;  %v24364_v31 = vld [vmem:[%s32097_s13 + $0x384] ss:$16 sps:$4 sm:$0xff]  }
 0xb8a   : > { %12504 = vmatprep.subr.bf16.mxu0 %v24288_v34  ;;  %12544 = vmatpush2.bf16.msra.mxu1 %v24283_v22  ;;  %v24359_v34 = vld [vmem:[%s32097_s13 + $0x180] ss:$16 sps:$4 sm:$0xff]  }
 0xb8b   : > { %12545 = vmatprep.subr.bf16.mxu1 %v24291_v35  ;;  %v24362_v22 = vld [vmem:[%s32097_s13 + $0x380] ss:$16 sps:$4 sm:$0xff]   ;;  %v24370_v35 = vld [vmem:[%s32097_s13 + $0x364] ss:$16 sps:$4 sm:$0xff]  }
 0xb8d   : > { %12505 = vmatpush2.bf16.msra.mxu0 %v24286_v36  ;;  %v24365_v36 = vld [vmem:[%s32097_s13 + $0x160] ss:$16 sps:$4 sm:$0xff]  }
 0xb8e   : > { %13218 = vmatprep.subr.bf16.mxu0 %v24294_v33  ;;  %12546 = vmatpush2.bf16.msra.mxu1 %v24289_v37  ;;  %v24368_v33 = vld [vmem:[%s32097_s13 + $0x360] ss:$16 sps:$4 sm:$0xff]   ;;  %v24376_v37 = vld [vmem:[%s32097_s13 + $0x344] ss:$16 sps:$4 sm:$0xff]  }
 0xb8f   : > { %13259 = vmatprep.subr.bf16.mxu1 %v24297_v10  ;;  %v24371_v10 = vld [vmem:[%s32097_s13 + $0x140] ss:$16 sps:$4 sm:$0xff]  }
 0xb90   : > { %12507 = vmatmul.mubr.bf16.vlgmr.msra.gmra.mxu0 %v29388_v25  ;;  %v24307_v25 = vld [vmem:[%s32097_s13 + $0xa4] ss:$16 sps:$4 sm:$0xff]  }
 0xb91   : > { %13219 = vmatpush1.bf16.msra.mxu0 %v24292_v42  ;;  %13250 = vmatprep.mubr.bf16.mxu0 %v29597_v2  ;;  %v24379_v42 = vld [vmem:[%s32097_s13 + $0x124] ss:$16 sps:$4 sm:$0xff]  }
 0xb92   : > { %12548 = vmatmul.mubr.bf16.vlgmr.msra.gmra.mxu1 %v29397_v45  ;;  %13220 = vmatprep.subr.bf16.mxu0 %v24301_v43  ;;  %v24305_v45 = vld [vmem:[%s32097_s13 + $0xa0] ss:$16 sps:$4 sm:$0xff]  }
 0xb93   : > { %13260 = vmatpush1.bf16.msra.mxu1 %v24295_v53  ;;  %13291 = vmatprep.mubr.bf16.mxu1 %v29609_v47  ;;  %v24374_v43 = vld [vmem:[%s32097_s13 + $0x340] ss:$16 sps:$4 sm:$0xff]   ;;  %v24382_v53 = vld [vmem:[%s32097_s13 + $0x324] ss:$16 sps:$4 sm:$0xff]  }
 0xb94   : > { %13261 = vmatprep.subr.bf16.mxu1 %v24304_v39  ;;  %v24377_v39 = vld [vmem:[%s32097_s13 + $0x120] ss:$16 sps:$4 sm:$0xff]  }
 0xb95   : > { %13221 = vmatpush1.bf16.msra.mxu0 %v24299_v38  ;;  %v24385_v38 = vld [vmem:[%s32097_s13 + $0x104] ss:$16 sps:$4 sm:$0xff]  }
 0xb96   : > { %13222 = vmatprep.subr.bf16.mxu0 %v24307_v25  ;;  %v24380_v25 = vld [vmem:[%s32097_s13 + $0x320] ss:$16 sps:$4 sm:$0xff]  }
 0xb97   : > { %13262 = vmatpush1.bf16.msra.mxu1 %v24302_v48  ;;  %v24388_v48 = vld [vmem:[%s32097_s13 + $0x304] ss:$16 sps:$4 sm:$0xff]  }
 0xb98   : > { %13263 = vmatprep.subr.bf16.mxu1 %v24310_v49  ;;  %v24383_v49 = vld [vmem:[%s32097_s13 + $0x100] ss:$16 sps:$4 sm:$0xff]  }
 0xb99   : > { %13223 = vmatpush1.bf16.msra.mxu0 %v24305_v45  ;;  %v24391_v45 = vld [vmem:[%s32097_s13 + $0xec] ss:$16 sps:$4 sm:$0xff]  }
 0xb9a   : > { %13224 = vmatprep.subr.bf16.mxu0 %v24313_v50  ;;  %v24386_v50 = vld [vmem:[%s32097_s13 + $0x300] ss:$16 sps:$4 sm:$0xff]  }
 0xb9b   : > { %13264 = vmatpush1.bf16.msra.mxu1 %v24308_v51  ;;  %v24394_v51 = vld [vmem:[%s32097_s13 + $0x2ec] ss:$16 sps:$4 sm:$0xff]  }
 0xb9c   : > { %13265 = vmatprep.subr.bf16.mxu1 %v24316_v44  ;;  %v24389_v44 = vld [vmem:[%s32097_s13 + $0xe8] ss:$16 sps:$4 sm:$0xff]  }
 0xb9d   : > { %13225 = vmatpush1.bf16.msra.mxu0 %v24311_v58  ;;  %v24397_v58 = vld [vmem:[%s32097_s13 + $0xcc] ss:$16 sps:$4 sm:$0xff]  }
 0xb9e   : > { %13226 = vmatprep.subr.bf16.mxu0 %v24319_v21  ;;  %v24392_v21 = vld [vmem:[%s32097_s13 + $0x2e8] ss:$16 sps:$4 sm:$0xff]  }
 0xb9f   : > { %13266 = vmatpush1.bf16.msra.mxu1 %v24314_v59  ;;  %v24400_v59 = vld [vmem:[%s32097_s13 + $0x2cc] ss:$16 sps:$4 sm:$0xff]  }
 0xba0   : > { %13267 = vmatprep.subr.bf16.mxu1 %v24322_v60  ;;  %v24395_v60 = vld [vmem:[%s32097_s13 + $0xc8] ss:$16 sps:$4 sm:$0xff]  }
 0xba1   : > { %13227 = vmatpush1.bf16.msra.mxu0 %v24317_v62  ;;  %v24403_v62 = vld [vmem:[%s32097_s13 + $0xac] ss:$16 sps:$4 sm:$0xff]  }
 0xba2   : > { %13228 = vmatprep.subr.bf16.mxu0 %v24325_v4  ;;  %v24398_v4 = vld [vmem:[%s32097_s13 + $0x2c8] ss:$16 sps:$4 sm:$0xff]  }
 0xba3   : > { %13268 = vmatpush1.bf16.msra.mxu1 %v24320_v5  ;;  %v24401_v5 = vld [vmem:[%s32097_s13 + $0xa8] ss:$16 sps:$4 sm:$0xff]  }
 0xba4   : > { %13269 = vmatprep.subr.bf16.mxu1 %v24328_v28  ;;  %v24409_v28 = vld [vmem:[%s32097_s13 + $0x8c] ss:$16 sps:$4 sm:$0xff]  }
 0xba5   : > { %13229 = vmatpush1.bf16.msra.mxu0 %v24323_v20  ;;  %v24412_v20 = vld [vmem:[%s32097_s13 + $0x28c] ss:$16 sps:$4 sm:$0xff]  }
 0xba6   : > { %13230 = vmatprep.subr.bf16.mxu0 %v24331_v54  ;;  %v24407_v54 = vld [vmem:[%s32097_s13 + $0x88] ss:$16 sps:$4 sm:$0xff]  }
 0xba7   : > { %13270 = vmatpush1.bf16.msra.mxu1 %v24326_v56  ;;  %v24415_v56 = vld [vmem:[%s32097_s13 + $0x6c] ss:$16 sps:$4 sm:$0xff]  }
 0xba8   : > { %13271 = vmatprep.subr.bf16.mxu1 %v24334_v55  ;;  %v24410_v55 = vld [vmem:[%s32097_s13 + $0x288] ss:$16 sps:$4 sm:$0xff]  }
 0xba9   : > { %13231 = vmatpush1.bf16.msra.mxu0 %v24329_v13  ;;  %v24418_v13 = vld [vmem:[%s32097_s13 + $0x26c] ss:$16 sps:$4 sm:$0xff]  }
 0xbaa   : > { %13232 = vmatprep.subr.bf16.mxu0 %v24337_v40  ;;  %v24413_v40 = vld [vmem:[%s32097_s13 + $0x68] ss:$16 sps:$4 sm:$0xff]  }
 0xbab   : > { %13272 = vmatpush1.bf16.msra.mxu1 %v24332_v0  ;;  %v24421_v0 = vld [vmem:[%s32097_s13 + $0x4c] ss:$16 sps:$4 sm:$0xff]  }
 0xbac   : > { %13273 = vmatprep.subr.bf16.mxu1 %v24340_v7  ;;  %v24416_v7 = vld [vmem:[%s32097_s13 + $0x268] ss:$16 sps:$4 sm:$0xff]  }
 0xbad   : > { %13233 = vmatpush1.bf16.msra.mxu0 %v24335_v16  ;;  %v24424_v16 = vld [vmem:[%s32097_s13 + $0x24c] ss:$16 sps:$4 sm:$0xff]  }
 0xbae   : > { %13234 = vmatprep.subr.bf16.mxu0 %v24343_v18  ;;  %v24419_v18 = vld [vmem:[%s32097_s13 + $0x48] ss:$16 sps:$4 sm:$0xff]  }
 0xbaf   : > { %13274 = vmatpush1.bf16.msra.mxu1 %v24338_v12  ;;  %v24427_v12 = vld [vmem:[%s32097_s13 + $0x2c] ss:$16 sps:$4 sm:$0xff]  }
 0xbb0   : > { %13275 = vmatprep.subr.bf16.mxu1 %v24346_v30  ;;  %v24422_v30 = vld [vmem:[%s32097_s13 + $0x248] ss:$16 sps:$4 sm:$0xff]  }
 0xbb1   : > { %13235 = vmatpush2.bf16.msra.mxu0 %v24341_v1  ;;  %v24430_v1 = vld [vmem:[%s32097_s13 + $0x22c] ss:$16 sps:$4 sm:$0xff]  }
 0xbb2   : > { %13236 = vmatprep.subr.bf16.mxu0 %v24349_v46  ;;  %v24425_v46 = vld [vmem:[%s32097_s13 + $0x28] ss:$16 sps:$4 sm:$0xff]  }
 0xbb3   : > { %13276 = vmatpush2.bf16.msra.mxu1 %v24344_v19  ;;  %v24433_v19 = vld [vmem:[%s32097_s13 + $0xc] ss:$16 sps:$4 sm:$0xff]  }
 0xbb4   : > { %13277 = vmatprep.subr.bf16.mxu1 %v24352_v61  ;;  %v24428_v61 = vld [vmem:[%s32097_s13 + $0x228] ss:$16 sps:$4 sm:$0xff]  }
 0xbb5   : > { %13237 = vmatpush2.bf16.msra.mxu0 %v24347_v29  ;;  %v24436_v29 = vld [vmem:[%s32097_s13 + $0x20c] ss:$16 sps:$4 sm:$0xff]  }
 0xbb6   : > { %13238 = vmatprep.subr.bf16.mxu0 %v24355_v23  ;;  %v24431_v23 = vld [vmem:[%s32097_s13 + $0x8] ss:$16 sps:$4 sm:$0xff]  }
 0xbb7   : > { %13278 = vmatpush2.bf16.msra.mxu1 %v24350_v63  ;;  %v24439_v63 = vld [vmem:[%s32097_s13 + $0x1ec] ss:$16 sps:$4 sm:$0xff]  }
 0xbb8   : > { %13279 = vmatprep.subr.bf16.mxu1 %v24358_v57  ;;  %v24434_v57 = vld [vmem:[%s32097_s13 + $0x208] ss:$16 sps:$4 sm:$0xff]  }
 0xbb9   : > { %13239 = vmatpush2.bf16.msra.mxu0 %v24353_v26  ;;  %v24442_v26 = vld [vmem:[%s32097_s13 + $0x3ec] ss:$16 sps:$4 sm:$0xff]  }
 0xbba   : > { %13240 = vmatprep.subr.bf16.mxu0 %v24361_v27  ;;  %v24437_v27 = vld [vmem:[%s32097_s13 + $0x1e8] ss:$16 sps:$4 sm:$0xff]  }
 0xbbb   : > { %13280 = vmatpush2.bf16.msra.mxu1 %v24356_v15  ;;  %v24445_v15 = vld [vmem:[%s32097_s13 + $0x1cc] ss:$16 sps:$4 sm:$0xff]  }
 0xbbc   : > { %13281 = vmatprep.subr.bf16.mxu1 %v24364_v31  ;;  %v24440_v31 = vld [vmem:[%s32097_s13 + $0x3e8] ss:$16 sps:$4 sm:$0xff]  }
 0xbbd   : > { %13241 = vmatpush2.bf16.msra.mxu0 %v24359_v34  ;;  %v24448_v34 = vld [vmem:[%s32097_s13 + $0x3cc] ss:$16 sps:$4 sm:$0xff]  }
 0xbbe   : > { %13242 = vmatprep.subr.bf16.mxu0 %v24367_v32  ;;  %v24443_v32 = vld [vmem:[%s32097_s13 + $0x1c8] ss:$16 sps:$4 sm:$0xff]  }
 0xbbf   : > { %13282 = vmatpush2.bf16.msra.mxu1 %v24362_v22  ;;  %v24451_v22 = vld [vmem:[%s32097_s13 + $0x1ac] ss:$16 sps:$4 sm:$0xff]  }
 0xbc0   : > { %13283 = vmatprep.subr.bf16.mxu1 %v24370_v35  ;;  %v24446_v35 = vld [vmem:[%s32097_s13 + $0x3c8] ss:$16 sps:$4 sm:$0xff]  }
 0xbc1   : > { %13243 = vmatpush2.bf16.msra.mxu0 %v24365_v36  ;;  %v24454_v36 = vld [vmem:[%s32097_s13 + $0x3ac] ss:$16 sps:$4 sm:$0xff]  }
 0xbc2   : > { %13244 = vmatprep.subr.bf16.mxu0 %v24373_v41  ;;  %v24449_v41 = vld [vmem:[%s32097_s13 + $0x1a8] ss:$16 sps:$4 sm:$0xff]  }
 0xbc3   : > { %13284 = vmatpush2.bf16.msra.mxu1 %v24368_v33  ;;  %v24457_v33 = vld [vmem:[%s32097_s13 + $0x18c] ss:$16 sps:$4 sm:$0xff]  }
 0xbc4   : > { %13285 = vmatprep.subr.bf16.mxu1 %v24376_v37  ;;  %v24452_v37 = vld [vmem:[%s32097_s13 + $0x3a8] ss:$16 sps:$4 sm:$0xff]  }
 0xbc5   : > { %13245 = vmatpush2.bf16.msra.mxu0 %v24371_v10  ;;  %v24460_v10 = vld [vmem:[%s32097_s13 + $0x38c] ss:$16 sps:$4 sm:$0xff]  }
 0xbc6   : > { %13246 = vmatprep.subr.bf16.mxu0 %v24379_v42  ;;  %v24455_v42 = vld [vmem:[%s32097_s13 + $0x188] ss:$16 sps:$4 sm:$0xff]  }
 0xbc7   : > { %13286 = vmatpush2.bf16.msra.mxu1 %v24374_v43  ;;  %v24463_v43 = vld [vmem:[%s32097_s13 + $0x16c] ss:$16 sps:$4 sm:$0xff]  }
 0xbc8   : > { %13287 = vmatprep.subr.bf16.mxu1 %v24382_v53  ;;  %v24458_v53 = vld [vmem:[%s32097_s13 + $0x388] ss:$16 sps:$4 sm:$0xff]  }
 0xbc9   : > { %13247 = vmatpush2.bf16.msra.mxu0 %v24377_v39  ;;  %v24466_v39 = vld [vmem:[%s32097_s13 + $0x36c] ss:$16 sps:$4 sm:$0xff]  }
 0xbca   : > { %13248 = vmatprep.subr.bf16.mxu0 %v24385_v38  ;;  %v24461_v38 = vld [vmem:[%s32097_s13 + $0x168] ss:$16 sps:$4 sm:$0xff]  }
 0xbcb   : > { %13288 = vmatpush2.bf16.msra.mxu1 %v24380_v25  ;;  %v24469_v25 = vld [vmem:[%s32097_s13 + $0x14c] ss:$16 sps:$4 sm:$0xff]  }
 0xbcc   : > { %13289 = vmatprep.subr.bf16.mxu1 %v24388_v48  ;;  %v24464_v48 = vld [vmem:[%s32097_s13 + $0x368] ss:$16 sps:$4 sm:$0xff]  }
 0xbcd   : > { %13249 = vmatpush2.bf16.msra.mxu0 %v24383_v49  ;;  %v24472_v49 = vld [vmem:[%s32097_s13 + $0x34c] ss:$16 sps:$4 sm:$0xff]  }
 0xbce   : > { %13300 = vmatprep.subr.bf16.mxu0 %v24391_v45  ;;  %v24467_v45 = vld [vmem:[%s32097_s13 + $0x148] ss:$16 sps:$4 sm:$0xff]  }
 0xbcf   : > { %13290 = vmatpush2.bf16.msra.mxu1 %v24386_v50  ;;  %v24475_v50 = vld [vmem:[%s32097_s13 + $0x12c] ss:$16 sps:$4 sm:$0xff]  }
 0xbd0   : > { %13251 = vmatmul.mubr.bf16.vlgmr.msra.gmra.mxu0 %v29581_v52  ;;  %13341 = vmatprep.subr.bf16.mxu1 %v24394_v51  ;;  %v13382_v51 = vld [vmem:[#allocation4] sm:$0xaa] }
 0xbd1   : > { %13301 = vmatpush1.bf16.msra.mxu0 %v24389_v44  ;;  %13332 = vmatprep.mubr.bf16.mxu0 %v29597_v2  ;;  %v24406_v2 = vld [vmem:[%s32097_s13 + $0x2ac] ss:$16 sps:$4 sm:$0xff]   ;;  %v24470_v44 = vld [vmem:[%s32097_s13 + $0x348] ss:$16 sps:$4 sm:$0xff]  }
 0xbd2   : > { %13292 = vmatmul.mubr.bf16.vlgmr.msra.gmra.mxu1 %v29590_v24  ;;  %13302 = vmatprep.subr.bf16.mxu0 %v24397_v58  ;;  %v24478_v58 = vld [vmem:[%s32097_s13 + $0x32c] ss:$16 sps:$4 sm:$0xff]  }
 0xbd3   : > { %13342 = vmatpush1.bf16.msra.mxu1 %v24392_v21  ;;  %13373 = vmatprep.mubr.bf16.mxu1 %v29609_v47  ;;  %v24404_v47 = vld [vmem:[%s32097_s13 + $0x2a8] ss:$16 sps:$4 sm:$0xff]  }
 0xbd4   : > { %13343 = vmatprep.subr.bf16.mxu1 %v24400_v59  ;;  %v24473_v21 = vld [vmem:[%s32097_s13 + $0x128] ss:$16 sps:$4 sm:$0xff]   ;;  %v13513_v59 = vcombine.high %v13382_v51, %v13382_v51 }
 0xbd5   : > { %13303 = vmatpush1.bf16.msra.mxu0 %v24395_v60  ;;  %v24481_v60 = vld [vmem:[%s32097_s13 + $0x10c] ss:$16 sps:$4 sm:$0xff]  }
 0xbd6   : > { %13304 = vmatprep.subr.bf16.mxu0 %v24403_v62  ;;  %v24476_v62 = vld [vmem:[%s32097_s13 + $0x328] ss:$16 sps:$4 sm:$0xff]  }
 0xbd7   : > { %13344 = vmatpush1.bf16.msra.mxu1 %v24398_v4  ;;  %v29975_v4 = vrot.slane %v13382_v51, %v29378_v9  ;;  %v24531_v51 = vld [vmem:[%s32097_s13 + $0xa00] ss:$16 sps:$4 sm:$0xff]  }
 0xbd8   : > { %13345 = vmatprep.subr.bf16.mxu1 %v24406_v2  ;;  %v24484_v2 = vld [vmem:[%s32097_s13 + $0x30c] ss:$16 sps:$4 sm:$0xff]  }
 0xbd9   : > { %13305 = vmatpush1.bf16.msra.mxu0 %v24401_v5  ;;  %v24479_v5 = vld [vmem:[%s32097_s13 + $0x108] ss:$16 sps:$4 sm:$0xff]  }
 0xbda   : > { %13306 = vmatprep.subr.bf16.mxu0 %v24409_v28  ;;  %v29984_v28 = vrot.slane %v13513_v59, %v29378_v9  ;;  %v24485_v9 = vld [vmem:[%s32097_s13 + $0x8e0] ss:$16 sps:$4 sm:$0xff]  }
 0xbdb   : > { %13346 = vmatpush1.bf16.msra.mxu1 %v24404_v47  ;;  %v24487_v47 = vld [vmem:[%s32097_s13 + $0x8e4] ss:$16 sps:$4 sm:$0xff]   ;;  %v24537_v59 = vld [vmem:[%s32097_s13 + $0xbe0] ss:$16 sps:$4 sm:$0xff]  }
 0xbdc   : > { %13347 = vmatprep.subr.bf16.mxu1 %v24412_v20  ;;  %v24482_v20 = vld [vmem:[%s32097_s13 + $0x308] ss:$16 sps:$4 sm:$0xff]  }
 0xbdd   : > { %13307 = vmatpush1.bf16.msra.mxu0 %v24407_v54  ;;  %v13528_v54 = vcombine.high %v29975_v4, %v29975_v4 }
 0xbde   : > { %13308 = vmatprep.subr.bf16.mxu0 %v24415_v56  ;;  %v24490_v56 = vld [vmem:[%s32097_s13 + $0xae4] ss:$16 sps:$4 sm:$0xff]  }
 0xbdf   : > { %13348 = vmatpush1.bf16.msra.mxu1 %v24410_v55  ;;  %v13529_v55 = vcombine.high %v29984_v28, %v29984_v28 }
 0xbe0   : > { %13349 = vmatprep.subr.bf16.mxu1 %v24418_v13  ;;  %v24494_v13 = vld [vmem:[%s32097_s13 + $0x8c4] ss:$16 sps:$4 sm:$0xff]  }
 0xbe1   : > { %13309 = vmatpush1.bf16.msra.mxu0 %v24413_v40  ;;  %v30005_v40 = vrot.slane %v13528_v54, 1  ;;  %v24554_v54 = vld [vmem:[%s32097_s13 + $0x984] ss:$16 sps:$4 sm:$0xff]  }
 0xbe2   : > { %13310 = vmatprep.subr.bf16.mxu0 %v24421_v0  ;;  %v24488_v0 = vld [vmem:[%s32097_s13 + $0xae0] ss:$16 sps:$4 sm:$0xff]  }
 0xbe3   : > { %13350 = vmatpush1.bf16.msra.mxu1 %v24416_v7 }
 0xbe4   : > { %13351 = vmatprep.subr.bf16.mxu1 %v24424_v16  ;;  %v24497_v16 = vld [vmem:[%s32097_s13 + $0xac4] ss:$16 sps:$4 sm:$0xff]  }
 0xbe5   : > { %13311 = vmatpush1.bf16.msra.mxu0 %v24419_v18  ;;  %v30015_v18 = vrot.slane %v13529_v55, 1  ;;  %v24552_v55 = vld [vmem:[%s32097_s13 + $0x980] ss:$16 sps:$4 sm:$0xff]  }
 0xbe6   : > { %13312 = vmatprep.subr.bf16.mxu0 %v24427_v12  ;;  %v24492_v12 = vld [vmem:[%s32097_s13 + $0x8c0] ss:$16 sps:$4 sm:$0xff]  }
 0xbe7   : > { %13352 = vmatpush1.bf16.msra.mxu1 %v24422_v30 }
 0xbe8   : > { %13353 = vmatprep.subr.bf16.mxu1 %v24430_v1 }
 0xbe9   : > { %13313 = vmatpush1.bf16.msra.mxu0 %v24425_v46 }
 0xbea   : > { %13314 = vmatprep.subr.bf16.mxu0 %v24433_v19  ;;  %v24495_v19 = vld [vmem:[%s32097_s13 + $0xac0] ss:$16 sps:$4 sm:$0xff]  }
 0xbeb   : > { %13354 = vmatpush1.bf16.msra.mxu1 %v24428_v61 }
 0xbec   : > { %13355 = vmatprep.subr.bf16.mxu1 %v24436_v29 }
 0xbed   : > { %13315 = vmatpush1.bf16.msra.mxu0 %v24431_v23 }
 0xbee   : > { %13316 = vmatprep.subr.bf16.mxu0 %v24439_v63  ;;  %v24498_v63 = vld [vmem:[%s32097_s13 + $0x8a0] ss:$16 sps:$4 sm:$0xff]  }
 0xbef   : > { %13356 = vmatpush1.bf16.msra.mxu1 %v24434_v57 }
 0xbf0   : > { %13357 = vmatprep.subr.bf16.mxu1 %v24442_v26 }
 0xbf1   : > { %13317 = vmatpush2.bf16.msra.mxu0 %v24437_v27  ;;  %v24506_v27 = vld [vmem:[%s32097_s13 + $0x884] ss:$16 sps:$4 sm:$0xff]  }
 0xbf2   : > { %13318 = vmatprep.subr.bf16.mxu0 %v24445_v15  ;;  %v24501_v15 = vld [vmem:[%s32097_s13 + $0xaa0] ss:$16 sps:$4 sm:$0xff]  }
 0xbf3   : > { %13358 = vmatpush2.bf16.msra.mxu1 %v24440_v31 }
 0xbf4   : > { %13359 = vmatprep.subr.bf16.mxu1 %v24448_v34  ;;  %v24509_v34 = vld [vmem:[%s32097_s13 + $0xa84] ss:$16 sps:$4 sm:$0xff]  }
 0xbf5   : > { %13319 = vmatpush2.bf16.msra.mxu0 %v24443_v32  ;;  %v24504_v32 = vld [vmem:[%s32097_s13 + $0x880] ss:$16 sps:$4 sm:$0xff]  }
 0xbf6   : > { %13320 = vmatprep.subr.bf16.mxu0 %v24451_v22  ;;  %v24512_v22 = vld [vmem:[%s32097_s13 + $0x864] ss:$16 sps:$4 sm:$0xff]  }
 0xbf7   : > { %13360 = vmatpush2.bf16.msra.mxu1 %v24446_v35  ;;  %v24507_v35 = vld [vmem:[%s32097_s13 + $0xa80] ss:$16 sps:$4 sm:$0xff]  }
 0xbf8   : > { %13361 = vmatprep.subr.bf16.mxu1 %v24454_v36  ;;  %v24515_v36 = vld [vmem:[%s32097_s13 + $0xa64] ss:$16 sps:$4 sm:$0xff]  }
 0xbf9   : > { %13321 = vmatpush2.bf16.msra.mxu0 %v24449_v41  ;;  %v24510_v41 = vld [vmem:[%s32097_s13 + $0x860] ss:$16 sps:$4 sm:$0xff]  }
 0xbfa   : > { %13322 = vmatprep.subr.bf16.mxu0 %v24457_v33  ;;  %v24518_v33 = vld [vmem:[%s32097_s13 + $0x844] ss:$16 sps:$4 sm:$0xff]  }
 0xbfb   : > { %13362 = vmatpush2.bf16.msra.mxu1 %v24452_v37  ;;  %v24513_v37 = vld [vmem:[%s32097_s13 + $0xa60] ss:$16 sps:$4 sm:$0xff]  }
 0xbfc   : > { %13363 = vmatprep.subr.bf16.mxu1 %v24460_v10  ;;  %v24521_v10 = vld [vmem:[%s32097_s13 + $0xa44] ss:$16 sps:$4 sm:$0xff]  }
 0xbfd   : > { %13323 = vmatpush2.bf16.msra.mxu0 %v24455_v42  ;;  %v24516_v42 = vld [vmem:[%s32097_s13 + $0x840] ss:$16 sps:$4 sm:$0xff]  }
 0xbfe   : > { %13324 = vmatprep.subr.bf16.mxu0 %v24463_v43  ;;  %v24524_v43 = vld [vmem:[%s32097_s13 + $0x824] ss:$16 sps:$4 sm:$0xff]  }
 0xbff   : > { %13364 = vmatpush2.bf16.msra.mxu1 %v24458_v53  ;;  %v24519_v53 = vld [vmem:[%s32097_s13 + $0xa40] ss:$16 sps:$4 sm:$0xff]  }
 0xc00   : > { %13365 = vmatprep.subr.bf16.mxu1 %v24466_v39  ;;  %v24527_v39 = vld [vmem:[%s32097_s13 + $0xa24] ss:$16 sps:$4 sm:$0xff]  }
 0xc01   : > { %13325 = vmatpush2.bf16.msra.mxu0 %v24461_v38  ;;  %v24522_v38 = vld [vmem:[%s32097_s13 + $0x820] ss:$16 sps:$4 sm:$0xff]  }
 0xc02   : > { %13326 = vmatprep.subr.bf16.mxu0 %v24469_v25  ;;  %v24530_v25 = vld [vmem:[%s32097_s13 + $0x804] ss:$16 sps:$4 sm:$0xff]  }
 0xc03   : > { %13366 = vmatpush2.bf16.msra.mxu1 %v24464_v48  ;;  %v24525_v48 = vld [vmem:[%s32097_s13 + $0xa20] ss:$16 sps:$4 sm:$0xff]  }
 0xc04   : > { %13367 = vmatprep.subr.bf16.mxu1 %v24472_v49  ;;  %v24533_v49 = vld [vmem:[%s32097_s13 + $0xa04] ss:$16 sps:$4 sm:$0xff]  }
 0xc05   : > { %13327 = vmatpush2.bf16.msra.mxu0 %v24467_v45  ;;  %v24528_v45 = vld [vmem:[%s32097_s13 + $0x800] ss:$16 sps:$4 sm:$0xff]  }
 0xc06   : > { %13328 = vmatprep.subr.bf16.mxu0 %v24475_v50  ;;  %v24536_v50 = vld [vmem:[%s32097_s13 + $0x9e4] ss:$16 sps:$4 sm:$0xff]  }
 0xc07   : > { %13368 = vmatpush2.bf16.msra.mxu1 %v24470_v44  ;;  %v24539_v44 = vld [vmem:[%s32097_s13 + $0xbe4] ss:$16 sps:$4 sm:$0xff]  }
 0xc08   : > { %13369 = vmatprep.subr.bf16.mxu1 %v24478_v58  ;;  %v24534_v58 = vld [vmem:[%s32097_s13 + $0x9e0] ss:$16 sps:$4 sm:$0xff]  }
 0xc09   : > { %13329 = vmatpush2.bf16.msra.mxu0 %v24473_v21  ;;  %v24542_v21 = vld [vmem:[%s32097_s13 + $0x9c4] ss:$16 sps:$4 sm:$0xff]  }
 0xc0a   : > { %13330 = vmatprep.subr.bf16.mxu0 %v24481_v60  ;;  %v24545_v60 = vld [vmem:[%s32097_s13 + $0xbc4] ss:$16 sps:$4 sm:$0xff]  }
 0xc0b   : > { %13370 = vmatpush2.bf16.msra.mxu1 %v24476_v62  ;;  %v24540_v62 = vld [vmem:[%s32097_s13 + $0x9c0] ss:$16 sps:$4 sm:$0xff]  }
 0xc0c   : > { %13371 = vmatprep.subr.bf16.mxu1 %v24484_v2  ;;  %v24548_v2 = vld [vmem:[%s32097_s13 + $0x9a4] ss:$16 sps:$4 sm:$0xff]  }
 0xc0d   : > { %13331 = vmatpush2.bf16.msra.mxu0 %v24479_v5  ;;  %v24543_v5 = vld [vmem:[%s32097_s13 + $0xbc0] ss:$16 sps:$4 sm:$0xff]  }
 0xc0e   : > { %14178 = vmatprep.subr.bf16.mxu0 %v24487_v47  ;;  %v24551_v47 = vld [vmem:[%s32097_s13 + $0xba4] ss:$16 sps:$4 sm:$0xff]  }
 0xc0f   : > { %13372 = vmatpush2.bf16.msra.mxu1 %v24482_v20  ;;  %v24546_v20 = vld [vmem:[%s32097_s13 + $0x9a0] ss:$16 sps:$4 sm:$0xff]  }
 0xc10   : > { %13333 = vmatmul.mubr.bf16.vlgmr.msra.gmra.mxu0 %v29581_v52  ;;  %v12426_v7 = vpop.f32.mrf.mxu0  ;;  %14219 = vmatprep.subr.bf16.mxu1 %v24490_v56  ;;  %v12467_v1 = vpop.f32.mrf.mxu1  ;;  %v24500_v52 = vld [vmem:[%s32097_s13 + $0x8a4] ss:$16 sps:$4 sm:$0xff]   ;;  %v24549_v56 = vld [vmem:[%s32097_s13 + $0xba0] ss:$16 sps:$4 sm:$0xff]  }
 0xc11   : > { %14179 = vmatpush1.bf16.msra.mxu0 %v24485_v9  ;;  %14210 = vmatprep.mubr.bf16.mxu0 %v30005_v40  ;;  %v30024_v46 = vadd.f32 %v12467_v1, %v12426_v7  ;;  %v24557_v9 = vld [vmem:[%s32097_s13 + $0xb84] ss:$16 sps:$4 sm:$0xff]  }
 0xc12   : > { %13374 = vmatmul.mubr.bf16.vlgmr.msra.gmra.mxu1 %v29590_v24  ;;  %v12428_v30 = vpop.f32.mrf.mxu0  ;;  %14180 = vmatprep.subr.bf16.mxu0 %v24494_v13  ;;  %v12469_v29 = vpop.f32.mrf.mxu1  ;;  %v24503_v24 = vld [vmem:[%s32097_s13 + $0xaa4] ss:$16 sps:$4 sm:$0xff]  }
 0xc13   : > { %14220 = vmatpush1.bf16.msra.mxu1 %v24488_v0  ;;  %14251 = vmatprep.mubr.bf16.mxu1 %v30015_v18  ;;  %v30033_v23 = vadd.f32 %v12469_v29, %v12428_v30  ;;  %v24560_v13 = vld [vmem:[%s32097_s13 + $0x964] ss:$16 sps:$4 sm:$0xff]   ;;  %v24555_v0 = vld [vmem:[%s32097_s13 + $0xb80] ss:$16 sps:$4 sm:$0xff]  }
 0xc14   : > { %v12430_v61 = vpop.f32.mrf.mxu0  ;;  %14221 = vmatprep.subr.bf16.mxu1 %v24497_v16  ;;  %v12471_v26 = vpop.f32.mrf.mxu1  ;;  %v24563_v7 = vld [vmem:[%s32097_s13 + $0xb64] ss:$16 sps:$4 sm:$0xff]   ;;  %v24558_v16 = vld [vmem:[%s32097_s13 + $0x960] ss:$16 sps:$4 sm:$0xff]  }
 0xc15   : > { %14181 = vmatpush1.bf16.msra.mxu0 %v24492_v12  ;;  %v24566_v12 = vld [vmem:[%s32097_s13 + $0x944] ss:$16 sps:$4 sm:$0xff]   ;;  %v24561_v30 = vld [vmem:[%s32097_s13 + $0xb60] ss:$16 sps:$4 sm:$0xff]  }
 0xc16   : > { %v12431_v57 = vpop.f32.mrf.mxu0  ;;  %14182 = vmatprep.subr.bf16.mxu0 %v24500_v52  ;;  %v12472_v31 = vpop.f32.mrf.mxu1  ;;  %v24569_v1 = vld [vmem:[%s32097_s13 + $0xb44] ss:$16 sps:$4 sm:$0xff]   ;;  %v24564_v52 = vld [vmem:[%s32097_s13 + $0x940] ss:$16 sps:$4 sm:$0xff]  }
 0xc17   : > { %14222 = vmatpush1.bf16.msra.mxu1 %v24495_v19  ;;  %v24572_v19 = vld [vmem:[%s32097_s13 + $0x924] ss:$16 sps:$4 sm:$0xff]   ;;  %v24567_v61 = vld [vmem:[%s32097_s13 + $0xb40] ss:$16 sps:$4 sm:$0xff]  }
 0xc18   : > { %14223 = vmatprep.subr.bf16.mxu1 %v24503_v24  ;;  %v24575_v29 = vld [vmem:[%s32097_s13 + $0xb24] ss:$16 sps:$4 sm:$0xff]   ;;  %v24570_v24 = vld [vmem:[%s32097_s13 + $0x920] ss:$16 sps:$4 sm:$0xff]  }
 0xc19   : > { %14183 = vmatpush1.bf16.msra.mxu0 %v24498_v63  ;;  %v24578_v63 = vld [vmem:[%s32097_s13 + $0x904] ss:$16 sps:$4 sm:$0xff]   ;;  %v24573_v57 = vld [vmem:[%s32097_s13 + $0xb20] ss:$16 sps:$4 sm:$0xff]  }
 0xc1a   : > { %14184 = vmatprep.subr.bf16.mxu0 %v24506_v27  ;;  %v24581_v26 = vld [vmem:[%s32097_s13 + $0xb04] ss:$16 sps:$4 sm:$0xff]   ;;  %v24576_v27 = vld [vmem:[%s32097_s13 + $0x900] ss:$16 sps:$4 sm:$0xff]  }
 0xc1b   : > { %14224 = vmatpush1.bf16.msra.mxu1 %v24501_v15  ;;  %v24584_v15 = vld [vmem:[%s32097_s13 + $0x8ec] ss:$16 sps:$4 sm:$0xff]   ;;  %v24579_v31 = vld [vmem:[%s32097_s13 + $0xb00] ss:$16 sps:$4 sm:$0xff]  }
 0xc1c   : > { %14225 = vmatprep.subr.bf16.mxu1 %v24509_v34  ;;  %v24587_v34 = vld [vmem:[%s32097_s13 + $0xaec] ss:$16 sps:$4 sm:$0xff]  }
 0xc1d   : > { %14185 = vmatpush1.bf16.msra.mxu0 %v24504_v32  ;;  %v24582_v32 = vld [vmem:[%s32097_s13 + $0x8e8] ss:$16 sps:$4 sm:$0xff]  }
 0xc1e   : > { %14186 = vmatprep.subr.bf16.mxu0 %v24512_v22  ;;  %v13530_v22 = vrot.slane %v29975_v4, 1 }
 0xc1f   : > { %14226 = vmatpush1.bf16.msra.mxu1 %v24507_v35  ;;  %v24590_v35 = vld [vmem:[%s32097_s13 + $0x8cc] ss:$16 sps:$4 sm:$0xff]  }
 0xc20   : > { %14227 = vmatprep.subr.bf16.mxu1 %v24515_v36  ;;  %v24585_v36 = vld [vmem:[%s32097_s13 + $0xae8] ss:$16 sps:$4 sm:$0xff]  }
 0xc21   : > { %14187 = vmatpush1.bf16.msra.mxu0 %v24510_v41  ;;  %v13532_v41 = vrot.slane %v29984_v28, 1 }
 0xc22   : > { %14188 = vmatprep.subr.bf16.mxu0 %v24518_v33 }
 0xc23   : > { %14228 = vmatpush1.bf16.msra.mxu1 %v24513_v37  ;;  %v24593_v37 = vld [vmem:[%s32097_s13 + $0xacc] ss:$16 sps:$4 sm:$0xff]  }
 0xc24   : > { %14229 = vmatprep.subr.bf16.mxu1 %v24521_v10  ;;  %v24588_v10 = vld [vmem:[%s32097_s13 + $0x8c8] ss:$16 sps:$4 sm:$0xff]  }
 0xc25   : > { %14189 = vmatpush1.bf16.msra.mxu0 %v24516_v42 }
 0xc26   : > { %14190 = vmatprep.subr.bf16.mxu0 %v24524_v43 }
 0xc27   : > { %14230 = vmatpush1.bf16.msra.mxu1 %v24519_v53  ;;  %v24596_v53 = vld [vmem:[%s32097_s13 + $0x8ac] ss:$16 sps:$4 sm:$0xff]  }
 0xc28   : > { %14231 = vmatprep.subr.bf16.mxu1 %v24527_v39 }
 0xc29   : > { %14191 = vmatpush1.bf16.msra.mxu0 %v24522_v38 }
 0xc2a   : > { %14192 = vmatprep.subr.bf16.mxu0 %v24530_v25 }
 0xc2b   : > { %14232 = vmatpush1.bf16.msra.mxu1 %v24525_v48  ;;  %v24599_v48 = vld [vmem:[%s32097_s13 + $0xaac] ss:$16 sps:$4 sm:$0xff]  }
 0xc2c   : > { %14233 = vmatprep.subr.bf16.mxu1 %v24533_v49 }
 0xc2d   : > { %14193 = vmatpush1.bf16.msra.mxu0 %v24528_v45  ;;  %v24594_v45 = vld [vmem:[%s32097_s13 + $0x8a8] ss:$16 sps:$4 sm:$0xff]  }
 0xc2e   : > { %14194 = vmatprep.subr.bf16.mxu0 %v24536_v50 }
 0xc2f   : > { %14234 = vmatpush1.bf16.msra.mxu1 %v24531_v51  ;;  %v24602_v51 = vld [vmem:[%s32097_s13 + $0x88c] ss:$16 sps:$4 sm:$0xff]  }
 0xc30   : > { %14235 = vmatprep.subr.bf16.mxu1 %v24539_v44  ;;  %v24597_v44 = vld [vmem:[%s32097_s13 + $0xaa8] ss:$16 sps:$4 sm:$0xff]  }
 0xc31   : > { %14195 = vmatpush2.bf16.msra.mxu0 %v24534_v58 }
 0xc32   : > { %14196 = vmatprep.subr.bf16.mxu0 %v24542_v21  ;;  %v24605_v21 = vld [vmem:[%s32097_s13 + $0xa8c] ss:$16 sps:$4 sm:$0xff]  }
 0xc33   : > { %14236 = vmatpush2.bf16.msra.mxu1 %v24537_v59  ;;  %v24600_v59 = vld [vmem:[%s32097_s13 + $0x888] ss:$16 sps:$4 sm:$0xff]  }
 0xc34   : > { %14237 = vmatprep.subr.bf16.mxu1 %v24545_v60  ;;  %v24608_v60 = vld [vmem:[%s32097_s13 + $0x86c] ss:$16 sps:$4 sm:$0xff]  }
 0xc35   : > { %14197 = vmatpush2.bf16.msra.mxu0 %v24540_v62  ;;  %v24603_v62 = vld [vmem:[%s32097_s13 + $0xa88] ss:$16 sps:$4 sm:$0xff]  }
 0xc36   : > { %14198 = vmatprep.subr.bf16.mxu0 %v24548_v2  ;;  %v24611_v2 = vld [vmem:[%s32097_s13 + $0xa6c] ss:$16 sps:$4 sm:$0xff]  }
 0xc37   : > { %14238 = vmatpush2.bf16.msra.mxu1 %v24543_v5  ;;  %v24606_v5 = vld [vmem:[%s32097_s13 + $0x868] ss:$16 sps:$4 sm:$0xff]  }
 0xc38   : > { %14239 = vmatprep.subr.bf16.mxu1 %v24551_v47  ;;  %v24614_v47 = vld [vmem:[%s32097_s13 + $0x84c] ss:$16 sps:$4 sm:$0xff]  }
 0xc39   : > { %14199 = vmatpush2.bf16.msra.mxu0 %v24546_v20  ;;  %v24609_v20 = vld [vmem:[%s32097_s13 + $0xa68] ss:$16 sps:$4 sm:$0xff]  }
 0xc3a   : > { %14200 = vmatprep.subr.bf16.mxu0 %v24554_v54  ;;  %v24617_v54 = vld [vmem:[%s32097_s13 + $0xa4c] ss:$16 sps:$4 sm:$0xff]  }
 0xc3b   : > { %14240 = vmatpush2.bf16.msra.mxu1 %v24549_v56  ;;  %v24612_v56 = vld [vmem:[%s32097_s13 + $0x848] ss:$16 sps:$4 sm:$0xff]  }
 0xc3c   : > { %14241 = vmatprep.subr.bf16.mxu1 %v24557_v9  ;;  %v24620_v9 = vld [vmem:[%s32097_s13 + $0x82c] ss:$16 sps:$4 sm:$0xff]  }
 0xc3d   : > { %14201 = vmatpush2.bf16.msra.mxu0 %v24552_v55  ;;  %v24615_v55 = vld [vmem:[%s32097_s13 + $0xa48] ss:$16 sps:$4 sm:$0xff]  }
 0xc3e   : > { %14202 = vmatprep.subr.bf16.mxu0 %v24560_v13  ;;  %v24623_v13 = vld [vmem:[%s32097_s13 + $0xa2c] ss:$16 sps:$4 sm:$0xff]  }
 0xc3f   : > { %14242 = vmatpush2.bf16.msra.mxu1 %v24555_v0  ;;  %v24618_v0 = vld [vmem:[%s32097_s13 + $0x828] ss:$16 sps:$4 sm:$0xff]  }
 0xc40   : > { %14243 = vmatprep.subr.bf16.mxu1 %v24563_v7  ;;  %v24626_v7 = vld [vmem:[%s32097_s13 + $0x80c] ss:$16 sps:$4 sm:$0xff]  }
 0xc41   : > { %14203 = vmatpush2.bf16.msra.mxu0 %v24558_v16  ;;  %v24621_v16 = vld [vmem:[%s32097_s13 + $0xa28] ss:$16 sps:$4 sm:$0xff]  }
 0xc42   : > { %14204 = vmatprep.subr.bf16.mxu0 %v24566_v12  ;;  %v24629_v12 = vld [vmem:[%s32097_s13 + $0xa0c] ss:$16 sps:$4 sm:$0xff]  }
 0xc43   : > { %14244 = vmatpush2.bf16.msra.mxu1 %v24561_v30  ;;  %v24624_v30 = vld [vmem:[%s32097_s13 + $0x808] ss:$16 sps:$4 sm:$0xff]  }
 0xc44   : > { %14245 = vmatprep.subr.bf16.mxu1 %v24569_v1  ;;  %v24632_v1 = vld [vmem:[%s32097_s13 + $0x9ec] ss:$16 sps:$4 sm:$0xff]  }
 0xc45   : > { %14205 = vmatpush2.bf16.msra.mxu0 %v24564_v52  ;;  %v24627_v52 = vld [vmem:[%s32097_s13 + $0xa08] ss:$16 sps:$4 sm:$0xff]  }
 0xc46   : > { %14206 = vmatprep.subr.bf16.mxu0 %v24572_v19  ;;  %v24635_v19 = vld [vmem:[%s32097_s13 + $0xbec] ss:$16 sps:$4 sm:$0xff]  }
 0xc47   : > { %14246 = vmatpush2.bf16.msra.mxu1 %v24567_v61  ;;  %v24630_v61 = vld [vmem:[%s32097_s13 + $0x9e8] ss:$16 sps:$4 sm:$0xff]  }
 0xc48   : > { %14247 = vmatprep.subr.bf16.mxu1 %v24575_v29  ;;  %v24638_v29 = vld [vmem:[%s32097_s13 + $0x9cc] ss:$16 sps:$4 sm:$0xff]  }
 0xc49   : > { %14207 = vmatpush2.bf16.msra.mxu0 %v24570_v24  ;;  %v24633_v24 = vld [vmem:[%s32097_s13 + $0xbe8] ss:$16 sps:$4 sm:$0xff]  }
 0xc4a   : > { %14208 = vmatprep.subr.bf16.mxu0 %v24578_v63  ;;  %v24641_v63 = vld [vmem:[%s32097_s13 + $0xbcc] ss:$16 sps:$4 sm:$0xff]  }
 0xc4b   : > { %14248 = vmatpush2.bf16.msra.mxu1 %v24573_v57  ;;  %v24636_v57 = vld [vmem:[%s32097_s13 + $0x9c8] ss:$16 sps:$4 sm:$0xff]  }
 0xc4c   : > { %14249 = vmatprep.subr.bf16.mxu1 %v24581_v26  ;;  %v24644_v26 = vld [vmem:[%s32097_s13 + $0x9ac] ss:$16 sps:$4 sm:$0xff]  }
 0xc4d   : > { %14209 = vmatpush2.bf16.msra.mxu0 %v24576_v27  ;;  %v24639_v27 = vld [vmem:[%s32097_s13 + $0xbc8] ss:$16 sps:$4 sm:$0xff]  }
 0xc4e   : > { %14260 = vmatprep.subr.bf16.mxu0 %v24584_v15  ;;  %v24647_v15 = vld [vmem:[%s32097_s13 + $0xbac] ss:$16 sps:$4 sm:$0xff]  }
 0xc4f   : > { %14250 = vmatpush2.bf16.msra.mxu1 %v24579_v31  ;;  %v24642_v31 = vld [vmem:[%s32097_s13 + $0x9a8] ss:$16 sps:$4 sm:$0xff]  }
 0xc50   : > { %v12508_v33 = vpop.f32.mrf.mxu0  ;;  %14211 = vmatmul.mubr.bf16.vlgmr.msra.gmra.mxu0 %v13530_v22  ;;  %14301 = vmatprep.subr.bf16.mxu1 %v24587_v34  ;;  %v24650_v34 = vld [vmem:[%s32097_s13 + $0x98c] ss:$16 sps:$4 sm:$0xff]  }
 0xc51   : > { %14261 = vmatpush1.bf16.msra.mxu0 %v24582_v32  ;;  %14292 = vmatprep.mubr.bf16.mxu0 %v30005_v40  ;;  %v24591_v40 = vld [vmem:[%s32097_s13 + $0xac8] ss:$16 sps:$4 sm:$0xff]  }
 0xc52   : > { %v12510_v42 = vpop.f32.mrf.mxu0  ;;  %v12549_v43 = vpop.f32.mrf.mxu1  ;;  %14252 = vmatmul.mubr.bf16.vlgmr.msra.gmra.mxu1 %v13532_v41  ;;  %14262 = vmatprep.subr.bf16.mxu0 %v24590_v35  ;;  %v24645_v32 = vld [vmem:[%s32097_s13 + $0xba8] ss:$16 sps:$4 sm:$0xff]   ;;  %v24653_v35 = vld [vmem:[%s32097_s13 + $0xb8c] ss:$16 sps:$4 sm:$0xff]  }
 0xc53   : > { %v30228_v39 = vadd.f32 %v12549_v43, %v12508_v33  ;;  %14302 = vmatpush1.bf16.msra.mxu1 %v24585_v36  ;;  %14333 = vmatprep.mubr.bf16.mxu1 %v30015_v18  ;;  %v24648_v36 = vld [vmem:[%s32097_s13 + $0x988] ss:$16 sps:$4 sm:$0xff]   ;;  %v24656_v33 = vld [vmem:[%s32097_s13 + $0x96c] ss:$16 sps:$4 sm:$0xff]  }
 0xc54   : > { %v12512_v38 = vpop.f32.mrf.mxu0  ;;  %v12551_v25 = vpop.f32.mrf.mxu1  ;;  %14303 = vmatprep.subr.bf16.mxu1 %v24593_v37  ;;  %v24651_v37 = vld [vmem:[%s32097_s13 + $0xb88] ss:$16 sps:$4 sm:$0xff]   ;;  %v24662_v43 = vld [vmem:[%s32097_s13 + $0x94c] ss:$16 sps:$4 sm:$0xff]  }
 0xc55   : > { %v30237_v49 = vadd.f32 %v12551_v25, %v12510_v42  ;;  %14263 = vmatpush1.bf16.msra.mxu0 %v24588_v10  ;;  %v24659_v10 = vld [vmem:[%s32097_s13 + $0xb6c] ss:$16 sps:$4 sm:$0xff]   ;;  %v24654_v42 = vld [vmem:[%s32097_s13 + $0x968] ss:$16 sps:$4 sm:$0xff]  }
 0xc56   : > { %v12513_v50 = vpop.f32.mrf.mxu0  ;;  %v12553_v18 = vpop.f32.mrf.mxu1  ;;  %14264 = vmatprep.subr.bf16.mxu0 %v24596_v53  ;;  %v24657_v53 = vld [vmem:[%s32097_s13 + $0xb68] ss:$16 sps:$4 sm:$0xff]   ;;  %v24668_v25 = vld [vmem:[%s32097_s13 + $0x92c] ss:$16 sps:$4 sm:$0xff]  }
 0xc57   : > { %14304 = vmatpush1.bf16.msra.mxu1 %v24591_v40  ;;  %v24665_v40 = vld [vmem:[%s32097_s13 + $0xb4c] ss:$16 sps:$4 sm:$0xff]   ;;  %v24660_v38 = vld [vmem:[%s32097_s13 + $0x948] ss:$16 sps:$4 sm:$0xff]  }
 0xc58   : > { %v12554_v58 = vpop.f32.mrf.mxu1  ;;  %14305 = vmatprep.subr.bf16.mxu1 %v24599_v48  ;;  %v24663_v48 = vld [vmem:[%s32097_s13 + $0xb48] ss:$16 sps:$4 sm:$0xff]   ;;  %v24674_v18 = vld [vmem:[%s32097_s13 + $0x90c] ss:$16 sps:$4 sm:$0xff]  }
 0xc59   : > { %14265 = vmatpush1.bf16.msra.mxu0 %v24594_v45  ;;  %v24671_v45 = vld [vmem:[%s32097_s13 + $0xb2c] ss:$16 sps:$4 sm:$0xff]   ;;  %v24666_v50 = vld [vmem:[%s32097_s13 + $0x928] ss:$16 sps:$4 sm:$0xff]  }
 0xc5a   : > { %14266 = vmatprep.subr.bf16.mxu0 %v24602_v51  ;;  %v24669_v51 = vld [vmem:[%s32097_s13 + $0xb28] ss:$16 sps:$4 sm:$0xff]  }
 0xc5b   : > { %14306 = vmatpush1.bf16.msra.mxu1 %v24597_v44  ;;  %v24677_v44 = vld [vmem:[%s32097_s13 + $0xb0c] ss:$16 sps:$4 sm:$0xff]   ;;  %v24672_v58 = vld [vmem:[%s32097_s13 + $0x908] ss:$16 sps:$4 sm:$0xff]  }
 0xc5c   : > { %14307 = vmatprep.subr.bf16.mxu1 %v24605_v21  ;;  %v24675_v21 = vld [vmem:[%s32097_s13 + $0xb08] ss:$16 sps:$4 sm:$0xff]  }
 0xc5d   : > { %14267 = vmatpush1.bf16.msra.mxu0 %v24600_v59 }
 0xc5e   : > { %14268 = vmatprep.subr.bf16.mxu0 %v24608_v60 }
 0xc5f   : > { %14308 = vmatpush1.bf16.msra.mxu1 %v24603_v62 }
 0xc60   : > { %14309 = vmatprep.subr.bf16.mxu1 %v24611_v2 }
 0xc61   : > { %14269 = vmatpush1.bf16.msra.mxu0 %v24606_v5 }
 0xc62   : > { %14270 = vmatprep.subr.bf16.mxu0 %v24614_v47 }
 0xc63   : > { %14310 = vmatpush1.bf16.msra.mxu1 %v24609_v20 }
 0xc64   : > { %14311 = vmatprep.subr.bf16.mxu1 %v24617_v54 }
 0xc65   : > { %14271 = vmatpush1.bf16.msra.mxu0 %v24612_v56 }
 0xc66   : > { %14272 = vmatprep.subr.bf16.mxu0 %v24620_v9 }
 0xc67   : > { %14312 = vmatpush1.bf16.msra.mxu1 %v24615_v55 }
 0xc68   : > { %14313 = vmatprep.subr.bf16.mxu1 %v24623_v13 }
 0xc69   : > { %14273 = vmatpush1.bf16.msra.mxu0 %v24618_v0 }
 0xc6a   : > { %14274 = vmatprep.subr.bf16.mxu0 %v24626_v7 }
 0xc6b   : > { %14314 = vmatpush1.bf16.msra.mxu1 %v24621_v16 }
 0xc6c   : > { %14315 = vmatprep.subr.bf16.mxu1 %v24629_v12 }
 0xc6d   : > { %14275 = vmatpush1.bf16.msra.mxu0 %v24624_v30 }
 0xc6e   : > { %14276 = vmatprep.subr.bf16.mxu0 %v24632_v1 }
 0xc6f   : > { %14316 = vmatpush1.bf16.msra.mxu1 %v24627_v52 }
 0xc70   : > { %14317 = vmatprep.subr.bf16.mxu1 %v24635_v19  ;;  %v30418_v19 = vld [vmem:[%s32098_s14] sm:$0xf] }
 0xc71   : > { %14277 = vmatpush2.bf16.msra.mxu0 %v24630_v61 }
 0xc72   : > { %14278 = vmatprep.subr.bf16.mxu0 %v24638_v29 }
 0xc73   : > { %14318 = vmatpush2.bf16.msra.mxu1 %v24633_v24 }
 0xc74   : > { %14319 = vmatprep.subr.bf16.mxu1 %v24641_v63 }
 0xc75   : > { %14279 = vmatpush2.bf16.msra.mxu0 %v24636_v57 }
 0xc76   : > { %14280 = vmatprep.subr.bf16.mxu0 %v24644_v26 }
 0xc77   : > { %14320 = vmatpush2.bf16.msra.mxu1 %v24639_v27  ;;  %v14355_v27 = vrot.slane %v30418_v19, %v25285_v6 }
 0xc78   : > { %14321 = vmatprep.subr.bf16.mxu1 %v24647_v15 }
 0xc79   : > { %14281 = vmatpush2.bf16.msra.mxu0 %v24642_v31 }
 0xc7a   : > { %14282 = vmatprep.subr.bf16.mxu0 %v24650_v34 }
 0xc7b   : > { %14322 = vmatpush2.bf16.msra.mxu1 %v24645_v32 }
 0xc7c   : > { %14323 = vmatprep.subr.bf16.mxu1 %v24653_v35 }
 0xc7d   : > { %14283 = vmatpush2.bf16.msra.mxu0 %v24648_v36 }
 0xc7e   : > { %14284 = vmatprep.subr.bf16.mxu0 %v24656_v33 }
 0xc7f   : > { %14324 = vmatpush2.bf16.msra.mxu1 %v24651_v37 }
 0xc80   : > { %14325 = vmatprep.subr.bf16.mxu1 %v24659_v10 }
 0xc81   : > { %14285 = vmatpush2.bf16.msra.mxu0 %v24654_v42 }
 0xc82   : > { %14286 = vmatprep.subr.bf16.mxu0 %v24662_v43 }
 0xc83   : > { %14326 = vmatpush2.bf16.msra.mxu1 %v24657_v53  ;;  %v30429_v53 = vld [vmem:[%s32099_s15] sm:$0x1] }
 0xc84   : > { %14327 = vmatprep.subr.bf16.mxu1 %v24665_v40  ;;  %v24680_v40 = vld [vmem:[%s32100_s16 + $0x74] ss:$8 sps:$4 sm:$0xff]  }
 0xc85   : > { %14287 = vmatpush2.bf16.msra.mxu0 %v24660_v38  ;;  %v30441_v38 = vld [vmem:[%s32099_s15 + $0x1] sm:$0x1] }
 0xc86   : > { %14288 = vmatprep.subr.bf16.mxu0 %v24668_v25  ;;  %v24678_v25 = vld [vmem:[%s32100_s16 + $0x70] ss:$8 sps:$4 sm:$0xff]  }
 0xc87   : > { %14328 = vmatpush2.bf16.msra.mxu1 %v24663_v48  ;;  %v24683_v48 = vld [vmem:[%s32100_s16 + $0x64] ss:$8 sps:$4 sm:$0xff]  }
 0xc88   : > { %14329 = vmatprep.subr.bf16.mxu1 %v24671_v45  ;;  %v24681_v45 = vld [vmem:[%s32100_s16 + $0x60] ss:$8 sps:$4 sm:$0xff]  }
 0xc89   : > { %14289 = vmatpush2.bf16.msra.mxu0 %v24666_v50  ;;  %v24686_v50 = vld [vmem:[%s32100_s16 + $0x54] ss:$8 sps:$4 sm:$0xff]  }
 0xc8a   : > { %14290 = vmatprep.subr.bf16.mxu0 %v24674_v18  ;;  %v24684_v18 = vld [vmem:[%s32100_s16 + $0x50] ss:$8 sps:$4 sm:$0xff]  }
 0xc8b   : > { %14330 = vmatpush2.bf16.msra.mxu1 %v24669_v51  ;;  %v24689_v51 = vld [vmem:[%s32100_s16 + $0x44] ss:$8 sps:$4 sm:$0xff]  }
 0xc8c   : > { %14331 = vmatprep.subr.bf16.mxu1 %v24677_v44  ;;  %v24687_v44 = vld [vmem:[%s32100_s16 + $0x40] ss:$8 sps:$4 sm:$0xff]  }
 0xc8d   : > { %14291 = vmatpush2.bf16.msra.mxu0 %v24672_v58  ;;  %v24692_v58 = vld [vmem:[%s32100_s16 + $0x34] ss:$8 sps:$4 sm:$0xff]  }
 0xc8f   : > { %14332 = vmatpush2.bf16.msra.mxu1 %v24675_v21  ;;  %v24690_v21 = vld [vmem:[%s32100_s16 + $0x30] ss:$8 sps:$4 sm:$0xff]  }
 0xc90   : > { %v13252_v59 = vpop.f32.mrf.mxu0  ;;  %14293 = vmatmul.mubr.bf16.vlgmr.msra.gmra.mxu0 %v13530_v22 }
 0xc91   : > { %v13253_v60 = vadd.f32 %v13252_v59, %v30024_v46  ;;  %14429 = vmatprep.mubr.bf16.mxu0 %v25041_v17  ;;  %v24695_v59 = vld [vmem:[%s32100_s16 + $0x24] ss:$8 sps:$4 sm:$0xff]  }
 0xc92   : > { %v13254_v62 = vpop.f32.mrf.mxu0  ;;  %v13293_v2 = vpop.f32.mrf.mxu1  ;;  %14334 = vmatmul.mubr.bf16.vlgmr.msra.gmra.mxu1 %v13532_v41 }
 0xc93   : > { %v13255_v5 = vadd.f32 %v13254_v62, %v30033_v23  ;;  %v13294_v47 = vadd.f32 %v13293_v2, %v13253_v60  ;;  %14470 = vmatprep.mubr.bf16.mxu1 %v25041_v17  ;;  %v24693_v60 = vld [vmem:[%s32100_s16 + $0x20] ss:$8 sps:$4 sm:$0xff]   ;;  %v24698_v62 = vld [vmem:[%s32100_s16 + $0x14] ss:$8 sps:$4 sm:$0xff]   ;;  %v24696_v2 = vld [vmem:[%s32100_s16 + $0x10] ss:$8 sps:$4 sm:$0xff]  }
 0xc94   : > { %v13256_v20 = vpop.f32.mrf.mxu0  ;;  %v13295_v54 = vpop.f32.mrf.mxu1 }
 0xc95   : > { %v13296_v56 = vadd.f32 %v13295_v54, %v13255_v5  ;;  %v24701_v5 = vld [vmem:[%s32100_s16 + $0x4] ss:$8 sps:$4 sm:$0xff]   ;;  %v24704_v20 = vld [vmem:[%s32100_s16 + $0xf4] ss:$8 sps:$4 sm:$0xff]   ;;  %v24702_v54 = vld [vmem:[%s32100_s16 + $0xf0] ss:$8 sps:$4 sm:$0xff]  }
 0xc96   : > { %v13257_v9 = vpop.f32.mrf.mxu0  ;;  %v13297_v4 = vpop.f32.mrf.mxu1 }
 0xc97   : > { %v24705_v9 = vld [vmem:[%s32100_s16 + $0xe0] ss:$8 sps:$4 sm:$0xff]   ;;  %v24710_v4 = vld [vmem:[%s32100_s16 + $0xd4] ss:$8 sps:$4 sm:$0xff]  }
 0xc98   : > { %v13298_v22 = vpop.f32.mrf.mxu1 }
 0xcd0   : > { %v13334_v55 = vpop.f32.mrf.mxu0 }
 0xcd1   : > { %v13335_v46 = vadd.f32 %v13334_v55, %v30228_v39  ;;  %v24708_v55 = vld [vmem:[%s32100_s16 + $0xd0] ss:$8 sps:$4 sm:$0xff]  }
 0xcd2   : > { %v13336_v13 = vpop.f32.mrf.mxu0  ;;  %v13375_v0 = vpop.f32.mrf.mxu1 }
 0xcd3   : > { %v13337_v7 = vadd.f32 %v13336_v13, %v30237_v49  ;;  %v30411_v28 = vadd.f32 %v13375_v0, %v13335_v46  ;;  %v14351_v49 = vrot.slane %v30418_v19, %v25294_v11  ;;  %v24713_v46 = vld [vmem:[%s32100_s16 + $0xc4] ss:$8 sps:$4 sm:$0xff]  }
 0xcd4   : > { %v13338_v41 = vpop.f32.mrf.mxu0  ;;  %v13377_v23 = vpop.f32.mrf.mxu1 }
 0xcd5   : > { %v30413_v16 = vadd.f32 %v13377_v23, %v13337_v7  ;;  %v14359_v41 = vrot.slane %v30418_v19, %v25297_v14 }
 0xcd6   : > { %v13339_v12 = vpop.f32.mrf.mxu0  ;;  %v13379_v30 = vpop.f32.mrf.mxu1 }
 0xcd7   : > { %v24711_v30 = vld [vmem:[%s32100_s16 + $0xc0] ss:$8 sps:$4 sm:$0xff]  }
 0xcd8   : > { %v13380_v1 = vpop.f32.mrf.mxu1 }
 0xd10   : > { %v14212_v52 = vpop.f32.mrf.mxu0 }
 0xd12   : > { %v14214_v39 = vpop.f32.mrf.mxu0  ;;  %v14253_v61 = vpop.f32.mrf.mxu1 }
 0xd13   : > { %v14254_v29 = vadd.f32 %v14253_v61, %v14212_v52  ;;  %v24716_v61 = vld [vmem:[%s32100_s16 + $0xb4] ss:$8 sps:$4 sm:$0xff]  }
 0xd14   : > { %v14216_v24 = vpop.f32.mrf.mxu0  ;;  %v14255_v63 = vpop.f32.mrf.mxu1 }
 0xd15   : > { %v14342_v57 = vadd.f32 %v14254_v29, %v13294_v47  ;;  %v14256_v26 = vadd.f32 %v14255_v63, %v14214_v39  ;;  %v24699_v47 = vld [vmem:[%s32100_s16] ss:$8 sps:$4 sm:$0xff]   ;;  %v14363_v39 = vrot.slane %v30418_v19, %v25291_v8 }
 0xd16   : > { %v14217_v15 = vpop.f32.mrf.mxu0  ;;  %v14257_v31 = vpop.f32.mrf.mxu1 }
 0xd17   : > { %v14368_v34 = vadd.f32 %v14351_v49, %v14342_v57  ;;  %v14343_v32 = vadd.f32 %v14256_v26, %v13296_v56  ;;  %v24707_v56 = vld [vmem:[%s32100_s16 + $0xe4] ss:$8 sps:$4 sm:$0xff]  }
 0xd18   : > { %v14258_v35 = vpop.f32.mrf.mxu1 }
 0xd19   : > { %v14372_v36 = vmax.f32 %v14368_v34, 0.0  ;;  %v14369_v33 = vadd.f32 %v14355_v27, %v14343_v32  ;;  %v24719_v32 = vld [vmem:[%s32100_s16 + $0xa4] ss:$8 sps:$4 sm:$0xff]   ;;  %v24720_v35 = vld [vmem:[%s32100_s16 + $0x90] ss:$8 sps:$4 sm:$0xff]  }
 0xd1b   : > { %v14373_v37 = vmax.f32 %v14369_v33, 0.0  ;;  %v14376_v10 = vpack.c.bf16 %v14372_v36, %v14372_v36  ;;  %v24722_v36 = vld [vmem:[%s32100_s16 + $0x94] ss:$8 sps:$4 sm:$0xff]   ;;  %v24723_v33 = vld [vmem:[%s32100_s16 + $0x80] ss:$8 sps:$4 sm:$0xff]  }
 0xd1d   : > { %v14377_v42 = vpack.c.bf16 %v14373_v37, %v14373_v37  ;;  %v14386_v43 = vsel %vm889_vm0, %v14376_v10, 0  ;;  %v24726_v37 = vld [vmem:[%s32100_s16 + $0x170] ss:$8 sps:$4 sm:$0xff]   ;;  %v24728_v10 = vld [vmem:[%s32100_s16 + $0x174] ss:$8 sps:$4 sm:$0xff]  }
 0xd1f   : > { %21467 = vmatprep.subr.msk.bf16.mxu0 %vm889_vm0, %v14377_v42 }
 0xd20   : > { %14412 = vmatpush1.bf16.msra.mxu0 %v14386_v43 }
 0xd21   : > { %21472 = vmatprep.subr.msk.bf16.mxu0 %vm889_vm0, %v14377_v42  ;;  %v24731_v42 = vld [vmem:[%s32100_s16 + $0x274] ss:$8 sps:$4 sm:$0xff]  }
 0xd23   : > { %21468 = vmatmul.mubr.msk.bf16.vlgmr.msra.gmra.mxu0 %vm14381_vm12, %v30429_v53 }
 0xd24   : > { %14499 = vmatpush1.bf16.msra.mxu0 %v14386_v43  ;;  %14516 = vmatprep.mubr.bf16.mxu0 %v25041_v17  ;;  %v24734_v43 = vld [vmem:[%s32100_s16 + $0x164] ss:$8 sps:$4 sm:$0xff]  }
 0xd25   : > { %14958 = vmatprep.subr.bf16.mxu0 %v24680_v40  ;;  %v24740_v40 = vld [vmem:[%s32100_s16 + $0x154] ss:$8 sps:$4 sm:$0xff]  }
 0xd2b   : > { %21473 = vmatmul.mubr.msk.bf16.vlgmr.msra.gmra.mxu0 %vm14381_vm12, %v30441_v38 }
 0xd2c   : > { %14959 = vmatpush1.bf16.msra.mxu0 %v24678_v25  ;;  %v24746_v25 = vld [vmem:[%s32100_s16 + $0x144] ss:$8 sps:$4 sm:$0xff]  }
 0xd2d   : > { %14960 = vmatprep.subr.bf16.mxu0 %v24683_v48  ;;  %v24744_v48 = vld [vmem:[%s32100_s16 + $0x140] ss:$8 sps:$4 sm:$0xff]  }
 0xd30   : > { %14961 = vmatpush1.bf16.msra.mxu0 %v24681_v45  ;;  %v24752_v45 = vld [vmem:[%s32100_s16 + $0x134] ss:$8 sps:$4 sm:$0xff]  }
 0xd31   : > { %14962 = vmatprep.subr.bf16.mxu0 %v24686_v50  ;;  %v24750_v50 = vld [vmem:[%s32100_s16 + $0x130] ss:$8 sps:$4 sm:$0xff]  }
 0xd34   : > { %14963 = vmatpush1.bf16.msra.mxu0 %v24684_v18  ;;  %v24758_v18 = vld [vmem:[%s32100_s16 + $0x124] ss:$8 sps:$4 sm:$0xff]  }
 0xd35   : > { %14964 = vmatprep.subr.bf16.mxu0 %v24689_v51  ;;  %v24756_v51 = vld [vmem:[%s32100_s16 + $0x120] ss:$8 sps:$4 sm:$0xff]  }
 0xd38   : > { %14965 = vmatpush1.bf16.msra.mxu0 %v24687_v44  ;;  %v24764_v44 = vld [vmem:[%s32100_s16 + $0x114] ss:$8 sps:$4 sm:$0xff]  }
 0xd39   : > { %14966 = vmatprep.subr.bf16.mxu0 %v24692_v58  ;;  %v24762_v58 = vld [vmem:[%s32100_s16 + $0x110] ss:$8 sps:$4 sm:$0xff]  }
 0xd3c   : > { %14967 = vmatpush1.bf16.msra.mxu0 %v24690_v21  ;;  %v24770_v21 = vld [vmem:[%s32100_s16 + $0x104] ss:$8 sps:$4 sm:$0xff]  }
 0xd3d   : > { %14968 = vmatprep.subr.bf16.mxu0 %v24695_v59  ;;  %v24768_v59 = vld [vmem:[%s32100_s16 + $0x100] ss:$8 sps:$4 sm:$0xff]  }
 0xd40   : > { %14969 = vmatpush1.bf16.msra.mxu0 %v24693_v60  ;;  %v24776_v60 = vld [vmem:[%s32100_s16 + $0x1f4] ss:$8 sps:$4 sm:$0xff]  }
 0xd41   : > { %14970 = vmatprep.subr.bf16.mxu0 %v24698_v62  ;;  %v24774_v62 = vld [vmem:[%s32100_s16 + $0x1f0] ss:$8 sps:$4 sm:$0xff]  }
 0xd44   : > { %14971 = vmatpush1.bf16.msra.mxu0 %v24696_v2  ;;  %v24782_v2 = vld [vmem:[%s32100_s16 + $0x1e4] ss:$8 sps:$4 sm:$0xff]  }
 0xd45   : > { %14972 = vmatprep.subr.bf16.mxu0 %v24701_v5  ;;  %v24780_v5 = vld [vmem:[%s32100_s16 + $0x1e0] ss:$8 sps:$4 sm:$0xff]  }
 0xd48   : > { %14973 = vmatpush1.bf16.msra.mxu0 %v24699_v47  ;;  %v24788_v47 = vld [vmem:[%s32100_s16 + $0x1d4] ss:$8 sps:$4 sm:$0xff]  }
 0xd49   : > { %14974 = vmatprep.subr.bf16.mxu0 %v24704_v20  ;;  %v24786_v20 = vld [vmem:[%s32100_s16 + $0x1d0] ss:$8 sps:$4 sm:$0xff]  }
 0xd4c   : > { %14975 = vmatpush2.bf16.msra.mxu0 %v24702_v54  ;;  %v24794_v54 = vld [vmem:[%s32100_s16 + $0x1c4] ss:$8 sps:$4 sm:$0xff]  }
 0xd4d   : > { %14976 = vmatprep.subr.bf16.mxu0 %v24707_v56  ;;  %v24792_v56 = vld [vmem:[%s32100_s16 + $0x1c0] ss:$8 sps:$4 sm:$0xff]  }
 0xd50   : > { %v14294_v22 = vpop.f32.mrf.mxu0  ;;  %14977 = vmatpush2.bf16.msra.mxu0 %v24705_v9  ;;  %v24800_v9 = vld [vmem:[%s32100_s16 + $0x1b4] ss:$8 sps:$4 sm:$0xff]  }
 0xd51   : > { %14978 = vmatprep.subr.bf16.mxu0 %v24710_v4  ;;  %v24798_v4 = vld [vmem:[%s32100_s16 + $0x1b0] ss:$8 sps:$4 sm:$0xff]  }
 0xd52   : > { %v14296_v13 = vpop.f32.mrf.mxu0  ;;  %v14335_v0 = vpop.f32.mrf.mxu1 }
 0xd53   : > { %v14336_v7 = vadd.f32 %v14335_v0, %v14294_v22  ;;  %v24804_v22 = vld [vmem:[%s32100_s16 + $0x1a0] ss:$8 sps:$4 sm:$0xff]   ;;  %v24818_v0 = vld [vmem:[%s32100_s16 + $0x184] ss:$8 sps:$4 sm:$0xff]  }
 0xd54   : > { %v14298_v23 = vpop.f32.mrf.mxu0  ;;  %v14337_v12 = vpop.f32.mrf.mxu1  ;;  %14979 = vmatpush2.bf16.msra.mxu0 %v24708_v55  ;;  %v24806_v55 = vld [vmem:[%s32100_s16 + $0x1a4] ss:$8 sps:$4 sm:$0xff]  }
 0xd55   : > { %v14344_v1 = vadd.f32 %v14336_v7, %v30411_v28  ;;  %v14338_v52 = vadd.f32 %v14337_v12, %v14296_v13  ;;  %14980 = vmatprep.subr.bf16.mxu0 %v24713_v46  ;;  %v24714_v28 = vld [vmem:[%s32100_s16 + $0xb0] ss:$8 sps:$4 sm:$0xff]   ;;  %v24812_v13 = vld [vmem:[%s32100_s16 + $0x194] ss:$8 sps:$4 sm:$0xff]   ;;  %v24816_v7 = vld [vmem:[%s32100_s16 + $0x180] ss:$8 sps:$4 sm:$0xff]  }
 0xd56   : > { %v14299_v29 = vpop.f32.mrf.mxu0  ;;  %v14339_v49 = vpop.f32.mrf.mxu1  ;;  %v24810_v46 = vld [vmem:[%s32100_s16 + $0x190] ss:$8 sps:$4 sm:$0xff]  }
 0xd57   : > { %v14370_v24 = vadd.f32 %v14359_v41, %v14344_v1  ;;  %v14345_v63 = vadd.f32 %v14338_v52, %v30413_v16  ;;  %v24717_v16 = vld [vmem:[%s32100_s16 + $0xa0] ss:$8 sps:$4 sm:$0xff]   ;;  %v24824_v41 = vld [vmem:[%s32100_s16 + $0x374] ss:$8 sps:$4 sm:$0xff]  }
 0xd58   : > { %v14340_v57 = vpop.f32.mrf.mxu1  ;;  %14981 = vmatpush2.bf16.msra.mxu0 %v24711_v30 }
 0xd59   : > { %v14374_v26 = vmax.f32 %v14370_v24, 0.0  ;;  %v14371_v27 = vadd.f32 %v14363_v39, %v14345_v63  ;;  %14982 = vmatprep.subr.bf16.mxu0 %v24716_v61  ;;  %v24729_v57 = vld [vmem:[%s32100_s16 + $0x270] ss:$8 sps:$4 sm:$0xff]  }
 0xd5b   : > { %v14375_v19 = vmax.f32 %v14371_v27, 0.0  ;;  %v14378_v15 = vpack.c.bf16 %v14374_v26, %v14374_v26  ;;  %v24735_v27 = vld [vmem:[%s32100_s16 + $0x260] ss:$8 sps:$4 sm:$0xff]  }
 0xd5c   : > { %14983 = vmatpush2.bf16.msra.mxu0 %v24714_v28  ;;  %v24737_v28 = vld [vmem:[%s32100_s16 + $0x264] ss:$8 sps:$4 sm:$0xff]  }
 0xd5d   : > { %v14379_v31 = vpack.c.bf16 %v14375_v19, %v14375_v19  ;;  %v14392_v34 = vsel %vm889_vm0, %v14378_v15, 0  ;;  %14984 = vmatprep.subr.bf16.mxu0 %v24719_v32  ;;  %v24743_v19 = vld [vmem:[%s32100_s16 + $0x254] ss:$8 sps:$4 sm:$0xff]   ;;  %v24741_v15 = vld [vmem:[%s32100_s16 + $0x250] ss:$8 sps:$4 sm:$0xff]  }
 0xd5e   : > { %v24753_v32 = vld [vmem:[%s32100_s16 + $0x230] ss:$8 sps:$4 sm:$0xff]  }
 0xd5f   : > { %21469 = vmatprep.subr.msk.bf16.mxu1 %vm889_vm0, %v14379_v31 }
 0xd60   : > { %14453 = vmatpush1.bf16.msra.mxu1 %v14392_v34  ;;  %14985 = vmatpush2.bf16.msra.mxu0 %v24717_v16  ;;  %v24755_v16 = vld [vmem:[%s32100_s16 + $0x234] ss:$8 sps:$4 sm:$0xff]  }
 0xd61   : > { %21474 = vmatprep.subr.msk.bf16.mxu1 %vm889_vm0, %v14379_v31  ;;  %14986 = vmatprep.subr.bf16.mxu0 %v24722_v36  ;;  %v24749_v31 = vld [vmem:[%s32100_s16 + $0x244] ss:$8 sps:$4 sm:$0xff]   ;;  %v24759_v36 = vld [vmem:[%s32100_s16 + $0x220] ss:$8 sps:$4 sm:$0xff]  }
 0xd63   : > { %21470 = vmatmul.mubr.msk.bf16.vlgmr.msra.gmra.mxu1 %vm14381_vm12, %v30429_v53  ;;  %v24732_v53 = vld [vmem:[%s32100_s16 + $0x160] ss:$8 sps:$4 sm:$0xff]  }
 0xd64   : > { %14540 = vmatpush1.bf16.msra.mxu1 %v14392_v34  ;;  %14557 = vmatprep.mubr.bf16.mxu1 %v25041_v17  ;;  %v24725_v17 = vld [vmem:[%s32100_s16 + $0x84] ss:$8 sps:$4 sm:$0xff]   ;;  %v24747_v34 = vld [vmem:[%s32100_s16 + $0x240] ss:$8 sps:$4 sm:$0xff]  }
 0xd65   : > { %14987 = vmatpush2.bf16.msra.mxu0 %v24720_v35  ;;  %14999 = vmatprep.subr.bf16.mxu1 %v24728_v10  ;;  %v24761_v35 = vld [vmem:[%s32100_s16 + $0x224] ss:$8 sps:$4 sm:$0xff]   ;;  %v24771_v10 = vld [vmem:[%s32100_s16 + $0x200] ss:$8 sps:$4 sm:$0xff]  }
 0xd66   : > { %14988 = vmatprep.subr.bf16.mxu0 %v24725_v17  ;;  %v24767_v17 = vld [vmem:[%s32100_s16 + $0x214] ss:$8 sps:$4 sm:$0xff]  }
 0xd69   : > { %14989 = vmatpush2.bf16.msra.mxu0 %v24723_v33  ;;  %v24765_v33 = vld [vmem:[%s32100_s16 + $0x210] ss:$8 sps:$4 sm:$0xff]  }
 0xd6a   : > { %15425 = vmatprep.subr.bf16.mxu0 %v24731_v42  ;;  %v24779_v42 = vld [vmem:[%s32100_s16 + $0x2f4] ss:$8 sps:$4 sm:$0xff]  }
 0xd6b   : > { %21475 = vmatmul.mubr.msk.bf16.vlgmr.msra.gmra.mxu1 %vm14381_vm12, %v30441_v38  ;;  %v24738_v38 = vld [vmem:[%s32100_s16 + $0x150] ss:$8 sps:$4 sm:$0xff]  }
 0xd6c   : > { %15000 = vmatpush1.bf16.msra.mxu1 %v24726_v37  ;;  %v24773_v37 = vld [vmem:[%s32100_s16 + $0x204] ss:$8 sps:$4 sm:$0xff]  }
 0xd6d   : > { %15001 = vmatprep.subr.bf16.mxu1 %v24734_v43  ;;  %v24777_v43 = vld [vmem:[%s32100_s16 + $0x2f0] ss:$8 sps:$4 sm:$0xff]  }
 0xd70   : > { %15002 = vmatpush1.bf16.msra.mxu1 %v24732_v53  ;;  %v24785_v53 = vld [vmem:[%s32100_s16 + $0x2e4] ss:$8 sps:$4 sm:$0xff]  }
 0xd71   : > { %15003 = vmatprep.subr.bf16.mxu1 %v24740_v40  ;;  %v24783_v40 = vld [vmem:[%s32100_s16 + $0x2e0] ss:$8 sps:$4 sm:$0xff]  }
 0xd74   : > { %15004 = vmatpush1.bf16.msra.mxu1 %v24738_v38  ;;  %v24791_v38 = vld [vmem:[%s32100_s16 + $0x2d4] ss:$8 sps:$4 sm:$0xff]  }
 0xd75   : > { %15005 = vmatprep.subr.bf16.mxu1 %v24746_v25  ;;  %v24789_v25 = vld [vmem:[%s32100_s16 + $0x2d0] ss:$8 sps:$4 sm:$0xff]  }
 0xd78   : > { %15006 = vmatpush1.bf16.msra.mxu1 %v24744_v48  ;;  %v24797_v48 = vld [vmem:[%s32100_s16 + $0x2c4] ss:$8 sps:$4 sm:$0xff]  }
 0xd79   : > { %15007 = vmatprep.subr.bf16.mxu1 %v24752_v45  ;;  %v24795_v45 = vld [vmem:[%s32100_s16 + $0x2c0] ss:$8 sps:$4 sm:$0xff]  }
 0xd7c   : > { %15008 = vmatpush1.bf16.msra.mxu1 %v24750_v50  ;;  %v24803_v50 = vld [vmem:[%s32100_s16 + $0x2b4] ss:$8 sps:$4 sm:$0xff]  }
 0xd7d   : > { %15009 = vmatprep.subr.bf16.mxu1 %v24758_v18  ;;  %v24801_v18 = vld [vmem:[%s32100_s16 + $0x2b0] ss:$8 sps:$4 sm:$0xff]  }
 0xd80   : > { %15010 = vmatpush1.bf16.msra.mxu1 %v24756_v51  ;;  %v24809_v51 = vld [vmem:[%s32100_s16 + $0x2a4] ss:$8 sps:$4 sm:$0xff]  }
 0xd81   : > { %15011 = vmatprep.subr.bf16.mxu1 %v24764_v44 }
 0xd84   : > { %15012 = vmatpush1.bf16.msra.mxu1 %v24762_v58  ;;  %v24807_v58 = vld [vmem:[%s32100_s16 + $0x2a0] ss:$8 sps:$4 sm:$0xff]  }
 0xd85   : > { %15013 = vmatprep.subr.bf16.mxu1 %v24770_v21 }
 0xd88   : > { %15014 = vmatpush1.bf16.msra.mxu1 %v24768_v59  ;;  %v24815_v59 = vld [vmem:[%s32100_s16 + $0x294] ss:$8 sps:$4 sm:$0xff]  }
 0xd89   : > { %15015 = vmatprep.subr.bf16.mxu1 %v24776_v60 }
 0xd8c   : > { %15016 = vmatpush2.bf16.msra.mxu1 %v24774_v62  ;;  %v24813_v62 = vld [vmem:[%s32100_s16 + $0x290] ss:$8 sps:$4 sm:$0xff]  }
 0xd8d   : > { %15017 = vmatprep.subr.bf16.mxu1 %v24782_v2 }
 0xd90   : > { %15018 = vmatpush2.bf16.msra.mxu1 %v24780_v5  ;;  %v24821_v5 = vld [vmem:[%s32100_s16 + $0x284] ss:$8 sps:$4 sm:$0xff]  }
 0xd91   : > { %15019 = vmatprep.subr.bf16.mxu1 %v24788_v47 }
 0xd94   : > { %15020 = vmatpush2.bf16.msra.mxu1 %v24786_v20  ;;  %v24819_v20 = vld [vmem:[%s32100_s16 + $0x280] ss:$8 sps:$4 sm:$0xff]  }
 0xd95   : > { %15021 = vmatprep.subr.bf16.mxu1 %v24794_v54 }
 0xd98   : > { %15022 = vmatpush2.bf16.msra.mxu1 %v24792_v56 }
 0xd99   : > { %15023 = vmatprep.subr.bf16.mxu1 %v24800_v9 }
 0xd9c   : > { %15024 = vmatpush2.bf16.msra.mxu1 %v24798_v4 }
 0xd9d   : > { %15025 = vmatprep.subr.bf16.mxu1 %v24806_v55  ;;  %v24822_v55 = vld [vmem:[%s32100_s16 + $0x370] ss:$8 sps:$4 sm:$0xff]  }
 0xda0   : > { %15026 = vmatpush2.bf16.msra.mxu1 %v24804_v22 }
 0xda1   : > { %15027 = vmatprep.subr.bf16.mxu1 %v24812_v13 }
 0xda4   : > { %15028 = vmatpush2.bf16.msra.mxu1 %v24810_v46 }
 0xda5   : > { %15029 = vmatprep.subr.bf16.mxu1 %v24818_v0  ;;  %v24827_v0 = vld [vmem:[%s32100_s16 + $0x364] ss:$8 sps:$4 sm:$0xff]  }
 0xda8   : > { %15030 = vmatpush2.bf16.msra.mxu1 %v24816_v7  ;;  %v24825_v7 = vld [vmem:[%s32100_s16 + $0x360] ss:$8 sps:$4 sm:$0xff]  }
 0xda9   : > { %15466 = vmatprep.subr.bf16.mxu1 %v24824_v41  ;;  %v24830_v41 = vld [vmem:[%s32100_s16 + $0x354] ss:$8 sps:$4 sm:$0xff]  }
 0xde3   : > { %v14431_v23 = vpop.f32.mrf.mxu0 }
 0xde5   : > { %v14433_v12 = vpop.f32.mrf.mxu0 }
 0xde7   : > { %v14435_v30 = vpop.f32.mrf.mxu0 }
 0xde8   : > { %v24831_v30 = vld [vmem:[%s32100_s16 + $0x340] ss:$8 sps:$4 sm:$0xff]  }
 0xde9   : > { %v14436_v1 = vpop.f32.mrf.mxu0 }
 0xdea   : > { %v24836_v1 = vld [vmem:[%s32100_s16 + $0x334] ss:$8 sps:$4 sm:$0xff]  }
 0xdeb   : > { %v14518_v52 = vpop.f32.mrf.mxu0 }
 0xdec   : > { %v14566_v39 = vmax.f32 %v14431_v23, %v14518_v52  ;;  %v24828_v23 = vld [vmem:[%s32100_s16 + $0x350] ss:$8 sps:$4 sm:$0xff]  }
 0xded   : > { %v14520_v61 = vpop.f32.mrf.mxu0  ;;  %v24834_v52 = vld [vmem:[%s32100_s16 + $0x330] ss:$8 sps:$4 sm:$0xff]  }
 0xdee   : > { %v14567_v29 = vmax.f32 %v14433_v12, %v14520_v61  ;;  %v30654_v49 = vpack.c.bf16 %v14566_v39, %v14566_v39  ;;  %v24833_v12 = vld [vmem:[%s32100_s16 + $0x344] ss:$8 sps:$4 sm:$0xff]   ;;  %v24837_v61 = vld [vmem:[%s32100_s16 + $0x320] ss:$8 sps:$4 sm:$0xff]  }
 0xdef   : > { %v14522_v24 = vpop.f32.mrf.mxu0  ;;  %v24839_v39 = vld [vmem:[%s32100_s16 + $0x324] ss:$8 sps:$4 sm:$0xff]  }
 0xdf0   : > { %v14571_v63 = vpack.c.bf16 %v14567_v29, %v14567_v29  ;;  %v24842_v29 = vld [vmem:[%s32100_s16 + $0x314] ss:$8 sps:$4 sm:$0xff]   ;;  %v24845_v24 = vld [vmem:[%s32100_s16 + $0x304] ss:$8 sps:$4 sm:$0xff]  }
 0xdf1   : > { %v14523_v26 = vpop.f32.mrf.mxu0 }
 0xdf2   : > { %14990 = vmatprep.mubr.bf16.mxu0 %v14571_v63  ;;  %v24851_v26 = vld [vmem:[%s32100_s16 + $0x3e4] ss:$8 sps:$4 sm:$0xff]  }
 0xdf3   : > { %14991 = vmatmul.mubr.bf16.vlgmr.msra.gmra.mxu0 %v30654_v49 }
 0xdf4   : > { %15426 = vmatpush1.bf16.msra.mxu0 %v24729_v57  ;;  %15457 = vmatprep.mubr.bf16.mxu0 %v14571_v63  ;;  %v24843_v63 = vld [vmem:[%s32100_s16 + $0x300] ss:$8 sps:$4 sm:$0xff]   ;;  %v24848_v57 = vld [vmem:[%s32100_s16 + $0x3f4] ss:$8 sps:$4 sm:$0xff]  }
 0xdf5   : > { %15427 = vmatprep.subr.bf16.mxu0 %v24737_v28  ;;  %v24846_v28 = vld [vmem:[%s32100_s16 + $0x3f0] ss:$8 sps:$4 sm:$0xff]  }
 0xdf8   : > { %15428 = vmatpush1.bf16.msra.mxu0 %v24735_v27  ;;  %v24849_v27 = vld [vmem:[%s32100_s16 + $0x3e0] ss:$8 sps:$4 sm:$0xff]  }
 0xdf9   : > { %15429 = vmatprep.subr.bf16.mxu0 %v24743_v19  ;;  %v24854_v19 = vld [vmem:[%s32100_s16 + $0x3d4] ss:$8 sps:$4 sm:$0xff]  }
 0xdfc   : > { %15430 = vmatpush1.bf16.msra.mxu0 %v24741_v15  ;;  %v24852_v15 = vld [vmem:[%s32100_s16 + $0x3d0] ss:$8 sps:$4 sm:$0xff]  }
 0xdfd   : > { %15431 = vmatprep.subr.bf16.mxu0 %v24749_v31  ;;  %v24857_v31 = vld [vmem:[%s32100_s16 + $0x3c4] ss:$8 sps:$4 sm:$0xff]  }
 0xe00   : > { %15432 = vmatpush1.bf16.msra.mxu0 %v24747_v34  ;;  %v24855_v34 = vld [vmem:[%s32100_s16 + $0x3c0] ss:$8 sps:$4 sm:$0xff]  }
 0xe01   : > { %15433 = vmatprep.subr.bf16.mxu0 %v24755_v16  ;;  %v24860_v16 = vld [vmem:[%s32100_s16 + $0x3b4] ss:$8 sps:$4 sm:$0xff]  }
 0xe04   : > { %15434 = vmatpush1.bf16.msra.mxu0 %v24753_v32  ;;  %v24858_v32 = vld [vmem:[%s32100_s16 + $0x3b0] ss:$8 sps:$4 sm:$0xff]  }
 0xe05   : > { %15435 = vmatprep.subr.bf16.mxu0 %v24761_v35  ;;  %v24863_v35 = vld [vmem:[%s32100_s16 + $0x3a4] ss:$8 sps:$4 sm:$0xff]  }
 0xe08   : > { %15436 = vmatpush1.bf16.msra.mxu0 %v24759_v36  ;;  %v24861_v36 = vld [vmem:[%s32100_s16 + $0x3a0] ss:$8 sps:$4 sm:$0xff]  }
 0xe09   : > { %15437 = vmatprep.subr.bf16.mxu0 %v24767_v17  ;;  %v24866_v17 = vld [vmem:[%s32100_s16 + $0x394] ss:$8 sps:$4 sm:$0xff]  }
 0xe0c   : > { %15438 = vmatpush1.bf16.msra.mxu0 %v24765_v33  ;;  %v24864_v33 = vld [vmem:[%s32100_s16 + $0x390] ss:$8 sps:$4 sm:$0xff]  }
 0xe0d   : > { %15439 = vmatprep.subr.bf16.mxu0 %v24773_v37  ;;  %v24869_v37 = vld [vmem:[%s32100_s16 + $0x384] ss:$8 sps:$4 sm:$0xff]  }
 0xe10   : > { %15440 = vmatpush1.bf16.msra.mxu0 %v24771_v10  ;;  %v24867_v10 = vld [vmem:[%s32100_s16 + $0x380] ss:$8 sps:$4 sm:$0xff]  }
 0xe11   : > { %15441 = vmatprep.subr.bf16.mxu0 %v24779_v42  ;;  %v24870_v42 = vld [vmem:[%s32101_s17 + $0xe0] ss:$16 sps:$4 sm:$0xff]  }
 0xe14   : > { %15442 = vmatpush2.bf16.msra.mxu0 %v24777_v43  ;;  %v24872_v43 = vld [vmem:[%s32101_s17 + $0xe4] ss:$16 sps:$4 sm:$0xff]  }
 0xe15   : > { %15443 = vmatprep.subr.bf16.mxu0 %v24785_v53  ;;  %v24873_v53 = vld [vmem:[%s32101_s17 + $0xe8] ss:$16 sps:$4 sm:$0xff]  }
 0xe18   : > { %15444 = vmatpush2.bf16.msra.mxu0 %v24783_v40  ;;  %v24875_v40 = vld [vmem:[%s32101_s17 + $0xec] ss:$16 sps:$4 sm:$0xff]  }
 0xe19   : > { %15445 = vmatprep.subr.bf16.mxu0 %v24791_v38  ;;  %v24878_v38 = vld [vmem:[%s32101_s17 + $0xc4] ss:$16 sps:$4 sm:$0xff]  }
 0xe1c   : > { %15446 = vmatpush2.bf16.msra.mxu0 %v24789_v25  ;;  %v24881_v25 = vld [vmem:[%s32101_s17 + $0xcc] ss:$16 sps:$4 sm:$0xff]  }
 0xe1d   : > { %15447 = vmatprep.subr.bf16.mxu0 %v24797_v48  ;;  %v24876_v48 = vld [vmem:[%s32101_s17 + $0xc0] ss:$16 sps:$4 sm:$0xff]  }
 0xe20   : > { %15448 = vmatpush2.bf16.msra.mxu0 %v24795_v45  ;;  %v24879_v45 = vld [vmem:[%s32101_s17 + $0xc8] ss:$16 sps:$4 sm:$0xff]  }
 0xe21   : > { %15449 = vmatprep.subr.bf16.mxu0 %v24803_v50  ;;  %v24884_v50 = vld [vmem:[%s32101_s17 + $0xa4] ss:$16 sps:$4 sm:$0xff]  }
 0xe23   : > { %v14472_v44 = vpop.f32.mrf.mxu1 }
 0xe24   : > { %15450 = vmatpush2.bf16.msra.mxu0 %v24801_v18  ;;  %v24887_v18 = vld [vmem:[%s32101_s17 + $0xac] ss:$16 sps:$4 sm:$0xff]  }
 0xe25   : > { %v14474_v21 = vpop.f32.mrf.mxu1  ;;  %15451 = vmatprep.subr.bf16.mxu0 %v24809_v51  ;;  %v24882_v51 = vld [vmem:[%s32101_s17 + $0xa0] ss:$16 sps:$4 sm:$0xff]  }
 0xe27   : > { %v14476_v60 = vpop.f32.mrf.mxu1 }
 0xe28   : > { %15452 = vmatpush2.bf16.msra.mxu0 %v24807_v58  ;;  %v24890_v58 = vld [vmem:[%s32101_s17 + $0x84] ss:$16 sps:$4 sm:$0xff]   ;;  %v24891_v60 = vld [vmem:[%s32101_s17 + $0x88] ss:$16 sps:$4 sm:$0xff]  }
 0xe29   : > { %v14477_v2 = vpop.f32.mrf.mxu1  ;;  %15453 = vmatprep.subr.bf16.mxu0 %v24815_v59  ;;  %v24888_v59 = vld [vmem:[%s32101_s17 + $0x80] ss:$16 sps:$4 sm:$0xff]  }
 0xe2a   : > { %v24899_v2 = vld [vmem:[%s32101_s17 + $0x6c] ss:$16 sps:$4 sm:$0xff]  }
 0xe2b   : > { %v14559_v47 = vpop.f32.mrf.mxu1 }
 0xe2c   : > { %15454 = vmatpush2.bf16.msra.mxu0 %v24813_v62  ;;  %v14568_v54 = vmax.f32 %v14472_v44, %v14559_v47  ;;  %v24885_v44 = vld [vmem:[%s32101_s17 + $0xa8] ss:$16 sps:$4 sm:$0xff]   ;;  %v24896_v62 = vld [vmem:[%s32101_s17 + $0x64] ss:$16 sps:$4 sm:$0xff]  }
 0xe2d   : > { %v14561_v56 = vpop.f32.mrf.mxu1  ;;  %15455 = vmatprep.subr.bf16.mxu0 %v24821_v5  ;;  %v24894_v5 = vld [vmem:[%s32101_s17 + $0x60] ss:$16 sps:$4 sm:$0xff]   ;;  %v24897_v47 = vld [vmem:[%s32101_s17 + $0x68] ss:$16 sps:$4 sm:$0xff]  }
 0xe2e   : > { %v14569_v9 = vmax.f32 %v14474_v21, %v14561_v56  ;;  %v30753_v46 = vpack.c.bf16 %v14568_v54, %v14568_v54  ;;  %v24893_v21 = vld [vmem:[%s32101_s17 + $0x8c] ss:$16 sps:$4 sm:$0xff]   ;;  %v24900_v56 = vld [vmem:[%s32101_s17 + $0x40] ss:$16 sps:$4 sm:$0xff]  }
 0xe2f   : > { %v14563_v4 = vpop.f32.mrf.mxu1  ;;  %v24905_v54 = vld [vmem:[%s32101_s17 + $0x4c] ss:$16 sps:$4 sm:$0xff]  }
 0xe30   : > { %v14573_v22 = vpack.c.bf16 %v14569_v9, %v14569_v9  ;;  %15456 = vmatpush2.bf16.msra.mxu0 %v24819_v20  ;;  %v24902_v20 = vld [vmem:[%s32101_s17 + $0x44] ss:$16 sps:$4 sm:$0xff]   ;;  %v24903_v9 = vld [vmem:[%s32101_s17 + $0x48] ss:$16 sps:$4 sm:$0xff]  }
 0xe31   : > { %v14564_v13 = vpop.f32.mrf.mxu1  ;;  %15917 = vmatprep.subr.bf16.mxu0 %v24872_v43  ;;  %v24908_v4 = vld [vmem:[%s32101_s17 + $0x24] ss:$16 sps:$4 sm:$0xff]   ;;  %v24954_v43 = vld [vmem:[%s32101_s17 + $0x120] ss:$16 sps:$4 sm:$0xff]  }
 0xe32   : > { %15031 = vmatprep.mubr.bf16.mxu1 %v14573_v22  ;;  %v24914_v13 = vld [vmem:[%s32101_s17 + $0x4] ss:$16 sps:$4 sm:$0xff]  }
 0xe33   : > { %15458 = vmatmul.mubr.bf16.vlgmr.msra.gmra.mxu0 %v30654_v49  ;;  %15032 = vmatmul.mubr.bf16.vlgmr.msra.gmra.mxu1 %v30753_v46  ;;  %v24840_v49 = vld [vmem:[%s32100_s16 + $0x310] ss:$8 sps:$4 sm:$0xff]  }
 0xe34   : > { %15467 = vmatpush1.bf16.msra.mxu1 %v24822_v55  ;;  %15498 = vmatprep.mubr.bf16.mxu1 %v14573_v22  ;;  %v24911_v22 = vld [vmem:[%s32101_s17 + $0x2c] ss:$16 sps:$4 sm:$0xff]   ;;  %v24906_v55 = vld [vmem:[%s32101_s17 + $0x20] ss:$16 sps:$4 sm:$0xff]  }
 0xe35   : > { %15468 = vmatprep.subr.bf16.mxu1 %v24827_v0  ;;  %15918 = vmatpush1.bf16.msra.mxu0 %v24870_v42  ;;  %v24917_v0 = vld [vmem:[%s32101_s17 + $0xc] ss:$16 sps:$4 sm:$0xff]  }
 0xe36   : > { %15919 = vmatprep.subr.bf16.mxu0 %v24878_v38  ;;  %v24962_v38 = vld [vmem:[%s32101_s17 + $0x104] ss:$16 sps:$4 sm:$0xff]  }
 0xe38   : > { %15469 = vmatpush1.bf16.msra.mxu1 %v24825_v7  ;;  %v24912_v7 = vld [vmem:[%s32101_s17] ss:$16 sps:$4 sm:$0xff]  }
 0xe39   : > { %15470 = vmatprep.subr.bf16.mxu1 %v24830_v41  ;;  %15920 = vmatpush1.bf16.msra.mxu0 %v24876_v48  ;;  %v24915_v41 = vld [vmem:[%s32101_s17 + $0x8] ss:$16 sps:$4 sm:$0xff]  }
 0xe3a   : > { %15921 = vmatprep.subr.bf16.mxu0 %v24884_v50  ;;  %v24963_v50 = vld [vmem:[%s32101_s17 + $0x108] ss:$16 sps:$4 sm:$0xff]  }
 0xe3c   : > { %15471 = vmatpush1.bf16.msra.mxu1 %v24828_v23  ;;  %v24920_v23 = vld [vmem:[%s32101_s17 + $0x1e4] ss:$16 sps:$4 sm:$0xff]  }
 0xe3d   : > { %15472 = vmatprep.subr.bf16.mxu1 %v24833_v12  ;;  %15922 = vmatpush1.bf16.msra.mxu0 %v24882_v51  ;;  %v24923_v12 = vld [vmem:[%s32101_s17 + $0x1ec] ss:$16 sps:$4 sm:$0xff]   ;;  %v16067_v51 = vld [vmem:[%s32103_s19 + $0x1e0] sm:$0xff] }
 0xe3e   : > { %15923 = vmatprep.subr.bf16.mxu0 %v24890_v58 }
 0xe40   : > { %15473 = vmatpush1.bf16.msra.mxu1 %v24831_v30  ;;  %v24918_v30 = vld [vmem:[%s32101_s17 + $0x1e0] ss:$16 sps:$4 sm:$0xff]  }
 0xe41   : > { %15474 = vmatprep.subr.bf16.mxu1 %v24836_v1  ;;  %15924 = vmatpush1.bf16.msra.mxu0 %v24888_v59  ;;  %v24921_v1 = vld [vmem:[%s32101_s17 + $0x1e8] ss:$16 sps:$4 sm:$0xff]   ;;  %v16195_v59 = vld [vmem:[%s32103_s19 + $0x5e0] sm:$0xff] }
 0xe42   : > { %15925 = vmatprep.subr.bf16.mxu0 %v24896_v62 }
 0xe44   : > { %15475 = vmatpush1.bf16.msra.mxu1 %v24834_v52  ;;  %v24926_v52 = vld [vmem:[%s32101_s17 + $0x1c4] ss:$16 sps:$4 sm:$0xff]  }
 0xe45   : > { %15476 = vmatprep.subr.bf16.mxu1 %v24839_v39  ;;  %15926 = vmatpush1.bf16.msra.mxu0 %v24894_v5  ;;  %v24929_v39 = vld [vmem:[%s32101_s17 + $0x1cc] ss:$16 sps:$4 sm:$0xff]  }
 0xe46   : > { %15927 = vmatprep.subr.bf16.mxu0 %v24902_v20 }
 0xe48   : > { %15477 = vmatpush1.bf16.msra.mxu1 %v24837_v61  ;;  %v24924_v61 = vld [vmem:[%s32101_s17 + $0x1c0] ss:$16 sps:$4 sm:$0xff]  }
 0xe49   : > { %15478 = vmatprep.subr.bf16.mxu1 %v24842_v29  ;;  %15928 = vmatpush1.bf16.msra.mxu0 %v24900_v56  ;;  %v24927_v29 = vld [vmem:[%s32101_s17 + $0x1c8] ss:$16 sps:$4 sm:$0xff]  }
 0xe4a   : > { %15929 = vmatprep.subr.bf16.mxu0 %v24908_v4 }
 0xe4c   : > { %15479 = vmatpush1.bf16.msra.mxu1 %v24840_v49  ;;  %v24932_v49 = vld [vmem:[%s32101_s17 + $0x1a4] ss:$16 sps:$4 sm:$0xff]  }
 0xe4d   : > { %15480 = vmatprep.subr.bf16.mxu1 %v24845_v24  ;;  %15930 = vmatpush1.bf16.msra.mxu0 %v24906_v55  ;;  %v24935_v24 = vld [vmem:[%s32101_s17 + $0x1ac] ss:$16 sps:$4 sm:$0xff]  }
 0xe4e   : > { %15931 = vmatprep.subr.bf16.mxu0 %v24914_v13 }
 0xe50   : > { %15481 = vmatpush1.bf16.msra.mxu1 %v24843_v63  ;;  %v24930_v63 = vld [vmem:[%s32101_s17 + $0x1a0] ss:$16 sps:$4 sm:$0xff]  }
 0xe51   : > { %15482 = vmatprep.subr.bf16.mxu1 %v24848_v57  ;;  %15932 = vmatpush1.bf16.msra.mxu0 %v24912_v7  ;;  %v24933_v57 = vld [vmem:[%s32101_s17 + $0x1a8] ss:$16 sps:$4 sm:$0xff]  }
 0xe52   : > { %15933 = vmatprep.subr.bf16.mxu0 %v24920_v23 }
 0xe54   : > { %15483 = vmatpush2.bf16.msra.mxu1 %v24846_v28  ;;  %v24938_v28 = vld [vmem:[%s32101_s17 + $0x184] ss:$16 sps:$4 sm:$0xff]  }
 0xe55   : > { %15484 = vmatprep.subr.bf16.mxu1 %v24851_v26  ;;  %15934 = vmatpush2.bf16.msra.mxu0 %v24918_v30  ;;  %v24941_v26 = vld [vmem:[%s32101_s17 + $0x18c] ss:$16 sps:$4 sm:$0xff]  }
 0xe56   : > { %15935 = vmatprep.subr.bf16.mxu0 %v24926_v52  ;;  %v16183_v52 = vld [vmem:[%s32103_s19 + $0x580] sm:$0xff] }
 0xe58   : > { %15485 = vmatpush2.bf16.msra.mxu1 %v24849_v27  ;;  %v24936_v27 = vld [vmem:[%s32101_s17 + $0x180] ss:$16 sps:$4 sm:$0xff]  }
 0xe59   : > { %15486 = vmatprep.subr.bf16.mxu1 %v24854_v19  ;;  %15936 = vmatpush2.bf16.msra.mxu0 %v24924_v61  ;;  %v24939_v19 = vld [vmem:[%s32101_s17 + $0x188] ss:$16 sps:$4 sm:$0xff]  }
 0xe5a   : > { %15937 = vmatprep.subr.bf16.mxu0 %v24932_v49 }
 0xe5c   : > { %15487 = vmatpush2.bf16.msra.mxu1 %v24852_v15  ;;  %v24944_v15 = vld [vmem:[%s32101_s17 + $0x164] ss:$16 sps:$4 sm:$0xff]  }
 0xe5d   : > { %15488 = vmatprep.subr.bf16.mxu1 %v24857_v31  ;;  %15938 = vmatpush2.bf16.msra.mxu0 %v24930_v63  ;;  %v24947_v31 = vld [vmem:[%s32101_s17 + $0x16c] ss:$16 sps:$4 sm:$0xff]  }
 0xe5e   : > { %15939 = vmatprep.subr.bf16.mxu0 %v24938_v28  ;;  %v16051_v28 = vld [vmem:[%s32103_s19 + $0x160] sm:$0xff] }
 0xe60   : > { %15489 = vmatpush2.bf16.msra.mxu1 %v24855_v34  ;;  %v24942_v34 = vld [vmem:[%s32101_s17 + $0x160] ss:$16 sps:$4 sm:$0xff]  }
 0xe61   : > { %15490 = vmatprep.subr.bf16.mxu1 %v24860_v16  ;;  %15940 = vmatpush2.bf16.msra.mxu0 %v24936_v27  ;;  %v24945_v16 = vld [vmem:[%s32101_s17 + $0x168] ss:$16 sps:$4 sm:$0xff]   ;;  %v16179_v27 = vld [vmem:[%s32103_s19 + $0x560] sm:$0xff] }
 0xe62   : > { %15941 = vmatprep.subr.bf16.mxu0 %v24944_v15 }
 0xe64   : > { %15491 = vmatpush2.bf16.msra.mxu1 %v24858_v32  ;;  %v24950_v32 = vld [vmem:[%s32101_s17 + $0x144] ss:$16 sps:$4 sm:$0xff]  }
 0xe65   : > { %15492 = vmatprep.subr.bf16.mxu1 %v24863_v35  ;;  %v24953_v35 = vld [vmem:[%s32101_s17 + $0x14c] ss:$16 sps:$4 sm:$0xff]   ;;  %15942 = vmatpush2.bf16.msra.mxu0 %v24942_v34 }
 0xe66   : > { %15943 = vmatprep.subr.bf16.mxu0 %v24950_v32  ;;  %v16043_v32 = vld [vmem:[%s32103_s19 + $0x120] sm:$0xff] }
 0xe68   : > { %15493 = vmatpush2.bf16.msra.mxu1 %v24861_v36  ;;  %v24948_v36 = vld [vmem:[%s32101_s17 + $0x140] ss:$16 sps:$4 sm:$0xff]  }
 0xe69   : > { %15494 = vmatprep.subr.bf16.mxu1 %v24866_v17  ;;  %v24951_v17 = vld [vmem:[%s32101_s17 + $0x148] ss:$16 sps:$4 sm:$0xff]   ;;  %15944 = vmatpush2.bf16.msra.mxu0 %v24948_v36  ;;  %v16171_v36 = vld [vmem:[%s32103_s19 + $0x520] sm:$0xff] }
 0xe6c   : > { %15495 = vmatpush2.bf16.msra.mxu1 %v24864_v33 }
 0xe6d   : > { %15496 = vmatprep.subr.bf16.mxu1 %v24869_v37  ;;  %v24956_v37 = vld [vmem:[%s32101_s17 + $0x124] ss:$16 sps:$4 sm:$0xff]  }
 0xe6e   : > { %15945 = vmatprep.subr.bf16.mxu0 %v24956_v37 }
 0xe6f   : > { %15946 = vmatpush2.bf16.msra.mxu0 %v24954_v43  ;;  %v16035_v43 = vld [vmem:[%s32103_s19 + $0xe0] sm:$0xff] }
 0xe70   : > { %15497 = vmatpush2.bf16.msra.mxu1 %v24867_v10  ;;  %v24959_v10 = vld [vmem:[%s32101_s17 + $0x12c] ss:$16 sps:$4 sm:$0xff]   ;;  %15947 = vmatprep.subr.bf16.mxu0 %v24962_v38 }
 0xe71   : > { %15958 = vmatprep.subr.bf16.mxu1 %v24875_v40 }
 0xe73   : > { %15499 = vmatmul.mubr.bf16.vlgmr.msra.gmra.mxu1 %v30753_v46  ;;  %v24909_v46 = vld [vmem:[%s32101_s17 + $0x28] ss:$16 sps:$4 sm:$0xff]  }
 0xe74   : > { %15959 = vmatpush1.bf16.msra.mxu1 %v24873_v53  ;;  %v24957_v53 = vld [vmem:[%s32101_s17 + $0x128] ss:$16 sps:$4 sm:$0xff]  }
 0xe75   : > { %15960 = vmatprep.subr.bf16.mxu1 %v24881_v25  ;;  %v24965_v25 = vld [vmem:[%s32101_s17 + $0x10c] ss:$16 sps:$4 sm:$0xff]  }
 0xe78   : > { %15961 = vmatpush1.bf16.msra.mxu1 %v24879_v45  ;;  %v24960_v45 = vld [vmem:[%s32101_s17 + $0x100] ss:$16 sps:$4 sm:$0xff]  }
 0xe79   : > { %15962 = vmatprep.subr.bf16.mxu1 %v24887_v18  ;;  %15948 = vmatpush2.bf16.msra.mxu0 %v24960_v45  ;;  %v16063_v18 = vld [vmem:[%s32103_s19 + $0x1c0] sm:$0xff] }
 0xe7a   : > { %v21788_v58 = vcombine.low %v16063_v18, %v16067_v51 }
 0xe7c   : > { %15963 = vmatpush1.bf16.msra.mxu1 %v24885_v44  ;;  %v16191_v44 = vld [vmem:[%s32103_s19 + $0x5c0] sm:$0xff] }
 0xe7d   : > { %15964 = vmatprep.subr.bf16.mxu1 %v24893_v21  ;;  %v21789_v21 = vcombine.high %v16063_v18, %v16067_v51  ;;  %v21917_v62 = vcombine.high %v16191_v44, %v16195_v59  ;;  %v16027_v18 = vld [vmem:[%s32103_s19 + $0xa0] sm:$0xff] }
 0xe7e   : > { %v16151_v51 = vld [vmem:[%s32103_s19 + $0x480] sm:$0xff] }
 0xe7f   : > { %17585 = vmatprep.subr.bf16.mxu0 %v21789_v21 }
 0xe80   : > { %15965 = vmatpush1.bf16.msra.mxu1 %v24891_v60  ;;  %v21916_v60 = vcombine.low %v16191_v44, %v16195_v59  ;;  %v16155_v44 = vld [vmem:[%s32103_s19 + $0x4a0] sm:$0xff] }
 0xe81   : > { %15966 = vmatprep.subr.bf16.mxu1 %v24899_v2 }
 0xe84   : > { %15967 = vmatpush1.bf16.msra.mxu1 %v24897_v47 }
 0xe85   : > { %15968 = vmatprep.subr.bf16.mxu1 %v24905_v54 }
 0xe88   : > { %15969 = vmatpush1.bf16.msra.mxu1 %v24903_v9 }
 0xe89   : > { %15970 = vmatprep.subr.bf16.mxu1 %v24911_v22 }
 0xe8c   : > { %15971 = vmatpush1.bf16.msra.mxu1 %v24909_v46 }
 0xe8d   : > { %15972 = vmatprep.subr.bf16.mxu1 %v24917_v0 }
 0xe90   : > { %15973 = vmatpush1.bf16.msra.mxu1 %v24915_v41 }
 0xe91   : > { %15974 = vmatprep.subr.bf16.mxu1 %v24923_v12  ;;  %v16055_v12 = vld [vmem:[%s32103_s19 + $0x180] sm:$0xff] }
 0xe94   : > { %15975 = vmatpush2.bf16.msra.mxu1 %v24921_v1  ;;  %v16059_v1 = vld [vmem:[%s32103_s19 + $0x1a0] sm:$0xff] }
 0xe95   : > { %15976 = vmatprep.subr.bf16.mxu1 %v24929_v39  ;;  %v16187_v39 = vld [vmem:[%s32103_s19 + $0x5a0] sm:$0xff] }
 0xe96   : > { %v21909_v63 = vcombine.high %v16183_v52, %v16187_v39  ;;  %v21908_v15 = vcombine.low %v16183_v52, %v16187_v39 }
 0xe98   : > { %15977 = vmatpush2.bf16.msra.mxu1 %v24927_v29 }
 0xe99   : > { %15978 = vmatprep.subr.bf16.mxu1 %v24935_v24  ;;  %v21781_v24 = vcombine.high %v16055_v12, %v16059_v1 }
 0xe9c   : > { %15979 = vmatpush2.bf16.msra.mxu1 %v24933_v57  ;;  %v16047_v57 = vld [vmem:[%s32103_s19 + $0x140] sm:$0xff] }
 0xe9d   : > { %15980 = vmatprep.subr.bf16.mxu1 %v24941_v26  ;;  %v16175_v26 = vld [vmem:[%s32103_s19 + $0x540] sm:$0xff] }
 0xe9e   : > { %v21901_v34 = vcombine.high %v16175_v26, %v16179_v27 }
 0xea0   : > { %15981 = vmatpush2.bf16.msra.mxu1 %v24939_v19  ;;  %v21780_v19 = vcombine.low %v16055_v12, %v16059_v1  ;;  %v16131_v12 = vld [vmem:[%s32103_s19 + $0x3e0] sm:$0xff] }
 0xea1   : > { %15982 = vmatprep.subr.bf16.mxu1 %v24947_v31  ;;  %v21773_v31 = vcombine.high %v16047_v57, %v16051_v28  ;;  %v16259_v1 = vld [vmem:[%s32103_s19 + $0x7e0] sm:$0xff] }
 0xea4   : > { %15983 = vmatpush2.bf16.msra.mxu1 %v24945_v16  ;;  %v16039_v16 = vld [vmem:[%s32103_s19 + $0x100] sm:$0xff] }
 0xea5   : > { %15984 = vmatprep.subr.bf16.mxu1 %v24953_v35  ;;  %v16167_v35 = vld [vmem:[%s32103_s19 + $0x500] sm:$0xff]  ;;  %v21765_v37 = vcombine.high %v16039_v16, %v16043_v32  ;;  %v21764_v38 = vcombine.low %v16039_v16, %v16043_v32 }
 0xea6   : > { %v16243_v16 = vld [vmem:[%s32103_s19 + $0x760] sm:$0xff] }
 0xea8   : > { %15985 = vmatpush2.bf16.msra.mxu1 %v24951_v17  ;;  %v21772_v17 = vcombine.low %v16047_v57, %v16051_v28  ;;  %v16251_v57 = vld [vmem:[%s32103_s19 + $0x7a0] sm:$0xff] }
 0xea9   : > { %15986 = vmatprep.subr.bf16.mxu1 %v24959_v10  ;;  %v21893_v10 = vcombine.high %v16167_v35, %v16171_v36 }
 0xeac   : > { %15987 = vmatpush2.bf16.msra.mxu1 %v24957_v53  ;;  %v16159_v53 = vld [vmem:[%s32103_s19 + $0x4c0] sm:$0xff] }
 0xead   : > { %15988 = vmatprep.subr.bf16.mxu1 %v24965_v25  ;;  %v21892_v25 = vcombine.low %v16167_v35, %v16171_v36 }
 0xeb0   : > { %15989 = vmatpush2.bf16.msra.mxu1 %v24963_v50  ;;  %v16023_v50 = vld [vmem:[%s32103_s19 + $0x80] sm:$0xff] }
 0xeb1   : > { %17626 = vmatprep.subr.bf16.mxu1 %v21917_v62  ;;  %v21749_v59 = vcombine.high %v16023_v50, %v16027_v18  ;;  %v16015_v62 = vld [vmem:[%s32103_s19 + $0x40] sm:$0xff] }
 0xeb3   : > { %v14992_v33 = vpop.f32.mrf.mxu0 }
 0xeb5   : > { %v14994_v42 = vpop.f32.mrf.mxu0 }
 0xeb7   : > { %v14996_v40 = vpop.f32.mrf.mxu0 }
 0xeb8   : > { %v16163_v40 = vld [vmem:[%s32103_s19 + $0x4e0] sm:$0xff] }
 0xeb9   : > { %v14997_v48 = vpop.f32.mrf.mxu0  ;;  %v21885_v45 = vcombine.high %v16159_v53, %v16163_v40  ;;  %v21884_v21 = vcombine.low %v16159_v53, %v16163_v40 }
 0xef3   : > { %v15459_v2 = vpop.f32.mrf.mxu0  ;;  %v15033_v5 = vpop.f32.mrf.mxu1 }
 0xef4   : > { %v15034_v47 = vadd.f32 %v15033_v5, %v14992_v33  ;;  %v21900_v33 = vcombine.low %v16175_v26, %v16179_v27  ;;  %v16143_v5 = vld [vmem:[%s32103_s19 + $0x440] sm:$0xff] }
 0xef5   : > { %v15461_v20 = vpop.f32.mrf.mxu0  ;;  %v15035_v54 = vpop.f32.mrf.mxu1 }
 0xef6   : > { %v15036_v56 = vadd.f32 %v15035_v54, %v14994_v42  ;;  %v16031_v42 = vld [vmem:[%s32103_s19 + $0xc0] sm:$0xff]  ;;  %v21876_v54 = vcombine.low %v16151_v51, %v16155_v44 }
 0xef7   : > { %v15463_v9 = vpop.f32.mrf.mxu0  ;;  %v15037_v4 = vpop.f32.mrf.mxu1  ;;  %v21757_v48 = vcombine.high %v16031_v42, %v16035_v43 }
 0xef8   : > { %v16007_v4 = vld [vmem:[%s32103_s19] sm:$0xff] }
 0xef9   : > { %v15464_v22 = vpop.f32.mrf.mxu0  ;;  %v15038_v55 = vpop.f32.mrf.mxu1 }
 0xefa   : > { %v16011_v22 = vld [vmem:[%s32103_s19 + $0x20] sm:$0xff] }
 0xefb   : > { %v16135_v55 = vld [vmem:[%s32103_s19 + $0x400] sm:$0xff]  ;;  %v21732_v52 = vcombine.low %v16007_v4, %v16011_v22 }
 0xf33   : > { %v15500_v46 = vpop.f32.mrf.mxu1 }
 0xf34   : > { %v15501_v13 = vadd.f32 %v15500_v46, %v15459_v2  ;;  %v16019_v2 = vld [vmem:[%s32103_s19 + $0x60] sm:$0xff] }
 0xf35   : > { %v15502_v0 = vpop.f32.mrf.mxu1  ;;  %v16139_v46 = vld [vmem:[%s32103_s19 + $0x420] sm:$0xff] }
 0xf36   : > { %v15507_v7 = vmax.f32 %v15034_v47, %v15501_v13  ;;  %v15503_v41 = vadd.f32 %v15502_v0, %v15461_v20  ;;  %v16147_v47 = vld [vmem:[%s32103_s19 + $0x460] sm:$0xff]  ;;  %v21748_v20 = vcombine.low %v16023_v50, %v16027_v18  ;;  %v21740_v13 = vcombine.low %v16015_v62, %v16019_v2 }
 0xf37   : > { %v15504_v23 = vpop.f32.mrf.mxu1  ;;  %v21869_v9 = vcombine.high %v16143_v5, %v16147_v47  ;;  %v21868_v0 = vcombine.low %v16143_v5, %v16147_v47  ;;  %v21860_v39 = vcombine.low %v16135_v55, %v16139_v46  ;;  %v16227_v50 = vld [vmem:[%s32103_s19 + $0x6e0] sm:$0xff] }
 0xf38   : > { %v15508_v30 = vmax.f32 %v15036_v56, %v15503_v41  ;;  %v15509_v49 = vpack.c.bf16 %v15507_v7, %v15507_v7  ;;  %v21741_v56 = vcombine.high %v16015_v62, %v16019_v2  ;;  %v21733_v7 = vcombine.high %v16007_v4, %v16011_v22  ;;  %v16127_v23 = vld [vmem:[%s32103_s19 + $0x3c0] sm:$0xff] }
 0xf39   : > { %v15505_v61 = vpop.f32.mrf.mxu1  ;;  %v21861_v41 = vcombine.high %v16135_v55, %v16139_v46  ;;  %v21852_v28 = vcombine.low %v16127_v23, %v16131_v12  ;;  %v16219_v62 = vld [vmem:[%s32103_s19 + $0x6a0] sm:$0xff] }
 0xf3a   : > { %v15510_v29 = vpack.c.bf16 %v15508_v30, %v15508_v30  ;;  %v16255_v30 = vld [vmem:[%s32103_s19 + $0x7c0] sm:$0xff]  ;;  %v21853_v61 = vcombine.high %v16127_v23, %v16131_v12 }
 0xf3b   : > { %v21980_v26 = vcombine.low %v16255_v30, %v16259_v1  ;;  %v16083_v4 = vld [vmem:[%s32103_s19 + $0x260] sm:$0xff] }
 0xf3c   : > { %15949 = vmatprep.mubr.bf16.mxu0 %v15510_v29  ;;  %15990 = vmatprep.mubr.bf16.mxu1 %v15510_v29  ;;  %v21981_v29 = vcombine.high %v16255_v30, %v16259_v1  ;;  %v16207_v22 = vld [vmem:[%s32103_s19 + $0x640] sm:$0xff] }
 0xf3d   : > { %15950 = vmatmul.mubr.bf16.vlgmr.msra.gmra.mxu0 %v15509_v49  ;;  %15991 = vmatmul.mubr.bf16.vlgmr.msra.gmra.mxu1 %v15509_v49  ;;  %v16119_v49 = vld [vmem:[%s32103_s19 + $0x380] sm:$0xff] }
 0xf3e   : > { %17586 = vmatpush1.bf16.msra.mxu0 %v21788_v58  ;;  %17627 = vmatpush1.bf16.msra.mxu1 %v21916_v60  ;;  %v21756_v58 = vcombine.low %v16031_v42, %v16035_v43  ;;  %v21877_v60 = vcombine.high %v16151_v51, %v16155_v44  ;;  %v16235_v42 = vld [vmem:[%s32103_s19 + $0x720] sm:$0xff] }
 0xf3f   : > { %17587 = vmatprep.subr.bf16.mxu0 %v21781_v24  ;;  %17628 = vmatprep.subr.bf16.mxu1 %v21909_v63  ;;  %v16123_v24 = vld [vmem:[%s32103_s19 + $0x3a0] sm:$0xff] }
 0xf40   : > { %v16247_v63 = vld [vmem:[%s32103_s19 + $0x780] sm:$0xff]  ;;  %v21845_v27 = vcombine.high %v16119_v49, %v16123_v24  ;;  %v21844_v32 = vcombine.low %v16119_v49, %v16123_v24  ;;  %v16068_v49 = vld [vmem:[%s32103_s19 + $0x1e8] sm:$0xff] }
 0xf41   : > { %v21972_v35 = vcombine.low %v16247_v63, %v16251_v57  ;;  %v16211_v46 = vld [vmem:[%s32103_s19 + $0x660] sm:$0xff]  ;;  %v16192_v24 = vld [vmem:[%s32103_s19 + $0x5c8] sm:$0xff] }
 0xf42   : > { %17588 = vmatpush1.bf16.msra.mxu0 %v21780_v19  ;;  %17629 = vmatpush1.bf16.msra.mxu1 %v21908_v15  ;;  %v21973_v19 = vcombine.high %v16247_v63, %v16251_v57  ;;  %v16111_v15 = vld [vmem:[%s32103_s19 + $0x340] sm:$0xff]  ;;  %v16196_v57 = vld [vmem:[%s32103_s19 + $0x5e8] sm:$0xff] }
 0xf43   : > { %17589 = vmatprep.subr.bf16.mxu0 %v21773_v31  ;;  %17630 = vmatprep.subr.bf16.mxu1 %v21901_v34  ;;  %v16115_v31 = vld [vmem:[%s32103_s19 + $0x360] sm:$0xff] }
 0xf44   : > { %v16239_v34 = vld [vmem:[%s32103_s19 + $0x740] sm:$0xff]  ;;  %v21837_v36 = vcombine.high %v16111_v15, %v16115_v31  ;;  %v21836_v43 = vcombine.low %v16111_v15, %v16115_v31 }
 0xf45   : > { %v21964_v53 = vcombine.low %v16239_v34, %v16243_v16  ;;  %v16075_v23 = vld [vmem:[%s32103_s19 + $0x220] sm:$0xff] }
 0xf46   : > { %17590 = vmatpush1.bf16.msra.mxu0 %v21772_v17  ;;  %17631 = vmatpush1.bf16.msra.mxu1 %v21900_v33  ;;  %v21965_v17 = vcombine.high %v16239_v34, %v16243_v16  ;;  %v16103_v33 = vld [vmem:[%s32103_s19 + $0x300] sm:$0xff] }
 0xf47   : > { %17591 = vmatprep.subr.bf16.mxu0 %v21765_v37  ;;  %17632 = vmatprep.subr.bf16.mxu1 %v21893_v10  ;;  %v16107_v37 = vld [vmem:[%s32103_s19 + $0x320] sm:$0xff] }
 0xf48   : > { %v16231_v10 = vld [vmem:[%s32103_s19 + $0x700] sm:$0xff]  ;;  %v21829_v40 = vcombine.high %v16103_v33, %v16107_v37  ;;  %v21828_v18 = vcombine.low %v16103_v33, %v16107_v37 }
 0xf49   : > { %v21956_v51 = vcombine.low %v16231_v10, %v16235_v42  ;;  %v16199_v12 = vld [vmem:[%s32103_s19 + $0x600] sm:$0xff] }
 0xf4a   : > { %17592 = vmatpush1.bf16.msra.mxu0 %v21764_v38  ;;  %17633 = vmatpush1.bf16.msra.mxu1 %v21892_v25  ;;  %v21957_v38 = vcombine.high %v16231_v10, %v16235_v42  ;;  %v16095_v25 = vld [vmem:[%s32103_s19 + $0x2c0] sm:$0xff] }
 0xf4b   : > { %17593 = vmatprep.subr.bf16.mxu0 %v21757_v48  ;;  %17634 = vmatprep.subr.bf16.mxu1 %v21885_v45  ;;  %v16099_v48 = vld [vmem:[%s32103_s19 + $0x2e0] sm:$0xff] }
 0xf4c   : > { %v16223_v45 = vld [vmem:[%s32103_s19 + $0x6c0] sm:$0xff]  ;;  %v21821_v44 = vcombine.high %v16095_v25, %v16099_v48  ;;  %v21820_v2 = vcombine.low %v16095_v25, %v16099_v48 }
 0xf4d   : > { %v21948_v5 = vcombine.low %v16223_v45, %v16227_v50  ;;  %v16203_v1 = vld [vmem:[%s32103_s19 + $0x620] sm:$0xff] }
 0xf4e   : > { %17594 = vmatpush1.bf16.msra.mxu0 %v21756_v58  ;;  %17635 = vmatpush1.bf16.msra.mxu1 %v21884_v21  ;;  %v21949_v58 = vcombine.high %v16223_v45, %v16227_v50  ;;  %v16087_v21 = vld [vmem:[%s32103_s19 + $0x280] sm:$0xff]  ;;  %v16056_v45 = vld [vmem:[%s32103_s19 + $0x188] sm:$0xff] }
 0xf4f   : > { %17595 = vmatprep.subr.bf16.mxu0 %v21749_v59  ;;  %17636 = vmatprep.subr.bf16.mxu1 %v21877_v60  ;;  %v16091_v59 = vld [vmem:[%s32103_s19 + $0x2a0] sm:$0xff] }
 0xf50   : > { %v16215_v60 = vld [vmem:[%s32103_s19 + $0x680] sm:$0xff]  ;;  %v21813_v47 = vcombine.high %v16087_v21, %v16091_v59 }
 0xf52   : > { %17596 = vmatpush1.bf16.msra.mxu0 %v21748_v20  ;;  %17637 = vmatpush1.bf16.msra.mxu1 %v21876_v54  ;;  %v21941_v20 = vcombine.high %v16215_v60, %v16219_v62  ;;  %v21812_v54 = vcombine.low %v16087_v21, %v16091_v59 }
 0xf53   : > { %17597 = vmatprep.subr.bf16.mxu0 %v21741_v56  ;;  %17638 = vmatprep.subr.bf16.mxu1 %v21869_v9  ;;  %v21940_v56 = vcombine.low %v16215_v60, %v16219_v62  ;;  %v16079_v9 = vld [vmem:[%s32103_s19 + $0x240] sm:$0xff] }
 0xf54   : > { %v21805_v55 = vcombine.high %v16079_v9, %v16083_v4 }
 0xf56   : > { %17598 = vmatpush1.bf16.msra.mxu0 %v21740_v13  ;;  %17639 = vmatpush1.bf16.msra.mxu1 %v21868_v0  ;;  %v21804_v13 = vcombine.low %v16079_v9, %v16083_v4  ;;  %v21932_v0 = vcombine.low %v16207_v22, %v16211_v46 }
 0xf57   : > { %17599 = vmatprep.subr.bf16.mxu0 %v21733_v7  ;;  %17640 = vmatprep.subr.bf16.mxu1 %v21861_v41  ;;  %v21933_v7 = vcombine.high %v16207_v22, %v16211_v46  ;;  %v16071_v41 = vld [vmem:[%s32103_s19 + $0x200] sm:$0xff]  ;;  %v16040_v46 = vld [vmem:[%s32103_s19 + $0x108] sm:$0xff] }
 0xf58   : > { %v21797_v30 = vcombine.high %v16071_v41, %v16075_v23 }
 0xf5a   : > { %17600 = vmatpush1.bf16.msra.mxu0 %v21732_v52  ;;  %17641 = vmatpush1.bf16.msra.mxu1 %v21860_v39  ;;  %v21796_v52 = vcombine.low %v16071_v41, %v16075_v23  ;;  %v21924_v39 = vcombine.low %v16199_v12, %v16203_v1 }
 0xf5b   : > { %17601 = vmatprep.subr.bf16.mxu0 %v21853_v61  ;;  %17642 = vmatprep.subr.bf16.mxu1 %v21981_v29  ;;  %v21925_v61 = vcombine.high %v16199_v12, %v16203_v1  ;;  %v16064_v29 = vld [vmem:[%s32103_s19 + $0x1c8] sm:$0xff] }
 0xf5c   : > { %v21791_v63 = vcombine.high %v16064_v29, %v16068_v49  ;;  %v16032_v1 = vld [vmem:[%s32103_s19 + $0xc8] sm:$0xff] }
 0xf5e   : > { %17602 = vmatpush2.bf16.msra.mxu0 %v21852_v28  ;;  %17643 = vmatpush2.bf16.msra.mxu1 %v21980_v26  ;;  %v21790_v28 = vcombine.low %v16064_v29, %v16068_v49  ;;  %v21918_v26 = vcombine.low %v16192_v24, %v16196_v57 }
 0xf5f   : > { %17603 = vmatprep.subr.bf16.mxu0 %v21845_v27  ;;  %17644 = vmatprep.subr.bf16.mxu1 %v21973_v19  ;;  %v21919_v27 = vcombine.high %v16192_v24, %v16196_v57  ;;  %v15575_v19 = vld [vmem:[%s32102_s18] sm:$0xf]  ;;  %v16024_v57 = vld [vmem:[%s32103_s19 + $0x88] sm:$0xff] }
 0xf60   : > { %v15900_v15 = vrot.slane %v15575_v19, %v25294_v11  ;;  %v15908_v31 = vrot.slane %v15575_v19, %v25297_v14  ;;  %v15904_v34 = vrot.slane %v15575_v19, %v25285_v6  ;;  %v15912_v16 = vrot.slane %v15575_v19, %v25291_v8 }
 0xf62   : > { %17604 = vmatpush2.bf16.msra.mxu0 %v21844_v32  ;;  %17645 = vmatpush2.bf16.msra.mxu1 %v21972_v35 }
 0xf63   : > { %17605 = vmatprep.subr.bf16.mxu0 %v21837_v36  ;;  %17646 = vmatprep.subr.bf16.mxu1 %v21965_v17 }
 0xf66   : > { %17606 = vmatpush2.bf16.msra.mxu0 %v21836_v43  ;;  %17647 = vmatpush2.bf16.msra.mxu1 %v21964_v53 }
 0xf67   : > { %17607 = vmatprep.subr.bf16.mxu0 %v21829_v40  ;;  %17648 = vmatprep.subr.bf16.mxu1 %v21957_v38 }
 0xf6a   : > { %17608 = vmatpush2.bf16.msra.mxu0 %v21828_v18  ;;  %17649 = vmatpush2.bf16.msra.mxu1 %v21956_v51  ;;  %v16060_v51 = vld [vmem:[%s32103_s19 + $0x1a8] sm:$0xff] }
 0xf6b   : > { %17609 = vmatprep.subr.bf16.mxu0 %v21821_v44  ;;  %17650 = vmatprep.subr.bf16.mxu1 %v21949_v58  ;;  %v16184_v44 = vld [vmem:[%s32103_s19 + $0x588] sm:$0xff]  ;;  %v21782_v9 = vcombine.low %v16056_v45, %v16060_v51 }
 0xf6c   : > { %v16188_v58 = vld [vmem:[%s32103_s19 + $0x5a8] sm:$0xff] }
 0xf6d   : > { %v21910_v4 = vcombine.low %v16184_v44, %v16188_v58 }
 0xf6e   : > { %17610 = vmatpush2.bf16.msra.mxu0 %v21820_v2  ;;  %17651 = vmatpush2.bf16.msra.mxu1 %v21948_v5  ;;  %v16048_v2 = vld [vmem:[%s32103_s19 + $0x148] sm:$0xff]  ;;  %v21783_v5 = vcombine.high %v16056_v45, %v16060_v51 }
 0xf6f   : > { %17611 = vmatprep.subr.bf16.mxu0 %v21813_v47  ;;  %17652 = vmatprep.subr.bf16.mxu1 %v21941_v20  ;;  %v21911_v47 = vcombine.high %v16184_v44, %v16188_v58  ;;  %v16052_v20 = vld [vmem:[%s32103_s19 + $0x168] sm:$0xff] }
 0xf70   : > { %v21775_v22 = vcombine.high %v16048_v2, %v16052_v20  ;;  %v21774_v41 = vcombine.low %v16048_v2, %v16052_v20  ;;  %v16256_v51 = vld [vmem:[%s32103_s19 + $0x7c8] sm:$0xff] }
 0xf71   : > { %v16260_v44 = vld [vmem:[%s32103_s19 + $0x7e8] sm:$0xff] }
 0xf72   : > { %17612 = vmatpush2.bf16.msra.mxu0 %v21812_v54  ;;  %17653 = vmatpush2.bf16.msra.mxu1 %v21940_v56  ;;  %v16176_v54 = vld [vmem:[%s32103_s19 + $0x548] sm:$0xff] }
 0xf73   : > { %17613 = vmatprep.subr.bf16.mxu0 %v21805_v55  ;;  %17654 = vmatprep.subr.bf16.mxu1 %v21933_v7  ;;  %v16180_v56 = vld [vmem:[%s32103_s19 + $0x568] sm:$0xff] }
 0xf74   : > { %v21903_v55 = vcombine.high %v16176_v54, %v16180_v56  ;;  %v16172_v7 = vld [vmem:[%s32103_s19 + $0x528] sm:$0xff]  ;;  %v21902_v23 = vcombine.low %v16176_v54, %v16180_v56 }
 0xf75   : > { %v16120_v20 = vld [vmem:[%s32103_s19 + $0x388] sm:$0xff] }
 0xf76   : > { %17614 = vmatpush2.bf16.msra.mxu0 %v21804_v13  ;;  %17655 = vmatpush2.bf16.msra.mxu1 %v21932_v0  ;;  %v16044_v13 = vld [vmem:[%s32103_s19 + $0x128] sm:$0xff] }
 0xf77   : > { %17615 = vmatprep.subr.bf16.mxu0 %v21797_v30  ;;  %17656 = vmatprep.subr.bf16.mxu1 %v21925_v61  ;;  %v16168_v0 = vld [vmem:[%s32103_s19 + $0x508] sm:$0xff]  ;;  %v21767_v12 = vcombine.high %v16040_v46, %v16044_v13  ;;  %v21766_v29 = vcombine.low %v16040_v46, %v16044_v13 }
 0xf78   : > { %v21895_v30 = vcombine.high %v16168_v0, %v16172_v7  ;;  %v16164_v61 = vld [vmem:[%s32103_s19 + $0x4e8] sm:$0xff]  ;;  %v21894_v49 = vcombine.low %v16168_v0, %v16172_v7 }
 0xf79   : > { %v16124_v54 = vld [vmem:[%s32103_s19 + $0x3a8] sm:$0xff] }
 0xf7a   : > { %17616 = vmatpush2.bf16.msra.mxu0 %v21796_v52  ;;  %17657 = vmatpush2.bf16.msra.mxu1 %v21924_v39  ;;  %v16036_v52 = vld [vmem:[%s32103_s19 + $0xe8] sm:$0xff] }
 0xf7b   : > { %17667 = vmatprep.subr.bf16.mxu0 %v21791_v63  ;;  %17708 = vmatprep.subr.bf16.mxu1 %v21919_v27  ;;  %v16160_v39 = vld [vmem:[%s32103_s19 + $0x4c8] sm:$0xff]  ;;  %v21759_v24 = vcombine.high %v16032_v1, %v16036_v52  ;;  %v21758_v19 = vcombine.low %v16032_v1, %v16036_v52 }
 0xf7c   : > { %v21887_v63 = vcombine.high %v16160_v39, %v16164_v61  ;;  %v16156_v27 = vld [vmem:[%s32103_s19 + $0x4a8] sm:$0xff] }
 0xf7d   : > { %v16248_v56 = vld [vmem:[%s32103_s19 + $0x788] sm:$0xff] }
 0xf7e   : > { %v16112_v13 = vld [vmem:[%s32103_s19 + $0x348] sm:$0xff] }
 0xf7f   : > { %v16116_v0 = vld [vmem:[%s32103_s19 + $0x368] sm:$0xff] }
 0xf80   : > { %v16240_v7 = vld [vmem:[%s32103_s19 + $0x748] sm:$0xff] }
 0xf81   : > { %v16104_v52 = vld [vmem:[%s32103_s19 + $0x308] sm:$0xff] }
 0xffd   : > { %v15951_v32 = vpop.f32.mrf.mxu0  ;;  %v15992_v35 = vpop.f32.mrf.mxu1 }
 0xffe   : > { %v15952_v36 = vadd.f32 %v15951_v32, %v15900_v15  ;;  %v15993_v17 = vadd.f32 %v15992_v35, %v15908_v31  ;;  %v21886_v15 = vcombine.low %v16160_v39, %v16164_v61  ;;  %v16020_v32 = vld [vmem:[%s32103_s19 + $0x68] sm:$0xff] }
 0xfff   : > { %v15953_v33 = vpop.f32.mrf.mxu0  ;;  %v15994_v37 = vpop.f32.mrf.mxu1  ;;  %v16144_v35 = vld [vmem:[%s32103_s19 + $0x448] sm:$0xff] }
0x1000   : > { %v15954_v10 = vadd.f32 %v15953_v33, %v15904_v34  ;;  %v15995_v42 = vadd.f32 %v15994_v37, %v15912_v16  ;;  %v15999_v43 = vmax.f32 %v15952_v36, 0.0  ;;  %v16001_v53 = vmax.f32 %v15993_v17, 0.0  ;;  %v16016_v16 = vld [vmem:[%s32103_s19 + $0x48] sm:$0xff] }
0x1001   : > { %v15955_v40 = vpop.f32.mrf.mxu0  ;;  %v15996_v38 = vpop.f32.mrf.mxu1  ;;  %v16148_v36 = vld [vmem:[%s32103_s19 + $0x468] sm:$0xff]  ;;  %v21743_v37 = vcombine.high %v16016_v16, %v16020_v32 }
0x1002   : > { %v16000_v25 = vmax.f32 %v15954_v10, 0.0  ;;  %v16002_v48 = vmax.f32 %v15995_v42, 0.0  ;;  %v31267_v60 = vpack.c.bf16 %v15999_v43, %v15999_v43  ;;  %v31269_v62 = vpack.c.bf16 %v16001_v53, %v16001_v53  ;;  %v16008_v42 = vld [vmem:[%s32103_s19 + $0x8] sm:$0xff] }
0x1003   : > { %v15956_v50 = vpop.f32.mrf.mxu0  ;;  %v15997_v18 = vpop.f32.mrf.mxu1  ;;  %v21871_v10 = vcombine.high %v16144_v35, %v16148_v36  ;;  %v16012_v43 = vld [vmem:[%s32103_s19 + $0x28] sm:$0xff]  ;;  %v21742_v38 = vcombine.low %v16016_v16, %v16020_v32 }
0x1004   : > { %v31263_v21 = vpack.c.bf16 %v16000_v25, %v16000_v25  ;;  %v31265_v59 = vpack.c.bf16 %v16002_v48, %v16002_v48  ;;  %v16136_v53 = vld [vmem:[%s32103_s19 + $0x408] sm:$0xff]  ;;  %v21870_v25 = vcombine.low %v16144_v35, %v16148_v36  ;;  %v21735_v48 = vcombine.high %v16008_v42, %v16012_v43 }
0x1005   : > { %v16140_v40 = vld [vmem:[%s32103_s19 + $0x428] sm:$0xff]  ;;  %v21734_v58 = vcombine.low %v16008_v42, %v16012_v43 }
0x1006   : > { %17617 = vmatprep.mubr.bf16.mxu0 %v31263_v21  ;;  %17658 = vmatprep.mubr.bf16.mxu1 %v31265_v59  ;;  %v21863_v45 = vcombine.high %v16136_v53, %v16140_v40  ;;  %v16128_v50 = vld [vmem:[%s32103_s19 + $0x3c8] sm:$0xff]  ;;  %v21862_v2 = vcombine.low %v16136_v53, %v16140_v40 }
0x1007   : > { %17618 = vmatmul.mubr.bf16.vlgmr.msra.gmra.mxu0 %v31267_v60  ;;  %17659 = vmatmul.mubr.bf16.vlgmr.msra.gmra.mxu1 %v31269_v62  ;;  %v16132_v18 = vld [vmem:[%s32103_s19 + $0x3e8] sm:$0xff] }
0x1008   : > { %17668 = vmatpush1.bf16.msra.mxu0 %v21790_v28  ;;  %17709 = vmatpush1.bf16.msra.mxu1 %v21918_v26  ;;  %v16028_v28 = vld [vmem:[%s32103_s19 + $0xa8] sm:$0xff] }
0x1009   : > { %17699 = vmatprep.mubr.bf16.mxu0 %v31263_v21  ;;  %17740 = vmatprep.mubr.bf16.mxu1 %v31265_v59  ;;  %v16152_v26 = vld [vmem:[%s32103_s19 + $0x488] sm:$0xff]  ;;  %v21751_v31 = vcombine.high %v16024_v57, %v16028_v28  ;;  %v21750_v17 = vcombine.low %v16024_v57, %v16028_v28 }
0x100a   : > { %17669 = vmatprep.subr.bf16.mxu0 %v21783_v5  ;;  %17710 = vmatprep.subr.bf16.mxu1 %v21911_v47  ;;  %v21879_v34 = vcombine.high %v16152_v26, %v16156_v27  ;;  %v21878_v33 = vcombine.low %v16152_v26, %v16156_v27  ;;  %v21855_v5 = vcombine.high %v16128_v50, %v16132_v18  ;;  %v16108_v39 = vld [vmem:[%s32103_s19 + $0x328] sm:$0xff] }
0x100b   : > { %v21983_v47 = vcombine.high %v16256_v51, %v16260_v44  ;;  %v16232_v61 = vld [vmem:[%s32103_s19 + $0x708] sm:$0xff] }
0x100c   : > { %17670 = vmatpush1.bf16.msra.mxu0 %v21782_v9  ;;  %17711 = vmatpush1.bf16.msra.mxu1 %v21910_v4  ;;  %v16252_v9 = vld [vmem:[%s32103_s19 + $0x7a8] sm:$0xff]  ;;  %v21854_v4 = vcombine.low %v16128_v50, %v16132_v18 }
0x100d   : > { %17671 = vmatprep.subr.bf16.mxu0 %v21775_v22  ;;  %17712 = vmatprep.subr.bf16.mxu1 %v21903_v55  ;;  %v21982_v22 = vcombine.low %v16256_v51, %v16260_v44  ;;  %v21847_v55 = vcombine.high %v16120_v20, %v16124_v54  ;;  %v21975_v46 = vcombine.high %v16248_v56, %v16252_v9  ;;  %v16096_v28 = vld [vmem:[%s32103_s19 + $0x2c8] sm:$0xff] }
0x100e   : > { %v16100_v26 = vld [vmem:[%s32103_s19 + $0x2e8] sm:$0xff] }
0x100f   : > { %v16224_v27 = vld [vmem:[%s32103_s19 + $0x6c8] sm:$0xff] }
0x1010   : > { %17672 = vmatpush1.bf16.msra.mxu0 %v21774_v41  ;;  %17713 = vmatpush1.bf16.msra.mxu1 %v21902_v23  ;;  %v16244_v41 = vld [vmem:[%s32103_s19 + $0x768] sm:$0xff]  ;;  %v21846_v23 = vcombine.low %v16120_v20, %v16124_v54  ;;  %v16065_v54 = vld [vmem:[%s32103_s19 + $0x1d0] sm:$0xff] }
0x1011   : > { %17673 = vmatprep.subr.bf16.mxu0 %v21767_v12  ;;  %17714 = vmatprep.subr.bf16.mxu1 %v21895_v30  ;;  %v21974_v12 = vcombine.low %v16248_v56, %v16252_v9  ;;  %v21839_v30 = vcombine.high %v16112_v13, %v16116_v0  ;;  %v21967_v1 = vcombine.high %v16240_v7, %v16244_v41  ;;  %v16088_v32 = vld [vmem:[%s32103_s19 + $0x288] sm:$0xff]  ;;  %v16069_v56 = vld [vmem:[%s32103_s19 + $0x1f0] sm:$0xff] }
0x1012   : > { %v16092_v35 = vld [vmem:[%s32103_s19 + $0x2a8] sm:$0xff]  ;;  %v16193_v9 = vld [vmem:[%s32103_s19 + $0x5d0] sm:$0xff] }
0x1013   : > { %v16216_v36 = vld [vmem:[%s32103_s19 + $0x688] sm:$0xff] }
0x1014   : > { %17674 = vmatpush1.bf16.msra.mxu0 %v21766_v29  ;;  %17715 = vmatpush1.bf16.msra.mxu1 %v21894_v49  ;;  %v16236_v29 = vld [vmem:[%s32103_s19 + $0x728] sm:$0xff]  ;;  %v21838_v49 = vcombine.low %v16112_v13, %v16116_v0  ;;  %v16057_v0 = vld [vmem:[%s32103_s19 + $0x190] sm:$0xff] }
0x1015   : > { %17675 = vmatprep.subr.bf16.mxu0 %v21759_v24  ;;  %17716 = vmatprep.subr.bf16.mxu1 %v21887_v63  ;;  %v21966_v24 = vcombine.low %v16240_v7, %v16244_v41  ;;  %v21831_v63 = vcombine.high %v16104_v52, %v16108_v39  ;;  %v21959_v57 = vcombine.high %v16232_v61, %v16236_v29  ;;  %v16080_v43 = vld [vmem:[%s32103_s19 + $0x248] sm:$0xff]  ;;  %v16061_v7 = vld [vmem:[%s32103_s19 + $0x1b0] sm:$0xff] }
0x1016   : > { %v16084_v53 = vld [vmem:[%s32103_s19 + $0x268] sm:$0xff]  ;;  %v16185_v41 = vld [vmem:[%s32103_s19 + $0x590] sm:$0xff] }
0x1017   : > { %v16208_v40 = vld [vmem:[%s32103_s19 + $0x648] sm:$0xff] }
0x1018   : > { %17676 = vmatpush1.bf16.msra.mxu0 %v21758_v19  ;;  %17717 = vmatpush1.bf16.msra.mxu1 %v21886_v15  ;;  %v16228_v19 = vld [vmem:[%s32103_s19 + $0x6e8] sm:$0xff]  ;;  %v21830_v15 = vcombine.low %v16104_v52, %v16108_v39  ;;  %v16049_v39 = vld [vmem:[%s32103_s19 + $0x150] sm:$0xff] }
0x1019   : > { %17677 = vmatprep.subr.bf16.mxu0 %v21751_v31  ;;  %17718 = vmatprep.subr.bf16.mxu1 %v21879_v34  ;;  %v21958_v31 = vcombine.low %v16232_v61, %v16236_v29  ;;  %v21823_v34 = vcombine.high %v16096_v28, %v16100_v26  ;;  %v21951_v16 = vcombine.high %v16224_v27, %v16228_v19  ;;  %v16072_v18 = vld [vmem:[%s32103_s19 + $0x208] sm:$0xff]  ;;  %v16053_v61 = vld [vmem:[%s32103_s19 + $0x170] sm:$0xff] }
0x101a   : > { %v16076_v51 = vld [vmem:[%s32103_s19 + $0x228] sm:$0xff]  ;;  %v16177_v29 = vld [vmem:[%s32103_s19 + $0x550] sm:$0xff] }
0x101b   : > { %v16200_v44 = vld [vmem:[%s32103_s19 + $0x608] sm:$0xff] }
0x101c   : > { %17678 = vmatpush1.bf16.msra.mxu0 %v21750_v17  ;;  %17719 = vmatpush1.bf16.msra.mxu1 %v21878_v33  ;;  %v16220_v17 = vld [vmem:[%s32103_s19 + $0x6a8] sm:$0xff]  ;;  %v21822_v33 = vcombine.low %v16096_v28, %v16100_v26  ;;  %v16041_v26 = vld [vmem:[%s32103_s19 + $0x110] sm:$0xff] }
0x101d   : > { %17679 = vmatprep.subr.bf16.mxu0 %v21743_v37  ;;  %17720 = vmatprep.subr.bf16.mxu1 %v21871_v10  ;;  %v21950_v37 = vcombine.low %v16224_v27, %v16228_v19  ;;  %v21815_v10 = vcombine.high %v16088_v32, %v16092_v35  ;;  %v21943_v42 = vcombine.high %v16216_v36, %v16220_v17  ;;  %v16045_v27 = vld [vmem:[%s32103_s19 + $0x130] sm:$0xff] }
0x101e   : > { %v16169_v19 = vld [vmem:[%s32103_s19 + $0x510] sm:$0xff] }
0x1020   : > { %17680 = vmatpush1.bf16.msra.mxu0 %v21742_v38  ;;  %17721 = vmatpush1.bf16.msra.mxu1 %v21870_v25  ;;  %v16212_v38 = vld [vmem:[%s32103_s19 + $0x668] sm:$0xff]  ;;  %v21814_v25 = vcombine.low %v16088_v32, %v16092_v35  ;;  %v16033_v35 = vld [vmem:[%s32103_s19 + $0xd0] sm:$0xff] }
0x1021   : > { %17681 = vmatprep.subr.bf16.mxu0 %v21735_v48  ;;  %17722 = vmatprep.subr.bf16.mxu1 %v21863_v45  ;;  %v21942_v48 = vcombine.low %v16216_v36, %v16220_v17  ;;  %v21807_v45 = vcombine.high %v16080_v43, %v16084_v53  ;;  %v21935_v50 = vcombine.high %v16208_v40, %v16212_v38  ;;  %v16037_v36 = vld [vmem:[%s32103_s19 + $0xf0] sm:$0xff] }
0x1022   : > { %v16161_v17 = vld [vmem:[%s32103_s19 + $0x4d0] sm:$0xff] }
0x1024   : > { %17682 = vmatpush1.bf16.msra.mxu0 %v21734_v58  ;;  %17723 = vmatpush1.bf16.msra.mxu1 %v21862_v2  ;;  %v16204_v58 = vld [vmem:[%s32103_s19 + $0x628] sm:$0xff]  ;;  %v21806_v2 = vcombine.low %v16080_v43, %v16084_v53  ;;  %v16025_v53 = vld [vmem:[%s32103_s19 + $0x90] sm:$0xff] }
0x1025   : > { %17683 = vmatprep.subr.bf16.mxu0 %v21855_v5  ;;  %17724 = vmatprep.subr.bf16.mxu1 %v21983_v47  ;;  %v21934_v5 = vcombine.low %v16208_v40, %v16212_v38  ;;  %v21799_v47 = vcombine.high %v16072_v18, %v16076_v51  ;;  %v21927_v20 = vcombine.high %v16200_v44, %v16204_v58  ;;  %v16029_v40 = vld [vmem:[%s32103_s19 + $0xb0] sm:$0xff] }
0x1026   : > { %v16153_v38 = vld [vmem:[%s32103_s19 + $0x490] sm:$0xff] }
0x1028   : > { %17684 = vmatpush2.bf16.msra.mxu0 %v21854_v4  ;;  %17725 = vmatpush2.bf16.msra.mxu1 %v21982_v22  ;;  %v16197_v4 = vld [vmem:[%s32103_s19 + $0x5f0] sm:$0xff]  ;;  %v21798_v22 = vcombine.low %v16072_v18, %v16076_v51 }
0x1029   : > { %17685 = vmatprep.subr.bf16.mxu0 %v21847_v55  ;;  %17726 = vmatprep.subr.bf16.mxu1 %v21975_v46  ;;  %v21926_v55 = vcombine.low %v16200_v44, %v16204_v58  ;;  %v21793_v46 = vcombine.high %v16065_v54, %v16069_v56  ;;  %v21921_v13 = vcombine.high %v16193_v9, %v16197_v4  ;;  %v16017_v51 = vld [vmem:[%s32103_s19 + $0x50] sm:$0xff] }
0x102a   : > { %v16021_v44 = vld [vmem:[%s32103_s19 + $0x70] sm:$0xff] }
0x102b   : > { %v16145_v58 = vld [vmem:[%s32103_s19 + $0x450] sm:$0xff] }
0x102c   : > { %17686 = vmatpush2.bf16.msra.mxu0 %v21846_v23  ;;  %17727 = vmatpush2.bf16.msra.mxu1 %v21974_v12  ;;  %v16189_v23 = vld [vmem:[%s32103_s19 + $0x5b0] sm:$0xff]  ;;  %v21792_v12 = vcombine.low %v16065_v54, %v16069_v56 }
0x102d   : > { %17687 = vmatprep.subr.bf16.mxu0 %v21839_v30  ;;  %17728 = vmatprep.subr.bf16.mxu1 %v21967_v1  ;;  %v21920_v30 = vcombine.low %v16193_v9, %v16197_v4  ;;  %v21785_v1 = vcombine.high %v16057_v0, %v16061_v7  ;;  %v21913_v52 = vcombine.high %v16185_v41, %v16189_v23  ;;  %v16009_v56 = vld [vmem:[%s32103_s19 + $0x10] sm:$0xff] }
0x102e   : > { %v16013_v9 = vld [vmem:[%s32103_s19 + $0x30] sm:$0xff] }
0x102f   : > { %v16137_v4 = vld [vmem:[%s32103_s19 + $0x410] sm:$0xff] }
0x1030   : > { %17688 = vmatpush2.bf16.msra.mxu0 %v21838_v49  ;;  %17729 = vmatpush2.bf16.msra.mxu1 %v21966_v24  ;;  %v16181_v49 = vld [vmem:[%s32103_s19 + $0x570] sm:$0xff]  ;;  %v21784_v24 = vcombine.low %v16057_v0, %v16061_v7 }
0x1031   : > { %17689 = vmatprep.subr.bf16.mxu0 %v21831_v63  ;;  %17730 = vmatprep.subr.bf16.mxu1 %v21959_v57  ;;  %v21912_v63 = vcombine.low %v16185_v41, %v16189_v23  ;;  %v21777_v57 = vcombine.high %v16049_v39, %v16053_v61  ;;  %v21905_v28 = vcombine.high %v16177_v29, %v16181_v49  ;;  %v16129_v7 = vld [vmem:[%s32103_s19 + $0x3d0] sm:$0xff] }
0x1032   : > { %v16133_v41 = vld [vmem:[%s32103_s19 + $0x3f0] sm:$0xff] }
0x1033   : > { %v16257_v23 = vld [vmem:[%s32103_s19 + $0x7d0] sm:$0xff] }
0x1034   : > { %17690 = vmatpush2.bf16.msra.mxu0 %v21830_v15  ;;  %17731 = vmatpush2.bf16.msra.mxu1 %v21958_v31  ;;  %v16173_v15 = vld [vmem:[%s32103_s19 + $0x530] sm:$0xff]  ;;  %v21776_v31 = vcombine.low %v16049_v39, %v16053_v61 }
0x1035   : > { %17691 = vmatprep.subr.bf16.mxu0 %v21823_v34  ;;  %17732 = vmatprep.subr.bf16.mxu1 %v21951_v16  ;;  %v21904_v34 = vcombine.low %v16177_v29, %v16181_v49  ;;  %v21769_v16 = vcombine.high %v16041_v26, %v16045_v27  ;;  %v21897_v32 = vcombine.high %v16169_v19, %v16173_v15  ;;  %v16121_v61 = vld [vmem:[%s32103_s19 + $0x390] sm:$0xff] }
0x1036   : > { %v16125_v29 = vld [vmem:[%s32103_s19 + $0x3b0] sm:$0xff] }
0x1037   : > { %v16249_v49 = vld [vmem:[%s32103_s19 + $0x790] sm:$0xff] }
0x1038   : > { %17692 = vmatpush2.bf16.msra.mxu0 %v21822_v33  ;;  %17733 = vmatpush2.bf16.msra.mxu1 %v21950_v37  ;;  %v16165_v33 = vld [vmem:[%s32103_s19 + $0x4f0] sm:$0xff]  ;;  %v21768_v37 = vcombine.low %v16041_v26, %v16045_v27 }
0x1039   : > { %17693 = vmatprep.subr.bf16.mxu0 %v21815_v10  ;;  %17734 = vmatprep.subr.bf16.mxu1 %v21943_v42  ;;  %v21896_v10 = vcombine.low %v16169_v19, %v16173_v15  ;;  %v21761_v42 = vcombine.high %v16033_v35, %v16037_v36  ;;  %v21889_v43 = vcombine.high %v16161_v17, %v16165_v33  ;;  %v16113_v27 = vld [vmem:[%s32103_s19 + $0x350] sm:$0xff] }
0x103a   : > { %v16117_v19 = vld [vmem:[%s32103_s19 + $0x370] sm:$0xff] }
0x103b   : > { %v16241_v15 = vld [vmem:[%s32103_s19 + $0x750] sm:$0xff] }
0x103c   : > { %17694 = vmatpush2.bf16.msra.mxu0 %v21814_v25  ;;  %17735 = vmatpush2.bf16.msra.mxu1 %v21942_v48  ;;  %v16157_v25 = vld [vmem:[%s32103_s19 + $0x4b0] sm:$0xff]  ;;  %v21760_v48 = vcombine.low %v16033_v35, %v16037_v36 }
0x103d   : > { %17695 = vmatprep.subr.bf16.mxu0 %v21807_v45  ;;  %17736 = vmatprep.subr.bf16.mxu1 %v21935_v50  ;;  %v21888_v45 = vcombine.low %v16161_v17, %v16165_v33  ;;  %v21753_v50 = vcombine.high %v16025_v53, %v16029_v40  ;;  %v21881_v18 = vcombine.high %v16153_v38, %v16157_v25  ;;  %v16105_v36 = vld [vmem:[%s32103_s19 + $0x310] sm:$0xff] }
0x103e   : > { %v16109_v17 = vld [vmem:[%s32103_s19 + $0x330] sm:$0xff] }
0x103f   : > { %v16233_v33 = vld [vmem:[%s32103_s19 + $0x710] sm:$0xff] }
0x1040   : > { %17696 = vmatpush2.bf16.msra.mxu0 %v21806_v2  ;;  %17737 = vmatpush2.bf16.msra.mxu1 %v21934_v5  ;;  %v16149_v2 = vld [vmem:[%s32103_s19 + $0x470] sm:$0xff]  ;;  %v21752_v5 = vcombine.low %v16025_v53, %v16029_v40 }
0x1041   : > { %17697 = vmatprep.subr.bf16.mxu0 %v21799_v47  ;;  %17738 = vmatprep.subr.bf16.mxu1 %v21927_v20  ;;  %v21880_v47 = vcombine.low %v16153_v38, %v16157_v25  ;;  %v21745_v20 = vcombine.high %v16017_v51, %v16021_v44  ;;  %v21873_v54 = vcombine.high %v16145_v58, %v16149_v2  ;;  %v16097_v40 = vld [vmem:[%s32103_s19 + $0x2d0] sm:$0xff] }
0x1042   : > { %v16101_v38 = vld [vmem:[%s32103_s19 + $0x2f0] sm:$0xff] }
0x1043   : > { %v16225_v25 = vld [vmem:[%s32103_s19 + $0x6d0] sm:$0xff] }
0x1044   : > { %17698 = vmatpush2.bf16.msra.mxu0 %v21798_v22  ;;  %17739 = vmatpush2.bf16.msra.mxu1 %v21926_v55  ;;  %v16141_v22 = vld [vmem:[%s32103_s19 + $0x430] sm:$0xff]  ;;  %v21744_v55 = vcombine.low %v16017_v51, %v16021_v44 }
0x1045   : > { %17749 = vmatprep.subr.bf16.mxu0 %v21793_v46  ;;  %17790 = vmatprep.subr.bf16.mxu1 %v21921_v13  ;;  %v21872_v46 = vcombine.low %v16145_v58, %v16149_v2  ;;  %v21737_v13 = vcombine.high %v16009_v56, %v16013_v9  ;;  %v21865_v0 = vcombine.high %v16137_v4, %v16141_v22  ;;  %v16089_v44 = vld [vmem:[%s32103_s19 + $0x290] sm:$0xff] }
0x1046   : > { %v16093_v58 = vld [vmem:[%s32103_s19 + $0x2b0] sm:$0xff] }
0x1047   : > { %17700 = vmatmul.mubr.bf16.vlgmr.msra.gmra.mxu0 %v31267_v60  ;;  %17741 = vmatmul.mubr.bf16.vlgmr.msra.gmra.mxu1 %v31269_v62  ;;  %v16217_v2 = vld [vmem:[%s32103_s19 + $0x690] sm:$0xff] }
0x1048   : > { %17750 = vmatpush1.bf16.msra.mxu0 %v21792_v12  ;;  %17781 = vmatprep.mubr.bf16.mxu0 %v31263_v21  ;;  %v16261_v12 = vld [vmem:[%s32103_s19 + $0x7f0] sm:$0xff] }
0x1049   : > { %17791 = vmatpush1.bf16.msra.mxu1 %v21920_v30  ;;  %17822 = vmatprep.mubr.bf16.mxu1 %v31265_v59  ;;  %v21736_v30 = vcombine.low %v16009_v56, %v16013_v9  ;;  %v21985_v39 = vcombine.high %v16257_v23, %v16261_v12  ;;  %v16081_v9 = vld [vmem:[%s32103_s19 + $0x250] sm:$0xff] }
0x104a   : > { %17751 = vmatprep.subr.bf16.mxu0 %v21785_v1  ;;  %17792 = vmatprep.subr.bf16.mxu1 %v21913_v52  ;;  %v21864_v1 = vcombine.low %v16137_v4, %v16141_v22  ;;  %v21857_v52 = vcombine.high %v16129_v7, %v16133_v41  ;;  %v16085_v4 = vld [vmem:[%s32103_s19 + $0x270] sm:$0xff] }
0x104b   : > { %v16209_v22 = vld [vmem:[%s32103_s19 + $0x650] sm:$0xff] }
0x104c   : > { %17752 = vmatpush1.bf16.msra.mxu0 %v21784_v24  ;;  %v16253_v24 = vld [vmem:[%s32103_s19 + $0x7b0] sm:$0xff] }
0x104d   : > { %17793 = vmatpush1.bf16.msra.mxu1 %v21912_v63  ;;  %17753 = vmatprep.subr.bf16.mxu0 %v21777_v57  ;;  %v21856_v63 = vcombine.low %v16129_v7, %v16133_v41  ;;  %v21984_v57 = vcombine.low %v16257_v23, %v16261_v12  ;;  %v21977_v26 = vcombine.high %v16249_v49, %v16253_v24  ;;  %v16073_v41 = vld [vmem:[%s32103_s19 + $0x210] sm:$0xff] }
0x104e   : > { %17794 = vmatprep.subr.bf16.mxu1 %v21905_v28  ;;  %v21849_v28 = vcombine.high %v16121_v61, %v16125_v29  ;;  %v16077_v23 = vld [vmem:[%s32103_s19 + $0x230] sm:$0xff] }
0x104f   : > { %v16201_v12 = vld [vmem:[%s32103_s19 + $0x610] sm:$0xff] }
0x1050   : > { %17754 = vmatpush1.bf16.msra.mxu0 %v21776_v31  ;;  %v16245_v31 = vld [vmem:[%s32103_s19 + $0x770] sm:$0xff] }
0x1051   : > { %17795 = vmatpush1.bf16.msra.mxu1 %v21904_v34  ;;  %17755 = vmatprep.subr.bf16.mxu0 %v21769_v16  ;;  %v21848_v34 = vcombine.low %v16121_v61, %v16125_v29  ;;  %v21976_v16 = vcombine.low %v16249_v49, %v16253_v24  ;;  %v21969_v35 = vcombine.high %v16241_v15, %v16245_v31  ;;  %v16066_v29 = vld [vmem:[%s32103_s19 + $0x1d8] sm:$0xff] }
0x1052   : > { %17796 = vmatprep.subr.bf16.mxu1 %v21897_v32  ;;  %v21841_v32 = vcombine.high %v16113_v27, %v16117_v19  ;;  %v16070_v49 = vld [vmem:[%s32103_s19 + $0x1f8] sm:$0xff] }
0x1053   : > { %v16194_v24 = vld [vmem:[%s32103_s19 + $0x5d8] sm:$0xff] }
0x1054   : > { %17756 = vmatpush1.bf16.msra.mxu0 %v21768_v37  ;;  %v16237_v37 = vld [vmem:[%s32103_s19 + $0x730] sm:$0xff] }
0x1055   : > { %17797 = vmatpush1.bf16.msra.mxu1 %v21896_v10  ;;  %17757 = vmatprep.subr.bf16.mxu0 %v21761_v42  ;;  %v21840_v10 = vcombine.low %v16113_v27, %v16117_v19  ;;  %v21968_v42 = vcombine.low %v16241_v15, %v16245_v31  ;;  %v21961_v53 = vcombine.high %v16233_v33, %v16237_v37  ;;  %v16058_v19 = vld [vmem:[%s32103_s19 + $0x198] sm:$0xff] }
0x1056   : > { %17798 = vmatprep.subr.bf16.mxu1 %v21889_v43  ;;  %v21833_v43 = vcombine.high %v16105_v36, %v16109_v17  ;;  %v16062_v15 = vld [vmem:[%s32103_s19 + $0x1b8] sm:$0xff]  ;;  %v21794_v31 = vcombine.low %v16066_v29, %v16070_v49 }
0x1058   : > { %17758 = vmatpush1.bf16.msra.mxu0 %v21760_v48  ;;  %v16229_v48 = vld [vmem:[%s32103_s19 + $0x6f0] sm:$0xff] }
0x1059   : > { %17799 = vmatpush1.bf16.msra.mxu1 %v21888_v45  ;;  %17759 = vmatprep.subr.bf16.mxu0 %v21753_v50  ;;  %v21832_v45 = vcombine.low %v16105_v36, %v16109_v17  ;;  %v21960_v50 = vcombine.low %v16233_v33, %v16237_v37  ;;  %v21953_v51 = vcombine.high %v16225_v25, %v16229_v48  ;;  %v16050_v36 = vld [vmem:[%s32103_s19 + $0x158] sm:$0xff] }
0x105a   : > { %17800 = vmatprep.subr.bf16.mxu1 %v21881_v18  ;;  %v21825_v18 = vcombine.high %v16097_v40, %v16101_v38  ;;  %v16054_v17 = vld [vmem:[%s32103_s19 + $0x178] sm:$0xff] }
0x105b   : > { %v16178_v37 = vld [vmem:[%s32103_s19 + $0x558] sm:$0xff] }
0x105c   : > { %17760 = vmatpush1.bf16.msra.mxu0 %v21752_v5  ;;  %v16221_v5 = vld [vmem:[%s32103_s19 + $0x6b0] sm:$0xff] }
0x105d   : > { %17801 = vmatpush1.bf16.msra.mxu1 %v21880_v47  ;;  %17761 = vmatprep.subr.bf16.mxu0 %v21745_v20  ;;  %v21824_v47 = vcombine.low %v16097_v40, %v16101_v38  ;;  %v21952_v20 = vcombine.low %v16225_v25, %v16229_v48  ;;  %v21945_v56 = vcombine.high %v16217_v2, %v16221_v5  ;;  %v16042_v38 = vld [vmem:[%s32103_s19 + $0x118] sm:$0xff] }
0x105e   : > { %17802 = vmatprep.subr.bf16.mxu1 %v21873_v54  ;;  %v21817_v54 = vcombine.high %v16089_v44, %v16093_v58  ;;  %v16046_v25 = vld [vmem:[%s32103_s19 + $0x138] sm:$0xff] }
0x105f   : > { %v16174_v48 = vld [vmem:[%s32103_s19 + $0x538] sm:$0xff] }
0x1060   : > { %17762 = vmatpush1.bf16.msra.mxu0 %v21744_v55  ;;  %v16213_v55 = vld [vmem:[%s32103_s19 + $0x670] sm:$0xff] }
0x1061   : > { %17803 = vmatpush1.bf16.msra.mxu1 %v21872_v46  ;;  %17763 = vmatprep.subr.bf16.mxu0 %v21737_v13  ;;  %v21816_v46 = vcombine.low %v16089_v44, %v16093_v58  ;;  %v21944_v13 = vcombine.low %v16217_v2, %v16221_v5  ;;  %v21937_v7 = vcombine.high %v16209_v22, %v16213_v55  ;;  %v16038_v44 = vld [vmem:[%s32103_s19 + $0xf8] sm:$0xff] }
0x1062   : > { %17804 = vmatprep.subr.bf16.mxu1 %v21865_v0  ;;  %v21809_v0 = vcombine.high %v16081_v9, %v16085_v4  ;;  %v16162_v58 = vld [vmem:[%s32103_s19 + $0x4d8] sm:$0xff]  ;;  %v21770_v5 = vcombine.low %v16042_v38, %v16046_v25 }
0x1063   : > { %v16166_v2 = vld [vmem:[%s32103_s19 + $0x4f8] sm:$0xff] }
0x1064   : > { %17764 = vmatpush1.bf16.msra.mxu0 %v21736_v30  ;;  %v16205_v30 = vld [vmem:[%s32103_s19 + $0x630] sm:$0xff] }
0x1065   : > { %17805 = vmatpush1.bf16.msra.mxu1 %v21864_v1  ;;  %17765 = vmatprep.subr.bf16.mxu0 %v21857_v52  ;;  %v21808_v1 = vcombine.low %v16081_v9, %v16085_v4  ;;  %v21936_v52 = vcombine.low %v16209_v22, %v16213_v55  ;;  %v21929_v61 = vcombine.high %v16201_v12, %v16205_v30  ;;  %v16030_v9 = vld [vmem:[%s32103_s19 + $0xb8] sm:$0xff] }
0x1066   : > { %17806 = vmatprep.subr.bf16.mxu1 %v21985_v39  ;;  %v21801_v39 = vcombine.high %v16073_v41, %v16077_v23  ;;  %v16154_v4 = vld [vmem:[%s32103_s19 + $0x498] sm:$0xff] }
0x1067   : > { %v16158_v22 = vld [vmem:[%s32103_s19 + $0x4b8] sm:$0xff] }
0x1068   : > { %17766 = vmatpush2.bf16.msra.mxu0 %v21856_v63  ;;  %v16198_v63 = vld [vmem:[%s32103_s19 + $0x5f8] sm:$0xff] }
0x1069   : > { %17807 = vmatpush2.bf16.msra.mxu1 %v21984_v57  ;;  %17767 = vmatprep.subr.bf16.mxu0 %v21849_v28  ;;  %v21800_v57 = vcombine.low %v16073_v41, %v16077_v23  ;;  %v21928_v28 = vcombine.low %v16201_v12, %v16205_v30  ;;  %v21923_v27 = vcombine.high %v16194_v24, %v16198_v63  ;;  %v16022_v41 = vld [vmem:[%s32103_s19 + $0x78] sm:$0xff] }
0x106a   : > { %17808 = vmatprep.subr.bf16.mxu1 %v21977_v26  ;;  %v21795_v26 = vcombine.high %v16066_v29, %v16070_v49  ;;  %v16146_v23 = vld [vmem:[%s32103_s19 + $0x458] sm:$0xff] }
0x106b   : > { %v16150_v12 = vld [vmem:[%s32103_s19 + $0x478] sm:$0xff] }
0x106c   : > { %17768 = vmatpush2.bf16.msra.mxu0 %v21848_v34  ;;  %v16186_v34 = vld [vmem:[%s32103_s19 + $0x598] sm:$0xff] }
0x106d   : > { %17809 = vmatpush2.bf16.msra.mxu1 %v21976_v16  ;;  %17769 = vmatprep.subr.bf16.mxu0 %v21841_v32  ;;  %v16190_v16 = vld [vmem:[%s32103_s19 + $0x5b8] sm:$0xff]  ;;  %v21922_v32 = vcombine.low %v16194_v24, %v16198_v63 }
0x106e   : > { %17810 = vmatprep.subr.bf16.mxu1 %v21969_v35  ;;  %v21787_v35 = vcombine.high %v16058_v19, %v16062_v15  ;;  %v21915_v33 = vcombine.high %v16186_v34, %v16190_v16  ;;  %v16014_v29 = vld [vmem:[%s32103_s19 + $0x38] sm:$0xff] }
0x106f   : > { %v16138_v49 = vld [vmem:[%s32103_s19 + $0x418] sm:$0xff] }
0x1070   : > { %17770 = vmatpush2.bf16.msra.mxu0 %v21840_v10  ;;  %v16182_v10 = vld [vmem:[%s32103_s19 + $0x578] sm:$0xff] }
0x1071   : > { %17811 = vmatpush2.bf16.msra.mxu1 %v21968_v42  ;;  %17771 = vmatprep.subr.bf16.mxu0 %v21833_v43  ;;  %v21786_v42 = vcombine.low %v16058_v19, %v16062_v15  ;;  %v21914_v43 = vcombine.low %v16186_v34, %v16190_v16  ;;  %v21907_v40 = vcombine.high %v16178_v37, %v16182_v10  ;;  %v16142_v24 = vld [vmem:[%s32103_s19 + $0x438] sm:$0xff] }
0x1072   : > { %17812 = vmatprep.subr.bf16.mxu1 %v21961_v53  ;;  %v21779_v53 = vcombine.high %v16050_v36, %v16054_v17  ;;  %v16134_v19 = vld [vmem:[%s32103_s19 + $0x3f8] sm:$0xff]  ;;  %v21866_v16 = vcombine.low %v16138_v49, %v16142_v24 }
0x1073   : > { %v16258_v15 = vld [vmem:[%s32103_s19 + $0x7d8] sm:$0xff] }
0x1074   : > { %17772 = vmatpush2.bf16.msra.mxu0 %v21832_v45  ;;  %v21906_v45 = vcombine.low %v16178_v37, %v16182_v10  ;;  %v16254_v37 = vld [vmem:[%s32103_s19 + $0x7b8] sm:$0xff] }
0x1075   : > { %17813 = vmatpush2.bf16.msra.mxu1 %v21960_v50  ;;  %17773 = vmatprep.subr.bf16.mxu0 %v21825_v18  ;;  %v21771_v50 = vcombine.high %v16042_v38, %v16046_v25  ;;  %v16118_v38 = vld [vmem:[%s32103_s19 + $0x378] sm:$0xff] }
0x1076   : > { %17814 = vmatprep.subr.bf16.mxu1 %v21953_v51  ;;  %v16034_v51 = vld [vmem:[%s32103_s19 + $0xd8] sm:$0xff] }
0x1077   : > { %v21762_v55 = vcombine.low %v16034_v51, %v16038_v44  ;;  %v16242_v25 = vld [vmem:[%s32103_s19 + $0x758] sm:$0xff] }
0x1078   : > { %17774 = vmatpush2.bf16.msra.mxu0 %v21824_v47 }
0x1079   : > { %17815 = vmatpush2.bf16.msra.mxu1 %v21952_v20  ;;  %17775 = vmatprep.subr.bf16.mxu0 %v21817_v54  ;;  %v21763_v20 = vcombine.high %v16034_v51, %v16038_v44  ;;  %v21891_v54 = vcombine.high %v16162_v58, %v16166_v2  ;;  %v16110_v51 = vld [vmem:[%s32103_s19 + $0x338] sm:$0xff] }
0x107a   : > { %17816 = vmatprep.subr.bf16.mxu1 %v21945_v56  ;;  %v16026_v56 = vld [vmem:[%s32103_s19 + $0x98] sm:$0xff] }
0x107b   : > { %v21754_v30 = vcombine.low %v16026_v56, %v16030_v9  ;;  %v16234_v44 = vld [vmem:[%s32103_s19 + $0x718] sm:$0xff] }
0x107c   : > { %17776 = vmatpush2.bf16.msra.mxu0 %v21816_v46  ;;  %v21890_v46 = vcombine.low %v16162_v58, %v16166_v2  ;;  %v16238_v58 = vld [vmem:[%s32103_s19 + $0x738] sm:$0xff] }
0x107d   : > { %17817 = vmatpush2.bf16.msra.mxu1 %v21944_v13  ;;  %17777 = vmatprep.subr.bf16.mxu0 %v21809_v0  ;;  %v21755_v13 = vcombine.high %v16026_v56, %v16030_v9  ;;  %v21883_v0 = vcombine.high %v16154_v4, %v16158_v22  ;;  %v16102_v56 = vld [vmem:[%s32103_s19 + $0x2f8] sm:$0xff] }
0x107e   : > { %17818 = vmatprep.subr.bf16.mxu1 %v21937_v7  ;;  %v16018_v7 = vld [vmem:[%s32103_s19 + $0x58] sm:$0xff] }
0x107f   : > { %v21746_v63 = vcombine.low %v16018_v7, %v16022_v41  ;;  %v16226_v9 = vld [vmem:[%s32103_s19 + $0x6d8] sm:$0xff] }
0x1080   : > { %17778 = vmatpush2.bf16.msra.mxu0 %v21808_v1  ;;  %v21882_v1 = vcombine.low %v16154_v4, %v16158_v22  ;;  %v16230_v4 = vld [vmem:[%s32103_s19 + $0x6f8] sm:$0xff] }
0x1081   : > { %17819 = vmatpush2.bf16.msra.mxu1 %v21936_v52  ;;  %17779 = vmatprep.subr.bf16.mxu0 %v21801_v39  ;;  %v21747_v52 = vcombine.high %v16018_v7, %v16022_v41  ;;  %v21875_v39 = vcombine.high %v16146_v23, %v16150_v12  ;;  %v16094_v7 = vld [vmem:[%s32103_s19 + $0x2b8] sm:$0xff] }
0x1082   : > { %17820 = vmatprep.subr.bf16.mxu1 %v21929_v61  ;;  %v16010_v61 = vld [vmem:[%s32103_s19 + $0x18] sm:$0xff] }
0x1083   : > { %v21738_v34 = vcombine.low %v16010_v61, %v16014_v29  ;;  %v16218_v41 = vld [vmem:[%s32103_s19 + $0x698] sm:$0xff] }
0x1084   : > { %17780 = vmatpush2.bf16.msra.mxu0 %v21800_v57  ;;  %v21874_v57 = vcombine.low %v16146_v23, %v16150_v12  ;;  %v16222_v23 = vld [vmem:[%s32103_s19 + $0x6b8] sm:$0xff] }
0x1085   : > { %17821 = vmatpush2.bf16.msra.mxu1 %v21928_v28  ;;  %17831 = vmatprep.subr.bf16.mxu0 %v21795_v26  ;;  %v21739_v28 = vcombine.high %v16010_v61, %v16014_v29  ;;  %v21867_v26 = vcombine.high %v16138_v49, %v16142_v24  ;;  %v16086_v61 = vld [vmem:[%s32103_s19 + $0x278] sm:$0xff] }
0x1086   : > { %17872 = vmatprep.subr.bf16.mxu1 %v21923_v27  ;;  %v16130_v27 = vld [vmem:[%s32103_s19 + $0x3d8] sm:$0xff] }
0x1087   : > { %17782 = vmatmul.mubr.bf16.vlgmr.msra.gmra.mxu0 %v31267_v60  ;;  %v21858_v10 = vcombine.low %v16130_v27, %v16134_v19  ;;  %v16210_v29 = vld [vmem:[%s32103_s19 + $0x658] sm:$0xff] }
0x1088   : > { %17823 = vmatmul.mubr.bf16.vlgmr.msra.gmra.mxu1 %v31269_v62  ;;  %17832 = vmatpush1.bf16.msra.mxu0 %v21794_v31  ;;  %v16262_v31 = vld [vmem:[%s32103_s19 + $0x7f8] sm:$0xff] }
0x1089   : > { %17863 = vmatprep.mubr.bf16.mxu0 %v31263_v21  ;;  %17873 = vmatpush1.bf16.msra.mxu1 %v21922_v32  ;;  %v16170_v21 = vld [vmem:[%s32103_s19 + $0x518] sm:$0xff]  ;;  %v21859_v32 = vcombine.high %v16130_v27, %v16134_v19 }
0x108a   : > { %17904 = vmatprep.mubr.bf16.mxu1 %v31265_v59  ;;  %17833 = vmatprep.subr.bf16.mxu0 %v21787_v35  ;;  %v21778_v59 = vcombine.low %v16050_v36, %v16054_v17  ;;  %v21899_v18 = vcombine.high %v16170_v21, %v16174_v48  ;;  %v21898_v47 = vcombine.low %v16170_v21, %v16174_v48  ;;  %v16122_v36 = vld [vmem:[%s32103_s19 + $0x398] sm:$0xff] }
0x108b   : > { %17874 = vmatprep.subr.bf16.mxu1 %v21915_v33  ;;  %v21987_v35 = vcombine.high %v16258_v15, %v16262_v31  ;;  %v16126_v17 = vld [vmem:[%s32103_s19 + $0x3b8] sm:$0xff] }
0x108c   : > { %17834 = vmatpush1.bf16.msra.mxu0 %v21786_v42  ;;  %v16250_v33 = vld [vmem:[%s32103_s19 + $0x798] sm:$0xff]  ;;  %v21986_v42 = vcombine.low %v16258_v15, %v16262_v31  ;;  %v21850_v48 = vcombine.low %v16122_v36, %v16126_v17 }
0x108d   : > { %17875 = vmatpush1.bf16.msra.mxu1 %v21914_v43  ;;  %17835 = vmatprep.subr.bf16.mxu0 %v21779_v53  ;;  %v21851_v43 = vcombine.high %v16122_v36, %v16126_v17  ;;  %v21979_v53 = vcombine.high %v16250_v33, %v16254_v37  ;;  %v16246_v21 = vld [vmem:[%s32103_s19 + $0x778] sm:$0xff] }
0x108e   : > { %17876 = vmatprep.subr.bf16.mxu1 %v21907_v40  ;;  %v16114_v40 = vld [vmem:[%s32103_s19 + $0x358] sm:$0xff] }
0x108f   : > { %v21842_v2 = vcombine.low %v16114_v40, %v16118_v38  ;;  %v16214_v49 = vld [vmem:[%s32103_s19 + $0x678] sm:$0xff] }
0x1090   : > { %17836 = vmatpush1.bf16.msra.mxu0 %v21778_v59  ;;  %v21978_v59 = vcombine.low %v16250_v33, %v16254_v37  ;;  %v16078_v27 = vld [vmem:[%s32103_s19 + $0x238] sm:$0xff] }
0x1091   : > { %17877 = vmatpush1.bf16.msra.mxu1 %v21906_v45  ;;  %17837 = vmatprep.subr.bf16.mxu0 %v21771_v50  ;;  %v21843_v45 = vcombine.high %v16114_v40, %v16118_v38  ;;  %v21971_v50 = vcombine.high %v16242_v25, %v16246_v21  ;;  %v16202_v19 = vld [vmem:[%s32103_s19 + $0x618] sm:$0xff]  ;;  %v24984_v40 = vld [vmem:[%s32105_s21 + $0xf0] sm:$0xff]  }
0x1092   : > { %17878 = vmatprep.subr.bf16.mxu1 %v21899_v18  ;;  %v16106_v18 = vld [vmem:[%s32103_s19 + $0x318] sm:$0xff] }
0x1093   : > { %v21834_v22 = vcombine.low %v16106_v18, %v16110_v51  ;;  %v16206_v15 = vld [vmem:[%s32103_s19 + $0x638] sm:$0xff] }
0x1094   : > { %17838 = vmatpush1.bf16.msra.mxu0 %v21770_v5  ;;  %v21970_v5 = vcombine.low %v16242_v25, %v16246_v21  ;;  %v21930_v36 = vcombine.low %v16202_v19, %v16206_v15  ;;  %v24966_v17 = vld [vmem:[%s32105_s21 + $0x78] sm:$0xff]   ;;  %v24969_v21 = vld [vmem:[%s32105_s21 + $0x30] sm:$0xff]  }
0x1095   : > { %17879 = vmatpush1.bf16.msra.mxu1 %v21898_v47  ;;  %17839 = vmatprep.subr.bf16.mxu0 %v21763_v20  ;;  %v21835_v47 = vcombine.high %v16106_v18, %v16110_v51  ;;  %v21963_v20 = vcombine.high %v16234_v44, %v16238_v58  ;;  %v24982_v33 = vld [vmem:[%s32105_s21 + $0xf8] sm:$0xff]  }
0x1096   : > { %17880 = vmatprep.subr.bf16.mxu1 %v21891_v54  ;;  %v16098_v54 = vld [vmem:[%s32103_s19 + $0x2d8] sm:$0xff] }
0x1097   : > { %v21826_v12 = vcombine.low %v16098_v54, %v16102_v56  ;;  %v24967_v37 = vld [vmem:[%s32105_s21 + $0x38] sm:$0xff]  }
0x1098   : > { %17840 = vmatpush1.bf16.msra.mxu0 %v21762_v55  ;;  %v21962_v55 = vcombine.low %v16234_v44, %v16238_v58  ;;  %v24971_v44 = vld [vmem:[%s32105_s21 + $0x28] sm:$0xff]  }
0x1099   : > { %17881 = vmatpush1.bf16.msra.mxu1 %v21890_v46  ;;  %17841 = vmatprep.subr.bf16.mxu0 %v21755_v13  ;;  %v21827_v46 = vcombine.high %v16098_v54, %v16102_v56  ;;  %v21955_v13 = vcombine.high %v16226_v9, %v16230_v4  ;;  %v24988_v54 = vld [vmem:[%s32105_s21 + $0xe0] sm:$0xff]  }
0x109a   : > { %17882 = vmatprep.subr.bf16.mxu1 %v21883_v0  ;;  %v16090_v0 = vld [vmem:[%s32103_s19 + $0x298] sm:$0xff] }
0x109b   : > { %v21818_v24 = vcombine.low %v16090_v0, %v16094_v7 }
0x109c   : > { %17842 = vmatpush1.bf16.msra.mxu0 %v21754_v30  ;;  %v21954_v30 = vcombine.low %v16226_v9, %v16230_v4  ;;  %v24973_v9 = vld [vmem:[%s32105_s21 + $0x20] sm:$0xff]   ;;  %v24974_v4 = vld [vmem:[%s32105_s21 + $0x58] sm:$0xff]  }
0x109d   : > { %17883 = vmatpush1.bf16.msra.mxu1 %v21882_v1  ;;  %17843 = vmatprep.subr.bf16.mxu0 %v21747_v52  ;;  %v21819_v1 = vcombine.high %v16090_v0, %v16094_v7  ;;  %v21947_v52 = vcombine.high %v16218_v41, %v16222_v23  ;;  %v24976_v0 = vld [vmem:[%s32105_s21 + $0x50] sm:$0xff]   ;;  %v24991_v7 = vld [vmem:[%s32105_s21 + $0x98] sm:$0xff]  }
0x109e   : > { %17884 = vmatprep.subr.bf16.mxu1 %v21875_v39  ;;  %v16082_v39 = vld [vmem:[%s32103_s19 + $0x258] sm:$0xff] }
0x109f   : > { %v21810_v31 = vcombine.low %v16082_v39, %v16086_v61 }
0x10a0   : > { %17844 = vmatpush1.bf16.msra.mxu0 %v21746_v63  ;;  %v21946_v63 = vcombine.low %v16218_v41, %v16222_v23  ;;  %v24992_v41 = vld [vmem:[%s32105_s21 + $0xd0] sm:$0xff]  }
0x10a1   : > { %17885 = vmatpush1.bf16.msra.mxu1 %v21874_v57  ;;  %17845 = vmatprep.subr.bf16.mxu0 %v21739_v28  ;;  %v21811_v57 = vcombine.high %v16082_v39, %v16086_v61  ;;  %v21939_v28 = vcombine.high %v16210_v29, %v16214_v49  ;;  %v24980_v61 = vld [vmem:[%s32105_s21 + $0x40] sm:$0xff]  }
0x10a2   : > { %17886 = vmatprep.subr.bf16.mxu1 %v21867_v26  ;;  %v16074_v26 = vld [vmem:[%s32103_s19 + $0x218] sm:$0xff] }
0x10a4   : > { %17846 = vmatpush1.bf16.msra.mxu0 %v21738_v34  ;;  %v21938_v34 = vcombine.low %v16210_v29, %v16214_v49  ;;  %v24995_v29 = vld [vmem:[%s32105_s21 + $0x88] sm:$0xff]   ;;  %v24996_v49 = vld [vmem:[%s32105_s21 + $0xc0] sm:$0xff]  }
0x10a5   : > { %17887 = vmatpush1.bf16.msra.mxu1 %v21866_v16  ;;  %17847 = vmatprep.subr.bf16.mxu0 %v21859_v32  ;;  %v21803_v16 = vcombine.high %v16074_v26, %v16078_v27  ;;  %v21931_v32 = vcombine.high %v16202_v19, %v16206_v15  ;;  %v25000_v15 = vld [vmem:[%s32105_s21 + $0x170] sm:$0xff]  }
0x10a6   : > { %17888 = vmatprep.subr.bf16.mxu1 %v21987_v35  ;;  %v21802_v35 = vcombine.low %v16074_v26, %v16078_v27  ;;  %v25014_v26 = vld [vmem:[%s32105_s21 + $0x1f8] sm:$0xff]  }
0x10a7   : > { %v24999_v27 = vld [vmem:[%s32105_s21 + $0x138] sm:$0xff]  }
0x10a8   : > { %17848 = vmatpush2.bf16.msra.mxu0 %v21858_v10  ;;  %v31849_v10 = vld [vmem:[%s32104_s20] sm:$0xff] }
0x10a9   : > { %17889 = vmatpush2.bf16.msra.mxu1 %v21986_v42  ;;  %17849 = vmatprep.subr.bf16.mxu0 %v21851_v43  ;;  %v24968_v42 = vld [vmem:[%s32105_s21 + $0x70] sm:$0xff]   ;;  %v24983_v43 = vld [vmem:[%s32105_s21 + $0xb8] sm:$0xff]  }
0x10aa   : > { %17890 = vmatprep.subr.bf16.mxu1 %v21979_v53  ;;  %v17552_v53 = vrot.slane %v31849_v10, %v25285_v6  ;;  %v24970_v6 = vld [vmem:[%s32105_s21 + $0x68] sm:$0xff]  }
0x10ac   : > { %17850 = vmatpush2.bf16.msra.mxu0 %v21850_v48 }
0x10ad   : > { %17891 = vmatpush2.bf16.msra.mxu1 %v21978_v59  ;;  %17851 = vmatprep.subr.bf16.mxu0 %v21843_v45 }
0x10ae   : > { %17892 = vmatprep.subr.bf16.mxu1 %v21971_v50 }
0x10b0   : > { %17852 = vmatpush2.bf16.msra.mxu0 %v21842_v2 }
0x10b1   : > { %17893 = vmatpush2.bf16.msra.mxu1 %v21970_v5  ;;  %17853 = vmatprep.subr.bf16.mxu0 %v21835_v47  ;;  %v24972_v5 = vld [vmem:[%s32105_s21 + $0x60] sm:$0xff]   ;;  %v24987_v47 = vld [vmem:[%s32105_s21 + $0xa8] sm:$0xff]  }
0x10b2   : > { %17894 = vmatprep.subr.bf16.mxu1 %v21963_v20 }
0x10b4   : > { %17854 = vmatpush2.bf16.msra.mxu0 %v21834_v22  ;;  %v24989_v22 = vld [vmem:[%s32105_s21 + $0xa0] sm:$0xff]  }
0x10b5   : > { %17895 = vmatpush2.bf16.msra.mxu1 %v21962_v55  ;;  %17855 = vmatprep.subr.bf16.mxu0 %v21827_v46  ;;  %v24990_v55 = vld [vmem:[%s32105_s21 + $0xd8] sm:$0xff]  }
0x10b6   : > { %17896 = vmatprep.subr.bf16.mxu1 %v21955_v13  ;;  %v24975_v46 = vld [vmem:[%s32105_s21 + $0x18] sm:$0xff]   ;;  %v17548_v13 = vrot.slane %v31849_v10, %v25294_v11  ;;  %v24977_v11 = vld [vmem:[%s32105_s21 + $0x10] sm:$0xff]  }
0x10b8   : > { %17856 = vmatpush2.bf16.msra.mxu0 %v21826_v12  ;;  %v24978_v12 = vld [vmem:[%s32105_s21 + $0x48] sm:$0xff]  }
0x10b9   : > { %17897 = vmatpush2.bf16.msra.mxu1 %v21954_v30  ;;  %17857 = vmatprep.subr.bf16.mxu0 %v21819_v1  ;;  %v24993_v30 = vld [vmem:[%s32105_s21 + $0x90] sm:$0xff]   ;;  %v24994_v1 = vld [vmem:[%s32105_s21 + $0xc8] sm:$0xff]  }
0x10ba   : > { %17898 = vmatprep.subr.bf16.mxu1 %v21947_v52  ;;  %v24979_v52 = vld [vmem:[%s32105_s21 + $0x8] sm:$0xff]  }
0x10bc   : > { %17858 = vmatpush2.bf16.msra.mxu0 %v21818_v24  ;;  %v24981_v24 = vld [vmem:[%s32105_s21] sm:$0xff]  }
0x10bd   : > { %17899 = vmatpush2.bf16.msra.mxu1 %v21946_v63  ;;  %17859 = vmatprep.subr.bf16.mxu0 %v21811_v57  ;;  %v24997_v57 = vld [vmem:[%s32105_s21 + $0x80] sm:$0xff]  }
0x10be   : > { %17900 = vmatprep.subr.bf16.mxu1 %v21939_v28  ;;  %v24998_v28 = vld [vmem:[%s32105_s21 + $0x178] sm:$0xff]  }
0x10c0   : > { %17860 = vmatpush2.bf16.msra.mxu0 %v21810_v31  ;;  %v25001_v31 = vld [vmem:[%s32105_s21 + $0x130] sm:$0xff]  }
0x10c1   : > { %17901 = vmatpush2.bf16.msra.mxu1 %v21938_v34  ;;  %17861 = vmatprep.subr.bf16.mxu0 %v21803_v16  ;;  %v25002_v34 = vld [vmem:[%s32105_s21 + $0x168] sm:$0xff]  }
0x10c2   : > { %17902 = vmatprep.subr.bf16.mxu1 %v21931_v32  ;;  %v25003_v16 = vld [vmem:[%s32105_s21 + $0x128] sm:$0xff]   ;;  %v25004_v32 = vld [vmem:[%s32105_s21 + $0x160] sm:$0xff]  }
0x10c4   : > { %17862 = vmatpush2.bf16.msra.mxu0 %v21802_v35  ;;  %v25005_v35 = vld [vmem:[%s32105_s21 + $0x120] sm:$0xff]  }
0x10c5   : > { %17903 = vmatpush2.bf16.msra.mxu1 %v21930_v36  ;;  %22238 = vmatprep.subr.bf16.mxu0 %v24966_v17  ;;  %v25006_v36 = vld [vmem:[%s32105_s21 + $0x158] sm:$0xff]  }
0x10c6   : > { %22260 = vmatprep.subr.bf16.mxu1 %v24982_v33  ;;  %v25007_v17 = vld [vmem:[%s32105_s21 + $0x118] sm:$0xff]   ;;  %v25008_v33 = vld [vmem:[%s32105_s21 + $0x150] sm:$0xff]  }
0x10c7   : > { %17864 = vmatmul.mubr.bf16.vlgmr.msra.gmra.mxu0 %v31267_v60  ;;  %v17619_v38 = vpop.f32.mrf.mxu0  ;;  %v17660_v25 = vpop.f32.mrf.mxu1  ;;  %v24985_v60 = vld [vmem:[%s32105_s21 + $0xb0] sm:$0xff]  }
0x10c8   : > { %17905 = vmatmul.mubr.bf16.vlgmr.msra.gmra.mxu1 %v31269_v62  ;;  %22239 = vmatpush3.bf16.msra.mxu0 %v24967_v37  ;;  %v24986_v62 = vld [vmem:[%s32105_s21 + $0xe8] sm:$0xff]   ;;  %v17620_v23 = vadd.f32 %v17619_v38, %v17548_v13  ;;  %v25009_v37 = vld [vmem:[%s32105_s21 + $0x110] sm:$0xff]   ;;  %v17556_v38 = vrot.slane %v31849_v10, %v25297_v14  ;;  %v25015_v14 = vld [vmem:[%s32105_s21 + $0x1b8] sm:$0xff]  }
0x10c9   : > { %v17621_v48 = vpop.f32.mrf.mxu0  ;;  %v17662_v59 = vpop.f32.mrf.mxu1  ;;  %22240 = vmatprep.subr.bf16.mxu0 %v24968_v42  ;;  %22261 = vmatpush3.bf16.msra.mxu1 %v24983_v43  ;;  %v25010_v42 = vld [vmem:[%s32105_s21 + $0x148] sm:$0xff]   ;;  %v25024_v13 = vld [vmem:[%s32105_s21 + $0x1d0] sm:$0xff]  }
0x10ca   : > { %v17622_v45 = vadd.f32 %v17621_v48, %v17552_v53  ;;  %22262 = vmatprep.subr.bf16.mxu1 %v24984_v40  ;;  %v17661_v39 = vadd.f32 %v17660_v25, %v17620_v23  ;;  %v25011_v43 = vld [vmem:[%s32105_s21 + $0x108] sm:$0xff]   ;;  %v25012_v53 = vld [vmem:[%s32105_s21 + $0x140] sm:$0xff]   ;;  %v17560_v25 = vrot.slane %v31849_v10, %v25291_v8 }
0x10cb   : > { %v17623_v50 = vpop.f32.mrf.mxu0  ;;  %v17664_v18 = vpop.f32.mrf.mxu1  ;;  %v25013_v40 = vld [vmem:[%s32105_s21 + $0x100] sm:$0xff]  }
0x10cc   : > { %v17663_v51 = vadd.f32 %v17662_v59, %v17622_v45  ;;  %22241 = vmatpush3.bf16.msra.mxu0 %v24969_v21  ;;  %v17913_v63 = vmax.f32 %v17661_v39, 0.0  ;;  %v25029_v23 = vld [vmem:[%s32105_s21 + $0x180] sm:$0xff]  }
0x10cd   : > { %v17624_v58 = vpop.f32.mrf.mxu0  ;;  %v17665_v2 = vpop.f32.mrf.mxu1  ;;  %22242 = vmatprep.subr.bf16.mxu0 %v24970_v6  ;;  %22263 = vmatpush3.bf16.msra.mxu1 %v24985_v60 }
0x10ce   : > { %v17914_v20 = vmax.f32 %v17663_v51, 0.0  ;;  %22264 = vmatprep.subr.bf16.mxu1 %v24986_v62  ;;  %v17921_v19 = vpack.c.bf16 %v17913_v63, %v17913_v63 }
0x10d0   : > { %v17922_v56 = vpack.c.bf16 %v17914_v20, %v17914_v20  ;;  %22243 = vmatpush3.bf16.msra.mxu0 %v24971_v44  ;;  %v25016_v20 = vld [vmem:[%s32105_s21 + $0x1f0] sm:$0xff]  }
0x10d1   : > { %22244 = vmatprep.subr.bf16.mxu0 %v24972_v5  ;;  %22265 = vmatpush3.bf16.msra.mxu1 %v24987_v47 }
0x10d2   : > { %18474 = vmatprep.mubr.bf16.mxu0 %v17922_v56  ;;  %22266 = vmatprep.subr.bf16.mxu1 %v24988_v54  ;;  %v25017_v54 = vld [vmem:[%s32105_s21 + $0x1b0] sm:$0xff]   ;;  %v25018_v56 = vld [vmem:[%s32105_s21 + $0x1e8] sm:$0xff]  }
0x10d4   : > { %22245 = vmatpush3.bf16.msra.mxu0 %v24973_v9  ;;  %v25019_v9 = vld [vmem:[%s32105_s21 + $0x1a8] sm:$0xff]  }
0x10d5   : > { %22246 = vmatprep.subr.bf16.mxu0 %v24974_v4  ;;  %22267 = vmatpush3.bf16.msra.mxu1 %v24989_v22  ;;  %v25020_v4 = vld [vmem:[%s32105_s21 + $0x1e0] sm:$0xff]  }
0x10d6   : > { %22268 = vmatprep.subr.bf16.mxu1 %v24990_v55  ;;  %v25021_v22 = vld [vmem:[%s32105_s21 + $0x1a0] sm:$0xff]   ;;  %v25022_v55 = vld [vmem:[%s32105_s21 + $0x1d8] sm:$0xff]  }
0x10d8   : > { %22247 = vmatpush3.bf16.msra.mxu0 %v24975_v46  ;;  %v25023_v46 = vld [vmem:[%s32105_s21 + $0x198] sm:$0xff]  }
0x10d9   : > { %22248 = vmatprep.subr.bf16.mxu0 %v24976_v0  ;;  %22269 = vmatpush3.bf16.msra.mxu1 %v24991_v7  ;;  %v25025_v0 = vld [vmem:[%s32105_s21 + $0x190] sm:$0xff]   ;;  %v25026_v7 = vld [vmem:[%s32105_s21 + $0x1c8] sm:$0xff]  }
0x10da   : > { %22270 = vmatprep.subr.bf16.mxu1 %v24992_v41  ;;  %v25027_v41 = vld [vmem:[%s32105_s21 + $0x188] sm:$0xff]  }
0x10dc   : > { %22249 = vmatpush3.bf16.msra.mxu0 %v24977_v11  ;;  %v25028_v11 = vld [vmem:[%s32105_s21 + $0x1c0] sm:$0xff]  }
0x10dd   : > { %22250 = vmatprep.subr.bf16.mxu0 %v24978_v12  ;;  %22271 = vmatpush3.bf16.msra.mxu1 %v24993_v30  ;;  %v17563_v12 = vsub.s32 4, %v25282_v3  ;;  %v17567_v30 = vsub.s32 5, %v25282_v3 }
0x10de   : > { %22272 = vmatprep.subr.bf16.mxu1 %v24994_v1 }
0x10df   : > { %v17564_v1 = vrot.slane %v31849_v10, %v17563_v12 }
0x10e0   : > { %22251 = vmatpush3.bf16.msra.mxu0 %v24979_v52  ;;  %v17568_v52 = vrot.slane %v31849_v10, %v17567_v30 }
0x10e1   : > { %22252 = vmatprep.subr.bf16.mxu0 %v24980_v61  ;;  %22273 = vmatpush3.bf16.msra.mxu1 %v24995_v29 }
0x10e2   : > { %22274 = vmatprep.subr.bf16.mxu1 %v24996_v49 }
0x10e4   : > { %22253 = vmatpush3.bf16.msra.mxu0 %v24981_v24 }
0x10e5   : > { %22275 = vmatpush3.bf16.msra.mxu1 %v24997_v57  ;;  %22282 = vmatprep.subr.bf16.mxu0 %v24998_v28 }
0x10e6   : > { %22304 = vmatprep.subr.bf16.mxu1 %v25014_v26 }
0x10e7   : > { %18475 = vmatmul.mubr.bf16.vlgmr.msra.gmra.mxu0 %v17921_v19 }
0x10e8   : > { %22283 = vmatpush3.bf16.msra.mxu0 %v24999_v27 }
0x10e9   : > { %22284 = vmatprep.subr.bf16.mxu0 %v25000_v15 }
0x10ec   : > { %22285 = vmatpush3.bf16.msra.mxu0 %v25001_v31 }
0x10ed   : > { %22286 = vmatprep.subr.bf16.mxu0 %v25002_v34 }
0x10f0   : > { %22287 = vmatpush3.bf16.msra.mxu0 %v25003_v16 }
0x10f1   : > { %22288 = vmatprep.subr.bf16.mxu0 %v25004_v32 }
0x10f4   : > { %22289 = vmatpush3.bf16.msra.mxu0 %v25005_v35  ;;  %v17571_v35 = vsub.s32 6, %v25282_v3 }
0x10f5   : > { %22290 = vmatprep.subr.bf16.mxu0 %v25006_v36  ;;  %v17575_v36 = vsub.s32 7, %v25282_v3 }
0x10f8   : > { %22291 = vmatpush3.bf16.msra.mxu0 %v25007_v17  ;;  %v17572_v17 = vrot.slane %v31849_v10, %v17571_v35 }
0x10f9   : > { %22292 = vmatprep.subr.bf16.mxu0 %v25008_v33  ;;  %v17576_v33 = vrot.slane %v31849_v10, %v17575_v36 }
0x10fc   : > { %22293 = vmatpush3.bf16.msra.mxu0 %v25009_v37 }
0x10fd   : > { %22294 = vmatprep.subr.bf16.mxu0 %v25010_v42 }
0x1100   : > { %22295 = vmatpush3.bf16.msra.mxu0 %v25011_v43 }
0x1101   : > { %22296 = vmatprep.subr.bf16.mxu0 %v25012_v53 }
0x1104   : > { %22297 = vmatpush3.bf16.msra.mxu0 %v25013_v40 }
0x1107   : > { %v17701_v21 = vpop.f32.mrf.mxu0  ;;  %v17742_v48 = vpop.f32.mrf.mxu1 }
0x1108   : > { %v17702_v59 = vadd.f32 %v17701_v21, %v17556_v38 }
0x1109   : > { %v17703_v6 = vpop.f32.mrf.mxu0  ;;  %v17744_v60 = vpop.f32.mrf.mxu1 }
0x110a   : > { %v17743_v45 = vadd.f32 %v17742_v48, %v17702_v59  ;;  %v17704_v62 = vadd.f32 %v17703_v6, %v17560_v25 }
0x110b   : > { %v17705_v50 = vpop.f32.mrf.mxu0  ;;  %v17746_v18 = vpop.f32.mrf.mxu1 }
0x110c   : > { %v17745_v51 = vadd.f32 %v17744_v60, %v17704_v62  ;;  %v17915_v44 = vmax.f32 %v17743_v45, 0.0 }
0x110d   : > { %v17706_v58 = vpop.f32.mrf.mxu0  ;;  %v17747_v2 = vpop.f32.mrf.mxu1 }
0x110e   : > { %v17916_v5 = vmax.f32 %v17745_v51, 0.0  ;;  %v17923_v8 = vpack.c.bf16 %v17915_v44, %v17915_v44  ;;  %v18057_v2 = vld [vmem:[%s32106_s22] sm:$0x1] }
0x1110   : > { %v17924_v47 = vpack.c.bf16 %v17916_v5, %v17916_v5 }
0x1112   : > { %18514 = vmatprep.mubr.bf16.mxu1 %v17924_v47  ;;  %v25043_v47 = vmov 0.0  }
0x1113   : > { %18515 = vmatmul.mubr.bf16.vlgmr.msra.gmra.mxu1 %v17923_v8  ;;  %22334 = vmatprep.subr.mxu0 %v25043_v47 }
0x1114   : > { %22305 = vmatpush3.bf16.msra.mxu1 %v25015_v14 }
0x1115   : > { %22306 = vmatprep.subr.bf16.mxu1 %v25016_v20 }
0x1118   : > { %22307 = vmatpush3.bf16.msra.mxu1 %v25017_v54  ;;  %v18606_v54 = vld [vmem:[%s32107_s23 + $0x18] sm:$0xff] }
0x1119   : > { %22308 = vmatprep.subr.bf16.mxu1 %v25018_v56 }
0x111c   : > { %22309 = vmatpush3.bf16.msra.mxu1 %v25019_v9 }
0x111d   : > { %22310 = vmatprep.subr.bf16.mxu1 %v25020_v4  ;;  %v18605_v4 = vld [vmem:[%s32107_s23 + $0x10] sm:$0xff] }
0x1120   : > { %22311 = vmatpush3.bf16.msra.mxu1 %v25021_v22 }
0x1121   : > { %22312 = vmatprep.subr.bf16.mxu1 %v25022_v55  ;;  %v18604_v55 = vld [vmem:[%s32107_s23 + $0x8] sm:$0xff] }
0x1124   : > { %22313 = vmatpush3.bf16.msra.mxu1 %v25023_v46  ;;  %v18603_v46 = vld [vmem:[%s32107_s23] sm:$0xff] }
0x1125   : > { %22314 = vmatprep.subr.bf16.mxu1 %v25024_v13 }
0x1128   : > { %22315 = vmatpush3.bf16.msra.mxu1 %v25025_v0 }
0x1129   : > { %22316 = vmatprep.subr.bf16.mxu1 %v25026_v7 }
0x112c   : > { %22317 = vmatpush3.bf16.msra.mxu1 %v25027_v41 }
0x112d   : > { %22318 = vmatprep.subr.bf16.mxu1 %v25028_v11 }
0x1130   : > { %22319 = vmatpush3.bf16.msra.mxu1 %v25029_v23 }
0x1131   : > { %22345 = vmatprep.subr.mxu1 %v25043_v47 }
0x1147   : > { %v17783_v39 = vpop.f32.mrf.mxu0 }
0x1148   : > { %v17784_v61 = vadd.f32 %v17783_v39, %v17564_v1  ;;  %v17824_v29 = vpop.f32.mrf.mxu1 }
0x1149   : > { %v17785_v49 = vpop.f32.mrf.mxu0 }
0x114a   : > { %v17825_v24 = vadd.f32 %v17824_v29, %v17784_v61  ;;  %v17786_v63 = vadd.f32 %v17785_v49, %v17568_v52  ;;  %v17826_v57 = vpop.f32.mrf.mxu1  ;;  %v18684_v49 = vld [vmem:[%s32109_s25 + $0x8] sm:$0xff] }
0x114b   : > { %v17787_v28 = vpop.f32.mrf.mxu0 }
0x114c   : > { %v17827_v26 = vadd.f32 %v17826_v57, %v17786_v63  ;;  %v17828_v27 = vpop.f32.mrf.mxu1  ;;  %v17917_v19 = vmax.f32 %v17825_v24, 0.0  ;;  %v18683_v24 = vld [vmem:[%s32109_s25] sm:$0xff] }
0x114d   : > { %v17788_v15 = vpop.f32.mrf.mxu0  ;;  %v18607_v63 = vld [vmem:[%s32108_s24] sm:$0x1] }
0x114e   : > { %v17918_v31 = vmax.f32 %v17827_v26, 0.0  ;;  %v17829_v34 = vpop.f32.mrf.mxu1  ;;  %v17925_v32 = vpack.c.bf16 %v17917_v19, %v17917_v19  ;;  %v18685_v19 = vld [vmem:[#allocation5] sm:$0x1] }
0x1150   : > { %v17926_v16 = vpack.c.bf16 %v17918_v31, %v17918_v31 }
0x1152   : > { %18554 = vmatprep.mubr.bf16.mxu0 %v17926_v16 }
0x1153   : > { %18555 = vmatmul.mubr.bf16.vlgmr.msra.gmra.mxu0 %v17925_v32 }
0x1154   : > { %22335 = vmatpush3.msra.mxu0 %v18606_v54  ;;  %22342 = vmatprep.mubr.msk.f32.mxu0 %vm25044_vm13, %v25043_v47 }
0x1155   : > { %22336 = vmatprep.subr.mxu0 %v25043_v47 }
0x1156   : > { %22337 = vmatpush3.msra.mxu0 %v18605_v4 }
0x1157   : > { %22338 = vmatprep.subr.mxu0 %v25043_v47 }
0x1158   : > { %22339 = vmatpush3.msra.mxu0 %v18604_v55 }
0x1159   : > { %22340 = vmatprep.subr.mxu0 %v25043_v47 }
0x115a   : > { %22341 = vmatpush3.msra.mxu0 %v18603_v46 }
0x1187   : > { %v17865_v37 = vpop.f32.mrf.mxu0 }
0x1188   : > { %v17866_v42 = vadd.f32 %v17865_v37, %v17572_v17  ;;  %v17906_v43 = vpop.f32.mrf.mxu1 }
0x1189   : > { %v17867_v53 = vpop.f32.mrf.mxu0 }
0x118a   : > { %v17907_v40 = vadd.f32 %v17906_v43, %v17866_v42  ;;  %v17868_v38 = vadd.f32 %v17867_v53, %v17576_v33  ;;  %v17908_v25 = vpop.f32.mrf.mxu1 }
0x118b   : > { %v17869_v21 = vpop.f32.mrf.mxu0 }
0x118c   : > { %v17909_v48 = vadd.f32 %v17908_v25, %v17868_v38  ;;  %v17910_v59 = vpop.f32.mrf.mxu1  ;;  %v17919_v6 = vmax.f32 %v17907_v40, 0.0 }
0x118d   : > { %v17870_v60 = vpop.f32.mrf.mxu0 }
0x118e   : > { %v17920_v45 = vmax.f32 %v17909_v48, 0.0  ;;  %v17911_v62 = vpop.f32.mrf.mxu1  ;;  %v17927_v3 = vpack.c.bf16 %v17919_v6, %v17919_v6 }
0x1190   : > { %v17928_v50 = vpack.c.bf16 %v17920_v45, %v17920_v45 }
0x1192   : > { %18594 = vmatprep.mubr.bf16.mxu1 %v17928_v50 }
0x1193   : > { %18595 = vmatmul.mubr.bf16.vlgmr.msra.gmra.mxu1 %v17927_v3 }
0x1194   : > { %22349 = vmatprep.mubr.msk.f32.mxu1 %vm25044_vm13, %v25043_v47  ;;  %22346 = vmatpush3.msra.mxu1 %v18684_v49 }
0x1195   : > { %22347 = vmatprep.subr.mxu1 %v25043_v47 }
0x1196   : > { %22348 = vmatpush3.msra.mxu1 %v18683_v24 }
0x11a7   : > { %v22254_v18 = vpop.f32.mrf.mxu0 }
0x11a9   : > { %v22255_v10 = vpop.f32.mrf.mxu0 }
0x11aa   : > { %v22256_v51 = vadd.f32 %v22255_v10, %v22254_v18 }
0x11ab   : > { %v22257_v44 = vpop.f32.mrf.mxu0 }
0x11ac   : > { %v18477_v8 = vadd.f32 %v22256_v51, %v18057_v2 }
0x11ad   : > { %v22258_v58 = vpop.f32.mrf.mxu0 }
0x11d3   : > { %v22276_v5 = vpop.f32.mrf.mxu1 }
0x11d5   : > { %v22277_v14 = vpop.f32.mrf.mxu1 }
0x11d6   : > { %v22278_v20 = vadd.f32 %v22277_v14, %v22276_v5 }
0x11d7   : > { %v22279_v56 = vpop.f32.mrf.mxu1 }
0x11d8   : > { %v18517_v9 = vadd.f32 %v22278_v20, %v18477_v8 }
0x11d9   : > { %v22280_v22 = vpop.f32.mrf.mxu1 }
0x1213   : > { %v22298_v13 = vpop.f32.mrf.mxu0 }
0x1215   : > { %v22299_v0 = vpop.f32.mrf.mxu0 }
0x1216   : > { %v22300_v7 = vadd.f32 %v22299_v0, %v22298_v13 }
0x1217   : > { %v22301_v41 = vpop.f32.mrf.mxu0 }
0x1218   : > { %v18557_v11 = vadd.f32 %v22300_v7, %v18517_v9 }
0x1219   : > { %v22302_v23 = vpop.f32.mrf.mxu0 }
0x1253   : > { %v22320_v12 = vpop.f32.mrf.mxu1 }
0x1255   : > { %v22321_v30 = vpop.f32.mrf.mxu1 }
0x1256   : > { %v22322_v1 = vadd.f32 %v22321_v30, %v22320_v12 }
0x1257   : > { %v22323_v52 = vpop.f32.mrf.mxu1 }
0x1258   : > { %v18597_v39 = vadd.f32 %v22322_v1, %v18557_v11 }
0x1259   : > { %v22324_v61 = vpop.f32.mrf.mxu1 }
0x125a   : > { %v18602_v29 = vmax.f32 %v18597_v39, 0.0 }
0x125c   : > { %22343 = vmatmul.mubr.msk.f32.vlgmr.msra.gmra.mxu0 %vm18608_vm14, %v18602_v29 }
0x131c   : > { %v18678_v57 = vpop.f32.mrf.mxu0 }
0x131d   : > { %v18679_v28 = vadd.f32 %v18678_v57, %v18607_v63 }
0x131e   : > { %v22344_v26 = vpop.f32.mrf.mxu0 }
0x131f   : > { %v18682_v27 = vmax.f32 %v18679_v28, 0.0 }
0x1321   : > { %22350 = vmatmul.mubr.msk.f32.vlgmr.msra.gmra.mxu1 %vm1321_vm4, %v18682_v27 }
0x13e1   : > { %v18755_v15 = vpop.f32.mrf.mxu1 }
0x13e2   : > { %v18756_v31 = vadd.f32 %v18755_v15, %v18685_v19 }
0x13e3   : > { %v22351_v34 = vpop.f32.mrf.mxu1 }
0x13e4   : > { %18760 = vst.msk [vmem:[%s816_s10] sm:$0x1] %vm18759_vm15, %v18756_v31 }
0x13e5 PF: > { %s39_s8 = sadd.s32 1, %s25039_s8  }
0x13e6   : > { %p36_p4 = scmp.ge.s32.totalorder %s39_s8, 4  }
0x13e8   :  { %38 = sbr.rel (!%p36_p4) target bundleno = 13 (0xd), region = 174 }

</bundles_post_ra>
